<compile_context>
chip_gen: v7x
topology: tpu7x:2x2x1
jax: 0.10.0
libtpu: 0.0.40
codegen_flags: <defaults>
</compile_context>

<pallas_src>
import numpy as np

import jax
import jax.numpy as jnp
from jax.experimental import pallas as pl
from jax.experimental.pallas import tpu as pltpu


C_LANES = 128

# Rows of the packed per-channel vector table (each row padded to 128 lanes).
(V_SC0, V_SH0,
 V_B1DW, V_SC1, V_SH1,
 V_SC2, V_SH2,
 V_B3DW, V_SC3, V_SH3,
 V_SC4, V_SH4,
 V_SC5, V_SH5,
 V_BSKDW, V_SCSK, V_SHSK,
 V_SC6, V_SH6,
 V_B7DW, V_SC7, V_SH7,
 V_BF) = range(23)
N_VEC = 23

# Slots of the packed (128,128) matmul-weight stack.
(M_PW1, M_W2, M_PW3, M_W4, M_W5, M_PWSK, M_W6, M_PW7, M_WF) = range(9)
N_MAT = 9

# Slots of the packed (9,128) depthwise-weight stack.
(D_L1, D_L3, D_SK, D_L7) = range(4)
N_DW = 4


# ---------------------------------------------------------------------------
# The fused Pallas kernel (one grid step == one image).
# ---------------------------------------------------------------------------
def _mcunet_kernel(pat_ref, w0_ref, dw_ref, vec_ref, mat_ref, s3_ref, ssk_ref,
                   m324_ref, m25_ref, o_ref):
    f32 = jnp.float32
    vec = vec_ref[...]                                   # (23, 128)

    def v(i):                                            # (1, 128) row
        return vec[i:i + 1, :]

    def mm(a, k):                                        # a @ MAT[k] on MXU
        return jnp.dot(a, mat_ref[k], preferred_element_type=f32)

    def relu(x):
        return jnp.maximum(x, 0.0)

    def relu6(x):
        return jnp.clip(x, 0.0, 6.0)

    def dw3x3(x, slot, bias_idx, wrow, start, count):
        """Dense (stride-1) 3x3 depthwise-conv taps via static row shifts.

        x     : (R, 128) activation in a flat (Hpad, Wpad) row-major layout.
        wrow  : Wpad (row pitch of that layout).
        start : row index in x of the first convolution centre.
        count : number of contiguous centres evaluated.
        """
        w = dw_ref[slot]                                 # (9, 128)
        acc = None
        t = 0
        for di in range(3):
            for dj in range(3):
                off = (di - 1) * wrow + (dj - 1)
                tap = x[start + off:start + off + count, :] * w[t:t + 1, :]
                acc = tap if acc is None else acc + tap
                t += 1
        return acc + v(bias_idx)

    # ---- l0: 3x3 s2 p1 conv (host im2col) + BN + ReLU6, written directly in
    #      the zero-padded (18,18) layout that l1 consumes. -------------------
    a = jnp.dot(pat_ref[0], w0_ref[...], preferred_element_type=f32)
    a = relu6(a * v(V_SC0) + v(V_SH0)) * m324_ref[...]           # (324, 128)

    # ---- l1: depthwise 3x3 s1 p1 + ReLU -> pointwise 16->16 -> BN. ----------
    #      Centres = rows [19, 305) of the (18,18) layout -> 286 rows.
    y = relu(dw3x3(a, D_L1, V_B1DW, 18, 19, 286))
    b = mm(y, M_PW1) * v(V_SC1) + v(V_SH1)                        # (286, 128)

    # ---- l2: 1x1 conv 16->32 + BN + ReLU6 (row-wise). -----------------------
    c = relu6(mm(b, M_W2) * v(V_SC2) + v(V_SH2))                  # (286, 128)

    # ---- l3: depthwise 3x3 s2 p0 + ReLU -> pointwise 32->32 -> BN. ----------
    #      Dense stride-1 taps (248 centres), then a one-hot selection matmul
    #      implements the stride-2 subsampling to the (7,7) layout.
    y = dw3x3(c, D_L3, V_B3DW, 18, 19, 248)                       # (248, 128)
    y = relu(jnp.dot(s3_ref[...], y, preferred_element_type=f32))  # (49, 128)
    d = mm(y, M_PW3) * v(V_SC3) + v(V_SH3)

    # ---- l4, l5: 1x1 convs + BN + ReLU6. ------------------------------------
    e = relu6(mm(d, M_W4) * v(V_SC4) + v(V_SH4))
    f = relu6(mm(e, M_W5) * v(V_SC5) + v(V_SH5))                  # (49, 128)

    # ---- skip: depthwise 3x3 s2 p0 + ReLU -> pointwise 64->16 -> BN. --------
    #      Result scattered (with zero borders) into the (5,5) layout l7 needs.
    y = relu(dw3x3(f, D_SK, V_BSKDW, 7, 8, 33))                   # (33, 128)
    y = mm(y, M_PWSK) * v(V_SCSK) + v(V_SHSK)
    sk = jnp.dot(ssk_ref[...], y, preferred_element_type=f32)     # (25, 128)

    # ---- l6: 1x1 conv 16->48 + BN + ReLU6 (padding rows re-zeroed). ---------
    g = relu6(mm(sk, M_W6) * v(V_SC6) + v(V_SH6)) * m25_ref[...]  # (25, 128)

    # ---- l7: depthwise 3x3 s1 p1 + ReLU -> pointwise 48->16 -> BN -> +skip. -
    y = relu(dw3x3(g, D_L7, V_B7DW, 5, 6, 13))                    # (13, 128)
    h = mm(y, M_PW7) * v(V_SC7) + v(V_SH7) + sk[6:19, :]          # (13, 128)

    # ---- MaxPool2d(2) over the 3x3 map (h rows 0,1,5,6) + final 1x1 conv. ---
    p = jnp.maximum(jnp.maximum(h[0:1, :], h[1:2, :]),
                    jnp.maximum(h[5:6, :], h[6:7, :]))            # (1, 128)
    out = mm(p, M_WF) + v(V_BF)                                   # (1, 128)
    o_ref[0] = jnp.broadcast_to(out, (8, C_LANES))


# ---------------------------------------------------------------------------
# Host-side parameter folding / packing helpers (tiny, fused by XLA).
# ---------------------------------------------------------------------------
def _pad2(a, rows, cols):
    return jnp.pad(a.astype(jnp.float32),
                   ((0, rows - a.shape[0]), (0, cols - a.shape[1])))


def _vrow(v):
    return jnp.pad(v.astype(jnp.float32), (0, C_LANES - v.shape[0]))


def _bn_fold(p, conv_bias=None):
    scale = p['gamma'] / jnp.sqrt(p['var'] + 1e-5)
    shift = p['beta'] - p['mean'] * scale
    if conv_bias is not None:
        shift = shift + conv_bias * scale
    return scale, shift


def _pw_mat(w):          # (cout, cin, 1, 1) -> (128, 128) [rows=cin, cols=cout]
    cout, cin = w.shape[0], w.shape[1]
    return _pad2(w.reshape(cout, cin).T, C_LANES, C_LANES)


def _dw_mat(w):          # (cin, 1, 3, 3) -> (9, 128)
    cin = w.shape[0]
    return _pad2(w.reshape(cin, 9).T, 9, C_LANES)


def _static_tables():
    # l3 stride-2 selection: (7,7) output <- dense centres of the (18,18) map.
    s3 = np.zeros((49, 248), np.float32)
    for ho in range(7):
        for wo in range(7):
            s3[ho * 7 + wo, 36 * ho + 2 * wo] = 1.0
    # skip stride-2 selection + scatter into zero-padded (5,5) layout.
    ssk = np.zeros((25, 33), np.float32)
    for ci in range(1, 4):
        for cj in range(1, 4):
            ssk[ci * 5 + cj, 14 * ci + 2 * cj - 16] = 1.0
    # interior masks (zero the padding rows of the (18,18) and (5,5) layouts).
    m324 = np.zeros((324, 1), np.float32)
    for i in range(1, 17):
        for j in range(1, 17):
            m324[i * 18 + j, 0] = 1.0
    m25 = np.zeros((25, 1), np.float32)
    for i in range(1, 4):
        for j in range(1, 4):
            m25[i * 5 + j, 0] = 1.0
    return s3, ssk, m324, m25


# ---------------------------------------------------------------------------
# Public entry point (NCHW in, NCHW out, like the PyTorch module).
# ---------------------------------------------------------------------------
@jax.jit
def mcunet_forward(x_nchw, params):
    assert x_nchw.shape[1:] == (3, 32, 32), x_nchw.shape
    x = jnp.transpose(x_nchw, (0, 2, 3, 1)).astype(jnp.float32)   # NHWC
    n = x.shape[0]

    # l0 im2col (Cin=3 only), laid out directly in the padded (18,18) grid.
    xp = jnp.pad(x, ((0, 0), (1, 1), (1, 1), (0, 0)))             # (n,34,34,3)
    taps = [xp[:, kh:kh + 31:2, kw:kw + 31:2, :]
            for kh in range(3) for kw in range(3)]
    pat = jnp.stack(taps, axis=3).reshape(n, 16, 16, 27)
    pat = jnp.pad(pat, ((0, 0), (1, 1), (1, 1), (0, 0))).reshape(n, 324, 27)
    pat = jnp.pad(pat, ((0, 0), (0, 0), (0, 32 - 27)))            # (n,324,32)

    # l0 weights / folded affine.
    p0 = params['l0']
    w0 = _pad2(jnp.transpose(p0['w'], (2, 3, 1, 0)).reshape(27, 16), 32,
               C_LANES)
    sc0, sh0 = _bn_fold(p0, p0['b'])

    # Packed per-channel vectors (scale / shift / depthwise bias / final bias).
    vec_rows = [None] * N_VEC
    vec_rows[V_SC0], vec_rows[V_SH0] = _vrow(sc0), _vrow(sh0)

    def fill_dw(pp, bidx, scidx, shidx):
        sc, sh = _bn_fold(pp)                  # BN after bias-less pointwise
        vec_rows[bidx] = _vrow(pp['dw_b'])
        vec_rows[scidx] = _vrow(sc)
        vec_rows[shidx] = _vrow(sh)

    def fill_conv(pp, scidx, shidx):
        sc, sh = _bn_fold(pp, pp['b'])         # conv bias folded into shift
        vec_rows[scidx] = _vrow(sc)
        vec_rows[shidx] = _vrow(sh)

    fill_dw(params['l1'], V_B1DW, V_SC1, V_SH1)
    fill_conv(params['l2'], V_SC2, V_SH2)
    fill_dw(params['l3'], V_B3DW, V_SC3, V_SH3)
    fill_conv(params['l4'], V_SC4, V_SH4)
    fill_conv(params['l5'], V_SC5, V_SH5)
    fill_dw(params['skip'], V_BSKDW, V_SCSK, V_SHSK)
    fill_conv(params['l6'], V_SC6, V_SH6)
    fill_dw(params['l7'], V_B7DW, V_SC7, V_SH7)
    vec_rows[V_BF] = _vrow(params['final']['b'])
    vec = jnp.stack(vec_rows, axis=0)                             # (23, 128)

    mats = jnp.stack([
        _pw_mat(params['l1']['pw_w']),
        _pw_mat(params['l2']['w']),
        _pw_mat(params['l3']['pw_w']),
        _pw_mat(params['l4']['w']),
        _pw_mat(params['l5']['w']),
        _pw_mat(params['skip']['pw_w']),
        _pw_mat(params['l6']['w']),
        _pw_mat(params['l7']['pw_w']),
        _pw_mat(params['final']['w']),
    ], axis=0)                                                    # (9,128,128)

    dws = jnp.stack([
        _dw_mat(params['l1']['dw_w']),
        _dw_mat(params['l3']['dw_w']),
        _dw_mat(params['skip']['dw_w']),
        _dw_mat(params['l7']['dw_w']),
    ], axis=0)                                                    # (4, 9, 128)

    s3_np, ssk_np, m324_np, m25_np = _static_tables()
    s3, ssk = jnp.asarray(s3_np), jnp.asarray(ssk_np)
    m324, m25 = jnp.asarray(m324_np), jnp.asarray(m25_np)

    out = pl.pallas_call(
        _mcunet_kernel,
        out_shape=jax.ShapeDtypeStruct((n, 8, C_LANES), jnp.float32),
        grid=(n,),
        in_specs=[
            pl.BlockSpec((1, 324, 32), lambda i: (i, 0, 0)),          # patches
            pl.BlockSpec((32, C_LANES), lambda i: (0, 0)),            # W0
            pl.BlockSpec((N_DW, 9, C_LANES), lambda i: (0, 0, 0)),    # dw wts
            pl.BlockSpec((N_VEC, C_LANES), lambda i: (0, 0)),         # vectors
            pl.BlockSpec((N_MAT, C_LANES, C_LANES), lambda i: (0, 0, 0)),
            pl.BlockSpec((49, 248), lambda i: (0, 0)),                # S3
            pl.BlockSpec((25, 33), lambda i: (0, 0)),                 # S_skip
            pl.BlockSpec((324, 1), lambda i: (0, 0)),                 # mask 18x18
            pl.BlockSpec((25, 1), lambda i: (0, 0)),                  # mask 5x5
        ],
        out_specs=pl.BlockSpec((1, 8, C_LANES), lambda i: (i, 0, 0)),
        compiler_params=pltpu.CompilerParams(
            dimension_semantics=("parallel",)),
    )(pat, w0, dws, vec, mats, s3, ssk, m324, m25)

    return out[:, 0, :3].reshape(n, 3, 1, 1)


# ---------------------------------------------------------------------------
# Plain-JAX reference (mirrors the PyTorch forward; used as a self-check).
# ---------------------------------------------------------------------------
def _ref_forward(x_nchw, params):
    eps = 1e-5
    x = jnp.transpose(x_nchw, (0, 2, 3, 1)).astype(jnp.float32)

    def conv(x, w, b, stride, pad, groups=1):
        kern = jnp.transpose(w, (2, 3, 1, 0))
        y = jax.lax.conv_general_dilated(
            x, kern, (stride, stride), [(pad, pad), (pad, pad)],
            dimension_numbers=('NHWC', 'HWIO', 'NHWC'),
            feature_group_count=groups)
        if b is not None:
            y = y + b.reshape(1, 1, 1, -1)
        return y

    def bn(x, p):
        sc = p['gamma'] / jnp.sqrt(p['var'] + eps)
        return (x - p['mean'].reshape(1, 1, 1, -1)) * sc.reshape(1, 1, 1, -1) \
            + p['beta'].reshape(1, 1, 1, -1)

    def conv_layer(x, p, stride, pad):
        return jnp.clip(bn(conv(x, p['w'], p['b'], stride, pad), p), 0.0, 6.0)

    def dw_layer(x, p, stride, pad):
        c = x.shape[-1]
        y = jnp.maximum(conv(x, p['dw_w'], p['dw_b'], stride, pad, groups=c),
                        0.0)
        y = conv(y, p['pw_w'], None, 1, 0)
        return bn(y, p)

    x = conv_layer(x, params['l0'], 2, 1)
    x = dw_layer(x, params['l1'], 1, 1)
    x = conv_layer(x, params['l2'], 1, 0)
    x = dw_layer(x, params['l3'], 2, 0)
    x = conv_layer(x, params['l4'], 1, 0)
    x = conv_layer(x, params['l5'], 1, 0)
    skip = dw_layer(x, params['skip'], 2, 0)
    x = conv_layer(skip, params['l6'], 1, 0)
    x = dw_layer(x, params['l7'], 1, 1)
    x = x + skip
    x = jax.lax.reduce_window(x, -jnp.inf, jax.lax.max,
                              (1, 2, 2, 1), (1, 2, 2, 1), 'VALID')
    x = conv(x, params['final']['w'], params['final']['b'], 1, 0)
    return jnp.transpose(x, (0, 3, 1, 2))


# ---------------------------------------------------------------------------
# Deterministic synthetic parameter init (shapes follow the PyTorch __init__).
# ---------------------------------------------------------------------------
def _init_conv(key, cin, cout, k):
    ks = jax.random.split(key, 6)
    return dict(
        w=0.1 * jax.random.normal(ks[0], (cout, cin, k, k), jnp.float32),
        b=0.1 * jax.random.normal(ks[1], (cout,), jnp.float32),
        gamma=1.0 + 0.1 * jax.random.normal(ks[2], (cout,), jnp.float32),
        beta=0.1 * jax.random.normal(ks[3], (cout,), jnp.float32),
        mean=0.1 * jax.random.normal(ks[4], (cout,), jnp.float32),
        var=jax.random.uniform(ks[5], (cout,), jnp.float32, 0.5, 1.5),
    )


def _init_dw(key, cin, cout, k):
    ks = jax.random.split(key, 7)
    return dict(
        dw_w=0.1 * jax.random.normal(ks[0], (cin, 1, k, k), jnp.float32),
        dw_b=0.1 * jax.random.normal(ks[1], (cin,), jnp.float32),
        pw_w=0.1 * jax.random.normal(ks[2], (cout, cin, 1, 1), jnp.float32),
        gamma=1.0 + 0.1 * jax.random.normal(ks[3], (cout,), jnp.float32),
        beta=0.1 * jax.random.normal(ks[4], (cout,), jnp.float32),
        mean=0.1 * jax.random.normal(ks[5], (cout,), jnp.float32),
        var=jax.random.uniform(ks[6], (cout,), jnp.float32, 0.5, 1.5),
    )


def init_params(key):
    ks = jax.random.split(key, 11)
    return {
        'l0': _init_conv(ks[0], 3, 16, 3),
        'l1': _init_dw(ks[1], 16, 16, 3),
        'l2': _init_conv(ks[2], 16, 32, 1),
        'l3': _init_dw(ks[3], 32, 32, 3),
        'l4': _init_conv(ks[4], 32, 16, 1),
        'l5': _init_conv(ks[5], 16, 64, 1),
        'skip': _init_dw(ks[6], 64, 16, 3),
        'l6': _init_conv(ks[7], 16, 48, 1),
        'l7': _init_dw(ks[8], 48, 16, 3),
        'final': dict(
            w=0.1 * jax.random.normal(ks[9], (3, 16, 1, 1), jnp.float32),
            b=0.1 * jax.random.normal(ks[10], (3,), jnp.float32)),
    }


if __name__ == "__main__":
    key = jax.random.PRNGKey(0)
    kx, kp = jax.random.split(key)
    # 32x32 input so all three stride-2 stages and the final MaxPool2d(2) are valid.
    x = jax.random.normal(kx, (2, 3, 32, 32), jnp.float32)
    params = init_params(kp)

    y = jax.block_until_ready(mcunet_forward(x, params))
    assert y.shape == (2, 3, 1, 1), y.shape
    assert bool(jnp.all(jnp.isfinite(y)))

    # Self-check the fused Pallas kernel against the plain-JAX reference.
    y_ref = jax.block_until_ready(jax.jit(_ref_forward)(x, params))
    err = float(jnp.max(jnp.abs(y - y_ref)))
    assert err < 5e-2, f"mismatch vs reference: max abs err = {err}"

    print("KERNEL_OK")
</pallas_src>

<mosaic_0001>
module attributes {stable_mosaic.version = 11 : i64} {
  func.func @_mcunet_kernel(%arg0: i32, %arg1: memref<1x324x32xf32, #tpu.memory_space<vmem>>, %arg2: memref<32x128xf32, #tpu.memory_space<vmem>>, %arg3: memref<4x9x128xf32, #tpu.memory_space<vmem>>, %arg4: memref<23x128xf32, #tpu.memory_space<vmem>>, %arg5: memref<9x128x128xf32, #tpu.memory_space<vmem>>, %arg6: memref<49x248xf32, #tpu.memory_space<vmem>>, %arg7: memref<25x33xf32, #tpu.memory_space<vmem>>, %arg8: memref<324x1xf32, #tpu.memory_space<vmem>>, %arg9: memref<25x1xf32, #tpu.memory_space<vmem>>, %arg10: memref<1x8x128xf32, #tpu.memory_space<vmem>>) attributes {dimension_semantics = [#tpu.dimension_semantics<parallel>], iteration_bounds = array<i64: 2>, scalar_prefetch = 0 : i64, scratch_operands = 0 : i64, tpu.core_type = #tpu.core_type<tc>, window_params = [{transform_indices = @transform_0, window_bounds = array<i64: 1, 324, 32>}, {pipeline_mode = #tpu.pipeline_mode<synchronous>, transform_indices = @transform_1, window_bounds = array<i64: 32, 128>}, {pipeline_mode = #tpu.pipeline_mode<synchronous>, transform_indices = @transform_2, window_bounds = array<i64: 4, 9, 128>}, {pipeline_mode = #tpu.pipeline_mode<synchronous>, transform_indices = @transform_3, window_bounds = array<i64: 23, 128>}, {pipeline_mode = #tpu.pipeline_mode<synchronous>, transform_indices = @transform_4, window_bounds = array<i64: 9, 128, 128>}, {pipeline_mode = #tpu.pipeline_mode<synchronous>, transform_indices = @transform_5, window_bounds = array<i64: 49, 248>}, {pipeline_mode = #tpu.pipeline_mode<synchronous>, transform_indices = @transform_6, window_bounds = array<i64: 25, 33>}, {pipeline_mode = #tpu.pipeline_mode<synchronous>, transform_indices = @transform_7, window_bounds = array<i64: 324, 1>}, {pipeline_mode = #tpu.pipeline_mode<synchronous>, transform_indices = @transform_8, window_bounds = array<i64: 25, 1>}, {transform_indices = @transform_9, window_bounds = array<i64: 1, 8, 128>}]} {
    %c0 = arith.constant 0 : index
    %c0_0 = arith.constant 0 : index
    %0 = vector.load %arg4[%c0, %c0_0] : memref<23x128xf32, #tpu.memory_space<vmem>>, vector<23x128xf32>
    %c0_1 = arith.constant 0 : index
    %c0_2 = arith.constant 0 : index
    %c0_3 = arith.constant 0 : index
    %1 = vector.load %arg1[%c0_1, %c0_2, %c0_3] : memref<1x324x32xf32, #tpu.memory_space<vmem>>, vector<1x324x32xf32>
    %2 = vector.shape_cast %1 : vector<1x324x32xf32> to vector<324x32xf32>
    %c0_4 = arith.constant 0 : index
    %c0_5 = arith.constant 0 : index
    %3 = vector.load %arg2[%c0_4, %c0_5] : memref<32x128xf32, #tpu.memory_space<vmem>>, vector<32x128xf32>
    %cst = arith.constant dense<0.000000e+00> : vector<324x128xf32>
    %4 = tpu.matmul %2, %3, %cst {dimension_numbers = #tpu.dot_dimension_numbers<[1], [0], [0], [1], [0, 0, 1, 1], [], []>} : vector<324x32xf32>, vector<32x128xf32>, vector<324x128xf32> -> vector<324x128xf32>
    %5 = vector.extract_strided_slice %0 {offsets = [0, 0], sizes = [1, 128], strides = [1, 1]} : vector<23x128xf32> to vector<1x128xf32>
    %6 = vector.broadcast %5 : vector<1x128xf32> to vector<324x128xf32>
    %7 = arith.mulf %4, %6 : vector<324x128xf32>
    %8 = vector.extract_strided_slice %0 {offsets = [1, 0], sizes = [1, 128], strides = [1, 1]} : vector<23x128xf32> to vector<1x128xf32>
    %9 = vector.broadcast %8 : vector<1x128xf32> to vector<324x128xf32>
    %10 = arith.addf %7, %9 : vector<324x128xf32>
    %cst_6 = arith.constant 0.000000e+00 : f32
    %cst_7 = arith.constant 6.000000e+00 : f32
    %11 = vector.broadcast %cst_6 : f32 to vector<324x128xf32>
    %12 = arith.maximumf %11, %10 : vector<324x128xf32>
    %13 = vector.broadcast %cst_7 : f32 to vector<324x128xf32>
    %14 = arith.minimumf %13, %12 : vector<324x128xf32>
    %c0_8 = arith.constant 0 : index
    %c0_9 = arith.constant 0 : index
    %15 = vector.load %arg8[%c0_8, %c0_9] : memref<324x1xf32, #tpu.memory_space<vmem>>, vector<324x1xf32>
    %16 = vector.broadcast %15 : vector<324x1xf32> to vector<324x128xf32>
    %17 = arith.mulf %14, %16 : vector<324x128xf32>
    %c0_10 = arith.constant 0 : index
    %c0_11 = arith.constant 0 : index
    %c0_12 = arith.constant 0 : index
    %18 = vector.load %arg3[%c0_10, %c0_11, %c0_12] : memref<4x9x128xf32, #tpu.memory_space<vmem>>, vector<1x9x128xf32>
    %19 = vector.shape_cast %18 : vector<1x9x128xf32> to vector<9x128xf32>
    %20 = vector.extract_strided_slice %17 {offsets = [0, 0], sizes = [286, 128], strides = [1, 1]} : vector<324x128xf32> to vector<286x128xf32>
    %21 = vector.extract_strided_slice %19 {offsets = [0, 0], sizes = [1, 128], strides = [1, 1]} : vector<9x128xf32> to vector<1x128xf32>
    %22 = vector.broadcast %21 : vector<1x128xf32> to vector<286x128xf32>
    %23 = arith.mulf %20, %22 : vector<286x128xf32>
    %24 = vector.extract_strided_slice %17 {offsets = [1, 0], sizes = [286, 128], strides = [1, 1]} : vector<324x128xf32> to vector<286x128xf32>
    %25 = vector.extract_strided_slice %19 {offsets = [1, 0], sizes = [1, 128], strides = [1, 1]} : vector<9x128xf32> to vector<1x128xf32>
    %26 = vector.broadcast %25 : vector<1x128xf32> to vector<286x128xf32>
    %27 = arith.mulf %24, %26 : vector<286x128xf32>
    %28 = arith.addf %23, %27 : vector<286x128xf32>
    %29 = vector.extract_strided_slice %17 {offsets = [2, 0], sizes = [286, 128], strides = [1, 1]} : vector<324x128xf32> to vector<286x128xf32>
    %30 = vector.extract_strided_slice %19 {offsets = [2, 0], sizes = [1, 128], strides = [1, 1]} : vector<9x128xf32> to vector<1x128xf32>
    %31 = vector.broadcast %30 : vector<1x128xf32> to vector<286x128xf32>
    %32 = arith.mulf %29, %31 : vector<286x128xf32>
    %33 = arith.addf %28, %32 : vector<286x128xf32>
    %34 = vector.extract_strided_slice %17 {offsets = [18, 0], sizes = [286, 128], strides = [1, 1]} : vector<324x128xf32> to vector<286x128xf32>
    %35 = vector.extract_strided_slice %19 {offsets = [3, 0], sizes = [1, 128], strides = [1, 1]} : vector<9x128xf32> to vector<1x128xf32>
    %36 = vector.broadcast %35 : vector<1x128xf32> to vector<286x128xf32>
    %37 = arith.mulf %34, %36 : vector<286x128xf32>
    %38 = arith.addf %33, %37 : vector<286x128xf32>
    %39 = vector.extract_strided_slice %17 {offsets = [19, 0], sizes = [286, 128], strides = [1, 1]} : vector<324x128xf32> to vector<286x128xf32>
    %40 = vector.extract_strided_slice %19 {offsets = [4, 0], sizes = [1, 128], strides = [1, 1]} : vector<9x128xf32> to vector<1x128xf32>
    %41 = vector.broadcast %40 : vector<1x128xf32> to vector<286x128xf32>
    %42 = arith.mulf %39, %41 : vector<286x128xf32>
    %43 = arith.addf %38, %42 : vector<286x128xf32>
    %44 = vector.extract_strided_slice %17 {offsets = [20, 0], sizes = [286, 128], strides = [1, 1]} : vector<324x128xf32> to vector<286x128xf32>
    %45 = vector.extract_strided_slice %19 {offsets = [5, 0], sizes = [1, 128], strides = [1, 1]} : vector<9x128xf32> to vector<1x128xf32>
    %46 = vector.broadcast %45 : vector<1x128xf32> to vector<286x128xf32>
    %47 = arith.mulf %44, %46 : vector<286x128xf32>
    %48 = arith.addf %43, %47 : vector<286x128xf32>
    %49 = vector.extract_strided_slice %17 {offsets = [36, 0], sizes = [286, 128], strides = [1, 1]} : vector<324x128xf32> to vector<286x128xf32>
    %50 = vector.extract_strided_slice %19 {offsets = [6, 0], sizes = [1, 128], strides = [1, 1]} : vector<9x128xf32> to vector<1x128xf32>
    %51 = vector.broadcast %50 : vector<1x128xf32> to vector<286x128xf32>
    %52 = arith.mulf %49, %51 : vector<286x128xf32>
    %53 = arith.addf %48, %52 : vector<286x128xf32>
    %54 = vector.extract_strided_slice %17 {offsets = [37, 0], sizes = [286, 128], strides = [1, 1]} : vector<324x128xf32> to vector<286x128xf32>
    %55 = vector.extract_strided_slice %19 {offsets = [7, 0], sizes = [1, 128], strides = [1, 1]} : vector<9x128xf32> to vector<1x128xf32>
    %56 = vector.broadcast %55 : vector<1x128xf32> to vector<286x128xf32>
    %57 = arith.mulf %54, %56 : vector<286x128xf32>
    %58 = arith.addf %53, %57 : vector<286x128xf32>
    %59 = vector.extract_strided_slice %17 {offsets = [38, 0], sizes = [286, 128], strides = [1, 1]} : vector<324x128xf32> to vector<286x128xf32>
    %60 = vector.extract_strided_slice %19 {offsets = [8, 0], sizes = [1, 128], strides = [1, 1]} : vector<9x128xf32> to vector<1x128xf32>
    %61 = vector.broadcast %60 : vector<1x128xf32> to vector<286x128xf32>
    %62 = arith.mulf %59, %61 : vector<286x128xf32>
    %63 = arith.addf %58, %62 : vector<286x128xf32>
    %64 = vector.extract_strided_slice %0 {offsets = [2, 0], sizes = [1, 128], strides = [1, 1]} : vector<23x128xf32> to vector<1x128xf32>
    %65 = vector.broadcast %64 : vector<1x128xf32> to vector<286x128xf32>
    %66 = arith.addf %63, %65 : vector<286x128xf32>
    %cst_13 = arith.constant 0.000000e+00 : f32
    %67 = vector.broadcast %cst_13 : f32 to vector<286x128xf32>
    %68 = arith.maximumf %66, %67 : vector<286x128xf32>
    %c0_14 = arith.constant 0 : index
    %c0_15 = arith.constant 0 : index
    %c0_16 = arith.constant 0 : index
    %69 = vector.load %arg5[%c0_14, %c0_15, %c0_16] : memref<9x128x128xf32, #tpu.memory_space<vmem>>, vector<1x128x128xf32>
    %70 = vector.shape_cast %69 : vector<1x128x128xf32> to vector<128x128xf32>
    %cst_17 = arith.constant dense<0.000000e+00> : vector<286x128xf32>
    %71 = tpu.matmul %68, %70, %cst_17 {dimension_numbers = #tpu.dot_dimension_numbers<[1], [0], [0], [1], [0, 0, 1, 1], [], []>} : vector<286x128xf32>, vector<128x128xf32>, vector<286x128xf32> -> vector<286x128xf32>
    %72 = vector.extract_strided_slice %0 {offsets = [3, 0], sizes = [1, 128], strides = [1, 1]} : vector<23x128xf32> to vector<1x128xf32>
    %73 = vector.broadcast %72 : vector<1x128xf32> to vector<286x128xf32>
    %74 = arith.mulf %71, %73 : vector<286x128xf32>
    %75 = vector.extract_strided_slice %0 {offsets = [4, 0], sizes = [1, 128], strides = [1, 1]} : vector<23x128xf32> to vector<1x128xf32>
    %76 = vector.broadcast %75 : vector<1x128xf32> to vector<286x128xf32>
    %77 = arith.addf %74, %76 : vector<286x128xf32>
    %c1 = arith.constant 1 : index
    %c0_18 = arith.constant 0 : index
    %c0_19 = arith.constant 0 : index
    %78 = vector.load %arg5[%c1, %c0_18, %c0_19] : memref<9x128x128xf32, #tpu.memory_space<vmem>>, vector<1x128x128xf32>
    %79 = vector.shape_cast %78 : vector<1x128x128xf32> to vector<128x128xf32>
    %cst_20 = arith.constant dense<0.000000e+00> : vector<286x128xf32>
    %80 = tpu.matmul %77, %79, %cst_20 {dimension_numbers = #tpu.dot_dimension_numbers<[1], [0], [0], [1], [0, 0, 1, 1], [], []>} : vector<286x128xf32>, vector<128x128xf32>, vector<286x128xf32> -> vector<286x128xf32>
    %81 = vector.extract_strided_slice %0 {offsets = [5, 0], sizes = [1, 128], strides = [1, 1]} : vector<23x128xf32> to vector<1x128xf32>
    %82 = vector.broadcast %81 : vector<1x128xf32> to vector<286x128xf32>
    %83 = arith.mulf %80, %82 : vector<286x128xf32>
    %84 = vector.extract_strided_slice %0 {offsets = [6, 0], sizes = [1, 128], strides = [1, 1]} : vector<23x128xf32> to vector<1x128xf32>
    %85 = vector.broadcast %84 : vector<1x128xf32> to vector<286x128xf32>
    %86 = arith.addf %83, %85 : vector<286x128xf32>
    %cst_21 = arith.constant 0.000000e+00 : f32
    %cst_22 = arith.constant 6.000000e+00 : f32
    %87 = vector.broadcast %cst_21 : f32 to vector<286x128xf32>
    %88 = arith.maximumf %87, %86 : vector<286x128xf32>
    %89 = vector.broadcast %cst_22 : f32 to vector<286x128xf32>
    %90 = arith.minimumf %89, %88 : vector<286x128xf32>
    %c1_23 = arith.constant 1 : index
    %c0_24 = arith.constant 0 : index
    %c0_25 = arith.constant 0 : index
    %91 = vector.load %arg3[%c1_23, %c0_24, %c0_25] : memref<4x9x128xf32, #tpu.memory_space<vmem>>, vector<1x9x128xf32>
    %92 = vector.shape_cast %91 : vector<1x9x128xf32> to vector<9x128xf32>
    %93 = vector.extract_strided_slice %90 {offsets = [0, 0], sizes = [248, 128], strides = [1, 1]} : vector<286x128xf32> to vector<248x128xf32>
    %94 = vector.extract_strided_slice %92 {offsets = [0, 0], sizes = [1, 128], strides = [1, 1]} : vector<9x128xf32> to vector<1x128xf32>
    %95 = vector.broadcast %94 : vector<1x128xf32> to vector<248x128xf32>
    %96 = arith.mulf %93, %95 : vector<248x128xf32>
    %97 = vector.extract_strided_slice %90 {offsets = [1, 0], sizes = [248, 128], strides = [1, 1]} : vector<286x128xf32> to vector<248x128xf32>
    %98 = vector.extract_strided_slice %92 {offsets = [1, 0], sizes = [1, 128], strides = [1, 1]} : vector<9x128xf32> to vector<1x128xf32>
    %99 = vector.broadcast %98 : vector<1x128xf32> to vector<248x128xf32>
    %100 = arith.mulf %97, %99 : vector<248x128xf32>
    %101 = arith.addf %96, %100 : vector<248x128xf32>
    %102 = vector.extract_strided_slice %90 {offsets = [2, 0], sizes = [248, 128], strides = [1, 1]} : vector<286x128xf32> to vector<248x128xf32>
    %103 = vector.extract_strided_slice %92 {offsets = [2, 0], sizes = [1, 128], strides = [1, 1]} : vector<9x128xf32> to vector<1x128xf32>
    %104 = vector.broadcast %103 : vector<1x128xf32> to vector<248x128xf32>
    %105 = arith.mulf %102, %104 : vector<248x128xf32>
    %106 = arith.addf %101, %105 : vector<248x128xf32>
    %107 = vector.extract_strided_slice %90 {offsets = [18, 0], sizes = [248, 128], strides = [1, 1]} : vector<286x128xf32> to vector<248x128xf32>
    %108 = vector.extract_strided_slice %92 {offsets = [3, 0], sizes = [1, 128], strides = [1, 1]} : vector<9x128xf32> to vector<1x128xf32>
    %109 = vector.broadcast %108 : vector<1x128xf32> to vector<248x128xf32>
    %110 = arith.mulf %107, %109 : vector<248x128xf32>
    %111 = arith.addf %106, %110 : vector<248x128xf32>
    %112 = vector.extract_strided_slice %90 {offsets = [19, 0], sizes = [248, 128], strides = [1, 1]} : vector<286x128xf32> to vector<248x128xf32>
    %113 = vector.extract_strided_slice %92 {offsets = [4, 0], sizes = [1, 128], strides = [1, 1]} : vector<9x128xf32> to vector<1x128xf32>
    %114 = vector.broadcast %113 : vector<1x128xf32> to vector<248x128xf32>
    %115 = arith.mulf %112, %114 : vector<248x128xf32>
    %116 = arith.addf %111, %115 : vector<248x128xf32>
    %117 = vector.extract_strided_slice %90 {offsets = [20, 0], sizes = [248, 128], strides = [1, 1]} : vector<286x128xf32> to vector<248x128xf32>
    %118 = vector.extract_strided_slice %92 {offsets = [5, 0], sizes = [1, 128], strides = [1, 1]} : vector<9x128xf32> to vector<1x128xf32>
    %119 = vector.broadcast %118 : vector<1x128xf32> to vector<248x128xf32>
    %120 = arith.mulf %117, %119 : vector<248x128xf32>
    %121 = arith.addf %116, %120 : vector<248x128xf32>
    %122 = vector.extract_strided_slice %90 {offsets = [36, 0], sizes = [248, 128], strides = [1, 1]} : vector<286x128xf32> to vector<248x128xf32>
    %123 = vector.extract_strided_slice %92 {offsets = [6, 0], sizes = [1, 128], strides = [1, 1]} : vector<9x128xf32> to vector<1x128xf32>
    %124 = vector.broadcast %123 : vector<1x128xf32> to vector<248x128xf32>
    %125 = arith.mulf %122, %124 : vector<248x128xf32>
    %126 = arith.addf %121, %125 : vector<248x128xf32>
    %127 = vector.extract_strided_slice %90 {offsets = [37, 0], sizes = [248, 128], strides = [1, 1]} : vector<286x128xf32> to vector<248x128xf32>
    %128 = vector.extract_strided_slice %92 {offsets = [7, 0], sizes = [1, 128], strides = [1, 1]} : vector<9x128xf32> to vector<1x128xf32>
    %129 = vector.broadcast %128 : vector<1x128xf32> to vector<248x128xf32>
    %130 = arith.mulf %127, %129 : vector<248x128xf32>
    %131 = arith.addf %126, %130 : vector<248x128xf32>
    %132 = vector.extract_strided_slice %90 {offsets = [38, 0], sizes = [248, 128], strides = [1, 1]} : vector<286x128xf32> to vector<248x128xf32>
    %133 = vector.extract_strided_slice %92 {offsets = [8, 0], sizes = [1, 128], strides = [1, 1]} : vector<9x128xf32> to vector<1x128xf32>
    %134 = vector.broadcast %133 : vector<1x128xf32> to vector<248x128xf32>
    %135 = arith.mulf %132, %134 : vector<248x128xf32>
    %136 = arith.addf %131, %135 : vector<248x128xf32>
    %137 = vector.extract_strided_slice %0 {offsets = [7, 0], sizes = [1, 128], strides = [1, 1]} : vector<23x128xf32> to vector<1x128xf32>
    %138 = vector.broadcast %137 : vector<1x128xf32> to vector<248x128xf32>
    %139 = arith.addf %136, %138 : vector<248x128xf32>
    %c0_26 = arith.constant 0 : index
    %c0_27 = arith.constant 0 : index
    %140 = vector.load %arg6[%c0_26, %c0_27] : memref<49x248xf32, #tpu.memory_space<vmem>>, vector<49x248xf32>
    %cst_28 = arith.constant dense<0.000000e+00> : vector<49x128xf32>
    %141 = tpu.matmul %140, %139, %cst_28 {dimension_numbers = #tpu.dot_dimension_numbers<[1], [0], [0], [1], [0, 0, 1, 1], [], []>} : vector<49x248xf32>, vector<248x128xf32>, vector<49x128xf32> -> vector<49x128xf32>
    %cst_29 = arith.constant 0.000000e+00 : f32
    %142 = vector.broadcast %cst_29 : f32 to vector<49x128xf32>
    %143 = arith.maximumf %141, %142 : vector<49x128xf32>
    %c2 = arith.constant 2 : index
    %c0_30 = arith.constant 0 : index
    %c0_31 = arith.constant 0 : index
    %144 = vector.load %arg5[%c2, %c0_30, %c0_31] : memref<9x128x128xf32, #tpu.memory_space<vmem>>, vector<1x128x128xf32>
    %145 = vector.shape_cast %144 : vector<1x128x128xf32> to vector<128x128xf32>
    %cst_32 = arith.constant dense<0.000000e+00> : vector<49x128xf32>
    %146 = tpu.matmul %143, %145, %cst_32 {dimension_numbers = #tpu.dot_dimension_numbers<[1], [0], [0], [1], [0, 0, 1, 1], [], []>} : vector<49x128xf32>, vector<128x128xf32>, vector<49x128xf32> -> vector<49x128xf32>
    %147 = vector.extract_strided_slice %0 {offsets = [8, 0], sizes = [1, 128], strides = [1, 1]} : vector<23x128xf32> to vector<1x128xf32>
    %148 = vector.broadcast %147 : vector<1x128xf32> to vector<49x128xf32>
    %149 = arith.mulf %146, %148 : vector<49x128xf32>
    %150 = vector.extract_strided_slice %0 {offsets = [9, 0], sizes = [1, 128], strides = [1, 1]} : vector<23x128xf32> to vector<1x128xf32>
    %151 = vector.broadcast %150 : vector<1x128xf32> to vector<49x128xf32>
    %152 = arith.addf %149, %151 : vector<49x128xf32>
    %c3 = arith.constant 3 : index
    %c0_33 = arith.constant 0 : index
    %c0_34 = arith.constant 0 : index
    %153 = vector.load %arg5[%c3, %c0_33, %c0_34] : memref<9x128x128xf32, #tpu.memory_space<vmem>>, vector<1x128x128xf32>
    %154 = vector.shape_cast %153 : vector<1x128x128xf32> to vector<128x128xf32>
    %cst_35 = arith.constant dense<0.000000e+00> : vector<49x128xf32>
    %155 = tpu.matmul %152, %154, %cst_35 {dimension_numbers = #tpu.dot_dimension_numbers<[1], [0], [0], [1], [0, 0, 1, 1], [], []>} : vector<49x128xf32>, vector<128x128xf32>, vector<49x128xf32> -> vector<49x128xf32>
    %156 = vector.extract_strided_slice %0 {offsets = [10, 0], sizes = [1, 128], strides = [1, 1]} : vector<23x128xf32> to vector<1x128xf32>
    %157 = vector.broadcast %156 : vector<1x128xf32> to vector<49x128xf32>
    %158 = arith.mulf %155, %157 : vector<49x128xf32>
    %159 = vector.extract_strided_slice %0 {offsets = [11, 0], sizes = [1, 128], strides = [1, 1]} : vector<23x128xf32> to vector<1x128xf32>
    %160 = vector.broadcast %159 : vector<1x128xf32> to vector<49x128xf32>
    %161 = arith.addf %158, %160 : vector<49x128xf32>
    %cst_36 = arith.constant 0.000000e+00 : f32
    %cst_37 = arith.constant 6.000000e+00 : f32
    %162 = vector.broadcast %cst_36 : f32 to vector<49x128xf32>
    %163 = arith.maximumf %162, %161 : vector<49x128xf32>
    %164 = vector.broadcast %cst_37 : f32 to vector<49x128xf32>
    %165 = arith.minimumf %164, %163 : vector<49x128xf32>
    %c4 = arith.constant 4 : index
    %c0_38 = arith.constant 0 : index
    %c0_39 = arith.constant 0 : index
    %166 = vector.load %arg5[%c4, %c0_38, %c0_39] : memref<9x128x128xf32, #tpu.memory_space<vmem>>, vector<1x128x128xf32>
    %167 = vector.shape_cast %166 : vector<1x128x128xf32> to vector<128x128xf32>
    %cst_40 = arith.constant dense<0.000000e+00> : vector<49x128xf32>
    %168 = tpu.matmul %165, %167, %cst_40 {dimension_numbers = #tpu.dot_dimension_numbers<[1], [0], [0], [1], [0, 0, 1, 1], [], []>} : vector<49x128xf32>, vector<128x128xf32>, vector<49x128xf32> -> vector<49x128xf32>
    %169 = vector.extract_strided_slice %0 {offsets = [12, 0], sizes = [1, 128], strides = [1, 1]} : vector<23x128xf32> to vector<1x128xf32>
    %170 = vector.broadcast %169 : vector<1x128xf32> to vector<49x128xf32>
    %171 = arith.mulf %168, %170 : vector<49x128xf32>
    %172 = vector.extract_strided_slice %0 {offsets = [13, 0], sizes = [1, 128], strides = [1, 1]} : vector<23x128xf32> to vector<1x128xf32>
    %173 = vector.broadcast %172 : vector<1x128xf32> to vector<49x128xf32>
    %174 = arith.addf %171, %173 : vector<49x128xf32>
    %cst_41 = arith.constant 0.000000e+00 : f32
    %cst_42 = arith.constant 6.000000e+00 : f32
    %175 = vector.broadcast %cst_41 : f32 to vector<49x128xf32>
    %176 = arith.maximumf %175, %174 : vector<49x128xf32>
    %177 = vector.broadcast %cst_42 : f32 to vector<49x128xf32>
    %178 = arith.minimumf %177, %176 : vector<49x128xf32>
    %c2_43 = arith.constant 2 : index
    %c0_44 = arith.constant 0 : index
    %c0_45 = arith.constant 0 : index
    %179 = vector.load %arg3[%c2_43, %c0_44, %c0_45] : memref<4x9x128xf32, #tpu.memory_space<vmem>>, vector<1x9x128xf32>
    %180 = vector.shape_cast %179 : vector<1x9x128xf32> to vector<9x128xf32>
    %181 = vector.extract_strided_slice %178 {offsets = [0, 0], sizes = [33, 128], strides = [1, 1]} : vector<49x128xf32> to vector<33x128xf32>
    %182 = vector.extract_strided_slice %180 {offsets = [0, 0], sizes = [1, 128], strides = [1, 1]} : vector<9x128xf32> to vector<1x128xf32>
    %183 = vector.broadcast %182 : vector<1x128xf32> to vector<33x128xf32>
    %184 = arith.mulf %181, %183 : vector<33x128xf32>
    %185 = vector.extract_strided_slice %178 {offsets = [1, 0], sizes = [33, 128], strides = [1, 1]} : vector<49x128xf32> to vector<33x128xf32>
    %186 = vector.extract_strided_slice %180 {offsets = [1, 0], sizes = [1, 128], strides = [1, 1]} : vector<9x128xf32> to vector<1x128xf32>
    %187 = vector.broadcast %186 : vector<1x128xf32> to vector<33x128xf32>
    %188 = arith.mulf %185, %187 : vector<33x128xf32>
    %189 = arith.addf %184, %188 : vector<33x128xf32>
    %190 = vector.extract_strided_slice %178 {offsets = [2, 0], sizes = [33, 128], strides = [1, 1]} : vector<49x128xf32> to vector<33x128xf32>
    %191 = vector.extract_strided_slice %180 {offsets = [2, 0], sizes = [1, 128], strides = [1, 1]} : vector<9x128xf32> to vector<1x128xf32>
    %192 = vector.broadcast %191 : vector<1x128xf32> to vector<33x128xf32>
    %193 = arith.mulf %190, %192 : vector<33x128xf32>
    %194 = arith.addf %189, %193 : vector<33x128xf32>
    %195 = vector.extract_strided_slice %178 {offsets = [7, 0], sizes = [33, 128], strides = [1, 1]} : vector<49x128xf32> to vector<33x128xf32>
    %196 = vector.extract_strided_slice %180 {offsets = [3, 0], sizes = [1, 128], strides = [1, 1]} : vector<9x128xf32> to vector<1x128xf32>
    %197 = vector.broadcast %196 : vector<1x128xf32> to vector<33x128xf32>
    %198 = arith.mulf %195, %197 : vector<33x128xf32>
    %199 = arith.addf %194, %198 : vector<33x128xf32>
    %200 = vector.extract_strided_slice %178 {offsets = [8, 0], sizes = [33, 128], strides = [1, 1]} : vector<49x128xf32> to vector<33x128xf32>
    %201 = vector.extract_strided_slice %180 {offsets = [4, 0], sizes = [1, 128], strides = [1, 1]} : vector<9x128xf32> to vector<1x128xf32>
    %202 = vector.broadcast %201 : vector<1x128xf32> to vector<33x128xf32>
    %203 = arith.mulf %200, %202 : vector<33x128xf32>
    %204 = arith.addf %199, %203 : vector<33x128xf32>
    %205 = vector.extract_strided_slice %178 {offsets = [9, 0], sizes = [33, 128], strides = [1, 1]} : vector<49x128xf32> to vector<33x128xf32>
    %206 = vector.extract_strided_slice %180 {offsets = [5, 0], sizes = [1, 128], strides = [1, 1]} : vector<9x128xf32> to vector<1x128xf32>
    %207 = vector.broadcast %206 : vector<1x128xf32> to vector<33x128xf32>
    %208 = arith.mulf %205, %207 : vector<33x128xf32>
    %209 = arith.addf %204, %208 : vector<33x128xf32>
    %210 = vector.extract_strided_slice %178 {offsets = [14, 0], sizes = [33, 128], strides = [1, 1]} : vector<49x128xf32> to vector<33x128xf32>
    %211 = vector.extract_strided_slice %180 {offsets = [6, 0], sizes = [1, 128], strides = [1, 1]} : vector<9x128xf32> to vector<1x128xf32>
    %212 = vector.broadcast %211 : vector<1x128xf32> to vector<33x128xf32>
    %213 = arith.mulf %210, %212 : vector<33x128xf32>
    %214 = arith.addf %209, %213 : vector<33x128xf32>
    %215 = vector.extract_strided_slice %178 {offsets = [15, 0], sizes = [33, 128], strides = [1, 1]} : vector<49x128xf32> to vector<33x128xf32>
    %216 = vector.extract_strided_slice %180 {offsets = [7, 0], sizes = [1, 128], strides = [1, 1]} : vector<9x128xf32> to vector<1x128xf32>
    %217 = vector.broadcast %216 : vector<1x128xf32> to vector<33x128xf32>
    %218 = arith.mulf %215, %217 : vector<33x128xf32>
    %219 = arith.addf %214, %218 : vector<33x128xf32>
    %220 = vector.extract_strided_slice %178 {offsets = [16, 0], sizes = [33, 128], strides = [1, 1]} : vector<49x128xf32> to vector<33x128xf32>
    %221 = vector.extract_strided_slice %180 {offsets = [8, 0], sizes = [1, 128], strides = [1, 1]} : vector<9x128xf32> to vector<1x128xf32>
    %222 = vector.broadcast %221 : vector<1x128xf32> to vector<33x128xf32>
    %223 = arith.mulf %220, %222 : vector<33x128xf32>
    %224 = arith.addf %219, %223 : vector<33x128xf32>
    %225 = vector.extract_strided_slice %0 {offsets = [14, 0], sizes = [1, 128], strides = [1, 1]} : vector<23x128xf32> to vector<1x128xf32>
    %226 = vector.broadcast %225 : vector<1x128xf32> to vector<33x128xf32>
    %227 = arith.addf %224, %226 : vector<33x128xf32>
    %cst_46 = arith.constant 0.000000e+00 : f32
    %228 = vector.broadcast %cst_46 : f32 to vector<33x128xf32>
    %229 = arith.maximumf %227, %228 : vector<33x128xf32>
    %c5 = arith.constant 5 : index
    %c0_47 = arith.constant 0 : index
    %c0_48 = arith.constant 0 : index
    %230 = vector.load %arg5[%c5, %c0_47, %c0_48] : memref<9x128x128xf32, #tpu.memory_space<vmem>>, vector<1x128x128xf32>
    %231 = vector.shape_cast %230 : vector<1x128x128xf32> to vector<128x128xf32>
    %cst_49 = arith.constant dense<0.000000e+00> : vector<33x128xf32>
    %232 = tpu.matmul %229, %231, %cst_49 {dimension_numbers = #tpu.dot_dimension_numbers<[1], [0], [0], [1], [0, 0, 1, 1], [], []>} : vector<33x128xf32>, vector<128x128xf32>, vector<33x128xf32> -> vector<33x128xf32>
    %233 = vector.extract_strided_slice %0 {offsets = [15, 0], sizes = [1, 128], strides = [1, 1]} : vector<23x128xf32> to vector<1x128xf32>
    %234 = vector.broadcast %233 : vector<1x128xf32> to vector<33x128xf32>
    %235 = arith.mulf %232, %234 : vector<33x128xf32>
    %236 = vector.extract_strided_slice %0 {offsets = [16, 0], sizes = [1, 128], strides = [1, 1]} : vector<23x128xf32> to vector<1x128xf32>
    %237 = vector.broadcast %236 : vector<1x128xf32> to vector<33x128xf32>
    %238 = arith.addf %235, %237 : vector<33x128xf32>
    %c0_50 = arith.constant 0 : index
    %c0_51 = arith.constant 0 : index
    %239 = vector.load %arg7[%c0_50, %c0_51] : memref<25x33xf32, #tpu.memory_space<vmem>>, vector<25x33xf32>
    %cst_52 = arith.constant dense<0.000000e+00> : vector<25x128xf32>
    %240 = tpu.matmul %239, %238, %cst_52 {dimension_numbers = #tpu.dot_dimension_numbers<[1], [0], [0], [1], [0, 0, 1, 1], [], []>} : vector<25x33xf32>, vector<33x128xf32>, vector<25x128xf32> -> vector<25x128xf32>
    %c6 = arith.constant 6 : index
    %c0_53 = arith.constant 0 : index
    %c0_54 = arith.constant 0 : index
    %241 = vector.load %arg5[%c6, %c0_53, %c0_54] : memref<9x128x128xf32, #tpu.memory_space<vmem>>, vector<1x128x128xf32>
    %242 = vector.shape_cast %241 : vector<1x128x128xf32> to vector<128x128xf32>
    %cst_55 = arith.constant dense<0.000000e+00> : vector<25x128xf32>
    %243 = tpu.matmul %240, %242, %cst_55 {dimension_numbers = #tpu.dot_dimension_numbers<[1], [0], [0], [1], [0, 0, 1, 1], [], []>} : vector<25x128xf32>, vector<128x128xf32>, vector<25x128xf32> -> vector<25x128xf32>
    %244 = vector.extract_strided_slice %0 {offsets = [17, 0], sizes = [1, 128], strides = [1, 1]} : vector<23x128xf32> to vector<1x128xf32>
    %245 = vector.broadcast %244 : vector<1x128xf32> to vector<25x128xf32>
    %246 = arith.mulf %243, %245 : vector<25x128xf32>
    %247 = vector.extract_strided_slice %0 {offsets = [18, 0], sizes = [1, 128], strides = [1, 1]} : vector<23x128xf32> to vector<1x128xf32>
    %248 = vector.broadcast %247 : vector<1x128xf32> to vector<25x128xf32>
    %249 = arith.addf %246, %248 : vector<25x128xf32>
    %cst_56 = arith.constant 0.000000e+00 : f32
    %cst_57 = arith.constant 6.000000e+00 : f32
    %250 = vector.broadcast %cst_56 : f32 to vector<25x128xf32>
    %251 = arith.maximumf %250, %249 : vector<25x128xf32>
    %252 = vector.broadcast %cst_57 : f32 to vector<25x128xf32>
    %253 = arith.minimumf %252, %251 : vector<25x128xf32>
    %c0_58 = arith.constant 0 : index
    %c0_59 = arith.constant 0 : index
    %254 = vector.load %arg9[%c0_58, %c0_59] : memref<25x1xf32, #tpu.memory_space<vmem>>, vector<25x1xf32>
    %255 = vector.broadcast %254 : vector<25x1xf32> to vector<25x128xf32>
    %256 = arith.mulf %253, %255 : vector<25x128xf32>
    %c3_60 = arith.constant 3 : index
    %c0_61 = arith.constant 0 : index
    %c0_62 = arith.constant 0 : index
    %257 = vector.load %arg3[%c3_60, %c0_61, %c0_62] : memref<4x9x128xf32, #tpu.memory_space<vmem>>, vector<1x9x128xf32>
    %258 = vector.shape_cast %257 : vector<1x9x128xf32> to vector<9x128xf32>
    %259 = vector.extract_strided_slice %256 {offsets = [0, 0], sizes = [13, 128], strides = [1, 1]} : vector<25x128xf32> to vector<13x128xf32>
    %260 = vector.extract_strided_slice %258 {offsets = [0, 0], sizes = [1, 128], strides = [1, 1]} : vector<9x128xf32> to vector<1x128xf32>
    %261 = vector.broadcast %260 : vector<1x128xf32> to vector<13x128xf32>
    %262 = arith.mulf %259, %261 : vector<13x128xf32>
    %263 = vector.extract_strided_slice %256 {offsets = [1, 0], sizes = [13, 128], strides = [1, 1]} : vector<25x128xf32> to vector<13x128xf32>
    %264 = vector.extract_strided_slice %258 {offsets = [1, 0], sizes = [1, 128], strides = [1, 1]} : vector<9x128xf32> to vector<1x128xf32>
    %265 = vector.broadcast %264 : vector<1x128xf32> to vector<13x128xf32>
    %266 = arith.mulf %263, %265 : vector<13x128xf32>
    %267 = arith.addf %262, %266 : vector<13x128xf32>
    %268 = vector.extract_strided_slice %256 {offsets = [2, 0], sizes = [13, 128], strides = [1, 1]} : vector<25x128xf32> to vector<13x128xf32>
    %269 = vector.extract_strided_slice %258 {offsets = [2, 0], sizes = [1, 128], strides = [1, 1]} : vector<9x128xf32> to vector<1x128xf32>
    %270 = vector.broadcast %269 : vector<1x128xf32> to vector<13x128xf32>
    %271 = arith.mulf %268, %270 : vector<13x128xf32>
    %272 = arith.addf %267, %271 : vector<13x128xf32>
    %273 = vector.extract_strided_slice %256 {offsets = [5, 0], sizes = [13, 128], strides = [1, 1]} : vector<25x128xf32> to vector<13x128xf32>
    %274 = vector.extract_strided_slice %258 {offsets = [3, 0], sizes = [1, 128], strides = [1, 1]} : vector<9x128xf32> to vector<1x128xf32>
    %275 = vector.broadcast %274 : vector<1x128xf32> to vector<13x128xf32>
    %276 = arith.mulf %273, %275 : vector<13x128xf32>
    %277 = arith.addf %272, %276 : vector<13x128xf32>
    %278 = vector.extract_strided_slice %256 {offsets = [6, 0], sizes = [13, 128], strides = [1, 1]} : vector<25x128xf32> to vector<13x128xf32>
    %279 = vector.extract_strided_slice %258 {offsets = [4, 0], sizes = [1, 128], strides = [1, 1]} : vector<9x128xf32> to vector<1x128xf32>
    %280 = vector.broadcast %279 : vector<1x128xf32> to vector<13x128xf32>
    %281 = arith.mulf %278, %280 : vector<13x128xf32>
    %282 = arith.addf %277, %281 : vector<13x128xf32>
    %283 = vector.extract_strided_slice %256 {offsets = [7, 0], sizes = [13, 128], strides = [1, 1]} : vector<25x128xf32> to vector<13x128xf32>
    %284 = vector.extract_strided_slice %258 {offsets = [5, 0], sizes = [1, 128], strides = [1, 1]} : vector<9x128xf32> to vector<1x128xf32>
    %285 = vector.broadcast %284 : vector<1x128xf32> to vector<13x128xf32>
    %286 = arith.mulf %283, %285 : vector<13x128xf32>
    %287 = arith.addf %282, %286 : vector<13x128xf32>
    %288 = vector.extract_strided_slice %256 {offsets = [10, 0], sizes = [13, 128], strides = [1, 1]} : vector<25x128xf32> to vector<13x128xf32>
    %289 = vector.extract_strided_slice %258 {offsets = [6, 0], sizes = [1, 128], strides = [1, 1]} : vector<9x128xf32> to vector<1x128xf32>
    %290 = vector.broadcast %289 : vector<1x128xf32> to vector<13x128xf32>
    %291 = arith.mulf %288, %290 : vector<13x128xf32>
    %292 = arith.addf %287, %291 : vector<13x128xf32>
    %293 = vector.extract_strided_slice %256 {offsets = [11, 0], sizes = [13, 128], strides = [1, 1]} : vector<25x128xf32> to vector<13x128xf32>
    %294 = vector.extract_strided_slice %258 {offsets = [7, 0], sizes = [1, 128], strides = [1, 1]} : vector<9x128xf32> to vector<1x128xf32>
    %295 = vector.broadcast %294 : vector<1x128xf32> to vector<13x128xf32>
    %296 = arith.mulf %293, %295 : vector<13x128xf32>
    %297 = arith.addf %292, %296 : vector<13x128xf32>
    %298 = vector.extract_strided_slice %256 {offsets = [12, 0], sizes = [13, 128], strides = [1, 1]} : vector<25x128xf32> to vector<13x128xf32>
    %299 = vector.extract_strided_slice %258 {offsets = [8, 0], sizes = [1, 128], strides = [1, 1]} : vector<9x128xf32> to vector<1x128xf32>
    %300 = vector.broadcast %299 : vector<1x128xf32> to vector<13x128xf32>
    %301 = arith.mulf %298, %300 : vector<13x128xf32>
    %302 = arith.addf %297, %301 : vector<13x128xf32>
    %303 = vector.extract_strided_slice %0 {offsets = [19, 0], sizes = [1, 128], strides = [1, 1]} : vector<23x128xf32> to vector<1x128xf32>
    %304 = vector.broadcast %303 : vector<1x128xf32> to vector<13x128xf32>
    %305 = arith.addf %302, %304 : vector<13x128xf32>
    %cst_63 = arith.constant 0.000000e+00 : f32
    %306 = vector.broadcast %cst_63 : f32 to vector<13x128xf32>
    %307 = arith.maximumf %305, %306 : vector<13x128xf32>
    %c7 = arith.constant 7 : index
    %c0_64 = arith.constant 0 : index
    %c0_65 = arith.constant 0 : index
    %308 = vector.load %arg5[%c7, %c0_64, %c0_65] : memref<9x128x128xf32, #tpu.memory_space<vmem>>, vector<1x128x128xf32>
    %309 = vector.shape_cast %308 : vector<1x128x128xf32> to vector<128x128xf32>
    %cst_66 = arith.constant dense<0.000000e+00> : vector<13x128xf32>
    %310 = tpu.matmul %307, %309, %cst_66 {dimension_numbers = #tpu.dot_dimension_numbers<[1], [0], [0], [1], [0, 0, 1, 1], [], []>} : vector<13x128xf32>, vector<128x128xf32>, vector<13x128xf32> -> vector<13x128xf32>
    %311 = vector.extract_strided_slice %0 {offsets = [20, 0], sizes = [1, 128], strides = [1, 1]} : vector<23x128xf32> to vector<1x128xf32>
    %312 = vector.broadcast %311 : vector<1x128xf32> to vector<13x128xf32>
    %313 = arith.mulf %310, %312 : vector<13x128xf32>
    %314 = vector.extract_strided_slice %0 {offsets = [21, 0], sizes = [1, 128], strides = [1, 1]} : vector<23x128xf32> to vector<1x128xf32>
    %315 = vector.broadcast %314 : vector<1x128xf32> to vector<13x128xf32>
    %316 = arith.addf %313, %315 : vector<13x128xf32>
    %317 = vector.extract_strided_slice %240 {offsets = [6, 0], sizes = [13, 128], strides = [1, 1]} : vector<25x128xf32> to vector<13x128xf32>
    %318 = arith.addf %316, %317 : vector<13x128xf32>
    %319 = vector.extract_strided_slice %318 {offsets = [0, 0], sizes = [1, 128], strides = [1, 1]} : vector<13x128xf32> to vector<1x128xf32>
    %320 = vector.extract_strided_slice %318 {offsets = [1, 0], sizes = [1, 128], strides = [1, 1]} : vector<13x128xf32> to vector<1x128xf32>
    %321 = arith.maximumf %319, %320 : vector<1x128xf32>
    %322 = vector.extract_strided_slice %318 {offsets = [5, 0], sizes = [1, 128], strides = [1, 1]} : vector<13x128xf32> to vector<1x128xf32>
    %323 = vector.extract_strided_slice %318 {offsets = [6, 0], sizes = [1, 128], strides = [1, 1]} : vector<13x128xf32> to vector<1x128xf32>
    %324 = arith.maximumf %322, %323 : vector<1x128xf32>
    %325 = arith.maximumf %321, %324 : vector<1x128xf32>
    %c8 = arith.constant 8 : index
    %c0_67 = arith.constant 0 : index
    %c0_68 = arith.constant 0 : index
    %326 = vector.load %arg5[%c8, %c0_67, %c0_68] : memref<9x128x128xf32, #tpu.memory_space<vmem>>, vector<1x128x128xf32>
    %327 = vector.shape_cast %326 : vector<1x128x128xf32> to vector<128x128xf32>
    %cst_69 = arith.constant dense<0.000000e+00> : vector<1x128xf32>
    %328 = tpu.matmul %325, %327, %cst_69 {dimension_numbers = #tpu.dot_dimension_numbers<[1], [0], [0], [1], [0, 0, 1, 1], [], []>} : vector<1x128xf32>, vector<128x128xf32>, vector<1x128xf32> -> vector<1x128xf32>
    %329 = vector.extract_strided_slice %0 {offsets = [22, 0], sizes = [1, 128], strides = [1, 1]} : vector<23x128xf32> to vector<1x128xf32>
    %330 = arith.addf %328, %329 : vector<1x128xf32>
    %331 = vector.shape_cast %330 : vector<1x128xf32> to vector<1x128xf32>
    %332 = vector.broadcast %331 : vector<1x128xf32> to vector<8x128xf32>
    %c0_70 = arith.constant 0 : index
    %c0_71 = arith.constant 0 : index
    %c0_72 = arith.constant 0 : index
    %333 = vector.load %arg10[%c0_70, %c0_71, %c0_72] : memref<1x8x128xf32, #tpu.memory_space<vmem>>, vector<1x8x128xf32>
    %334 = vector.shape_cast %333 : vector<1x8x128xf32> to vector<8x128xf32>
    %335 = vector.shape_cast %332 : vector<8x128xf32> to vector<1x8x128xf32>
    tpu.vector_store %arg10[%c0_70, %c0_71, %c0_72], %335 {strides = array<i32>} : memref<1x8x128xf32, #tpu.memory_space<vmem>>, vector<1x8x128xf32>,
    return
  }
  func.func @transform_0(%arg0: i32) -> (i32, i32, i32) {
    %c0_i32 = arith.constant 0 : i32
    %c0_i32_0 = arith.constant 0 : i32
    %c0_i32_1 = arith.constant 0 : i32
    return %arg0, %c0_i32, %c0_i32_0 : i32, i32, i32
  }
  func.func @transform_1(%arg0: i32) -> (i32, i32) {
    %c0_i32 = arith.constant 0 : i32
    %c0_i32_0 = arith.constant 0 : i32
    %c0_i32_1 = arith.constant 0 : i32
    return %c0_i32, %c0_i32_0 : i32, i32
  }
  func.func @transform_2(%arg0: i32) -> (i32, i32, i32) {
    %c0_i32 = arith.constant 0 : i32
    %c0_i32_0 = arith.constant 0 : i32
    %c0_i32_1 = arith.constant 0 : i32
    %c0_i32_2 = arith.constant 0 : i32
    return %c0_i32, %c0_i32_0, %c0_i32_1 : i32, i32, i32
  }
  func.func @transform_3(%arg0: i32) -> (i32, i32) {
    %c0_i32 = arith.constant 0 : i32
    %c0_i32_0 = arith.constant 0 : i32
    %c0_i32_1 = arith.constant 0 : i32
    return %c0_i32, %c0_i32_0 : i32, i32
  }
  func.func @transform_4(%arg0: i32) -> (i32, i32, i32) {
    %c0_i32 = arith.constant 0 : i32
    %c0_i32_0 = arith.constant 0 : i32
    %c0_i32_1 = arith.constant 0 : i32
    %c0_i32_2 = arith.constant 0 : i32
    return %c0_i32, %c0_i32_0, %c0_i32_1 : i32, i32, i32
  }
  func.func @transform_5(%arg0: i32) -> (i32, i32) {
    %c0_i32 = arith.constant 0 : i32
    %c0_i32_0 = arith.constant 0 : i32
    %c0_i32_1 = arith.constant 0 : i32
    return %c0_i32, %c0_i32_0 : i32, i32
  }
  func.func @transform_6(%arg0: i32) -> (i32, i32) {
    %c0_i32 = arith.constant 0 : i32
    %c0_i32_0 = arith.constant 0 : i32
    %c0_i32_1 = arith.constant 0 : i32
    return %c0_i32, %c0_i32_0 : i32, i32
  }
  func.func @transform_7(%arg0: i32) -> (i32, i32) {
    %c0_i32 = arith.constant 0 : i32
    %c0_i32_0 = arith.constant 0 : i32
    %c0_i32_1 = arith.constant 0 : i32
    return %c0_i32, %c0_i32_0 : i32, i32
  }
  func.func @transform_8(%arg0: i32) -> (i32, i32) {
    %c0_i32 = arith.constant 0 : i32
    %c0_i32_0 = arith.constant 0 : i32
    %c0_i32_1 = arith.constant 0 : i32
    return %c0_i32, %c0_i32_0 : i32, i32
  }
  func.func @transform_9(%arg0: i32) -> (i32, i32, i32) {
    %c0_i32 = arith.constant 0 : i32
    %c0_i32_0 = arith.constant 0 : i32
    %c0_i32_1 = arith.constant 0 : i32
    return %arg0, %c0_i32, %c0_i32_0 : i32, i32, i32
  }
}

</mosaic_0001>

<bundles_post_ra>
// kernel: mcunet_forward.1
= control target key start
LH: loop header
LB: loop body
LE: loop exit
PB: predicated region body
PF: predicated region fallthrough
CT: control target
= control target key end

     0   :  { %s8667_s30 = smov 0   ;;  %s13834_s0 = inlined_call_operand.vmem [shape: f32[2,324,32], index: 0, kind: input, shape index: {}]   ;;  %s13835_s1 = inlined_call_operand.vmem [shape: f32[32,128], index: 1, kind: input, shape index: {}]   ;;  %s13836_s2 = inlined_call_operand.vmem [shape: f32[4,9,128], index: 2, kind: input, shape index: {}]   ;;  %s13837_s3 = inlined_call_operand.vmem [shape: f32[23,128], index: 3, kind: input, shape index: {}]   ;;  %s13838_s4 = inlined_call_operand.vmem [shape: f32[9,128,128], index: 4, kind: input, shape index: {}]   ;;  %s13839_s5 = inlined_call_operand.vmem [shape: f32[49,248], index: 5, kind: input, shape index: {}]   ;;  %s13840_s6 = inlined_call_operand.vmem [shape: f32[25,33], index: 6, kind: input, shape index: {}]   ;;  %s13841_s7 = inlined_call_operand.vmem [shape: f32[324,1], index: 7, kind: input, shape index: {}]   ;;  %s13842_s8 = inlined_call_operand.vmem [shape: f32[25,1], index: 8, kind: input, shape index: {}]   ;;  %s13843_s9 = inlined_call_operand.vmem [shape: f32[2,8,128], index: 9, kind: output, shape index: {}]  }
   0x1 LB: > { %s7142_s10 = sadd.s32 4294967295, %s8611_s30   ;;  %p7146_p0 = scmp.ge.s32.totalorder %s8611_s30, 1  ;;  %s8611_s30 = sphi %s8667_s30, %s19_s30  }
   0x2   : > { %p287_p1 = scmp.lt.s32.totalorder %s8611_s30, 3 }
   0x4   : > { %p288_p2 = pnand %p7146_p0, %p287_p1 }
   0x6   : > { %291 = sbr.rel (%p288_p2) target bundleno = 3265 (0xcc1), region = 56 }
   0xd   : > { %v375_v0 = vld [vmem:[%s13835_s1] sm:$0xff]  ;;  %v376_v1 = vld [vmem:[%s13835_s1 + $0x8] sm:$0xff]  ;;  %v377_v2 = vld [vmem:[%s13835_s1 + $0x10] sm:$0xff]  ;;  %v13846_v3 = vmov 0.0|0.0   ;;  %vm8614_vm0 = vmmov 0   ;;  %v13844_v6 = vmov 0.0  }
   0xe   : > { %8278 = vmatprep.subr.bf16.mxu0 %v13846_v3  ;;  %v8279_v4 = vpack.c.bf16 %v376_v1, %v375_v0  ;;  %v378_v5 = vld [vmem:[%s13835_s1 + $0x18] sm:$0xff]  ;;  %7653 = vmatprep.mubr.msk.f32.mxu0 %vm8614_vm0, %v13844_v6  ;;  %p322_p3 = scmp.lt.s32.totalorder %s7142_s10, 1  ;;  %v945_v7 = vld [vmem:[%s13841_s7] sm:$0xff]  ;;  %v8616_v8 = vmov 0   ;;  %v947_v9 = vld [vmem:[%s13841_s7 + $0x10] sm:$0xff]  ;;  %vm379_vm1 = vcmask 261120  }
   0xf   : > { %8598 = vset.pattern.permute.xlu0 %v8616_v8  ;;  %8599 = vset.pattern.permute.xlu1 %v8616_v8  ;;  %v8282_v10 = vpack.c.bf16 %v378_v5, %v377_v2  ;;  %v946_v11 = vld [vmem:[%s13841_s7 + $0x8] sm:$0xff]  ;;  %v948_v12 = vld [vmem:[%s13841_s7 + $0x18] sm:$0xff]  ;;  %v949_v14 = vld [vmem:[%s13841_s7 + $0x20] sm:$0xff]  ;;  %vm1350_vm2 = vcmask 1046528   ;;  %vm1570_vm3 = vcmask 1045504   ;;  %vm2011_vm4 = vcmask 1044480  }
  0x10   : > { %8280 = vmatpush3.bf16.msra.mxu0 %v8279_v4  ;;  %s14147_s10 = smov (!%p322_p3, %s7142_s10), 1  ;;  %988 = vperm.xlu0 %8598, %v945_v7   ;;  %v950_v15 = vld [vmem:[%s13841_s7 + $0x28] sm:$0xff]  ;;  %v951_v17 = vld [vmem:[%s13841_s7 + $0x30] sm:$0xff]  ;;  %v952_v18 = vld [vmem:[%s13841_s7 + $0x38] sm:$0xff]  ;;  %vm2235_vm5 = vcmask 1043456   ;;  %vm2682_vm6 = vcmask 1042432  }
  0x11   : > { %8281 = vmatprep.subr.bf16.mxu0 %v13846_v3  ;;  %998 = vperm.xlu1 %8599, %v947_v9   ;;  %s8585_s25 = smul.u32 328, %s14147_s10  ;;  %v953_v20 = vld [vmem:[%s13841_s7 + $0x40] sm:$0xff]  ;;  %v954_v21 = vld [vmem:[%s13841_s7 + $0x48] sm:$0xff]  ;;  %v955_v23 = vld [vmem:[%s13841_s7 + $0x50] sm:$0xff]  ;;  %vm2906_vm7 = vcmask 1041408   ;;  %vm5514_vm8 = vcmask 982016  }
  0x12   : > { %v956_v24 = vld [vmem:[%s13841_s7 + $0x58] sm:$0xff]  ;;  %v957_v26 = vld [vmem:[%s13841_s7 + $0x60] sm:$0xff]  ;;  %v958_v27 = vld [vmem:[%s13841_s7 + $0x68] sm:$0xff]  ;;  %vm6180_vm9 = vcmask 1040384   ;;  %vm6470_vm10 = vcmask 269312   ;;  %s7148_s19 = sshll.u32 %s14147_s10, 3 }
  0x13   : > { %s8709_s11 = scalar_lea.vmem %s13834_s0, %s8585_s25  ;;  %v959_v29 = vld [vmem:[%s13841_s7 + $0x70] sm:$0xff]  ;;  %v960_v30 = vld [vmem:[%s13841_s7 + $0x78] sm:$0xff]  ;;  %v961_v32 = vld [vmem:[%s13841_s7 + $0x80] sm:$0xff]  ;;  %s330_s21 = scalar_lea.vmem %s13843_s9, %s7148_s19 }
  0x14   : > { %8283 = vmatpush3.bf16.msra.mxu0 %v8282_v10  ;;  %993 = vperm.xlu0 %8598, %v946_v11   ;;  %v334_v13 = vld [vmem:[%s8709_s11] sm:$0xff]  ;;  %v335_v16 = vld [vmem:[%s8709_s11 + $0x8] sm:$0xff]  ;;  %v336_v19 = vld [vmem:[%s8709_s11 + $0x10] sm:$0xff] }
  0x15   : > { %1003 = vperm.xlu1 %8599, %v948_v12   ;;  %8348 = vmatprep.subr.bf16.mxu0 %v13846_v3  ;;  %v337_v22 = vld [vmem:[%s8709_s11 + $0x18] sm:$0xff]  ;;  %v338_v25 = vld [vmem:[%s8709_s11 + $0x20] sm:$0xff]  ;;  %v339_v28 = vld [vmem:[%s8709_s11 + $0x28] sm:$0xff] }
  0x16   : > { %v340_v31 = vld [vmem:[%s8709_s11 + $0x30] sm:$0xff]  ;;  %v962_v33 = vld [vmem:[%s13841_s7 + $0x88] sm:$0xff]  ;;  %v341_v34 = vld [vmem:[%s8709_s11 + $0x38] sm:$0xff] }
  0x17   : > { %7654 = vmatmul.mubr.msk.f32.vlgmr.msra.gmra.mrb[0].mxu0 %vm379_vm1, %v334_v13  ;;  %v963_v35 = vld [vmem:[%s13841_s7 + $0x90] sm:$0xff]  ;;  %v964_v36 = vld [vmem:[%s13841_s7 + $0x98] sm:$0xff]  ;;  %v342_v37 = vld [vmem:[%s8709_s11 + $0x40] sm:$0xff] }
  0x18   : > { %7656 = vmatprep.mubr.msk.f32.mxu0 %vm8614_vm0, %v13844_v6  ;;  %1008 = vperm.xlu0 %8598, %v949_v14   ;;  %v965_v38 = vld [vmem:[%s13841_s7 + $0xa0] sm:$0xff]  ;;  %v966_v39 = vld [vmem:[%s13841_s7 + $0xa8] sm:$0xff]  ;;  %v967_v41 = vld [vmem:[%s13841_s7 + $0xb0] sm:$0xff] }
  0x19   : > { %1013 = vperm.xlu1 %8599, %v950_v15   ;;  %v343_v40 = vld [vmem:[%s8709_s11 + $0x48] sm:$0xff]  ;;  %v968_v42 = vld [vmem:[%s13841_s7 + $0xb8] sm:$0xff]  ;;  %v344_v43 = vld [vmem:[%s8709_s11 + $0x50] sm:$0xff] }
  0x1a   : > { %v969_v44 = vld [vmem:[%s13841_s7 + $0xc0] sm:$0xff]  ;;  %v970_v45 = vld [vmem:[%s13841_s7 + $0xc8] sm:$0xff]  ;;  %v345_v46 = vld [vmem:[%s8709_s11 + $0x58] sm:$0xff] }
  0x1b   : > { %7657 = vmatmul.mubr.msk.f32.gmra.mrb[2].mxu0 %vm379_vm1, %v335_v16  ;;  %v971_v47 = vld [vmem:[%s13841_s7 + $0xd0] sm:$0xff]  ;;  %v972_v48 = vld [vmem:[%s13841_s7 + $0xd8] sm:$0xff]  ;;  %v346_v49 = vld [vmem:[%s8709_s11 + $0x60] sm:$0xff] }
  0x1c   : > { %7659 = vmatprep.mubr.msk.f32.mxu0 %vm8614_vm0, %v13844_v6  ;;  %1018 = vperm.xlu0 %8598, %v951_v17   ;;  %v973_v50 = vld [vmem:[%s13841_s7 + $0xe0] sm:$0xff]  ;;  %v974_v51 = vld [vmem:[%s13841_s7 + $0xe8] sm:$0xff]  ;;  %v975_v53 = vld [vmem:[%s13841_s7 + $0xf0] sm:$0xff] }
  0x1d   : > { %1023 = vperm.xlu1 %8599, %v952_v18   ;;  %v347_v52 = vld [vmem:[%s8709_s11 + $0x68] sm:$0xff]  ;;  %v976_v54 = vld [vmem:[%s13841_s7 + $0xf8] sm:$0xff]  ;;  %v348_v55 = vld [vmem:[%s8709_s11 + $0x70] sm:$0xff] }
  0x1e   : > { %v977_v56 = vld [vmem:[%s13841_s7 + $0x100] sm:$0xff]  ;;  %v978_v57 = vld [vmem:[%s13841_s7 + $0x108] sm:$0xff]  ;;  %v349_v58 = vld [vmem:[%s8709_s11 + $0x78] sm:$0xff] }
  0x1f   : > { %7660 = vmatmul.mubr.msk.f32.gmra.mrb[4].mxu0 %vm379_vm1, %v336_v19  ;;  %v979_v59 = vld [vmem:[%s13841_s7 + $0x110] sm:$0xff]  ;;  %v980_v60 = vld [vmem:[%s13841_s7 + $0x118] sm:$0xff]  ;;  %v350_v61 = vld [vmem:[%s8709_s11 + $0x80] sm:$0xff] }
  0x20   : > { %7662 = vmatprep.mubr.msk.f32.mxu0 %vm8614_vm0, %v13844_v6  ;;  %1028 = vperm.xlu0 %8598, %v953_v20   ;;  %v981_v62 = vld [vmem:[%s13841_s7 + $0x120] sm:$0xff]  ;;  %v982_v63 = vld [vmem:[%s13841_s7 + $0x128] sm:$0xff]  ;;  %v983_v1 = vld [vmem:[%s13841_s7 + $0x130] sm:$0xff] }
  0x21   : > { %1033 = vperm.xlu1 %8599, %v954_v21   ;;  %v351_v0 = vld [vmem:[%s8709_s11 + $0x88] sm:$0xff]  ;;  %v984_v2 = vld [vmem:[%s13841_s7 + $0x138] sm:$0xff]  ;;  %v352_v4 = vld [vmem:[%s8709_s11 + $0x90] sm:$0xff] }
  0x22   : > { %v985_v5 = vld [vmem:[%s13841_s7 + $0x140] sm:$0xf]  ;;  %v353_v8 = vld [vmem:[%s8709_s11 + $0x98] sm:$0xff]  ;;  %v6698_v9 = vld [vmem:[%s13842_s8 + $0x8] sm:$0xff] }
  0x23   : > { %7663 = vmatmul.mubr.msk.f32.gmra.mrb[6].mxu0 %vm379_vm1, %v337_v22  ;;  %v6697_v7 = vld [vmem:[%s13842_s8] sm:$0xff]  ;;  %v6699_v10 = vld [vmem:[%s13842_s8 + $0x10] sm:$0xff]  ;;  %v6700_v12 = vld [vmem:[%s13842_s8 + $0x18] sm:$0x1] }
  0x24   : > { %7665 = vmatprep.mubr.msk.f32.mxu0 %vm8614_vm0, %v13844_v6  ;;  %1038 = vperm.xlu0 %8598, %v955_v23   ;;  %v354_v11 = vld [vmem:[%s8709_s11 + $0xa0] sm:$0xff]  ;;  %v355_v13 = vld [vmem:[%s8709_s11 + $0xa8] sm:$0xff]  ;;  %v356_v14 = vld [vmem:[%s8709_s11 + $0xb0] sm:$0xff] }
  0x25   : > { %1043 = vperm.xlu1 %8599, %v956_v24   ;;  %v357_v15 = vld [vmem:[%s8709_s11 + $0xb8] sm:$0xff]  ;;  %v358_v16 = vld [vmem:[%s8709_s11 + $0xc0] sm:$0xff]  ;;  %v359_v17 = vld [vmem:[%s8709_s11 + $0xc8] sm:$0xff] }
  0x26   : > { %v3128_v18 = vld [vmem:[%s13838_s4] sm:$0xff]  ;;  %v3129_v19 = vld [vmem:[%s13838_s4 + $0x8] sm:$0xff]  ;;  %v360_v21 = vld [vmem:[%s8709_s11 + $0xd0] sm:$0xff] }
  0x27   : > { %7666 = vmatmul.mubr.msk.f32.gmra.mrb[8].mxu0 %vm379_vm1, %v338_v25  ;;  %v8284_v20 = vpack.c.bf16 %v3129_v19, %v3128_v18  ;;  %v3130_v22 = vld [vmem:[%s13838_s4 + $0x10] sm:$0xff]  ;;  %v3131_v23 = vld [vmem:[%s13838_s4 + $0x18] sm:$0xff] }
  0x28   : > { %7668 = vmatprep.mubr.msk.f32.mxu0 %vm8614_vm0, %v13844_v6  ;;  %1048 = vperm.xlu0 %8598, %v957_v26   ;;  %v8288_v24 = vpack.c.bf16 %v3131_v23, %v3130_v22  ;;  %v361_v25 = vld [vmem:[%s8709_s11 + $0xd8] sm:$0xff]  ;;  %v3132_v26 = vld [vmem:[%s13838_s4 + $0x20] sm:$0xff] }
  0x29   : > { %1053 = vperm.xlu1 %8599, %v958_v27   ;;  %8285 = vmatprep.subr.bf16.mxu1 %v8284_v20  ;;  %v3133_v27 = vld [vmem:[%s13838_s4 + $0x28] sm:$0xff] }
  0x2a   : > { %8287 = vmatpush3.bf16.msra.mxu1 %v8284_v20 }
  0x2b   : > { %7669 = vmatmul.mubr.msk.f32.gmra.mrb[10].mxu0 %vm379_vm1, %v339_v28  ;;  %8289 = vmatprep.subr.bf16.mxu1 %v8288_v24  ;;  %v8292_v28 = vpack.c.bf16 %v3133_v27, %v3132_v26 }
  0x2c   : > { %7671 = vmatprep.mubr.msk.f32.mxu0 %vm8614_vm0, %v13844_v6  ;;  %1058 = vperm.xlu0 %8598, %v959_v29   ;;  %v362_v29 = vld [vmem:[%s8709_s11 + $0xe0] sm:$0xff] }
  0x2d   : > { %1063 = vperm.xlu1 %8599, %v960_v30   ;;  %v3134_v30 = vld [vmem:[%s13838_s4 + $0x30] sm:$0xff] }
  0x2e   : > { %8291 = vmatpush3.bf16.msra.mxu1 %v8288_v24 }
  0x2f   : > { %7672 = vmatmul.mubr.msk.f32.gmra.mrb[12].mxu0 %vm379_vm1, %v340_v31  ;;  %8293 = vmatprep.subr.bf16.mxu1 %v8292_v28  ;;  %v3135_v31 = vld [vmem:[%s13838_s4 + $0x38] sm:$0xff] }
  0x30   : > { %7674 = vmatprep.mubr.msk.f32.mxu0 %vm8614_vm0, %v13844_v6  ;;  %1068 = vperm.xlu0 %8598, %v961_v32   ;;  %v8296_v32 = vpack.c.bf16 %v3135_v31, %v3134_v30 }
  0x31   : > { %1073 = vperm.xlu1 %8599, %v962_v33   ;;  %v363_v33 = vld [vmem:[%s8709_s11 + $0xe8] sm:$0xff] }
  0x32   : > { %8295 = vmatpush3.bf16.msra.mxu1 %v8292_v28 }
  0x33   : > { %7675 = vmatmul.mubr.msk.f32.gmra.mrb[14].mxu0 %vm379_vm1, %v341_v34  ;;  %8297 = vmatprep.subr.bf16.mxu1 %v8296_v32  ;;  %v3136_v34 = vld [vmem:[%s13838_s4 + $0x40] sm:$0xff] }
  0x34   : > { %7677 = vmatprep.mubr.msk.f32.mxu0 %vm8614_vm0, %v13844_v6  ;;  %1078 = vperm.xlu0 %8598, %v963_v35   ;;  %v3137_v35 = vld [vmem:[%s13838_s4 + $0x48] sm:$0xff] }
  0x35   : > { %1083 = vperm.xlu1 %8599, %v964_v36   ;;  %v8300_v36 = vpack.c.bf16 %v3137_v35, %v3136_v34 }
  0x36   : > { %8299 = vmatpush3.bf16.msra.mxu1 %v8296_v32 }
  0x37   : > { %7678 = vmatmul.mubr.msk.f32.gmra.mrb[16].mxu0 %vm379_vm1, %v342_v37  ;;  %v364_v37 = vld [vmem:[%s8709_s11 + $0xf0] sm:$0xff]  ;;  %8301 = vmatprep.subr.bf16.mxu1 %v8300_v36 }
  0x38   : > { %7680 = vmatprep.mubr.msk.f32.mxu0 %vm8614_vm0, %v13844_v6  ;;  %1088 = vperm.xlu0 %8598, %v965_v38   ;;  %v3138_v38 = vld [vmem:[%s13838_s4 + $0x50] sm:$0xff] }
  0x39   : > { %1093 = vperm.xlu1 %8599, %v966_v39   ;;  %v3139_v39 = vld [vmem:[%s13838_s4 + $0x58] sm:$0xff] }
  0x3a   : > { %8303 = vmatpush3.bf16.msra.mxu1 %v8300_v36 }
  0x3b   : > { %7681 = vmatmul.mubr.msk.f32.gmra.mrb[18].mxu0 %vm379_vm1, %v343_v40  ;;  %v8304_v40 = vpack.c.bf16 %v3139_v39, %v3138_v38 }
  0x3c   : > { %7683 = vmatprep.mubr.msk.f32.mxu0 %vm8614_vm0, %v13844_v6  ;;  %1098 = vperm.xlu0 %8598, %v967_v41   ;;  %v365_v41 = vld [vmem:[%s8709_s11 + $0xf8] sm:$0xff] }
  0x3d   : > { %1103 = vperm.xlu1 %8599, %v968_v42   ;;  %8305 = vmatprep.subr.bf16.mxu1 %v8304_v40  ;;  %v3140_v42 = vld [vmem:[%s13838_s4 + $0x60] sm:$0xff] }
  0x3e   : > { %8307 = vmatpush3.bf16.msra.mxu1 %v8304_v40 }
  0x3f   : > { %7684 = vmatmul.mubr.msk.f32.gmra.mrb[20].mxu0 %vm379_vm1, %v344_v43  ;;  %v3141_v43 = vld [vmem:[%s13838_s4 + $0x68] sm:$0xff] }
  0x40   : > { %7686 = vmatprep.mubr.msk.f32.mxu0 %vm8614_vm0, %v13844_v6  ;;  %1108 = vperm.xlu0 %8598, %v969_v44   ;;  %v8308_v44 = vpack.c.bf16 %v3141_v43, %v3140_v42 }
  0x41   : > { %1113 = vperm.xlu1 %8599, %v970_v45   ;;  %v366_v45 = vld [vmem:[%s8709_s11 + $0x100] sm:$0xff] }
  0x42   : > { %8309 = vmatprep.subr.bf16.mxu1 %v8308_v44 }
  0x43   : > { %7687 = vmatmul.mubr.msk.f32.gmra.mrb[22].mxu0 %vm379_vm1, %v345_v46  ;;  %8311 = vmatpush3.bf16.msra.mxu1 %v8308_v44  ;;  %v3142_v46 = vld [vmem:[%s13838_s4 + $0x70] sm:$0xff] }
  0x44   : > { %7689 = vmatprep.mubr.msk.f32.mxu0 %vm8614_vm0, %v13844_v6  ;;  %1118 = vperm.xlu0 %8598, %v971_v47   ;;  %v3143_v47 = vld [vmem:[%s13838_s4 + $0x78] sm:$0xff] }
  0x45   : > { %1123 = vperm.xlu1 %8599, %v972_v48   ;;  %v8312_v48 = vpack.c.bf16 %v3143_v47, %v3142_v46 }
  0x47   : > { %7690 = vmatmul.mubr.msk.f32.gmra.mrb[24].mxu0 %vm379_vm1, %v346_v49  ;;  %v367_v49 = vld [vmem:[%s8709_s11 + $0x108] sm:$0xff]  ;;  %8313 = vmatprep.subr.bf16.mxu1 %v8312_v48 }
  0x48   : > { %7692 = vmatprep.mubr.msk.f32.mxu0 %vm8614_vm0, %v13844_v6  ;;  %1128 = vperm.xlu0 %8598, %v973_v50   ;;  %v368_v50 = vld [vmem:[%s8709_s11 + $0x110] sm:$0xff] }
  0x49   : > { %1133 = vperm.xlu1 %8599, %v974_v51   ;;  %8315 = vmatpush3.bf16.msra.mxu1 %v8312_v48  ;;  %v369_v51 = vld [vmem:[%s8709_s11 + $0x118] sm:$0xff] }
  0x4b   : > { %7693 = vmatmul.mubr.msk.f32.gmra.mrb[26].mxu0 %vm379_vm1, %v347_v52  ;;  %v370_v52 = vld [vmem:[%s8709_s11 + $0x120] sm:$0xff] }
  0x4c   : > { %7695 = vmatprep.mubr.msk.f32.mxu0 %vm8614_vm0, %v13844_v6  ;;  %1138 = vperm.xlu0 %8598, %v975_v53   ;;  %v371_v53 = vld [vmem:[%s8709_s11 + $0x128] sm:$0xff] }
  0x4d   : > { %1143 = vperm.xlu1 %8599, %v976_v54   ;;  %v372_v54 = vld [vmem:[%s8709_s11 + $0x130] sm:$0xff] }
  0x4f   : > { %7696 = vmatmul.mubr.msk.f32.gmra.mrb[28].mxu0 %vm379_vm1, %v348_v55  ;;  %v373_v55 = vld [vmem:[%s8709_s11 + $0x138] sm:$0xff] }
  0x50   : > { %7698 = vmatprep.mubr.msk.f32.mxu0 %vm8614_vm0, %v13844_v6  ;;  %1148 = vperm.xlu0 %8598, %v977_v56   ;;  %v374_v56 = vld [vmem:[%s8709_s11 + $0x140] sm:$0xf] }
  0x51   : > { %1153 = vperm.xlu1 %8599, %v978_v57   ;;  %v773_v57 = vlaneseq }
  0x53   : > { %7699 = vmatmul.mubr.msk.f32.gmra.mrb[30].mxu0 %vm379_vm1, %v349_v58  ;;  %v774_v58 = vshrl.u32 %v773_v57, 7 }
  0x54   : > { %7701 = vmatprep.mubr.msk.f32.mxu0 %vm8614_vm0, %v13844_v6  ;;  %1158 = vperm.xlu0 %8598, %v979_v59  }
  0x55   : > { %1163 = vperm.xlu1 %8599, %v980_v60   ;;  %v9045_v59 = vsub.s32 0, %v774_v58  ;;  %v9050_v60 = vld [vmem:[%s13837_s3] sm:$0xff]  ;;  %v9078_v22 = vsub.s32 3, %v774_v58  ;;  %v9080_v23 = vsub.s32 4, %v774_v58  ;;  %v9082_v24 = vsub.s32 5, %v774_v58 }
  0x56   : > { %v9087_v27 = vsub.s32 6, %v774_v58 }
  0x57   : > { %7702 = vmatmul.mubr.msk.f32.gmra.mrb[32].mxu0 %vm379_vm1, %v350_v61  ;;  %13970 = vst [vmem:[#allocation2_spill] sm:$0xff] %v9045_v59  ;;  %v9052_v61 = vsub.s32 1, %v774_v58  ;;  %13973 = vst [vmem:[#allocation5_spill] sm:$0xff] %v9078_v22 }
  0x58   : > { %7704 = vmatprep.mubr.msk.f32.mxu0 %vm8614_vm0, %v13844_v6  ;;  %1168 = vperm.xlu0 %8598, %v981_v62   ;;  %v9056_v62 = vrot.slane %v9050_v60, %v9045_v59  ;;  %13974 = vst [vmem:[#allocation6_spill] sm:$0xff] %v9080_v23  ;;  %13975 = vst [vmem:[#allocation7_spill] sm:$0xff] %v9082_v24 }
  0x59   : > { %1173 = vperm.xlu1 %8599, %v982_v63   ;;  %13971 = vst [vmem:[#allocation3_spill] sm:$0xff] %v9052_v61  ;;  %v9060_v63 = vrot.slane %v9050_v60, %v9052_v61  ;;  %13976 = vst [vmem:[#allocation8_spill] sm:$0xff] %v9087_v27 }
  0x5b   : > { %7705 = vmatmul.mubr.msk.f32.gmra.mrb[34].mxu0 %vm379_vm1, %v351_v0 }
  0x5c   : > { %7707 = vmatprep.mubr.msk.f32.mxu0 %vm8614_vm0, %v13844_v6  ;;  %1178 = vperm.xlu0 %8598, %v983_v1  }
  0x5d   : > { %1183 = vperm.xlu1 %8599, %v984_v2  }
  0x5f   : > { %7708 = vmatmul.mubr.msk.f32.gmra.mrb[36].mxu0 %vm379_vm1, %v352_v4 }
  0x60   : > { %7710 = vmatprep.mubr.msk.f32.mxu0 %vm8614_vm0, %v13844_v6  ;;  %1188 = vperm.xlu0 %8598, %v985_v5   ;;  %v9064_v5 = vsub.s32 2, %v774_v58 }
  0x61   : > { %6703 = vperm.xlu1 %8599, %v6697_v7  }
  0x62   : > { %13972 = vst [vmem:[#allocation4_spill] sm:$0xff] %v9064_v5 }
  0x63   : > { %7711 = vmatmul.mubr.msk.f32.gmra.mrb[38].mxu0 %vm379_vm1, %v353_v8 }
  0x64   : > { %7713 = vmatprep.mubr.msk.f32.mxu0 %vm8614_vm0, %v13844_v6  ;;  %6708 = vperm.xlu0 %8598, %v6698_v9   ;;  %v1232_v9 = vld [vmem:[%s13836_s2] sm:$0xff] }
  0x65   : > { %6713 = vperm.xlu1 %8599, %v6699_v10   ;;  %v9096_v39 = vrot.slane %v1232_v9, %v9078_v22  ;;  %v9099_v40 = vrot.slane %v1232_v9, %v9080_v23 }
  0x67   : > { %7714 = vmatmul.mubr.msk.f32.gmra.mrb[40].mxu0 %vm379_vm1, %v354_v11 }
  0x68   : > { %7716 = vmatprep.mubr.msk.f32.mxu0 %vm8614_vm0, %v13844_v6  ;;  %6718 = vperm.xlu0 %8598, %v6700_v12  }
  0x6b   : > { %7717 = vmatmul.mubr.msk.f32.gmra.mrb[42].mxu0 %vm379_vm1, %v355_v13 }
  0x6c   : > { %7719 = vmatprep.mubr.msk.f32.mxu0 %vm8614_vm0, %v13844_v6 }
  0x6f   : > { %7720 = vmatmul.mubr.msk.f32.gmra.mrb[44].mxu0 %vm379_vm1, %v356_v14 }
  0x70   : > { %7722 = vmatprep.mubr.msk.f32.mxu0 %vm8614_vm0, %v13844_v6 }
  0x73   : > { %7723 = vmatmul.mubr.msk.f32.gmra.mrb[46].mxu0 %vm379_vm1, %v357_v15  ;;  %v9072_v15 = vrot.slane %v1232_v9, %v9052_v61 }
  0x74   : > { %7725 = vmatprep.mubr.msk.f32.mxu0 %vm8614_vm0, %v13844_v6 }
  0x77   : > { %7726 = vmatmul.mubr.msk.f32.gmra.mrb[48].mxu0 %vm379_vm1, %v358_v16  ;;  %v9075_v16 = vrot.slane %v1232_v9, %v9064_v5 }
  0x78   : > { %7728 = vmatprep.mubr.msk.f32.mxu0 %vm8614_vm0, %v13844_v6 }
  0x7b   : > { %7729 = vmatmul.mubr.msk.f32.gmra.mrb[50].mxu0 %vm379_vm1, %v359_v17 }
  0x7c   : > { %7731 = vmatprep.mubr.msk.f32.mxu0 %vm8614_vm0, %v13844_v6 }
  0x7f   : > { %7732 = vmatmul.mubr.msk.f32.gmra.mrb[52].mxu0 %vm379_vm1, %v360_v21 }
  0x80   : > { %7734 = vmatprep.mubr.msk.f32.mxu0 %vm8614_vm0, %v13844_v6 }
  0x83   : > { %7735 = vmatmul.mubr.msk.f32.gmra.mrb[54].mxu0 %vm379_vm1, %v361_v25  ;;  %v9085_v25 = vrot.slane %v1232_v9, %v9045_v59 }
  0x84   : > { %7737 = vmatprep.mubr.msk.f32.mxu0 %vm8614_vm0, %v13844_v6 }
  0x87   : > { %7738 = vmatmul.mubr.msk.f32.gmra.mrb[56].mxu0 %vm379_vm1, %v362_v29 }
  0x88   : > { %7740 = vmatprep.mubr.msk.f32.mxu0 %vm8614_vm0, %v13844_v6 }
  0x8b   : > { %7741 = vmatmul.mubr.msk.f32.gmra.mrb[58].mxu0 %vm379_vm1, %v363_v33  ;;  %v9092_v33 = vsub.s32 7, %v774_v58 }
  0x8c   : > { %7743 = vmatprep.mubr.msk.f32.mxu0 %vm8614_vm0, %v13844_v6 }
  0x8d   : > { %13977 = vst [vmem:[#allocation9_spill] sm:$0xff] %v9092_v33 }
  0x8f   : > { %7744 = vmatmul.mubr.msk.f32.gmra.mrb[60].mxu0 %vm379_vm1, %v364_v37  ;;  %v989_v12 = vpop.permute.xlu0 %988 }
  0x90   : > { %7746 = vmatprep.mubr.msk.f32.mxu0 %vm8614_vm0, %v13844_v6  ;;  %v999_v37 = vpop.permute.xlu1 %998 }
  0x93   : > { %7747 = vmatmul.mubr.msk.f32.gmra.mrb[62].mxu0 %vm379_vm1, %v365_v41  ;;  %v994_v28 = vpop.permute.xlu0 %993  ;;  %v9102_v41 = vrot.slane %v1232_v9, %v9082_v24 }
  0x94   : > { %7749 = vmatprep.mubr.msk.f32.mxu0 %vm8614_vm0, %v13844_v6 }
  0x97   : > { %7750 = vmatmul.mubr.msk.f32.gmra.mrb[64].mxu0 %vm379_vm1, %v366_v45  ;;  %v9112_v45 = vrot.slane %v1232_v9, %v9087_v27 }
  0x98   : > { %7752 = vmatprep.mubr.msk.f32.mxu0 %vm8614_vm0, %v13844_v6 }
  0x9b   : > { %7753 = vmatmul.mubr.msk.f32.gmra.mrb[66].mxu0 %vm379_vm1, %v367_v49 }
  0x9c   : > { %7755 = vmatprep.mubr.msk.f32.mxu0 %vm8614_vm0, %v13844_v6 }
  0x9f   : > { %7756 = vmatmul.mubr.msk.f32.gmra.mrb[68].mxu0 %vm379_vm1, %v368_v50  ;;  %v9115_v50 = vrot.slane %v1232_v9, %v9092_v33 }
  0xa0   : > { %7758 = vmatprep.mubr.msk.f32.mxu0 %vm8614_vm0, %v13844_v6 }
  0xa3   : > { %7759 = vmatmul.mubr.msk.f32.gmra.mrb[70].mxu0 %vm379_vm1, %v369_v51 }
  0xa4   : > { %7761 = vmatprep.mubr.msk.f32.mxu0 %vm8614_vm0, %v13844_v6 }
  0xa7   : > { %7762 = vmatmul.mubr.msk.f32.gmra.mrb[72].mxu0 %vm379_vm1, %v370_v52 }
  0xa8   : > { %7764 = vmatprep.mubr.msk.f32.mxu0 %vm8614_vm0, %v13844_v6 }
  0xab   : > { %7765 = vmatmul.mubr.msk.f32.gmra.mrb[74].mxu0 %vm379_vm1, %v371_v53 }
  0xac   : > { %7767 = vmatprep.mubr.msk.f32.mxu0 %vm8614_vm0, %v13844_v6 }
  0xaf   : > { %7768 = vmatmul.mubr.msk.f32.gmra.mrb[76].mxu0 %vm379_vm1, %v372_v54 }
  0xb0   : > { %7770 = vmatprep.mubr.msk.f32.mxu0 %vm8614_vm0, %v13844_v6 }
  0xb3   : > { %7771 = vmatmul.mubr.msk.f32.gmra.mrb[78].mxu0 %vm379_vm1, %v373_v55 }
  0xb4   : > { %7773 = vmatprep.mubr.msk.f32.mxu0 %vm8614_vm0, %v13844_v6 }
  0xb7   : > { %7774 = vmatmul.mubr.msk.f32.gmra.mrb[80].mxu0 %vm379_vm1, %v374_v56 }
  0xea   : > { %v569_v0 = vpop.f32.mrb[0].mxu0 }
  0xeb   : > { %v777_v1 = vmul.f32 %v9056_v62, %v569_v0  ;;  %v7655_v2 = vpop.f32.mrb[1].mxu0  ;;  %v9128_v0 = vrot.slane %v9050_v60, %v9064_v5 }
  0xed   : > { %v822_v4 = vadd.f32 %v9060_v63, %v777_v1 }
  0xee   : > { %v574_v7 = vpop.f32.mrb[2].mxu0 }
  0xef   : > { %v863_v8 = vmax.f32 %v822_v4, 0.0  ;;  %v778_v10 = vmul.f32 %v9056_v62, %v574_v7  ;;  %v7658_v11 = vpop.f32.mrb[3].mxu0 }
  0xf1   : > { %v904_v13 = vmin.f32 %v863_v8, 6.0  ;;  %v823_v14 = vadd.f32 %v9060_v63, %v778_v10  ;;  %v1004_v8 = vpop.permute.xlu1 %1003 }
  0xf2   : > { %v579_v17 = vpop.f32.mrb[4].mxu0 }
  0xf3   : > { %v1191_v18 = vmul.f32 %v989_v12, %v904_v13  ;;  %v864_v19 = vmax.f32 %v823_v14, 0.0  ;;  %v779_v20 = vmul.f32 %v9056_v62, %v579_v17  ;;  %v7661_v21 = vpop.f32.mrb[5].mxu0 }
  0xf5   : > { %v905_v26 = vmin.f32 %v864_v19, 6.0  ;;  %v1278_v29 = vmul.f32 %v9072_v15, %v1191_v18  ;;  %v1498_v30 = vmul.f32 %v9075_v16, %v1191_v18  ;;  %v824_v31 = vadd.f32 %v9060_v63, %v779_v20 }
  0xf6   : > { %v584_v32 = vpop.f32.mrb[6].mxu0  ;;  %v1238_v56 = vmul.f32 %v9085_v25, %v1191_v18 }
  0xf7   : > { %v1192_v34 = vmul.f32 %v994_v28, %v905_v26  ;;  %v780_v35 = vmul.f32 %v9056_v62, %v584_v32  ;;  %v7664_v36 = vpop.f32.mrb[7].mxu0  ;;  %v865_v38 = vmax.f32 %v824_v31, 0.0  ;;  %v1351_v46 = vrot.slane %v1278_v29, 1 }
  0xf8   : > { %v1571_v47 = vrot.slane %v1498_v30, 2 }
  0xf9   : > { %v9105_v42 = vmul.f32 %v9072_v15, %v1192_v34  ;;  %v9108_v43 = vmul.f32 %v9075_v16, %v1192_v34  ;;  %v825_v44 = vadd.f32 %v9060_v63, %v780_v35  ;;  %v906_v48 = vmin.f32 %v865_v38, 6.0 }
  0xfa   : > { %v589_v49 = vpop.f32.mrb[8].mxu0  ;;  %v9122_v57 = vmul.f32 %v9085_v25, %v1192_v34  ;;  %v1009_v34 = vpop.permute.xlu0 %1008 }
  0xfb   : > { %v1352_v51 = vrot.slane %v9105_v42, 1  ;;  %v1572_v52 = vrot.slane %v9108_v43, 2  ;;  %v866_v53 = vmax.f32 %v825_v44, 0.0  ;;  %v781_v54 = vmul.f32 %v9056_v62, %v589_v49  ;;  %v7667_v55 = vpop.f32.mrb[9].mxu0 }
  0xfc   : > { %v9124_v58 = vmul.f32 %v999_v37, %v906_v48 }
  0xfd   : > { %v1353_v1 = vsel %vm1350_vm2, %v1351_v46, %v1352_v51  ;;  %v1573_v2 = vsel %vm1570_vm3, %v1571_v47, %v1572_v52  ;;  %v907_v4 = vmin.f32 %v866_v53, 6.0  ;;  %v826_v7 = vadd.f32 %v9060_v63, %v781_v54  ;;  %v9183_v54 = vld [vmem:[%s13836_s2 + $0x8] ss:$0 sm:$0xff] }
  0xfe   : > { %v1458_v9 = vadd.f32 %v1353_v1, %v1238_v56  ;;  %v9139_v10 = vmul.f32 %v9072_v15, %v9124_v58  ;;  %v9143_v60 = vmul.f32 %v9075_v16, %v9124_v58  ;;  %v594_v11 = vpop.f32.mrb[10].mxu0  ;;  %v1718_v12 = vmul.f32 %v9096_v39, %v9124_v58 }
  0xff   : > { %v9147_v13 = vmul.f32 %v1004_v8, %v907_v4  ;;  %v867_v14 = vmax.f32 %v826_v7, 0.0  ;;  %v782_v17 = vmul.f32 %v9056_v62, %v594_v11  ;;  %v7670_v18 = vpop.f32.mrb[11].mxu0  ;;  %v1937_v19 = vmul.f32 %v9099_v40, %v9124_v58  ;;  %v1014_v11 = vpop.permute.xlu1 %1013 }
 0x100   : > { %v1354_v20 = vrot.slane %v9139_v10, 1  ;;  %v1678_v21 = vadd.f32 %v1573_v2, %v1458_v9  ;;  %v1790_v26 = vrot.slane %v1718_v12, 2  ;;  %v2161_v28 = vmul.f32 %v9102_v41, %v9124_v58 }
 0x101   : > { %v9157_v29 = vmul.f32 %v9072_v15, %v9147_v13  ;;  %v9161_v30 = vmul.f32 %v9075_v16, %v9147_v13  ;;  %v908_v31 = vmin.f32 %v867_v14, 6.0  ;;  %v827_v32 = vadd.f32 %v9060_v63, %v782_v17 }
 0x102   : > { %v599_v35 = vpop.f32.mrb[12].mxu0  ;;  %v9166_v36 = vmul.f32 %v9096_v39, %v9147_v13  ;;  %v9170_v37 = vmul.f32 %v9099_v40, %v9147_v13  ;;  %v2012_v38 = vrot.slane %v1937_v19, 3  ;;  %v9174_v44 = vmul.f32 %v9102_v41, %v9147_v13 }
 0x103   : > { %v1356_v46 = vrot.slane %v9157_v29, 1  ;;  %v9177_v47 = vmul.f32 %v1009_v34, %v908_v31  ;;  %v868_v48 = vmax.f32 %v827_v32, 0.0  ;;  %v783_v49 = vmul.f32 %v9056_v62, %v599_v35  ;;  %v7673_v53 = vpop.f32.mrb[13].mxu0 }
 0x104   : > { %v1791_v55 = vrot.slane %v9166_v36, 2  ;;  %v2013_v56 = vrot.slane %v9170_v37, 3  ;;  %v2236_v1 = vrot.slane %v2161_v28, 4  ;;  %v2237_v2 = vrot.slane %v9174_v44, 4 }
 0x105   : > { %v909_v4 = vmin.f32 %v868_v48, 6.0  ;;  %v828_v7 = vadd.f32 %v9060_v63, %v783_v49  ;;  %v2385_v8 = vmul.f32 %v9112_v45, %v9177_v47  ;;  %v2608_v9 = vmul.f32 %v9115_v50, %v9177_v47 }
 0x106   : > { %v604_v12 = vpop.f32.mrb[14].mxu0  ;;  %v1792_v14 = vsel %vm1570_vm3, %v1790_v26, %v1791_v55  ;;  %v2014_v17 = vsel %vm2011_vm4, %v2012_v38, %v2013_v56  ;;  %v2238_v18 = vsel %vm2235_vm5, %v2236_v1, %v2237_v2  ;;  %v2832_v19 = vmul.f32 %v9183_v54, %v9177_v47 }
 0x107   : > { %v9204_v28 = vmul.f32 %v1014_v11, %v909_v4  ;;  %v869_v31 = vmax.f32 %v828_v7, 0.0  ;;  %v784_v32 = vmul.f32 %v9056_v62, %v604_v12  ;;  %v7676_v34 = vpop.f32.mrb[15].mxu0  ;;  %v1897_v35 = vadd.f32 %v1792_v14, %v1678_v21  ;;  %v1019_v7 = vpop.permute.xlu0 %1018 }
 0x108   : > { %v2459_v48 = vrot.slane %v2385_v8, 4  ;;  %v2683_v26 = vrot.slane %v2608_v9, 5  ;;  %v2907_v49 = vrot.slane %v2832_v19, 6  ;;  %v1355_v38 = vsel %vm1350_vm2, %v1352_v51, %v1354_v20 }
 0x109   : > { %v910_v53 = vmin.f32 %v869_v31, 6.0  ;;  %v829_v1 = vadd.f32 %v9060_v63, %v784_v32  ;;  %v2121_v6 = vadd.f32 %v2014_v17, %v1897_v35  ;;  %v2386_v4 = vmul.f32 %v9112_v45, %v9204_v28 }
 0x10a   : > { %v609_v11 = vpop.f32.mrb[16].mxu0  ;;  %v2609_v21 = vmul.f32 %v9115_v50, %v9204_v28  ;;  %v9219_v8 = vmul.f32 %v9183_v54, %v9204_v28  ;;  %v1459_v42 = vadd.f32 %v1355_v38, %v9122_v57  ;;  %v13848_v51 = vrot.slane %v9143_v60, 2 }
 0x10b   : > { %v9223_v9 = vmul.f32 %v1019_v7, %v910_v53  ;;  %v870_v12 = vmax.f32 %v829_v1, 0.0  ;;  %v785_v14 = vmul.f32 %v9056_v62, %v609_v11  ;;  %v7679_v17 = vpop.f32.mrb[17].mxu0  ;;  %v2345_v19 = vadd.f32 %v2238_v18, %v2121_v6  ;;  %v1024_v7 = vpop.permute.xlu1 %1023 }
 0x10c   : > { %v2460_v31 = vrot.slane %v2386_v4, 4  ;;  %v2684_v32 = vrot.slane %v2609_v21, 5  ;;  %v13849_v34 = vrot.slane %v9219_v8, 6  ;;  %v1575_v35 = vsel %vm1570_vm3, %v1572_v52, %v13848_v51 }
 0x10d   : > { %v911_v57 = vmin.f32 %v870_v12, 6.0  ;;  %v830_v38 = vadd.f32 %v9060_v63, %v785_v14  ;;  %v1679_v53 = vadd.f32 %v1575_v35, %v1459_v42  ;;  %v9235_v1 = vmul.f32 %v9096_v39, %v9177_v47 }
 0x10e   : > { %v614_v6 = vpop.f32.mrb[18].mxu0  ;;  %v2461_v18 = vsel %vm2235_vm5, %v2459_v48, %v2460_v31  ;;  %v2685_v4 = vsel %vm2682_vm6, %v2683_v26, %v2684_v32  ;;  %v2909_v43 = vsel %vm2906_vm7, %v2907_v49, %v13849_v34  ;;  %v9244_v52 = vmul.f32 %v9099_v40, %v9177_v47 }
 0x10f   : > { %v9246_v11 = vmul.f32 %v1024_v7, %v911_v57  ;;  %v871_v21 = vmax.f32 %v830_v38, 0.0  ;;  %v786_v42 = vmul.f32 %v9056_v62, %v614_v6  ;;  %v7682_v12 = vpop.f32.mrb[19].mxu0  ;;  %v2568_v14 = vadd.f32 %v2461_v18, %v2345_v19  ;;  %v1029_v19 = vpop.permute.xlu0 %1028 }
 0x110   : > { %v1793_v17 = vrot.slane %v9235_v1, 2  ;;  %v2015_v48 = vrot.slane %v9244_v52, 3  ;;  %v9253_v26 = vmul.f32 %v9102_v41, %v9177_v47  ;;  %v9257_v49 = vmul.f32 %v9112_v45, %v9223_v9 }
 0x111   : > { %v912_v35 = vmin.f32 %v871_v21, 6.0  ;;  %v831_v57 = vadd.f32 %v9060_v63, %v786_v42  ;;  %v2792_v38 = vadd.f32 %v2685_v4, %v2568_v14  ;;  %v9262_v7 = vmul.f32 %v9115_v50, %v9223_v9 }
 0x112   : > { %v619_v6 = vpop.f32.mrb[20].mxu0  ;;  %v1794_v18 = vsel %vm1570_vm3, %v1791_v55, %v1793_v17  ;;  %v2016_v21 = vsel %vm2011_vm4, %v2013_v56, %v2015_v48  ;;  %v2239_v4 = vrot.slane %v9253_v26, 4  ;;  %v2462_v42 = vrot.slane %v9257_v49, 4 }
 0x113   : > { %v9276_v12 = vmul.f32 %v1029_v19, %v912_v35  ;;  %v872_v14 = vmax.f32 %v831_v57, 0.0  ;;  %v787_v3 = vmul.f32 %v9056_v62, %v619_v6  ;;  %v7685_v51 = vpop.f32.mrb[21].mxu0  ;;  %v3016_v34 = vadd.f32 %v2909_v43, %v2792_v38 }
 0x114   : > { %v1898_v36 = vadd.f32 %v1794_v18, %v1679_v53  ;;  %v2240_v55 = vsel %vm2235_vm5, %v2237_v2, %v2239_v4  ;;  %v2463_v37 = vsel %vm2235_vm5, %v2460_v31, %v2462_v42  ;;  %v13850_v56 = vrot.slane %v9262_v7, 5  ;;  %v1034_v53 = vpop.permute.xlu1 %1033 }
 0x115   : > { %v913_v26 = vmin.f32 %v872_v14, 6.0  ;;  %v832_v35 = vadd.f32 %v9060_v63, %v787_v3  ;;  %v3056_v57 = vadd.f32 %v9128_v0, %v3016_v34  ;;  %v9290_v51 = vmul.f32 %v9183_v54, %v9223_v9 }
 0x116   : > { %v624_v43 = vpop.f32.mrb[22].mxu0  ;;  %v2122_v44 = vadd.f32 %v2016_v21, %v1898_v36  ;;  %v2687_v2 = vsel %vm2682_vm6, %v2684_v32, %v13850_v56  ;;  %v1240_v31 = vmul.f32 %v9085_v25, %v9124_v58  ;;  %v1357_v3 = vsel %vm1350_vm2, %v1354_v20, %v1356_v46 }
 0x117   : > { %v9302_v34 = vmul.f32 %v1034_v53, %v913_v26  ;;  %v873_v38 = vmax.f32 %v832_v35, 0.0  ;;  %v788_v19 = vmul.f32 %v9056_v62, %v624_v43  ;;  %v7688_v6 = vpop.f32.mrb[23].mxu0  ;;  %v3092_v18 = vmax.f32 %v3056_v57, 0.0  ;;  %v1039_v26 = vpop.permute.xlu0 %1038 }
 0x118   : > { %v2346_v21 = vadd.f32 %v2240_v55, %v2122_v44  ;;  %v2910_v14 = vrot.slane %v9290_v51, 6  ;;  %v1460_v32 = vadd.f32 %v1357_v3, %v1240_v31  ;;  %v1576_v36 = vrot.slane %v9161_v30, 2 }
 0x119   : > { %v914_v58 = vmin.f32 %v873_v38, 6.0  ;;  %v833_v56 = vadd.f32 %v9060_v63, %v788_v19  ;;  %7808 = vmatprep.mubr.f32.mxu1 %v3092_v18  ;;  %v9310_v10 = vmul.f32 %v9096_v39, %v9204_v28  ;;  %v9314_v20 = vmul.f32 %v9099_v40, %v9204_v28 }
 0x11a   : > { %v629_v35 = vpop.f32.mrb[24].mxu0  ;;  %v2569_v55 = vadd.f32 %v2463_v37, %v2346_v21  ;;  %v13978_v57 = vrot.slane %v9219_v8, 6  ;;  %v13979_v53 = vrot.slane %v9143_v60, 2  ;;  %v9326_v44 = vmul.f32 %v9102_v41, %v9204_v28 }
 0x11b   : > { %v9328_v31 = vmul.f32 %v1039_v26, %v914_v58  ;;  %v874_v3 = vmax.f32 %v833_v56, 0.0  ;;  %v789_v38 = vmul.f32 %v9056_v62, %v629_v35  ;;  %v7691_v37 = vpop.f32.mrb[25].mxu0  ;;  %v1795_v6 = vrot.slane %v9310_v10, 2  ;;  %v1044_v58 = vpop.permute.xlu1 %1043 }
 0x11c   : > { %v2911_v51 = vsel %vm2906_vm7, %v13978_v57, %v2910_v14  ;;  %v1577_v43 = vsel %vm1570_vm3, %v13979_v53, %v1576_v36  ;;  %v2793_v8 = vadd.f32 %v2687_v2, %v2569_v55  ;;  %v2017_v18 = vrot.slane %v9314_v20, 3 }
 0x11d   : > { %v1680_v19 = vadd.f32 %v1577_v43, %v1460_v32  ;;  %v2241_v60 = vrot.slane %v9326_v44, 4  ;;  %v915_v21 = vmin.f32 %v874_v3, 6.0  ;;  %v834_v57 = vadd.f32 %v9060_v63, %v789_v38 }
 0x11e   : > { %v9337_v53 = vmul.f32 %v9112_v45, %v9246_v11  ;;  %v9341_v56 = vmul.f32 %v9115_v50, %v9246_v11  ;;  %v3017_v32 = vadd.f32 %v2911_v51, %v2793_v8  ;;  %v634_v2 = vpop.f32.mrb[26].mxu0  ;;  %v1796_v10 = vsel %vm1570_vm3, %v1793_v17, %v1795_v6 }
 0x11f   : > { %v2018_v26 = vsel %vm2011_vm4, %v2015_v48, %v2017_v18  ;;  %v2242_v35 = vsel %vm2235_vm5, %v2239_v4, %v2241_v60  ;;  %v9354_v55 = vmul.f32 %v1044_v58, %v915_v21  ;;  %v875_v43 = vmax.f32 %v834_v57, 0.0  ;;  %v7694_v38 = vpop.f32.mrb[27].mxu0  ;;  %v1049_v57 = vpop.permute.xlu0 %1048 }
 0x120   : > { %v790_v51 = vmul.f32 %v9056_v62, %v634_v2  ;;  %v1899_v3 = vadd.f32 %v1796_v10, %v1680_v19  ;;  %v3057_v1 = vadd.f32 %v9128_v0, %v3017_v32  ;;  %v2464_v17 = vrot.slane %v9337_v53, 4 }
 0x121   : > { %v13851_v37 = vrot.slane %v9341_v56, 5  ;;  %v9362_v52 = vmul.f32 %v9183_v54, %v9246_v11  ;;  %v916_v48 = vmin.f32 %v875_v43, 6.0  ;;  %v1241_v21 = vmul.f32 %v9085_v25, %v9147_v13 }
 0x122   : > { %v835_v4 = vadd.f32 %v9060_v63, %v790_v51  ;;  %v2123_v8 = vadd.f32 %v2018_v26, %v1899_v3  ;;  %v3093_v19 = vmax.f32 %v3057_v1, 0.0  ;;  %v2465_v58 = vsel %vm2235_vm5, %v2462_v42, %v2464_v17  ;;  %v639_v26 = vpop.f32.mrb[28].mxu0 }
 0x123   : > { %v13980_v32 = vrot.slane %v9262_v7, 5  ;;  %v2912_v10 = vrot.slane %v9362_v52, 6  ;;  %v9378_v43 = vmul.f32 %v1049_v57, %v916_v48  ;;  %v791_v3 = vmul.f32 %v9056_v62, %v639_v26  ;;  %v7697_v38 = vpop.f32.mrb[29].mxu0  ;;  %v1059_v29 = vpop.permute.xlu0 %1058 }
 0x124   : > { %v876_v13 = vmax.f32 %v835_v4, 0.0  ;;  %v2347_v51 = vadd.f32 %v2242_v35, %v2123_v8  ;;  %7809 = vmatmul.mubr.f32.vlgmr.msra.gmra.mrb[0].mxu1 %v3093_v19  ;;  %v9384_v42 = vmul.f32 %v9072_v15, %v9177_v47  ;;  %v9388_v7 = vmul.f32 %v9075_v16, %v9177_v47 }
 0x125   : > { %v2689_v2 = vsel %vm2682_vm6, %v13980_v32, %v13851_v37  ;;  %v2913_v49 = vsel %vm2906_vm7, %v2910_v14, %v2912_v10  ;;  %v9392_v1 = vmul.f32 %v9096_v39, %v9223_v9  ;;  %v836_v48 = vadd.f32 %v9060_v63, %v791_v3  ;;  %v1054_v14 = vpop.permute.xlu1 %1053 }
 0x126   : > { %v917_v52 = vmin.f32 %v876_v13, 6.0  ;;  %v2570_v35 = vadd.f32 %v2465_v58, %v2347_v51  ;;  %v9397_v4 = vmul.f32 %v9099_v40, %v9223_v9  ;;  %v1358_v8 = vrot.slane %v9384_v42, 1  ;;  %v644_v26 = vpop.f32.mrb[30].mxu0 }
 0x127   : > { %v1578_v57 = vrot.slane %v9388_v7, 2  ;;  %v13852_v19 = vrot.slane %v9392_v1, 2  ;;  %v9404_v32 = vmul.f32 %v9102_v41, %v9223_v9  ;;  %v877_v51 = vmax.f32 %v836_v48, 0.0  ;;  %v7700_v38 = vpop.f32.mrb[31].mxu0 }
 0x128   : > { %v9406_v13 = vmul.f32 %v1054_v14, %v917_v52  ;;  %v2794_v58 = vadd.f32 %v2689_v2, %v2570_v35  ;;  %v2019_v3 = vrot.slane %v9397_v4, 3  ;;  %v1359_v42 = vsel %vm1350_vm2, %v1356_v46, %v1358_v8 }
 0x129   : > { %v1579_v7 = vsel %vm1570_vm3, %v1576_v36, %v1578_v57  ;;  %v1798_v37 = vsel %vm1570_vm3, %v1795_v6, %v13852_v19  ;;  %v2243_v52 = vrot.slane %v9404_v32, 4  ;;  %v918_v2 = vmin.f32 %v877_v51, 6.0 }
 0x12a   : > { %v3018_v14 = vadd.f32 %v2913_v49, %v2794_v58  ;;  %v1461_v35 = vadd.f32 %v1359_v42, %v1241_v21  ;;  %v2020_v48 = vsel %vm2011_vm4, %v2017_v18, %v2019_v3  ;;  %v2389_v46 = vmul.f32 %v9112_v45, %v9276_v12  ;;  %v649_v21 = vpop.f32.mrb[32].mxu0 }
 0x12b   : > { %v2244_v30 = vsel %vm2235_vm5, %v2241_v60, %v2243_v52  ;;  %v9429_v36 = vmul.f32 %v9115_v50, %v9276_v12  ;;  %v9433_v6 = vmul.f32 %v9183_v54, %v9276_v12  ;;  %v9436_v18 = vmul.f32 %v1059_v29, %v918_v2  ;;  %v7703_v60 = vpop.f32.mrb[33].mxu0 }
 0x12c   : > { %v3058_v20 = vadd.f32 %v9128_v0, %v3018_v14  ;;  %v1681_v49 = vadd.f32 %v1579_v7, %v1461_v35  ;;  %v792_v44 = vmul.f32 %v9056_v62, %v644_v26  ;;  %v2466_v4 = vrot.slane %v2389_v46, 4  ;;  %v1064_v60 = vpop.permute.xlu1 %1063 }
 0x12d   : > { %v2690_v32 = vrot.slane %v9429_v36, 5  ;;  %v2914_v58 = vrot.slane %v9433_v6, 6  ;;  %v1242_v51 = vmul.f32 %v9085_v25, %v9177_v47  ;;  %v1283_v14 = vmul.f32 %v9072_v15, %v9204_v28 }
 0x12e   : > { %v3094_v38 = vmax.f32 %v3058_v20, 0.0  ;;  %v1900_v42 = vadd.f32 %v1798_v37, %v1681_v49  ;;  %v837_v19 = vadd.f32 %v9060_v63, %v792_v44  ;;  %v2467_v26 = vsel %vm2235_vm5, %v2464_v17, %v2466_v4  ;;  %v9457_v37 = vpop.f32.mrb[34].mxu0 }
 0x12f   : > { %v13981_v7 = vrot.slane %v9341_v56, 5  ;;  %v2915_v35 = vsel %vm2906_vm7, %v2912_v10, %v2914_v58  ;;  %v9455_v47 = vmul.f32 %v9075_v16, %v9204_v28  ;;  %v1360_v36 = vrot.slane %v1283_v14, 1  ;;  %v7706_v17 = vpop.f32.mrb[35].mxu0 }
 0x130   : > { %7811 = vmatprep.mubr.f32.mxu1 %v3094_v38  ;;  %v2124_v29 = vadd.f32 %v2020_v48, %v1900_v42  ;;  %v878_v46 = vmax.f32 %v837_v19, 0.0  ;;  %v1723_v53 = vmul.f32 %v9096_v39, %v9246_v11  ;;  %v9464_v6 = vmul.f32 %v9099_v40, %v9246_v11 }
 0x131   : > { %v2691_v2 = vsel %vm2682_vm6, %v13981_v7, %v2690_v32  ;;  %v1580_v56 = vrot.slane %v9455_v47, 2  ;;  %v9468_v10 = vmul.f32 %v9102_v41, %v9246_v11  ;;  %v9472_v20 = vmul.f32 %v9112_v45, %v9302_v34 }
 0x132   : > { %v2348_v19 = vadd.f32 %v2244_v30, %v2124_v29  ;;  %v919_v48 = vmin.f32 %v878_v46, 6.0  ;;  %v1361_v49 = vsel %vm1350_vm2, %v1358_v8, %v1360_v36  ;;  %v1799_v44 = vrot.slane %v1723_v53, 2  ;;  %v9478_v47 = vpop.f32.mrb[36].mxu0 }
 0x133   : > { %v1462_v38 = vadd.f32 %v1361_v49, %v1242_v51  ;;  %v1581_v42 = vsel %vm1570_vm3, %v1578_v57, %v1580_v56  ;;  %v2021_v14 = vrot.slane %v9464_v6, 3  ;;  %v2245_v7 = vrot.slane %v9468_v10, 4  ;;  %v7709_v29 = vpop.f32.mrb[37].mxu0 }
 0x134   : > { %v2571_v17 = vadd.f32 %v2467_v26, %v2348_v19  ;;  %v9480_v33 = vmul.f32 %v1064_v60, %v919_v48  ;;  %v13982_v5 = vrot.slane %v9392_v1, 2  ;;  %v13858_v8 = vrot.slane %v9472_v20, 4 }
 0x135   : > { %v1682_v46 = vadd.f32 %v1581_v42, %v1462_v38  ;;  %v2022_v51 = vsel %vm2011_vm4, %v2019_v3, %v2021_v14  ;;  %v2246_v57 = vsel %vm2235_vm5, %v2243_v52, %v2245_v7  ;;  %v2613_v53 = vmul.f32 %v9115_v50, %v9302_v34 }
 0x136   : > { %v1800_v30 = vsel %vm1570_vm3, %v13982_v5, %v1799_v44  ;;  %v2795_v26 = vadd.f32 %v2691_v2, %v2571_v17  ;;  %v2469_v1 = vsel %vm2235_vm5, %v2466_v4, %v13858_v8  ;;  %v2837_v5 = vmul.f32 %v9183_v54, %v9302_v34  ;;  %v9504_v49 = vpop.f32.mrb[38].mxu0 }
 0x137   : > { %v793_v6 = vmul.f32 %v9056_v62, %v649_v21  ;;  %v1901_v19 = vadd.f32 %v1800_v30, %v1682_v46  ;;  %v2692_v48 = vrot.slane %v2613_v53, 5  ;;  %v1243_v3 = vmul.f32 %v9085_v25, %v9204_v28  ;;  %v7712_v21 = vpop.f32.mrb[39].mxu0 }
 0x138   : > { %v9502_v52 = vmul.f32 %v9072_v15, %v9223_v9  ;;  %v3019_v2 = vadd.f32 %v2915_v35, %v2795_v26  ;;  %v2916_v60 = vrot.slane %v2837_v5, 6  ;;  %v9509_v38 = vmul.f32 %v9075_v16, %v9223_v9 }
 0x139   : > { %v838_v4 = vadd.f32 %v9060_v63, %v793_v6  ;;  %v2125_v42 = vadd.f32 %v2022_v51, %v1901_v19  ;;  %v2693_v17 = vsel %vm2682_vm6, %v2690_v32, %v2692_v48  ;;  %v9515_v30 = vmul.f32 %v9096_v39, %v9276_v12 }
 0x13a   : > { %v13857_v28 = vrot.slane %v9502_v52, 1  ;;  %v3059_v29 = vadd.f32 %v9128_v0, %v3019_v2  ;;  %v2917_v35 = vsel %vm2906_vm7, %v2914_v58, %v2916_v60  ;;  %v1582_v53 = vrot.slane %v9509_v38, 2  ;;  %v9528_v6 = vpop.f32.mrb[40].mxu0  ;;  %v1069_v38 = vpop.permute.xlu0 %1068 }
 0x13b   : > { %v879_v46 = vmax.f32 %v838_v4, 0.0  ;;  %v2349_v26 = vadd.f32 %v2246_v57, %v2125_v42  ;;  %v1801_v32 = vrot.slane %v9515_v30, 2  ;;  %v9526_v5 = vmul.f32 %v9099_v40, %v9276_v12  ;;  %v7715_v4 = vpop.f32.mrb[41].mxu0 }
 0x13c   : > { %v1363_v51 = vsel %vm1350_vm2, %v1360_v36, %v13857_v28  ;;  %v3095_v19 = vmax.f32 %v3059_v29, 0.0  ;;  %v1583_v58 = vsel %vm1570_vm3, %v1580_v56, %v1582_v53  ;;  %v2167_v28 = vmul.f32 %v9102_v41, %v9276_v12 }
 0x13d   : > { %v920_v2 = vmin.f32 %v879_v46, 6.0  ;;  %v1463_v21 = vadd.f32 %v1363_v51, %v1243_v3  ;;  %v2572_v57 = vadd.f32 %v2469_v1, %v2349_v26  ;;  %v1802_v36 = vsel %vm1570_vm3, %v1799_v44, %v1801_v32 }
 0x13e   : > { %v2023_v42 = vrot.slane %v9526_v5, 3  ;;  %7812 = vmatmul.mubr.f32.gmra.mrb[2].mxu1 %v3095_v19  ;;  %v2391_v3 = vmul.f32 %v9112_v45, %v9328_v31  ;;  %v9543_v56 = vmul.f32 %v9115_v50, %v9328_v31  ;;  %v2247_v44 = vrot.slane %v2167_v28, 4  ;;  %v9550_v51 = vpop.f32.mrb[42].mxu0 }
 0x13f   : > { %v9537_v8 = vmul.f32 %v1069_v38, %v920_v2  ;;  %v1683_v29 = vadd.f32 %v1583_v58, %v1463_v21  ;;  %v2796_v1 = vadd.f32 %v2693_v17, %v2572_v57  ;;  %v9548_v26 = vmul.f32 %v9183_v54, %v9328_v31  ;;  %v7718_v58 = vpop.f32.mrb[43].mxu0 }
 0x140   : > { %v2024_v46 = vsel %vm2011_vm4, %v2021_v14, %v2023_v42  ;;  %v2470_v19 = vrot.slane %v2391_v3, 4  ;;  %v2694_v2 = vrot.slane %v9543_v56, 5  ;;  %v794_v21 = vmul.f32 %v9056_v62, %v9457_v37 }
 0x141   : > { %v1902_v5 = vadd.f32 %v1802_v36, %v1683_v29  ;;  %v3020_v4 = vadd.f32 %v2917_v35, %v2796_v1  ;;  %v2248_v14 = vsel %vm2235_vm5, %v2245_v7, %v2247_v44  ;;  %v2918_v17 = vrot.slane %v9548_v26, 6 }
 0x142   : > { %v1244_v28 = vmul.f32 %v9085_v25, %v9223_v9  ;;  %v13983_v57 = vrot.slane %v9472_v20, 4  ;;  %v2695_v29 = vsel %vm2682_vm6, %v2692_v48, %v2694_v2  ;;  %v839_v37 = vadd.f32 %v9060_v63, %v794_v21  ;;  %v9574_v9 = vpop.f32.mrb[44].mxu0 }
 0x143   : > { %v2126_v38 = vadd.f32 %v2024_v46, %v1902_v5  ;;  %v3060_v35 = vadd.f32 %v9128_v0, %v3020_v4  ;;  %v2919_v10 = vsel %vm2906_vm7, %v2916_v60, %v2918_v17  ;;  %v1285_v7 = vmul.f32 %v9072_v15, %v9246_v11  ;;  %v7721_v60 = vpop.f32.mrb[45].mxu0 }
 0x144   : > { %v2471_v36 = vsel %vm2235_vm5, %v13983_v57, %v2470_v19  ;;  %v9572_v3 = vmul.f32 %v9075_v16, %v9246_v11  ;;  %v880_v56 = vmax.f32 %v839_v37, 0.0  ;;  %v9578_v48 = vmul.f32 %v9096_v39, %v9302_v34  ;;  %v1074_v57 = vpop.permute.xlu1 %1073 }
 0x145   : > { %v2350_v20 = vadd.f32 %v2248_v14, %v2126_v38  ;;  %v9582_v1 = vmul.f32 %v9099_v40, %v9302_v34  ;;  %v3096_v46 = vmax.f32 %v3060_v35, 0.0  ;;  %v1364_v26 = vrot.slane %v1285_v7, 1 }
 0x146   : > { %v1584_v5 = vrot.slane %v9572_v3, 2  ;;  %v9587_v21 = vmul.f32 %v9102_v41, %v9302_v34  ;;  %v921_v4 = vmin.f32 %v880_v56, 6.0  ;;  %v1803_v14 = vrot.slane %v9578_v48, 2 }
 0x147   : > { %v2573_v58 = vadd.f32 %v2471_v36, %v2350_v20  ;;  %v2025_v38 = vrot.slane %v9582_v1, 3  ;;  %7814 = vmatprep.mubr.f32.mxu1 %v3096_v46  ;;  %v13984_v37 = vrot.slane %v9502_v52, 1  ;;  %v9598_v3 = vmul.f32 %v9112_v45, %v9354_v55  ;;  %v9600_v36 = vpop.f32.mrb[46].mxu0 }
 0x148   : > { %v1585_v35 = vsel %vm1570_vm3, %v1582_v53, %v1584_v5  ;;  %v2249_v7 = vrot.slane %v9587_v21, 4  ;;  %v9602_v56 = vmul.f32 %v1074_v57, %v921_v4  ;;  %v1804_v52 = vsel %vm1570_vm3, %v1801_v32, %v1803_v14  ;;  %v7724_v1 = vpop.f32.mrb[47].mxu0 }
 0x149   : > { %v1365_v60 = vsel %vm1350_vm2, %v13984_v37, %v1364_v26  ;;  %v2797_v20 = vadd.f32 %v2695_v29, %v2573_v58  ;;  %v2026_v46 = vsel %vm2011_vm4, %v2023_v42, %v2025_v38  ;;  %v2472_v21 = vrot.slane %v9598_v3, 4 }
 0x14a   : > { %v1464_v48 = vadd.f32 %v1365_v60, %v1244_v28  ;;  %v2250_v53 = vsel %vm2235_vm5, %v2247_v44, %v2249_v7  ;;  %v9612_v37 = vmul.f32 %v9115_v50, %v9354_v55  ;;  %v2839_v28 = vmul.f32 %v9183_v54, %v9354_v55  ;;  %v9626_v4 = vpop.f32.mrb[48].mxu0 }
 0x14b   : > { %v3021_v61 = vadd.f32 %v2919_v10, %v2797_v20  ;;  %v795_v30 = vmul.f32 %v9056_v62, %v9478_v47  ;;  %v2473_v32 = vsel %vm2235_vm5, %v2470_v19, %v2472_v21  ;;  %v1245_v44 = vmul.f32 %v9085_v25, %v9246_v11  ;;  %v7727_v47 = vpop.f32.mrb[49].mxu0 }
 0x14c   : > { %v1684_v29 = vadd.f32 %v1585_v35, %v1464_v48  ;;  %v2696_v42 = vrot.slane %v9612_v37, 5  ;;  %v9624_v58 = vmul.f32 %v9072_v15, %v9276_v12  ;;  %v2920_v60 = vrot.slane %v2839_v28, 6 }
 0x14d   : > { %v3061_v10 = vadd.f32 %v9128_v0, %v3021_v61  ;;  %v840_v35 = vadd.f32 %v9060_v63, %v795_v30  ;;  %v9634_v11 = vmul.f32 %v9075_v16, %v9276_v12  ;;  %v9638_v20 = vmul.f32 %v9096_v39, %v9328_v31 }
 0x14e   : > { %v1903_v57 = vadd.f32 %v1804_v52, %v1684_v29  ;;  %v2697_v19 = vsel %vm2682_vm6, %v2694_v2, %v2696_v42  ;;  %v13861_v3 = vrot.slane %v9624_v58, 1  ;;  %v2921_v61 = vsel %vm2906_vm7, %v2918_v17, %v2920_v60  ;;  %v9650_v30 = vpop.f32.mrb[50].mxu0 }
 0x14f   : > { %v3097_v48 = vmax.f32 %v3061_v10, 0.0  ;;  %v881_v52 = vmax.f32 %v840_v35, 0.0  ;;  %v1586_v2 = vrot.slane %v9634_v11, 2  ;;  %v1805_v29 = vrot.slane %v9638_v20, 2  ;;  %v7730_v35 = vpop.f32.mrb[51].mxu0 }
 0x150   : > { %v2127_v1 = vadd.f32 %v2026_v46, %v1903_v57  ;;  %v1367_v37 = vsel %vm1350_vm2, %v1364_v26, %v13861_v3  ;;  %v9648_v28 = vmul.f32 %v9099_v40, %v9328_v31  ;;  %v9654_v17 = vmul.f32 %v9102_v41, %v9328_v31  ;;  %v1079_v26 = vpop.permute.xlu0 %1078 }
 0x151   : > { %7815 = vmatmul.mubr.f32.gmra.mrb[4].mxu1 %v3097_v48  ;;  %v922_v46 = vmin.f32 %v881_v52, 6.0  ;;  %v1465_v57 = vadd.f32 %v1367_v37, %v1245_v44  ;;  %v1587_v47 = vsel %vm1570_vm3, %v1584_v5, %v1586_v2  ;;  %v1806_v11 = vsel %vm1570_vm3, %v1803_v14, %v1805_v29 }
 0x152   : > { %v2351_v10 = vadd.f32 %v2250_v53, %v2127_v1  ;;  %v2027_v20 = vrot.slane %v9648_v28, 3  ;;  %v9661_v3 = vmul.f32 %v9112_v45, %v9378_v43  ;;  %v2251_v1 = vrot.slane %v9654_v17, 4  ;;  %v9676_v28 = vpop.f32.mrb[52].mxu0 }
 0x153   : > { %v9663_v53 = vmul.f32 %v1079_v26, %v922_v46  ;;  %v1685_v44 = vadd.f32 %v1587_v47, %v1465_v57  ;;  %v9670_v5 = vmul.f32 %v9115_v50, %v9378_v43  ;;  %v9674_v14 = vmul.f32 %v9183_v54, %v9378_v43 }
 0x154   : > { %v2574_v48 = vadd.f32 %v2473_v32, %v2351_v10  ;;  %v2028_v52 = vsel %vm2011_vm4, %v2025_v38, %v2027_v20  ;;  %v2474_v37 = vrot.slane %v9661_v3, 4  ;;  %v2252_v46 = vsel %vm2235_vm5, %v2249_v7, %v2251_v1  ;;  %v7733_v38 = vpop.f32.mrb[53].mxu0 }
 0x155   : > { %v1904_v10 = vadd.f32 %v1806_v11, %v1685_v44  ;;  %v796_v57 = vmul.f32 %v9056_v62, %v9504_v49  ;;  %v2698_v17 = vrot.slane %v9670_v5, 5  ;;  %v2922_v35 = vrot.slane %v9674_v14, 6 }
 0x156   : > { %v2798_v32 = vadd.f32 %v2697_v19, %v2574_v48  ;;  %v2475_v3 = vsel %vm2235_vm5, %v2472_v21, %v2474_v37  ;;  %v1246_v26 = vmul.f32 %v9085_v25, %v9276_v12  ;;  %v9689_v7 = vmul.f32 %v9072_v15, %v9302_v34  ;;  %v9701_v12 = vpop.f32.mrb[54].mxu0 }
 0x157   : > { %v2128_v59 = vadd.f32 %v2028_v52, %v1904_v10  ;;  %v841_v19 = vadd.f32 %v9060_v63, %v796_v57  ;;  %v2699_v49 = vsel %vm2682_vm6, %v2696_v42, %v2698_v17  ;;  %v2923_v11 = vsel %vm2906_vm7, %v2920_v60, %v2922_v35  ;;  %v7736_v14 = vpop.f32.mrb[55].mxu0 }
 0x158   : > { %v3022_v47 = vadd.f32 %v2921_v61, %v2798_v32  ;;  %v9695_v21 = vmul.f32 %v9075_v16, %v9302_v34  ;;  %v9699_v48 = vmul.f32 %v9096_v39, %v9354_v55  ;;  %v1368_v5 = vrot.slane %v9689_v7, 1 }
 0x159   : > { %v2352_v44 = vadd.f32 %v2252_v46, %v2128_v59  ;;  %v882_v52 = vmax.f32 %v841_v19, 0.0  ;;  %v9709_v32 = vmul.f32 %v9099_v40, %v9354_v55  ;;  %v9713_v10 = vmul.f32 %v9102_v41, %v9354_v55  ;;  %v1084_v19 = vpop.permute.xlu1 %1083 }
 0x15a   : > { %v3062_v61 = vadd.f32 %v9128_v0, %v3022_v47  ;;  %v1588_v42 = vrot.slane %v9695_v21, 2  ;;  %v13868_v60 = vrot.slane %v9699_v48, 2  ;;  %v13985_v59 = vrot.slane %v9624_v58, 1  ;;  %v9723_v24 = vpop.f32.mrb[56].mxu0 }
 0x15b   : > { %v2575_v38 = vadd.f32 %v2475_v3, %v2352_v44  ;;  %v923_v47 = vmin.f32 %v882_v52, 6.0  ;;  %v2029_v27 = vrot.slane %v9709_v32, 3  ;;  %v2253_v58 = vrot.slane %v9713_v10, 4 }
 0x15c   : > { %v3098_v57 = vmax.f32 %v3062_v61, 0.0  ;;  %v1369_v46 = vsel %vm1350_vm2, %v13985_v59, %v1368_v5  ;;  %v1589_v21 = vsel %vm1570_vm3, %v1586_v2, %v1588_v42  ;;  %v1808_v14 = vsel %vm1570_vm3, %v1805_v29, %v13868_v60 }
 0x15d   : > { %v1466_v7 = vadd.f32 %v1369_v46, %v1246_v26  ;;  %v2799_v61 = vadd.f32 %v2699_v49, %v2575_v38  ;;  %v9725_v3 = vmul.f32 %v1084_v19, %v923_v47  ;;  %v2394_v44 = vmul.f32 %v9112_v45, %v9406_v13  ;;  %v7739_v26 = vpop.f32.mrb[57].mxu0 }
 0x15e   : > { %7817 = vmatprep.mubr.f32.mxu1 %v3098_v57  ;;  %v2030_v2 = vsel %vm2011_vm4, %v2027_v20, %v2029_v27  ;;  %v9733_v29 = vmul.f32 %v9115_v50, %v9406_v13  ;;  %v9737_v32 = vmul.f32 %v9183_v54, %v9406_v13  ;;  %v2254_v57 = vsel %vm2235_vm5, %v2251_v1, %v2253_v58  ;;  %v9746_v19 = vpop.f32.mrb[58].mxu0 }
 0x15f   : > { %v1686_v52 = vadd.f32 %v1589_v21, %v1466_v7  ;;  %v3023_v49 = vadd.f32 %v2923_v11, %v2799_v61  ;;  %v2476_v38 = vrot.slane %v2394_v44, 4  ;;  %v797_v10 = vmul.f32 %v9056_v62, %v9528_v6  ;;  %v7742_v6 = vpop.f32.mrb[59].mxu0 }
 0x160   : > { %v2700_v59 = vrot.slane %v9733_v29, 5  ;;  %v2924_v20 = vrot.slane %v9737_v32, 6  ;;  %v1247_v46 = vmul.f32 %v9085_v25, %v9302_v34  ;;  %v9753_v21 = vmul.f32 %v9072_v15, %v9328_v31 }
 0x161   : > { %v1905_v47 = vadd.f32 %v1808_v14, %v1686_v52  ;;  %v3063_v7 = vadd.f32 %v9128_v0, %v3023_v49  ;;  %v2477_v11 = vsel %vm2235_vm5, %v2474_v37, %v2476_v38  ;;  %v842_v1 = vadd.f32 %v9060_v63, %v797_v10 }
 0x162   : > { %v2701_v61 = vsel %vm2682_vm6, %v2698_v17, %v2700_v59  ;;  %v2925_v44 = vsel %vm2906_vm7, %v2922_v35, %v2924_v20  ;;  %v1508_v34 = vmul.f32 %v9075_v16, %v9328_v31  ;;  %v1370_v29 = vrot.slane %v9753_v21, 1  ;;  %v9772_v35 = vpop.f32.mrb[60].mxu0  ;;  %v1089_v21 = vpop.permute.xlu0 %1088 }
 0x163   : > { %v2129_v14 = vadd.f32 %v2030_v2, %v1905_v47  ;;  %v3099_v26 = vmax.f32 %v3063_v7, 0.0  ;;  %v883_v52 = vmax.f32 %v842_v1, 0.0  ;;  %v9762_v37 = vmul.f32 %v9096_v39, %v9378_v43  ;;  %13986 = vst [vmem:[#allocation10_spill] sm:$0xff] %v9772_v35  ;;  %v7745_v1 = vpop.f32.mrb[61].mxu0 }
 0x164   : > { %v1590_v49 = vrot.slane %v1508_v34, 2  ;;  %v9766_v2 = vmul.f32 %v9099_v40, %v9378_v43  ;;  %v9770_v17 = vmul.f32 %v9102_v41, %v9378_v43  ;;  %v1371_v47 = vsel %vm1350_vm2, %v1368_v5, %v1370_v29 }
 0x165   : > { %v2353_v32 = vadd.f32 %v2254_v57, %v2129_v14  ;;  %7818 = vmatmul.mubr.f32.gmra.mrb[6].mxu1 %v3099_v26  ;;  %v924_v10 = vmin.f32 %v883_v52, 6.0  ;;  %v1809_v7 = vrot.slane %v9762_v37, 2  ;;  %v9778_v57 = vmul.f32 %v9112_v45, %v9436_v18 }
 0x166   : > { %v1467_v14 = vadd.f32 %v1371_v47, %v1247_v46  ;;  %v1591_v34 = vsel %vm1570_vm3, %v1588_v42, %v1590_v49  ;;  %v2031_v60 = vrot.slane %v9766_v2, 3  ;;  %v13987_v26 = vrot.slane %v9699_v48, 2  ;;  %v9792_v42 = vpop.f32.mrb[62].mxu0 }
 0x167   : > { %v2576_v6 = vadd.f32 %v2477_v11, %v2353_v32  ;;  %v9782_v23 = vmul.f32 %v1089_v21, %v924_v10  ;;  %v2255_v52 = vrot.slane %v9770_v17, 4  ;;  %v2478_v37 = vrot.slane %v9778_v57, 4  ;;  %v7748_v2 = vpop.f32.mrb[63].mxu0 }
 0x168   : > { %v1810_v5 = vsel %vm1570_vm3, %v13987_v26, %v1809_v7  ;;  %v1687_v35 = vadd.f32 %v1591_v34, %v1467_v14  ;;  %v2032_v1 = vsel %vm2011_vm4, %v2029_v27, %v2031_v60  ;;  %v2618_v46 = vmul.f32 %v9115_v50, %v9436_v18 }
 0x169   : > { %v2800_v22 = vadd.f32 %v2701_v61, %v2576_v6  ;;  %v2256_v11 = vsel %vm2235_vm5, %v2253_v58, %v2255_v52  ;;  %v2479_v48 = vsel %vm2235_vm5, %v2476_v38, %v2478_v37  ;;  %v2842_v32 = vmul.f32 %v9183_v54, %v9436_v18 }
 0x16a   : > { %v798_v61 = vmul.f32 %v9056_v62, %v9550_v51  ;;  %v1906_v27 = vadd.f32 %v1810_v5, %v1687_v35  ;;  %v2702_v10 = vrot.slane %v2618_v46, 5  ;;  %v1248_v47 = vmul.f32 %v9085_v25, %v9328_v31  ;;  %v9819_v31 = vpop.f32.mrb[64].mxu0 }
 0x16b   : > { %v3024_v17 = vadd.f32 %v2925_v44, %v2800_v22  ;;  %v2926_v21 = vrot.slane %v2842_v32, 6  ;;  %v9807_v6 = vmul.f32 %v9072_v15, %v9354_v55  ;;  %v9811_v54 = vmul.f32 %v9075_v16, %v9354_v55  ;;  %v7751_v5 = vpop.f32.mrb[65].mxu0 }
 0x16c   : > { %v843_v58 = vadd.f32 %v9060_v63, %v798_v61  ;;  %v2130_v38 = vadd.f32 %v2032_v1, %v1906_v27  ;;  %v2703_v22 = vsel %vm2682_vm6, %v2700_v59, %v2702_v10  ;;  %v9817_v44 = vmul.f32 %v9096_v39, %v9406_v13  ;;  %v1094_v27 = vpop.permute.xlu1 %1093 }
 0x16d   : > { %v3064_v51 = vadd.f32 %v9128_v0, %v3024_v17  ;;  %v2927_v35 = vsel %vm2906_vm7, %v2924_v20, %v2926_v21  ;;  %v1372_v34 = vrot.slane %v9807_v6, 1  ;;  %v1592_v26 = vrot.slane %v9811_v54, 2 }
 0x16e   : > { %v884_v14 = vmax.f32 %v843_v58, 0.0  ;;  %v2354_v32 = vadd.f32 %v2256_v11, %v2130_v38  ;;  %v1811_v1 = vrot.slane %v9817_v44, 2  ;;  %v1948_v59 = vmul.f32 %v9099_v40, %v9406_v13 }
 0x16f   : > { %v3100_v46 = vmax.f32 %v3064_v51, 0.0  ;;  %v1373_v2 = vsel %vm1350_vm2, %v1370_v29, %v1372_v34  ;;  %v1593_v17 = vsel %vm1570_vm3, %v1590_v49, %v1592_v26  ;;  %v2172_v20 = vmul.f32 %v9102_v41, %v9406_v13 }
 0x170   : > { %v925_v61 = vmin.f32 %v884_v14, 6.0  ;;  %v2577_v58 = vadd.f32 %v2479_v48, %v2354_v32  ;;  %v1468_v6 = vadd.f32 %v1373_v2, %v1248_v47  ;;  %v1812_v54 = vsel %vm1570_vm3, %v1809_v7, %v1811_v1  ;;  %v9846_v7 = vld [vmem:[%s13836_s2 + $0x8] ss:$0 sm:$0xff]  ;;  %v9852_v47 = vpop.f32.mrb[66].mxu0 }
 0x171   : > { %7820 = vmatprep.mubr.f32.mxu1 %v3100_v46  ;;  %v2033_v11 = vrot.slane %v1948_v59, 3  ;;  %v2257_v38 = vrot.slane %v2172_v20, 4  ;;  %v9836_v44 = vmul.f32 %v9112_v45, %v9480_v33  ;;  %v9840_v29 = vmul.f32 %v9115_v50, %v9480_v33  ;;  %v7754_v59 = vpop.f32.mrb[67].mxu0 }
 0x172   : > { %v9832_v51 = vmul.f32 %v1094_v27, %v925_v61  ;;  %v2801_v49 = vadd.f32 %v2703_v22, %v2577_v58  ;;  %v1688_v14 = vadd.f32 %v1593_v17, %v1468_v6  ;;  %v9850_v48 = vmul.f32 %v9846_v7, %v9480_v33 }
 0x173   : > { %v2034_v5 = vsel %vm2011_vm4, %v2031_v60, %v2033_v11  ;;  %v2258_v46 = vsel %vm2235_vm5, %v2255_v52, %v2257_v38  ;;  %v2480_v32 = vrot.slane %v9836_v44, 4  ;;  %v2704_v22 = vrot.slane %v9840_v29, 5 }
 0x174   : > { %v799_v60 = vmul.f32 %v9056_v62, %v9574_v9  ;;  %v3025_v61 = vadd.f32 %v2927_v35, %v2801_v49  ;;  %v1907_v2 = vadd.f32 %v1812_v54, %v1688_v14  ;;  %v2928_v17 = vrot.slane %v9850_v48, 6 }
 0x175   : > { %v1249_v20 = vmul.f32 %v9085_v25, %v9354_v55  ;;  %v2481_v27 = vsel %vm2235_vm5, %v2478_v37, %v2480_v32  ;;  %v2705_v52 = vsel %vm2682_vm6, %v2702_v10, %v2704_v22  ;;  %v1290_v6 = vmul.f32 %v9072_v15, %v9378_v43 }
 0x176   : > { %v844_v58 = vadd.f32 %v9060_v63, %v799_v60  ;;  %v3065_v9 = vadd.f32 %v9128_v0, %v3025_v61  ;;  %v2131_v35 = vadd.f32 %v2034_v5, %v1907_v2  ;;  %v2929_v54 = vsel %vm2906_vm7, %v2926_v21, %v2928_v17  ;;  %v1099_v61 = vpop.permute.xlu0 %1098 }
 0x177   : > { %v1510_v44 = vmul.f32 %v9075_v16, %v9378_v43  ;;  %v1374_v29 = vrot.slane %v1290_v6, 1  ;;  %v9875_v57 = vmul.f32 %v9096_v39, %v9436_v18  ;;  %v9879_v37 = vmul.f32 %v9099_v40, %v9436_v18 }
 0x178   : > { %v885_v55 = vmax.f32 %v844_v58, 0.0  ;;  %v3101_v10 = vmax.f32 %v3065_v9, 0.0  ;;  %v2355_v49 = vadd.f32 %v2258_v46, %v2131_v35  ;;  %v9883_v5 = vmul.f32 %v9102_v41, %v9436_v18 }
 0x179   : > { %v1594_v14 = vrot.slane %v1510_v44, 2  ;;  %v1375_v48 = vsel %vm1350_vm2, %v1372_v34, %v1374_v29  ;;  %v1813_v60 = vrot.slane %v9875_v57, 2  ;;  %v2035_v59 = vrot.slane %v9879_v37, 3 }
 0x17a   : > { %v926_v21 = vmin.f32 %v885_v55, 6.0  ;;  %7821 = vmatmul.mubr.f32.gmra.mrb[8].mxu1 %v3101_v10  ;;  %v2578_v2 = vadd.f32 %v2481_v27, %v2355_v49  ;;  %v1469_v58 = vadd.f32 %v1375_v48, %v1249_v20  ;;  %v2259_v46 = vrot.slane %v9883_v5, 4  ;;  %v9896_v55 = vpop.f32.mrb[68].mxu0 }
 0x17b   : > { %v1595_v6 = vsel %vm1570_vm3, %v1592_v26, %v1594_v14  ;;  %v1814_v35 = vsel %vm1570_vm3, %v1811_v1, %v1813_v60  ;;  %v2036_v44 = vsel %vm2011_vm4, %v2033_v11, %v2035_v59  ;;  %v2397_v34 = vmul.f32 %v9112_v45, %v9537_v8  ;;  %v7757_v20 = vpop.f32.mrb[69].mxu0 }
 0x17c   : > { %v9890_v9 = vmul.f32 %v1099_v61, %v926_v21  ;;  %v2802_v57 = vadd.f32 %v2705_v52, %v2578_v2  ;;  %v1689_v37 = vadd.f32 %v1595_v6, %v1469_v58  ;;  %v2260_v27 = vsel %vm2235_vm5, %v2257_v38, %v2259_v46 }
 0x17d   : > { %v2620_v26 = vmul.f32 %v9115_v50, %v9537_v8  ;;  %v2482_v10 = vrot.slane %v2397_v34, 4  ;;  %v2844_v49 = vmul.f32 %v9846_v7, %v9537_v8  ;;  %v800_v1 = vmul.f32 %v9056_v62, %v9600_v36 }
 0x17e   : > { %v1250_v11 = vmul.f32 %v9085_v25, %v9378_v43  ;;  %v3026_v5 = vadd.f32 %v2929_v54, %v2802_v57  ;;  %v1908_v21 = vadd.f32 %v1814_v35, %v1689_v37  ;;  %v9909_v38 = vmul.f32 %v9072_v15, %v9406_v13 }
 0x17f   : > { %v2706_v52 = vrot.slane %v2620_v26, 5  ;;  %v2483_v48 = vsel %vm2235_vm5, %v2480_v32, %v2482_v10  ;;  %v2930_v61 = vrot.slane %v2844_v49, 6  ;;  %v845_v2 = vadd.f32 %v9060_v63, %v800_v1 }
 0x180   : > { %v9915_v58 = vmul.f32 %v9075_v16, %v9406_v13  ;;  %v3066_v36 = vadd.f32 %v9128_v0, %v3026_v5  ;;  %v2132_v6 = vadd.f32 %v2036_v44, %v1908_v21  ;;  %v1376_v54 = vrot.slane %v9909_v38, 1  ;;  %v1104_v21 = vpop.permute.xlu1 %1103 }
 0x181   : > { %v2707_v43 = vsel %vm2682_vm6, %v2704_v22, %v2706_v52  ;;  %v2931_v35 = vsel %vm2906_vm7, %v2928_v17, %v2930_v61  ;;  %v886_v34 = vmax.f32 %v845_v2, 0.0  ;;  %v1731_v32 = vmul.f32 %v9096_v39, %v9480_v33 }
 0x182   : > { %v1596_v57 = vrot.slane %v9915_v58, 2  ;;  %v3102_v37 = vmax.f32 %v3066_v36, 0.0  ;;  %v2356_v26 = vadd.f32 %v2260_v27, %v2132_v6  ;;  %v1377_v20 = vsel %vm1350_vm2, %v1374_v29, %v1376_v54 }
 0x183   : > { %v1950_v49 = vmul.f32 %v9099_v40, %v9480_v33  ;;  %v927_v44 = vmin.f32 %v886_v34, 6.0  ;;  %v1470_v1 = vadd.f32 %v1377_v20, %v1250_v11  ;;  %v1815_v5 = vrot.slane %v1731_v32, 2 }
 0x184   : > { %v1597_v22 = vsel %vm1570_vm3, %v1594_v14, %v1596_v57  ;;  %7823 = vmatprep.mubr.f32.mxu1 %v3102_v37  ;;  %v2579_v17 = vadd.f32 %v2483_v48, %v2356_v26  ;;  %v2174_v2 = vmul.f32 %v9102_v41, %v9480_v33  ;;  %v2398_v27 = vmul.f32 %v9112_v45, %v9602_v56 }
 0x185   : > { %v2037_v38 = vrot.slane %v1950_v49, 3  ;;  %v9932_v58 = vmul.f32 %v1104_v21, %v927_v44  ;;  %v1690_v29 = vadd.f32 %v1597_v22, %v1470_v1  ;;  %v1816_v36 = vsel %vm1570_vm3, %v1813_v60, %v1815_v5  ;;  %v9945_v49 = vpop.f32.mrb[70].mxu0 }
 0x186   : > { %v9937_v11 = vmul.f32 %v9115_v50, %v9602_v56  ;;  %v2803_v14 = vadd.f32 %v2707_v43, %v2579_v17  ;;  %v2261_v48 = vrot.slane %v2174_v2, 4  ;;  %v2484_v34 = vrot.slane %v2398_v27, 4  ;;  %v7760_v1 = vpop.f32.mrb[71].mxu0 }
 0x187   : > { %v2038_v6 = vsel %vm2011_vm4, %v2035_v59, %v2037_v38  ;;  %v1909_v32 = vadd.f32 %v1816_v36, %v1690_v29  ;;  %v2845_v26 = vmul.f32 %v9846_v7, %v9602_v56  ;;  %v801_v20 = vmul.f32 %v9056_v62, %v9626_v4 }
 0x188   : > { %v2708_v37 = vrot.slane %v9937_v11, 5  ;;  %v3027_v60 = vadd.f32 %v2931_v35, %v2803_v14  ;;  %v2262_v44 = vsel %vm2235_vm5, %v2259_v46, %v2261_v48  ;;  %v2485_v43 = vsel %vm2235_vm5, %v2482_v10, %v2484_v34 }
 0x189   : > { %v1251_v59 = vmul.f32 %v9085_v25, %v9406_v13  ;;  %v2133_v22 = vadd.f32 %v2038_v6, %v1909_v32  ;;  %v2932_v17 = vrot.slane %v2845_v26, 6  ;;  %v846_v2 = vadd.f32 %v9060_v63, %v801_v20 }
 0x18a   : > { %v2709_v21 = vsel %vm2682_vm6, %v2706_v52, %v2708_v37  ;;  %v3067_v27 = vadd.f32 %v9128_v0, %v3027_v60  ;;  %v1292_v4 = vmul.f32 %v9072_v15, %v9436_v18  ;;  %v9958_v46 = vmul.f32 %v9075_v16, %v9436_v18 }
 0x18b   : > { %v9962_v10 = vmul.f32 %v9096_v39, %v9537_v8  ;;  %v2357_v13 = vadd.f32 %v2262_v44, %v2133_v22  ;;  %v2933_v35 = vsel %vm2906_vm7, %v2930_v61, %v2932_v17  ;;  %v887_v52 = vmax.f32 %v846_v2, 0.0  ;;  %v1109_v61 = vpop.permute.xlu0 %1108 }
 0x18c   : > { %v9967_v29 = vmul.f32 %v9099_v40, %v9537_v8  ;;  %v3103_v36 = vmax.f32 %v3067_v27, 0.0  ;;  %v1378_v11 = vrot.slane %v1292_v4, 1  ;;  %v1598_v14 = vrot.slane %v9958_v46, 2 }
 0x18d   : > { %v1817_v6 = vrot.slane %v9962_v10, 2  ;;  %v2580_v32 = vadd.f32 %v2485_v43, %v2357_v13  ;;  %v928_v26 = vmin.f32 %v887_v52, 6.0  ;;  %v9974_v60 = vmul.f32 %v9102_v41, %v9537_v8 }
 0x18e   : > { %v2039_v20 = vrot.slane %v9967_v29, 3  ;;  %7824 = vmatmul.mubr.f32.gmra.mrb[10].mxu1 %v3103_v36  ;;  %v1379_v44 = vsel %vm1350_vm2, %v1376_v54, %v1378_v11  ;;  %v1599_v1 = vsel %vm1570_vm3, %v1596_v57, %v1598_v14  ;;  %v2399_v2 = vmul.f32 %v9112_v45, %v9663_v53  ;;  %v9993_v57 = vpop.f32.mrb[72].mxu0 }
 0x18f   : > { %v1818_v22 = vsel %vm1570_vm3, %v1815_v5, %v1817_v6  ;;  %v2804_v27 = vadd.f32 %v2709_v21, %v2580_v32  ;;  %v9981_v43 = vmul.f32 %v1109_v61, %v928_v26  ;;  %v1471_v4 = vadd.f32 %v1379_v44, %v1251_v59  ;;  %v7763_v29 = vpop.f32.mrb[73].mxu0 }
 0x190   : > { %v2040_v46 = vsel %vm2011_vm4, %v2037_v38, %v2039_v20  ;;  %v2263_v10 = vrot.slane %v9974_v60, 4  ;;  %v2486_v13 = vrot.slane %v2399_v2, 4  ;;  %v9987_v52 = vmul.f32 %v9115_v50, %v9663_v53  ;;  %v1114_v29 = vpop.permute.xlu1 %1113 }
 0x191   : > { %v9991_v54 = vmul.f32 %v9846_v7, %v9663_v53  ;;  %v3028_v5 = vadd.f32 %v2933_v35, %v2804_v27  ;;  %v1691_v21 = vadd.f32 %v1599_v1, %v1471_v4  ;;  %v802_v59 = vmul.f32 %v9056_v62, %v9650_v30 }
 0x192   : > { %v1252_v38 = vmul.f32 %v9085_v25, %v9436_v18  ;;  %v2264_v36 = vsel %vm2235_vm5, %v2261_v48, %v2263_v10  ;;  %v2487_v32 = vsel %vm2235_vm5, %v2484_v34, %v2486_v13  ;;  %v2710_v26 = vrot.slane %v9987_v52, 5 }
 0x193   : > { %v2934_v60 = vrot.slane %v9991_v54, 6  ;;  %v3068_v61 = vadd.f32 %v9128_v0, %v3028_v5  ;;  %v1910_v44 = vadd.f32 %v1818_v22, %v1691_v21  ;;  %v847_v35 = vadd.f32 %v9060_v63, %v802_v59 }
 0x194   : > { %v1293_v30 = vmul.f32 %v9072_v15, %v9480_v33  ;;  %v2711_v1 = vsel %vm2682_vm6, %v2708_v37, %v2710_v26  ;;  %v1513_v48 = vmul.f32 %v9075_v16, %v9480_v33  ;;  %v1733_v34 = vmul.f32 %v9096_v39, %v9602_v56 }
 0x195   : > { %v2935_v18 = vsel %vm2906_vm7, %v2932_v17, %v2934_v60  ;;  %v3104_v2 = vmax.f32 %v3068_v61, 0.0  ;;  %v2134_v27 = vadd.f32 %v2040_v46, %v1910_v44  ;;  %v888_v4 = vmax.f32 %v847_v35, 0.0 }
 0x196   : > { %v1380_v52 = vrot.slane %v1293_v30, 1  ;;  %v1600_v22 = vrot.slane %v1513_v48, 2  ;;  %v1819_v54 = vrot.slane %v1733_v34, 2  ;;  %v10015_v5 = vmul.f32 %v9099_v40, %v9602_v56 }
 0x197   : > { %v10019_v37 = vmul.f32 %v9102_v41, %v9602_v56  ;;  %7826 = vmatprep.mubr.f32.mxu1 %v3104_v2  ;;  %v2358_v17 = vadd.f32 %v2264_v36, %v2134_v27  ;;  %v929_v21 = vmin.f32 %v888_v4, 6.0  ;;  %v10024_v46 = vmul.f32 %v9112_v45, %v9725_v3 }
 0x198   : > { %v1381_v59 = vsel %vm1350_vm2, %v1378_v11, %v1380_v52  ;;  %v1601_v44 = vsel %vm1570_vm3, %v1598_v14, %v1600_v22  ;;  %v1820_v35 = vsel %vm1570_vm3, %v1817_v6, %v1819_v54  ;;  %v2041_v30 = vrot.slane %v10015_v5, 3  ;;  %v10040_v6 = vpop.f32.mrb[74].mxu0 }
 0x199   : > { %v1472_v61 = vadd.f32 %v1381_v59, %v1252_v38  ;;  %v2581_v48 = vadd.f32 %v2487_v32, %v2358_v17  ;;  %v10029_v34 = vmul.f32 %v1114_v29, %v929_v21  ;;  %v2265_v36 = vrot.slane %v10019_v37, 4  ;;  %v7766_v17 = vpop.f32.mrb[75].mxu0 }
 0x19a   : > { %v2488_v2 = vrot.slane %v10024_v46, 4  ;;  %v2042_v27 = vsel %vm2011_vm4, %v2039_v20, %v2041_v30  ;;  %v2623_v4 = vmul.f32 %v9115_v50, %v9725_v3  ;;  %v10038_v14 = vmul.f32 %v9846_v7, %v9725_v3 }
 0x19b   : > { %v1692_v11 = vadd.f32 %v1601_v44, %v1472_v61  ;;  %v2805_v38 = vadd.f32 %v2711_v1, %v2581_v48  ;;  %v2266_v32 = vsel %vm2235_vm5, %v2263_v10, %v2265_v36  ;;  %v803_v37 = vmul.f32 %v9056_v62, %v9676_v28 }
 0x19c   : > { %v2489_v5 = vsel %vm2235_vm5, %v2486_v13, %v2488_v2  ;;  %v2712_v20 = vrot.slane %v2623_v4, 5  ;;  %v2936_v59 = vrot.slane %v10038_v14, 6  ;;  %v1253_v46 = vmul.f32 %v9085_v25, %v9480_v33 }
 0x19d   : > { %v1911_v21 = vadd.f32 %v1820_v35, %v1692_v11  ;;  %v3029_v29 = vadd.f32 %v2935_v18, %v2805_v38  ;;  %v848_v61 = vadd.f32 %v9060_v63, %v803_v37  ;;  %v1294_v1 = vmul.f32 %v9072_v15, %v9537_v8 }
 0x19e   : > { %v10054_v10 = vmul.f32 %v9075_v16, %v9537_v8  ;;  %v2713_v28 = vsel %vm2682_vm6, %v2710_v26, %v2712_v20  ;;  %v2937_v44 = vsel %vm2906_vm7, %v2934_v60, %v2936_v59  ;;  %v10060_v35 = vmul.f32 %v9096_v39, %v9663_v53 }
 0x19f   : > { %v2135_v13 = vadd.f32 %v2042_v27, %v1911_v21  ;;  %v3069_v33 = vadd.f32 %v9128_v0, %v3029_v29  ;;  %v889_v18 = vmax.f32 %v848_v61, 0.0  ;;  %v1382_v48 = vrot.slane %v1294_v1, 1  ;;  %v1119_v21 = vpop.permute.xlu0 %1118 }
 0x1a0   : > { %v1602_v11 = vrot.slane %v10054_v10, 2  ;;  %v1821_v14 = vrot.slane %v10060_v35, 2  ;;  %v1953_v27 = vmul.f32 %v9099_v40, %v9663_v53  ;;  %v10069_v26 = vmul.f32 %v9102_v41, %v9663_v53 }
 0x1a1   : > { %v2359_v4 = vadd.f32 %v2266_v32, %v2135_v13  ;;  %v3105_v60 = vmax.f32 %v3069_v33, 0.0  ;;  %v930_v38 = vmin.f32 %v889_v18, 6.0  ;;  %v1383_v37 = vsel %vm1350_vm2, %v1380_v52, %v1382_v48 }
 0x1a2   : > { %v1603_v17 = vsel %vm1570_vm3, %v1600_v22, %v1602_v11  ;;  %v1473_v61 = vadd.f32 %v1383_v37, %v1253_v46  ;;  %v1822_v32 = vsel %vm1570_vm3, %v1819_v54, %v1821_v14  ;;  %v2043_v1 = vrot.slane %v1953_v27, 3  ;;  %v10088_v46 = vpop.f32.mrb[76].mxu0 }
 0x1a3   : > { %v2582_v29 = vadd.f32 %v2489_v5, %v2359_v4  ;;  %7827 = vmatmul.mubr.f32.gmra.mrb[12].mxu1 %v3105_v60  ;;  %v10074_v10 = vmul.f32 %v1119_v21, %v930_v38  ;;  %v2267_v13 = vrot.slane %v10069_v26, 4  ;;  %v2401_v35 = vmul.f32 %v9112_v45, %v9782_v23  ;;  %v7769_v60 = vpop.f32.mrb[77].mxu0 }
 0x1a4   : > { %v10081_v33 = vmul.f32 %v9115_v50, %v9782_v23  ;;  %v1693_v22 = vadd.f32 %v1603_v17, %v1473_v61  ;;  %v2044_v5 = vsel %vm2011_vm4, %v2041_v30, %v2043_v1  ;;  %v10086_v54 = vmul.f32 %v9846_v7, %v9782_v23 }
 0x1a5   : > { %v2806_v52 = vadd.f32 %v2713_v28, %v2582_v29  ;;  %v2268_v18 = vsel %vm2235_vm5, %v2265_v36, %v2267_v13  ;;  %v2490_v4 = vrot.slane %v2401_v35, 4  ;;  %v804_v26 = vmul.f32 %v9056_v62, %v9701_v12 }
 0x1a6   : > { %v2714_v27 = vrot.slane %v10081_v33, 5  ;;  %v1912_v28 = vadd.f32 %v1822_v32, %v1693_v22  ;;  %v2938_v37 = vrot.slane %v10086_v54, 6  ;;  %v1254_v30 = vmul.f32 %v9085_v25, %v9537_v8 }
 0x1a7   : > { %v3030_v38 = vadd.f32 %v2937_v44, %v2806_v52  ;;  %v2491_v17 = vsel %vm2235_vm5, %v2488_v2, %v2490_v4  ;;  %v849_v36 = vadd.f32 %v9060_v63, %v804_v26  ;;  %v1295_v29 = vmul.f32 %v9072_v15, %v9602_v56 }
 0x1a8   : > { %v2715_v21 = vsel %vm2682_vm6, %v2712_v20, %v2714_v27  ;;  %v2136_v12 = vadd.f32 %v2044_v5, %v1912_v28  ;;  %v2939_v44 = vsel %vm2906_vm7, %v2936_v59, %v2938_v37  ;;  %v1515_v32 = vmul.f32 %v9075_v16, %v9602_v56 }
 0x1a9   : > { %v3070_v61 = vadd.f32 %v9128_v0, %v3030_v38  ;;  %v890_v35 = vmax.f32 %v849_v36, 0.0  ;;  %v1384_v33 = vrot.slane %v1295_v29, 1  ;;  %v10108_v8 = vmul.f32 %v9096_v39, %v9725_v3  ;;  %v1124_v38 = vpop.permute.xlu1 %1123 }
 0x1aa   : > { %v10112_v2 = vmul.f32 %v9099_v40, %v9725_v3  ;;  %v2360_v52 = vadd.f32 %v2268_v18, %v2136_v12  ;;  %v1604_v22 = vrot.slane %v1515_v32, 2  ;;  %v10116_v5 = vmul.f32 %v9102_v41, %v9725_v3 }
 0x1ab   : > { %v3106_v20 = vmax.f32 %v3070_v61, 0.0  ;;  %v931_v59 = vmin.f32 %v890_v35, 6.0  ;;  %v1385_v54 = vsel %vm1350_vm2, %v1382_v48, %v1384_v33  ;;  %v1823_v26 = vrot.slane %v10108_v8, 2  ;;  %v10129_v35 = vpop.f32.mrb[78].mxu0 }
 0x1ac   : > { %v2045_v60 = vrot.slane %v10112_v2, 3  ;;  %v2583_v28 = vadd.f32 %v2491_v17, %v2360_v52  ;;  %v1474_v36 = vadd.f32 %v1385_v54, %v1254_v30  ;;  %v1605_v29 = vsel %vm1570_vm3, %v1602_v11, %v1604_v22  ;;  %v7772_v30 = vpop.f32.mrb[79].mxu0 }
 0x1ad   : > { %7829 = vmatprep.mubr.f32.mxu1 %v3106_v20  ;;  %v2269_v18 = vrot.slane %v10116_v5, 4  ;;  %v10123_v61 = vmul.f32 %v1124_v38, %v931_v59  ;;  %v1824_v12 = vsel %vm1570_vm3, %v1821_v14, %v1823_v26  ;;  %v2402_v48 = vmul.f32 %v9112_v45, %v9832_v51 }
 0x1ae   : > { %v2046_v32 = vsel %vm2011_vm4, %v2043_v1, %v2045_v60  ;;  %v2807_v8 = vadd.f32 %v2715_v21, %v2583_v28  ;;  %v1694_v2 = vadd.f32 %v1605_v29, %v1474_v36  ;;  %v2625_v11 = vmul.f32 %v9115_v50, %v9832_v51 }
 0x1af   : > { %v2270_v17 = vsel %vm2235_vm5, %v2267_v13, %v2269_v18  ;;  %v2492_v20 = vrot.slane %v2402_v48, 4  ;;  %v2849_v52 = vmul.f32 %v9846_v7, %v9832_v51  ;;  %v805_v14 = vmul.f32 %v9056_v62, %v9723_v24 }
 0x1b0   : > { %v1255_v1 = vmul.f32 %v9085_v25, %v9602_v56  ;;  %v3031_v5 = vadd.f32 %v2939_v44, %v2807_v8  ;;  %v1913_v59 = vadd.f32 %v1824_v12, %v1694_v2  ;;  %v2716_v21 = vrot.slane %v2625_v11, 5 }
 0x1b1   : > { %v10142_v13 = vmul.f32 %v9072_v15, %v9663_v53  ;;  %v2493_v54 = vsel %vm2235_vm5, %v2490_v4, %v2492_v20  ;;  %v2940_v38 = vrot.slane %v2849_v52, 6  ;;  %v850_v28 = vadd.f32 %v9060_v63, %v805_v14 }
 0x1b2   : > { %v10148_v36 = vmul.f32 %v9075_v16, %v9663_v53  ;;  %v3071_v24 = vadd.f32 %v9128_v0, %v3031_v5  ;;  %v2137_v29 = vadd.f32 %v2046_v32, %v1913_v59  ;;  %v2717_v56 = vsel %vm2682_vm6, %v2714_v27, %v2716_v21  ;;  %v1129_v59 = vpop.permute.xlu0 %1128 }
 0x1b3   : > { %v1386_v44 = vrot.slane %v10142_v13, 1  ;;  %v2941_v12 = vsel %vm2906_vm7, %v2938_v37, %v2940_v38  ;;  %v891_v48 = vmax.f32 %v850_v28, 0.0  ;;  %v1736_v4 = vmul.f32 %v9096_v39, %v9782_v23 }
 0x1b4   : > { %v1606_v8 = vrot.slane %v10148_v36, 2  ;;  %v3107_v2 = vmax.f32 %v3071_v24, 0.0  ;;  %v2361_v11 = vadd.f32 %v2270_v17, %v2137_v29  ;;  %v1955_v52 = vmul.f32 %v9099_v40, %v9782_v23 }
 0x1b5   : > { %v1387_v30 = vsel %vm1350_vm2, %v1384_v33, %v1386_v44  ;;  %v932_v32 = vmin.f32 %v891_v48, 6.0  ;;  %v1825_v5 = vrot.slane %v1736_v4, 2  ;;  %v2179_v28 = vmul.f32 %v9102_v41, %v9782_v23 }
 0x1b6   : > { %v1475_v14 = vadd.f32 %v1387_v30, %v1255_v1  ;;  %v1607_v27 = vsel %vm1570_vm3, %v1604_v22, %v1606_v8  ;;  %7830 = vmatmul.mubr.f32.gmra.mrb[14].mxu1 %v3107_v2  ;;  %v2584_v37 = vadd.f32 %v2493_v54, %v2361_v11  ;;  %v2047_v13 = vrot.slane %v1955_v52, 3 }
 0x1b7   : > { %v2403_v17 = vmul.f32 %v9112_v45, %v9890_v9  ;;  %v10165_v36 = vmul.f32 %v1129_v59, %v932_v32  ;;  %v1826_v24 = vsel %vm1570_vm3, %v1823_v26, %v1825_v5  ;;  %v10170_v1 = vmul.f32 %v9115_v50, %v9890_v9 }
 0x1b8   : > { %v1695_v33 = vadd.f32 %v1607_v27, %v1475_v14  ;;  %v2808_v22 = vadd.f32 %v2717_v56, %v2584_v37  ;;  %v2048_v29 = vsel %vm2011_vm4, %v2045_v60, %v2047_v13  ;;  %v2271_v54 = vrot.slane %v2179_v28, 4  ;;  %v10182_v60 = vpop.f32.mrb[80].mxu0 }
 0x1b9   : > { %v2494_v48 = vrot.slane %v2403_v17, 4  ;;  %v2718_v2 = vrot.slane %v10170_v1, 5  ;;  %v2850_v11 = vmul.f32 %v9846_v7, %v9890_v9  ;;  %v806_v30 = vmul.f32 %v9056_v62, %v9746_v19  ;;  %v7775_v28 = vpop.f32.mrb[81].mxu0 }
 0x1ba   : > { %v1914_v4 = vadd.f32 %v1826_v24, %v1695_v33  ;;  %v3032_v52 = vadd.f32 %v2941_v12, %v2808_v22  ;;  %v2272_v26 = vsel %vm2235_vm5, %v2269_v18, %v2271_v54  ;;  %v1256_v56 = vmul.f32 %v9085_v25, %v9663_v53  ;;  %v1134_v28 = vpop.permute.xlu1 %1133 }
 0x1bb   : > { %v2495_v32 = vsel %vm2235_vm5, %v2492_v20, %v2494_v48  ;;  %v2719_v27 = vsel %vm2682_vm6, %v2716_v21, %v2718_v2  ;;  %v2942_v59 = vrot.slane %v2850_v11, 6  ;;  %v851_v37 = vadd.f32 %v9060_v63, %v806_v30 }
 0x1bc   : > { %v2138_v14 = vadd.f32 %v2048_v29, %v1914_v4  ;;  %v3072_v17 = vadd.f32 %v9128_v0, %v3032_v52  ;;  %v1297_v19 = vmul.f32 %v9072_v15, %v9725_v3  ;;  %v1517_v18 = vmul.f32 %v9075_v16, %v9725_v3 }
 0x1bd   : > { %v1737_v53 = vmul.f32 %v9096_v39, %v9832_v51  ;;  %v2943_v12 = vsel %vm2906_vm7, %v2940_v38, %v2942_v59  ;;  %v892_v33 = vmax.f32 %v851_v37, 0.0  ;;  %v10196_v21 = vmul.f32 %v9099_v40, %v9832_v51 }
 0x1be   : > { %v2362_v20 = vadd.f32 %v2272_v26, %v2138_v14  ;;  %v3108_v24 = vmax.f32 %v3072_v17, 0.0  ;;  %v1388_v1 = vrot.slane %v1297_v19, 1  ;;  %v1608_v22 = vrot.slane %v1517_v18, 2 }
 0x1bf   : > { %v1827_v29 = vrot.slane %v1737_v53, 2  ;;  %v933_v11 = vmin.f32 %v892_v33, 6.0  ;;  %v2049_v30 = vrot.slane %v10196_v21, 3  ;;  %v2180_v52 = vmul.f32 %v9102_v41, %v9832_v51 }
 0x1c0   : > { %v2585_v4 = vadd.f32 %v2495_v32, %v2362_v20  ;;  %7832 = vmatprep.mubr.f32.mxu1 %v3108_v24  ;;  %v1389_v38 = vsel %vm1350_vm2, %v1386_v44, %v1388_v1  ;;  %v1609_v26 = vsel %vm1570_vm3, %v1606_v8, %v1608_v22  ;;  %v2404_v37 = vmul.f32 %v9112_v45, %v9932_v58 }
 0x1c1   : > { %v1828_v14 = vsel %vm1570_vm3, %v1825_v5, %v1827_v29  ;;  %v10206_v19 = vmul.f32 %v1134_v28, %v933_v11  ;;  %v1476_v32 = vadd.f32 %v1389_v38, %v1256_v56  ;;  %v2050_v18 = vsel %vm2011_vm4, %v2047_v13, %v2049_v30  ;;  %v13988_v5 = vld [vmem:[#allocation10_spill] sm:$0xff] }
 0x1c2   : > { %v2809_v17 = vadd.f32 %v2719_v27, %v2585_v4  ;;  %v2273_v53 = vrot.slane %v2180_v52, 4  ;;  %v2496_v20 = vrot.slane %v2404_v37, 4  ;;  %v2627_v33 = vmul.f32 %v9115_v50, %v9932_v58 }
 0x1c3   : > { %v2851_v44 = vmul.f32 %v9846_v7, %v9932_v58  ;;  %v1696_v21 = vadd.f32 %v1609_v26, %v1476_v32  ;;  %v807_v24 = vmul.f32 %v9056_v62, %v13988_v5  ;;  %v1257_v27 = vmul.f32 %v9085_v25, %v9725_v3 }
 0x1c4   : > { %v3033_v8 = vadd.f32 %v2943_v12, %v2809_v17  ;;  %v2274_v56 = vsel %vm2235_vm5, %v2271_v54, %v2273_v53  ;;  %v2497_v13 = vsel %vm2235_vm5, %v2494_v48, %v2496_v20  ;;  %v2720_v4 = vrot.slane %v2627_v33, 5 }
 0x1c5   : > { %v2944_v11 = vrot.slane %v2851_v44, 6  ;;  %v1915_v28 = vadd.f32 %v1828_v14, %v1696_v21  ;;  %v852_v38 = vadd.f32 %v9060_v63, %v807_v24  ;;  %v1298_v12 = vmul.f32 %v9072_v15, %v9782_v23 }
 0x1c6   : > { %v3073_v52 = vadd.f32 %v9128_v0, %v3033_v8  ;;  %v2721_v26 = vsel %vm2682_vm6, %v2718_v2, %v2720_v4  ;;  %v1518_v3 = vmul.f32 %v9075_v16, %v9782_v23  ;;  %v1738_v54 = vmul.f32 %v9096_v39, %v9890_v9 }
 0x1c7   : > { %v2945_v37 = vsel %vm2906_vm7, %v2942_v59, %v2944_v11  ;;  %v2139_v17 = vadd.f32 %v2050_v18, %v1915_v28  ;;  %v893_v32 = vmax.f32 %v852_v38, 0.0  ;;  %v1390_v33 = vrot.slane %v1298_v12, 1  ;;  %v1139_v18 = vpop.permute.xlu0 %1138 }
 0x1c8   : > { %v3109_v48 = vmax.f32 %v3073_v52, 0.0  ;;  %v1610_v14 = vrot.slane %v1518_v3, 2  ;;  %v1829_v44 = vrot.slane %v1738_v54, 2  ;;  %v1957_v8 = vmul.f32 %v9099_v40, %v9890_v9 }
 0x1c9   : > { %v10233_v2 = vmul.f32 %v9102_v41, %v9890_v9  ;;  %v2363_v59 = vadd.f32 %v2274_v56, %v2139_v17  ;;  %v934_v21 = vmin.f32 %v893_v32, 6.0  ;;  %v1391_v5 = vsel %vm1350_vm2, %v1388_v1, %v1390_v33 }
 0x1ca   : > { %7833 = vmatmul.mubr.f32.gmra.mrb[16].mxu1 %v3109_v48  ;;  %v10238_v24 = vmul.f32 %v9112_v45, %v9981_v43  ;;  %v1477_v52 = vadd.f32 %v1391_v5, %v1257_v27  ;;  %v1611_v28 = vsel %vm1570_vm3, %v1608_v22, %v1610_v14  ;;  %v1830_v38 = vsel %vm1570_vm3, %v1827_v29, %v1829_v44 }
 0x1cb   : > { %v2051_v12 = vrot.slane %v1957_v8, 3  ;;  %v2586_v3 = vadd.f32 %v2497_v13, %v2363_v59  ;;  %v10242_v54 = vmul.f32 %v1139_v18, %v934_v21  ;;  %v2275_v48 = vrot.slane %v10233_v2, 4 }
 0x1cc   : > { %v2498_v56 = vrot.slane %v10238_v24, 4  ;;  %v1697_v17 = vadd.f32 %v1611_v28, %v1477_v52  ;;  %v2628_v32 = vmul.f32 %v9115_v50, %v9981_v43  ;;  %v2852_v27 = vmul.f32 %v9846_v7, %v9981_v43 }
 0x1cd   : > { %v2052_v1 = vsel %vm2011_vm4, %v2049_v30, %v2051_v12  ;;  %v2810_v22 = vadd.f32 %v2721_v26, %v2586_v3  ;;  %v2276_v29 = vsel %vm2235_vm5, %v2273_v53, %v2275_v48  ;;  %v808_v8 = vmul.f32 %v9056_v62, %v9792_v42 }
 0x1ce   : > { %v2499_v13 = vsel %vm2235_vm5, %v2496_v20, %v2498_v56  ;;  %v1916_v2 = vadd.f32 %v1830_v38, %v1697_v17  ;;  %v2722_v59 = vrot.slane %v2628_v32, 5  ;;  %v2946_v21 = vrot.slane %v2852_v27, 6 }
 0x1cf   : > { %v1258_v30 = vmul.f32 %v9085_v25, %v9782_v23  ;;  %v3034_v5 = vadd.f32 %v2945_v37, %v2810_v22  ;;  %v853_v24 = vadd.f32 %v9060_v63, %v808_v8  ;;  %v1299_v18 = vmul.f32 %v9072_v15, %v9832_v51  ;;  %v1144_v8 = vpop.permute.xlu1 %1143 }
 0x1d0   : > { %v10262_v53 = vmul.f32 %v9075_v16, %v9832_v51  ;;  %v2140_v20 = vadd.f32 %v2052_v1, %v1916_v2  ;;  %v2723_v26 = vsel %vm2682_vm6, %v2720_v4, %v2722_v59  ;;  %v2947_v42 = vsel %vm2906_vm7, %v2944_v11, %v2946_v21 }
 0x1d1   : > { %v10268_v52 = vmul.f32 %v9096_v39, %v9932_v58  ;;  %v3074_v23 = vadd.f32 %v9128_v0, %v3034_v5  ;;  %v894_v37 = vmax.f32 %v853_v24, 0.0  ;;  %v1392_v28 = vrot.slane %v1299_v18, 1 }
 0x1d2   : > { %v1612_v38 = vrot.slane %v10262_v53, 2  ;;  %v2364_v3 = vadd.f32 %v2276_v29, %v2140_v20  ;;  %v1958_v1 = vmul.f32 %v9099_v40, %v9932_v58  ;;  %v2182_v4 = vmul.f32 %v9102_v41, %v9932_v58 }
 0x1d3   : > { %v1831_v17 = vrot.slane %v10268_v52, 2  ;;  %v3110_v11 = vmax.f32 %v3074_v23, 0.0  ;;  %v935_v32 = vmin.f32 %v894_v37, 6.0  ;;  %v1393_v27 = vsel %vm1350_vm2, %v1390_v33, %v1392_v28 }
 0x1d4   : > { %v1613_v22 = vsel %vm1570_vm3, %v1610_v14, %v1612_v38  ;;  %v2587_v2 = vadd.f32 %v2499_v13, %v2364_v3  ;;  %v1478_v5 = vadd.f32 %v1393_v27, %v1258_v30  ;;  %v2053_v29 = vrot.slane %v1958_v1, 3 }
 0x1d5   : > { %v1832_v24 = vsel %vm1570_vm3, %v1829_v44, %v1831_v17  ;;  %7835 = vmatprep.mubr.f32.mxu1 %v3110_v11  ;;  %v10280_v18 = vmul.f32 %v1144_v8, %v935_v32  ;;  %v2277_v53 = vrot.slane %v2182_v4, 4  ;;  %v2406_v20 = vmul.f32 %v9112_v45, %v10029_v34 }
 0x1d6   : > { %v10286_v52 = vmul.f32 %v9115_v50, %v10029_v34  ;;  %v2811_v33 = vadd.f32 %v2723_v26, %v2587_v2  ;;  %v1698_v23 = vadd.f32 %v1613_v22, %v1478_v5  ;;  %v2054_v14 = vsel %vm2011_vm4, %v2051_v12, %v2053_v29 }
 0x1d7   : > { %v2853_v13 = vmul.f32 %v9846_v7, %v10029_v34  ;;  %v2278_v44 = vsel %vm2235_vm5, %v2275_v48, %v2277_v53  ;;  %v2500_v30 = vrot.slane %v2406_v20, 4  ;;  %v809_v3 = vmul.f32 %v9056_v62, %v9819_v31 }
 0x1d8   : > { %v2724_v37 = vrot.slane %v10286_v52, 5  ;;  %v3035_v1 = vadd.f32 %v2947_v42, %v2811_v33  ;;  %v1917_v4 = vadd.f32 %v1832_v24, %v1698_v23  ;;  %v1259_v26 = vmul.f32 %v9085_v25, %v9832_v51 }
 0x1d9   : > { %v2948_v11 = vrot.slane %v2853_v13, 6  ;;  %v2501_v32 = vsel %vm2235_vm5, %v2498_v56, %v2500_v30  ;;  %v854_v27 = vadd.f32 %v9060_v63, %v809_v3  ;;  %v1300_v48 = vmul.f32 %v9072_v15, %v9890_v9  ;;  %v1149_v13 = vpop.permute.xlu0 %1148 }
 0x1da   : > { %v2725_v12 = vsel %vm2682_vm6, %v2722_v59, %v2724_v37  ;;  %v3075_v22 = vadd.f32 %v9128_v0, %v3035_v1  ;;  %v2141_v8 = vadd.f32 %v2054_v14, %v1917_v4  ;;  %v1520_v42 = vmul.f32 %v9075_v16, %v9890_v9 }
 0x1db   : > { %v2949_v31 = vsel %vm2906_vm7, %v2946_v21, %v2948_v11  ;;  %v895_v2 = vmax.f32 %v854_v27, 0.0  ;;  %v1394_v5 = vrot.slane %v1300_v48, 1  ;;  %v1740_v51 = vmul.f32 %v9096_v39, %v9981_v43 }
 0x1dc   : > { %v10310_v56 = vmul.f32 %v9099_v40, %v9981_v43  ;;  %v3111_v59 = vmax.f32 %v3075_v22, 0.0  ;;  %v2365_v24 = vadd.f32 %v2278_v44, %v2141_v8  ;;  %v1614_v20 = vrot.slane %v1520_v42, 2 }
 0x1dd   : > { %v10314_v52 = vmul.f32 %v9102_v41, %v9981_v43  ;;  %v936_v21 = vmin.f32 %v895_v2, 6.0  ;;  %v1395_v33 = vsel %vm1350_vm2, %v1392_v28, %v1394_v5  ;;  %v1833_v23 = vrot.slane %v1740_v51, 2 }
 0x1de   : > { %v2055_v14 = vrot.slane %v10310_v56, 3  ;;  %7836 = vmatmul.mubr.f32.gmra.mrb[18].mxu1 %v3111_v59  ;;  %v2588_v3 = vadd.f32 %v2501_v32, %v2365_v24  ;;  %v1479_v1 = vadd.f32 %v1395_v33, %v1259_v26  ;;  %v1615_v4 = vsel %vm1570_vm3, %v1612_v38, %v1614_v20 }
 0x1df   : > { %v2279_v27 = vrot.slane %v10314_v52, 4  ;;  %v10320_v44 = vmul.f32 %v1149_v13, %v936_v21  ;;  %v1834_v48 = vsel %vm1570_vm3, %v1831_v17, %v1833_v23  ;;  %v2407_v28 = vmul.f32 %v9112_v45, %v10074_v10 }
 0x1e0   : > { %v2056_v22 = vsel %vm2011_vm4, %v2053_v29, %v2055_v14  ;;  %v2812_v8 = vadd.f32 %v2725_v12, %v2588_v3  ;;  %v1699_v42 = vadd.f32 %v1615_v4, %v1479_v1  ;;  %v2630_v26 = vmul.f32 %v9115_v50, %v10074_v10 }
 0x1e1   : > { %v2280_v2 = vsel %vm2235_vm5, %v2277_v53, %v2279_v27  ;;  %v2502_v32 = vrot.slane %v2407_v28, 4  ;;  %v2854_v38 = vmul.f32 %v9846_v7, %v10074_v10  ;;  %v810_v51 = vmul.f32 %v9056_v62, %v9852_v47 }
 0x1e2   : > { %v1260_v17 = vmul.f32 %v9085_v25, %v9890_v9  ;;  %v3036_v29 = vadd.f32 %v2949_v31, %v2812_v8  ;;  %v1918_v56 = vadd.f32 %v1834_v48, %v1699_v42  ;;  %v2726_v59 = vrot.slane %v2630_v26, 5  ;;  %v1154_v26 = vpop.permute.xlu1 %1153 }
 0x1e3   : > { %v10337_v12 = vmul.f32 %v9072_v15, %v9932_v58  ;;  %v2503_v53 = vsel %vm2235_vm5, %v2500_v30, %v2502_v32  ;;  %v2950_v24 = vrot.slane %v2854_v38, 6  ;;  %v855_v52 = vadd.f32 %v9060_v63, %v810_v51 }
 0x1e4   : > { %v10343_v7 = vmul.f32 %v9075_v16, %v9932_v58  ;;  %v3076_v47 = vadd.f32 %v9128_v0, %v3036_v29  ;;  %v2142_v21 = vadd.f32 %v2056_v22, %v1918_v56  ;;  %v2727_v9 = vsel %vm2682_vm6, %v2724_v37, %v2726_v59 }
 0x1e5   : > { %v1396_v31 = vrot.slane %v10337_v12, 1  ;;  %v2951_v33 = vsel %vm2906_vm7, %v2948_v11, %v2950_v24  ;;  %v896_v13 = vmax.f32 %v855_v52, 0.0  ;;  %v1741_v30 = vmul.f32 %v9096_v39, %v10029_v34 }
 0x1e6   : > { %v1616_v3 = vrot.slane %v10343_v7, 2  ;;  %v3112_v1 = vmax.f32 %v3076_v47, 0.0  ;;  %v2366_v4 = vadd.f32 %v2280_v2, %v2142_v21  ;;  %v1960_v28 = vmul.f32 %v9099_v40, %v10029_v34  ;;  %v10369_v21 = vld [vmem:[%s13836_s2 + $0x8] ss:$0 sm:$0xff] }
 0x1e7   : > { %v1397_v48 = vsel %vm1350_vm2, %v1394_v5, %v1396_v31  ;;  %v937_v22 = vmin.f32 %v896_v13, 6.0  ;;  %v1835_v42 = vrot.slane %v1741_v30, 2  ;;  %v2184_v51 = vmul.f32 %v9102_v41, %v10029_v34 }
 0x1e8   : > { %v1480_v8 = vadd.f32 %v1397_v48, %v1260_v17  ;;  %v1617_v37 = vsel %vm1570_vm3, %v1614_v20, %v1616_v3  ;;  %7838 = vmatprep.mubr.f32.mxu1 %v3112_v1  ;;  %v2589_v11 = vadd.f32 %v2503_v53, %v2366_v4  ;;  %v2057_v38 = vrot.slane %v1960_v28, 3 }
 0x1e9   : > { %v2408_v2 = vmul.f32 %v9112_v45, %v10123_v61  ;;  %v10360_v29 = vmul.f32 %v1154_v26, %v937_v22  ;;  %v1836_v56 = vsel %vm1570_vm3, %v1833_v23, %v1835_v42  ;;  %v2631_v17 = vmul.f32 %v9115_v50, %v10123_v61 }
 0x1ea   : > { %v1700_v5 = vadd.f32 %v1617_v37, %v1480_v8  ;;  %v2813_v20 = vadd.f32 %v2727_v9, %v2589_v11  ;;  %v2058_v12 = vsel %vm2011_vm4, %v2055_v14, %v2057_v38  ;;  %v2281_v52 = vrot.slane %v2184_v51, 4 }
 0x1eb   : > { %v2504_v53 = vrot.slane %v2408_v2, 4  ;;  %v2728_v47 = vrot.slane %v2631_v17, 5  ;;  %v2855_v13 = vmul.f32 %v10369_v21, %v10123_v61  ;;  %v811_v23 = vmul.f32 %v9056_v62, %v9896_v55 }
 0x1ec   : > { %v1919_v7 = vadd.f32 %v1836_v56, %v1700_v5  ;;  %v3037_v30 = vadd.f32 %v2951_v33, %v2813_v20  ;;  %v2282_v9 = vsel %vm2235_vm5, %v2279_v27, %v2281_v52  ;;  %v1261_v1 = vmul.f32 %v9085_v25, %v9932_v58 }
 0x1ed   : > { %v2505_v14 = vsel %vm2235_vm5, %v2502_v32, %v2504_v53  ;;  %v2729_v48 = vsel %vm2682_vm6, %v2726_v59, %v2728_v47  ;;  %v2952_v28 = vrot.slane %v2855_v13, 6  ;;  %v856_v22 = vadd.f32 %v9060_v63, %v811_v23 }
 0x1ee   : > { %v2143_v4 = vadd.f32 %v2058_v12, %v1919_v7  ;;  %v3077_v8 = vadd.f32 %v9128_v0, %v3037_v30  ;;  %v1302_v37 = vmul.f32 %v9072_v15, %v9981_v43  ;;  %v1522_v55 = vmul.f32 %v9075_v16, %v9981_v43  ;;  %v1159_v12 = vpop.permute.xlu0 %1158 }
 0x1ef   : > { %v1742_v27 = vmul.f32 %v9096_v39, %v10074_v10  ;;  %v2953_v58 = vsel %vm2906_vm7, %v2950_v24, %v2952_v28  ;;  %v897_v33 = vmax.f32 %v856_v22, 0.0  ;;  %v10391_v59 = vmul.f32 %v9099_v40, %v10074_v10 }
 0x1f0   : > { %v2367_v32 = vadd.f32 %v2282_v9, %v2143_v4  ;;  %v3113_v26 = vmax.f32 %v3077_v8, 0.0  ;;  %v1398_v11 = vrot.slane %v1302_v37, 1  ;;  %v1618_v51 = vrot.slane %v1522_v55, 2 }
 0x1f1   : > { %v1837_v2 = vrot.slane %v1742_v27, 2  ;;  %v938_v56 = vmin.f32 %v897_v33, 6.0  ;;  %v2059_v17 = vrot.slane %v10391_v59, 3  ;;  %v2185_v20 = vmul.f32 %v9102_v41, %v10074_v10 }
 0x1f2   : > { %v2590_v5 = vadd.f32 %v2505_v14, %v2367_v32  ;;  %7839 = vmatmul.mubr.f32.gmra.mrb[20].mxu1 %v3113_v26  ;;  %v1399_v24 = vsel %vm1350_vm2, %v1396_v31, %v1398_v11  ;;  %v1619_v7 = vsel %vm1570_vm3, %v1616_v3, %v1618_v51  ;;  %v2409_v23 = vmul.f32 %v9112_v45, %v10165_v36 }
 0x1f3   : > { %v1838_v13 = vsel %vm1570_vm3, %v1835_v42, %v1837_v2  ;;  %v10401_v9 = vmul.f32 %v1159_v12, %v938_v56  ;;  %v1481_v14 = vadd.f32 %v1399_v24, %v1261_v1  ;;  %v2060_v4 = vsel %vm2011_vm4, %v2057_v38, %v2059_v17 }
 0x1f4   : > { %v2814_v30 = vadd.f32 %v2729_v48, %v2590_v5  ;;  %v2283_v22 = vrot.slane %v2185_v20, 4  ;;  %v2506_v8 = vrot.slane %v2409_v23, 4  ;;  %v2632_v37 = vmul.f32 %v9115_v50, %v10165_v36 }
 0x1f5   : > { %v2856_v31 = vmul.f32 %v10369_v21, %v10165_v36  ;;  %v1701_v55 = vadd.f32 %v1619_v7, %v1481_v14  ;;  %v812_v42 = vmul.f32 %v9056_v62, %v9945_v49  ;;  %v1262_v48 = vmul.f32 %v9085_v25, %v9981_v43 }
 0x1f6   : > { %v3038_v3 = vadd.f32 %v2953_v58, %v2814_v30  ;;  %v2284_v1 = vsel %vm2235_vm5, %v2281_v52, %v2283_v22  ;;  %v2507_v38 = vsel %vm2235_vm5, %v2504_v53, %v2506_v8  ;;  %v2730_v27 = vrot.slane %v2632_v37, 5 }
 0x1f7   : > { %v2954_v32 = vrot.slane %v2856_v31, 6  ;;  %v1920_v59 = vadd.f32 %v1838_v13, %v1701_v55  ;;  %v857_v26 = vadd.f32 %v9060_v63, %v812_v42  ;;  %v1303_v58 = vmul.f32 %v9072_v15, %v10029_v34  ;;  %v10440_v42 = vpop.f32.mrb[0].mxu1 }
 0x1f8   : > { %v3078_v33 = vadd.f32 %v9128_v0, %v3038_v3  ;;  %v2731_v5 = vsel %vm2682_vm6, %v2728_v47, %v2730_v27  ;;  %v1523_v43 = vmul.f32 %v9075_v16, %v10029_v34  ;;  %v1743_v52 = vmul.f32 %v9096_v39, %v10123_v61 }
 0x1f9   : > { %v2955_v49 = vsel %vm2906_vm7, %v2952_v28, %v2954_v32  ;;  %v2144_v56 = vadd.f32 %v2060_v4, %v1920_v59  ;;  %v898_v20 = vmax.f32 %v857_v26, 0.0  ;;  %v1400_v12 = vrot.slane %v1303_v58, 1  ;;  %v1164_v4 = vpop.permute.xlu1 %1163 }
 0x1fa   : > { %v3114_v53 = vmax.f32 %v3078_v33, 0.0  ;;  %v1620_v24 = vrot.slane %v1523_v43, 2  ;;  %v1839_v7 = vrot.slane %v1743_v52, 2  ;;  %v10426_v13 = vmul.f32 %v9099_v40, %v10123_v61 }
 0x1fb   : > { %v10430_v47 = vmul.f32 %v9102_v41, %v10123_v61  ;;  %v2368_v28 = vadd.f32 %v2284_v1, %v2144_v56  ;;  %v939_v23 = vmin.f32 %v898_v20, 6.0  ;;  %v1401_v30 = vsel %vm1350_vm2, %v1398_v11, %v1400_v12 }
 0x1fc   : > { %7841 = vmatprep.mubr.f32.mxu1 %v3114_v53  ;;  %v10435_v14 = vmul.f32 %v9112_v45, %v10206_v19  ;;  %v1482_v37 = vadd.f32 %v1401_v30, %v1262_v48  ;;  %v1621_v31 = vsel %vm1570_vm3, %v1618_v51, %v1620_v24  ;;  %v1840_v3 = vsel %vm1570_vm3, %v1837_v2, %v1839_v7  ;;  %v10455_v53 = vpop.f32.mrb[1].mxu1 }
 0x1fd   : > { %v2061_v55 = vrot.slane %v10426_v13, 3  ;;  %v2591_v33 = vadd.f32 %v2507_v38, %v2368_v28  ;;  %v10442_v59 = vmul.f32 %v1164_v4, %v939_v23  ;;  %v2285_v1 = vrot.slane %v10430_v47, 4 }
 0x1fe   : > { %v2508_v11 = vrot.slane %v10435_v14, 4  ;;  %v1702_v26 = vadd.f32 %v1621_v31, %v1482_v37  ;;  %v2633_v48 = vmul.f32 %v9115_v50, %v10206_v19  ;;  %v2857_v51 = vmul.f32 %v10369_v21, %v10206_v19 }
 0x1ff   : > { %v2062_v58 = vsel %vm2011_vm4, %v2059_v17, %v2061_v55  ;;  %v2815_v2 = vadd.f32 %v2731_v5, %v2591_v33  ;;  %v2286_v43 = vsel %vm2235_vm5, %v2283_v22, %v2285_v1  ;;  %v813_v52 = vmul.f32 %v9056_v62, %v9993_v57 }
 0x200   : > { %v2509_v38 = vsel %vm2235_vm5, %v2506_v8, %v2508_v11  ;;  %v1921_v56 = vadd.f32 %v1840_v3, %v1702_v26  ;;  %v2732_v20 = vrot.slane %v2633_v48, 5  ;;  %v2956_v13 = vrot.slane %v2857_v51, 6  ;;  %v1169_v48 = vpop.permute.xlu0 %1168 }
 0x201   : > { %v1263_v17 = vmul.f32 %v9085_v25, %v10029_v34  ;;  %v3039_v47 = vadd.f32 %v2955_v49, %v2815_v2  ;;  %v858_v28 = vadd.f32 %v9060_v63, %v813_v52  ;;  %v1304_v5 = vmul.f32 %v9072_v15, %v10074_v10 }
 0x202   : > { %v10464_v22 = vmul.f32 %v9075_v16, %v10074_v10  ;;  %v2145_v8 = vadd.f32 %v2062_v58, %v1921_v56  ;;  %v2733_v57 = vsel %vm2682_vm6, %v2730_v27, %v2732_v20  ;;  %v2957_v23 = vsel %vm2906_vm7, %v2954_v32, %v2956_v13 }
 0x203   : > { %v10470_v30 = vmul.f32 %v9096_v39, %v10165_v36  ;;  %v3079_v34 = vadd.f32 %v9128_v0, %v3039_v47  ;;  %v899_v49 = vmax.f32 %v858_v28, 0.0  ;;  %v1402_v14 = vrot.slane %v1304_v5, 1 }
 0x204   : > { %v1622_v4 = vrot.slane %v10464_v22, 2  ;;  %v2369_v37 = vadd.f32 %v2286_v43, %v2145_v8  ;;  %v1963_v3 = vmul.f32 %v9099_v40, %v10165_v36  ;;  %v2187_v27 = vmul.f32 %v9102_v41, %v10165_v36 }
 0x205   : > { %v1841_v31 = vrot.slane %v10470_v30, 2  ;;  %v3115_v32 = vmax.f32 %v3079_v34, 0.0  ;;  %v940_v33 = vmin.f32 %v899_v49, 6.0  ;;  %v1403_v26 = vsel %vm1350_vm2, %v1400_v12, %v1402_v14 }
 0x206   : > { %v1623_v58 = vsel %vm1570_vm3, %v1620_v24, %v1622_v4  ;;  %v2592_v51 = vadd.f32 %v2509_v38, %v2369_v37  ;;  %v1483_v2 = vadd.f32 %v1403_v26, %v1263_v17  ;;  %v2063_v43 = vrot.slane %v1963_v3, 3 }
 0x207   : > { %v1842_v52 = vsel %vm1570_vm3, %v1839_v7, %v1841_v31  ;;  %7842 = vmatmul.mubr.f32.gmra.mrb[22].mxu1 %v3115_v32  ;;  %v10482_v56 = vmul.f32 %v1169_v48, %v940_v33  ;;  %v2287_v47 = vrot.slane %v2187_v27, 4  ;;  %v2411_v28 = vmul.f32 %v9112_v45, %v10242_v54 }
 0x208   : > { %v10488_v5 = vmul.f32 %v9115_v50, %v10242_v54  ;;  %v2816_v12 = vadd.f32 %v2733_v57, %v2592_v51  ;;  %v1703_v22 = vadd.f32 %v1623_v58, %v1483_v2  ;;  %v2064_v24 = vsel %vm2011_vm4, %v2061_v55, %v2063_v43 }
 0x209   : > { %v10493_v38 = vmul.f32 %v10369_v21, %v10242_v54  ;;  %v2288_v7 = vsel %vm2235_vm5, %v2285_v1, %v2287_v47  ;;  %v2510_v17 = vrot.slane %v2411_v28, 4  ;;  %v814_v30 = vmul.f32 %v9056_v62, %v10040_v6 }
 0x20a   : > { %v2734_v8 = vrot.slane %v10488_v5, 5  ;;  %v3040_v34 = vadd.f32 %v2957_v23, %v2816_v12  ;;  %v1922_v49 = vadd.f32 %v1842_v52, %v1703_v22  ;;  %v1264_v57 = vmul.f32 %v9085_v25, %v10074_v10  ;;  %v1174_v12 = vpop.permute.xlu1 %1173 }
 0x20b   : > { %v2958_v37 = vrot.slane %v10493_v38, 6  ;;  %v2511_v55 = vsel %vm2235_vm5, %v2508_v11, %v2510_v17  ;;  %v859_v27 = vadd.f32 %v9060_v63, %v814_v30  ;;  %v1305_v1 = vmul.f32 %v9072_v15, %v10123_v61 }
 0x20c   : > { %v2735_v3 = vsel %vm2682_vm6, %v2732_v20, %v2734_v8  ;;  %v3080_v32 = vadd.f32 %v9128_v0, %v3040_v34  ;;  %v2146_v33 = vadd.f32 %v2064_v24, %v1922_v49  ;;  %v1525_v23 = vmul.f32 %v9075_v16, %v10123_v61 }
 0x20d   : > { %v2959_v6 = vsel %vm2906_vm7, %v2956_v13, %v2958_v37  ;;  %v900_v26 = vmax.f32 %v859_v27, 0.0  ;;  %v1404_v58 = vrot.slane %v1305_v1, 1  ;;  %v10513_v10 = vmul.f32 %v9096_v39, %v10206_v19 }
 0x20e   : > { %v10517_v11 = vmul.f32 %v9099_v40, %v10206_v19  ;;  %v3116_v20 = vmax.f32 %v3080_v32, 0.0  ;;  %v2370_v48 = vadd.f32 %v2288_v7, %v2146_v33  ;;  %v1624_v51 = vrot.slane %v1525_v23, 2 }
 0x20f   : > { %v10521_v2 = vmul.f32 %v9102_v41, %v10206_v19  ;;  %v941_v13 = vmin.f32 %v900_v26, 6.0  ;;  %v1405_v52 = vsel %vm1350_vm2, %v1402_v14, %v1404_v58  ;;  %v1843_v28 = vrot.slane %v10513_v10, 2 }
 0x210   : > { %v2065_v5 = vrot.slane %v10517_v11, 3  ;;  %7844 = vmatprep.mubr.f32.mxu1 %v3116_v20  ;;  %v2593_v22 = vadd.f32 %v2511_v55, %v2370_v48  ;;  %v1484_v24 = vadd.f32 %v1405_v52, %v1264_v57  ;;  %v1625_v38 = vsel %vm1570_vm3, %v1622_v4, %v1624_v51 }
 0x211   : > { %v2289_v7 = vrot.slane %v10521_v2, 4  ;;  %v10528_v30 = vmul.f32 %v1174_v12, %v941_v13  ;;  %v1844_v34 = vsel %vm1570_vm3, %v1841_v31, %v1843_v28  ;;  %v2412_v14 = vmul.f32 %v9112_v45, %v10280_v18  ;;  %v10537_v55 = vpop.f32.mrb[2].mxu1 }
 0x212   : > { %v2066_v49 = vsel %vm2011_vm4, %v2063_v43, %v2065_v5  ;;  %v2817_v27 = vadd.f32 %v2735_v3, %v2593_v22  ;;  %v1704_v1 = vadd.f32 %v1625_v38, %v1484_v24  ;;  %v2635_v57 = vmul.f32 %v9115_v50, %v10280_v18  ;;  %v10547_v3 = vpop.f32.mrb[3].mxu1 }
 0x213   : > { %v2290_v32 = vsel %vm2235_vm5, %v2287_v47, %v2289_v7  ;;  %v2512_v4 = vrot.slane %v2412_v14, 4  ;;  %v10541_v33 = vmul.f32 %v10369_v21, %v10280_v18  ;;  %v815_v31 = vmul.f32 %v9056_v62, %v10088_v46 }
 0x214   : > { %v1265_v43 = vmul.f32 %v9085_v25, %v10123_v61  ;;  %v3041_v23 = vadd.f32 %v2959_v6, %v2817_v27  ;;  %v1923_v47 = vadd.f32 %v1844_v34, %v1704_v1  ;;  %v2736_v26 = vrot.slane %v2635_v57, 5  ;;  %v1179_v1 = vpop.permute.xlu0 %1178 }
 0x215   : > { %v10551_v10 = vmul.f32 %v9072_v15, %v10165_v36  ;;  %v2513_v11 = vsel %vm2235_vm5, %v2510_v17, %v2512_v4  ;;  %v2960_v20 = vrot.slane %v10541_v33, 6  ;;  %v860_v48 = vadd.f32 %v9060_v63, %v815_v31 }
 0x216   : > { %v10558_v46 = vmul.f32 %v9075_v16, %v10165_v36  ;;  %v3081_v61 = vadd.f32 %v9128_v0, %v3041_v23  ;;  %v2147_v2 = vadd.f32 %v2066_v49, %v1923_v47  ;;  %v2737_v6 = vsel %vm2682_vm6, %v2734_v8, %v2736_v26 }
 0x217   : > { %v1406_v13 = vrot.slane %v10551_v10, 1  ;;  %v2961_v52 = vsel %vm2906_vm7, %v2958_v37, %v2960_v20  ;;  %v901_v12 = vmax.f32 %v860_v48, 0.0  ;;  %v10567_v22 = vmul.f32 %v9096_v39, %v10242_v54 }
 0x218   : > { %v1626_v17 = vrot.slane %v10558_v46, 2  ;;  %v3117_v24 = vmax.f32 %v3081_v61, 0.0  ;;  %v2371_v38 = vadd.f32 %v2290_v32, %v2147_v2  ;;  %v1965_v49 = vmul.f32 %v9099_v40, %v10242_v54 }
 0x219   : > { %v1407_v34 = vsel %vm1350_vm2, %v1404_v58, %v1406_v13  ;;  %v942_v14 = vmin.f32 %v901_v12, 6.0  ;;  %v1845_v37 = vrot.slane %v10567_v22, 2  ;;  %v2189_v31 = vmul.f32 %v9102_v41, %v10242_v54 }
 0x21a   : > { %v1485_v8 = vadd.f32 %v1407_v34, %v1265_v43  ;;  %v1627_v27 = vsel %vm1570_vm3, %v1624_v51, %v1626_v17  ;;  %7845 = vmatmul.mubr.f32.gmra.mrb[24].mxu1 %v3117_v24  ;;  %v2594_v57 = vadd.f32 %v2513_v11, %v2371_v38  ;;  %v2067_v33 = vrot.slane %v1965_v49, 3 }
 0x21b   : > { %v2413_v32 = vmul.f32 %v9112_v45, %v10320_v44  ;;  %v10578_v58 = vmul.f32 %v1179_v1, %v942_v14  ;;  %v1846_v47 = vsel %vm1570_vm3, %v1843_v28, %v1845_v37  ;;  %v10583_v51 = vmul.f32 %v9115_v50, %v10320_v44 }
 0x21c   : > { %v1705_v23 = vadd.f32 %v1627_v27, %v1485_v8  ;;  %v2818_v43 = vadd.f32 %v2737_v6, %v2594_v57  ;;  %v2068_v10 = vsel %vm2011_vm4, %v2065_v5, %v2067_v33  ;;  %v2291_v11 = vrot.slane %v2189_v31, 4 }
 0x21d   : > { %v2514_v48 = vrot.slane %v2413_v32, 4  ;;  %v10588_v46 = vmul.f32 %v9099_v40, %v10578_v58  ;;  %v10592_v61 = vmul.f32 %v9102_v41, %v10578_v58  ;;  %v2738_v28 = vrot.slane %v10583_v51, 5 }
 0x21e   : > { %v1924_v2 = vadd.f32 %v1846_v47, %v1705_v23  ;;  %v3042_v12 = vadd.f32 %v2961_v52, %v2818_v43  ;;  %v2292_v22 = vsel %vm2235_vm5, %v2289_v7, %v2291_v11  ;;  %v2860_v5 = vmul.f32 %v10369_v21, %v10320_v44 }
 0x21f   : > { %v2515_v6 = vsel %vm2235_vm5, %v2512_v4, %v2514_v48  ;;  %v2739_v34 = vsel %vm2682_vm6, %v2736_v26, %v2738_v28  ;;  %v816_v49 = vmul.f32 %v9056_v62, %v10129_v35  ;;  %v1266_v7 = vmul.f32 %v9085_v25, %v10165_v36 }
 0x220   : > { %v2148_v38 = vadd.f32 %v2068_v10, %v1924_v2  ;;  %v3082_v14 = vadd.f32 %v9128_v0, %v3042_v12  ;;  %v2962_v52 = vrot.slane %v2860_v5, 6  ;;  %v10610_v4 = vmul.f32 %v9072_v15, %v10206_v19 }
 0x221   : > { %v861_v27 = vadd.f32 %v9060_v63, %v816_v49  ;;  %v10615_v1 = vmul.f32 %v9075_v16, %v10206_v19  ;;  %v10619_v35 = vmul.f32 %v9096_v39, %v10280_v18  ;;  %v10625_v31 = vmul.f32 %v9099_v40, %v10280_v18 }
 0x222   : > { %v2372_v8 = vadd.f32 %v2292_v22, %v2148_v38  ;;  %v3118_v26 = vmax.f32 %v3082_v14, 0.0  ;;  %v2963_v57 = vsel %vm2906_vm7, %v2960_v20, %v2962_v52  ;;  %v1408_v36 = vrot.slane %v10610_v4, 1 }
 0x223   : > { %v902_v23 = vmax.f32 %v861_v27, 0.0  ;;  %v1628_v47 = vrot.slane %v10615_v1, 2  ;;  %v1847_v43 = vrot.slane %v10619_v35, 2  ;;  %v2069_v2 = vrot.slane %v10625_v31, 3 }
 0x224   : > { %v2595_v32 = vadd.f32 %v2515_v6, %v2372_v8  ;;  %7847 = vmatprep.mubr.f32.mxu1 %v3118_v26  ;;  %v1409_v10 = vsel %vm1350_vm2, %v1406_v13, %v1408_v36  ;;  %v10635_v20 = vmul.f32 %v9102_v41, %v10280_v18  ;;  %v10639_v12 = vmul.f32 %v9112_v45, %v10360_v29  ;;  %v10641_v22 = vpop.f32.mrb[4].mxu1  ;;  %v1184_v13 = vpop.permute.xlu1 %1183 }
 0x225   : > { %13989 = vst [vmem:[#allocation10_spill] sm:$0xff] %v10641_v22  ;;  %v943_v5 = vmin.f32 %v902_v23, 6.0  ;;  %v1486_v38 = vadd.f32 %v1409_v10, %v1266_v7  ;;  %v1629_v49 = vsel %vm1570_vm3, %v1626_v17, %v1628_v47  ;;  %v10644_v14 = vpop.f32.mrb[5].mxu1  ;;  %v1848_v8 = vsel %vm1570_vm3, %v1845_v37, %v1847_v43 }
 0x226   : > { %v2819_v6 = vadd.f32 %v2739_v34, %v2595_v32  ;;  %v2070_v27 = vsel %vm2011_vm4, %v2067_v33, %v2069_v2  ;;  %v2293_v1 = vrot.slane %v10635_v20, 4  ;;  %v2516_v35 = vrot.slane %v10639_v12, 4 }
 0x227   : > { %v1230_v24 = vmul.f32 %v1184_v13, %v943_v5  ;;  %v1706_v34 = vadd.f32 %v1629_v49, %v1486_v38  ;;  %v10654_v7 = vmul.f32 %v9115_v50, %v10360_v29  ;;  %v10660_v37 = vmul.f32 %v10369_v21, %v10360_v29 }
 0x228   : > { %v3043_v26 = vadd.f32 %v2963_v57, %v2819_v6  ;;  %v2294_v17 = vsel %vm2235_vm5, %v2291_v11, %v2293_v1  ;;  %v2517_v32 = vsel %vm2235_vm5, %v2514_v48, %v2516_v35  ;;  %v817_v33 = vmul.f32 %v9056_v62, %v10182_v60 }
 0x229   : > { %v10666_v57 = vmul.f32 %v9112_v45, %v1230_v24  ;;  %v10669_v10 = vmul.f32 %v9115_v50, %v1230_v24  ;;  %v10672_v20 = vmul.f32 %v10369_v21, %v1230_v24  ;;  %v1925_v11 = vadd.f32 %v1848_v8, %v1706_v34 }
 0x22a   : > { %v3083_v23 = vadd.f32 %v9128_v0, %v3043_v26  ;;  %v2740_v48 = vrot.slane %v10654_v7, 5  ;;  %v13873_v12 = vrot.slane %v10660_v37, 6  ;;  %v862_v6 = vadd.f32 %v9060_v63, %v817_v33 }
 0x22b   : > { %v2149_v49 = vadd.f32 %v2070_v27, %v1925_v11  ;;  %v1267_v63 = vmul.f32 %v9085_v25, %v10206_v19  ;;  %v1308_v26 = vmul.f32 %v9072_v15, %v10242_v54  ;;  %v1528_v27 = vmul.f32 %v9075_v16, %v10242_v54 }
 0x22c   : > { %v3119_v5 = vmax.f32 %v3083_v23, 0.0  ;;  %v2741_v24 = vsel %vm2682_vm6, %v2738_v28, %v2740_v48  ;;  %v2965_v13 = vsel %vm2906_vm7, %v2962_v52, %v13873_v12  ;;  %v903_v8 = vmax.f32 %v862_v6, 0.0  ;;  %v1189_v23 = vpop.permute.xlu0 %1188 }
 0x22d   : > { %v1748_v51 = vmul.f32 %v9096_v39, %v10320_v44  ;;  %v2373_v34 = vadd.f32 %v2294_v17, %v2149_v49  ;;  %v1967_v33 = vmul.f32 %v9099_v40, %v10320_v44  ;;  %v10700_v52 = vmul.f32 %v9102_v41, %v10320_v44 }
 0x22e   : > { %7848 = vmatmul.mubr.f32.gmra.mrb[26].mxu1 %v3119_v5  ;;  %v944_v28 = vmin.f32 %v903_v8, 6.0  ;;  %v1410_v19 = vrot.slane %v1308_v26, 1  ;;  %v1630_v11 = vrot.slane %v1528_v27, 2  ;;  %v10704_v5 = vmul.f32 %v9112_v45, %v10401_v9 }
 0x22f   : > { %v1849_v6 = vrot.slane %v1748_v51, 2  ;;  %v2596_v38 = vadd.f32 %v2517_v32, %v2373_v34  ;;  %v2071_v62 = vrot.slane %v1967_v33, 3  ;;  %v2295_v17 = vrot.slane %v10700_v52, 4 }
 0x230   : > { %v1231_v60 = vmul.f32 %v1189_v23, %v944_v28  ;;  %v1411_v49 = vsel %vm1350_vm2, %v1408_v36, %v1410_v19  ;;  %v1631_v8 = vsel %vm1570_vm3, %v1628_v47, %v1630_v11  ;;  %v2518_v26 = vrot.slane %v10704_v5, 4 }
 0x231   : > { %v1850_v12 = vsel %vm1570_vm3, %v1847_v43, %v1849_v6  ;;  %v2820_v27 = vadd.f32 %v2741_v24, %v2596_v38  ;;  %v1487_v28 = vadd.f32 %v1411_v49, %v1267_v63  ;;  %v2072_v4 = vsel %vm2011_vm4, %v2069_v2, %v2071_v62 }
 0x232   : > { %v10714_v51 = vmul.f32 %v9112_v45, %v1231_v60  ;;  %v10717_v32 = vmul.f32 %v9115_v50, %v1231_v60  ;;  %v10720_v34 = vmul.f32 %v10369_v21, %v1231_v60  ;;  %v2296_v36 = vsel %vm2235_vm5, %v2293_v1, %v2295_v17 }
 0x233   : > { %v2519_v47 = vsel %vm2235_vm5, %v2516_v35, %v2518_v26  ;;  %v3044_v43 = vadd.f32 %v2965_v13, %v2820_v27  ;;  %v1707_v52 = vadd.f32 %v1631_v8, %v1487_v28  ;;  %v2638_v60 = vmul.f32 %v9115_v50, %v10401_v9 }
 0x234   : > { %v2862_v31 = vmul.f32 %v10369_v21, %v10401_v9  ;;  %v1268_v2 = vmul.f32 %v9085_v25, %v10242_v54  ;;  %v1309_v35 = vmul.f32 %v9072_v15, %v10280_v18  ;;  %v1529_v13 = vmul.f32 %v9075_v16, %v10280_v18 }
 0x235   : > { %v3084_v1 = vadd.f32 %v9128_v0, %v3044_v43  ;;  %v1749_v63 = vmul.f32 %v9096_v39, %v10360_v29  ;;  %v1926_v23 = vadd.f32 %v1850_v12, %v1707_v52  ;;  %v2742_v5 = vrot.slane %v2638_v60, 5 }
 0x236   : > { %v2966_v49 = vrot.slane %v2862_v31, 6  ;;  %v1968_v8 = vmul.f32 %v9099_v40, %v10360_v29  ;;  %v1412_v28 = vrot.slane %v1309_v35, 1  ;;  %v1632_v54 = vrot.slane %v1529_v13, 2 }
 0x237   : > { %v3120_v27 = vmax.f32 %v3084_v1, 0.0  ;;  %v1851_v33 = vrot.slane %v1749_v63, 2  ;;  %v2150_v24 = vadd.f32 %v2072_v4, %v1926_v23  ;;  %v2743_v38 = vsel %vm2682_vm6, %v2740_v48, %v2742_v5 }
 0x238   : > { %v10745_v43 = vpop.f32.mrb[6].mxu1  ;;  %v13991_v22 = vrot.slane %v10660_v37, 6  ;;  %v2073_v52 = vrot.slane %v1968_v8, 3  ;;  %v1413_v31 = vsel %vm1350_vm2, %v1410_v19, %v1412_v28  ;;  %v1633_v1 = vsel %vm1570_vm3, %v1630_v11, %v1632_v54 }
 0x239   : > { %13990 = vst [vmem:[#allocation11_spill] sm:$0xff] %v10745_v43  ;;  %v10753_v60 = vpop.f32.mrb[7].mxu1  ;;  %7850 = vmatprep.mubr.f32.mxu1 %v3120_v27  ;;  %v1852_v35 = vsel %vm1570_vm3, %v1849_v6, %v1851_v33  ;;  %v2192_v4 = vmul.f32 %v9102_v41, %v10360_v29  ;;  %v2374_v7 = vadd.f32 %v2296_v36, %v2150_v24 }
 0x23a   : > { %v2967_v12 = vsel %vm2906_vm7, %v13991_v22, %v2966_v49  ;;  %13992 = vst [vmem:[#allocation12_spill] sm:$0xff] %v10753_v60  ;;  %v1488_v13 = vadd.f32 %v1413_v31, %v1268_v2  ;;  %v2074_v48 = vsel %vm2011_vm4, %v2071_v62, %v2073_v52  ;;  %v2416_v22 = vmul.f32 %v9112_v45, %v10442_v59 }
 0x23b   : > { %v2297_v37 = vrot.slane %v2192_v4, 4  ;;  %v2639_v63 = vmul.f32 %v9115_v50, %v10442_v59  ;;  %v2863_v19 = vmul.f32 %v10369_v21, %v10442_v59  ;;  %v1269_v11 = vmul.f32 %v9085_v25, %v10280_v18 }
 0x23c   : > { %v2597_v6 = vadd.f32 %v2519_v47, %v2374_v7  ;;  %v1708_v23 = vadd.f32 %v1633_v1, %v1488_v13  ;;  %v2520_v8 = vrot.slane %v2416_v22, 4  ;;  %v1310_v36 = vmul.f32 %v9072_v15, %v10320_v44 }
 0x23d   : > { %v2298_v62 = vsel %vm2235_vm5, %v2295_v17, %v2297_v37  ;;  %v2744_v24 = vrot.slane %v2639_v63, 5  ;;  %v2968_v2 = vrot.slane %v2863_v19, 6  ;;  %v1530_v27 = vmul.f32 %v9075_v16, %v10320_v44 }
 0x23e   : > { %v2821_v31 = vadd.f32 %v2743_v38, %v2597_v6  ;;  %v1927_v4 = vadd.f32 %v1852_v35, %v1708_v23  ;;  %v2521_v43 = vsel %vm2235_vm5, %v2518_v26, %v2520_v8  ;;  %v1414_v60 = vrot.slane %v1310_v36, 1 }
 0x23f   : > { %v2745_v18 = vsel %vm2682_vm6, %v2742_v5, %v2744_v24  ;;  %v2969_v47 = vsel %vm2906_vm7, %v2966_v49, %v2968_v2  ;;  %v1634_v1 = vrot.slane %v1530_v27, 2  ;;  %v1750_v7 = vmul.f32 %v9096_v39, %v10401_v9 }
 0x240   : > { %v3045_v13 = vadd.f32 %v2967_v12, %v2821_v31  ;;  %v2151_v17 = vadd.f32 %v2074_v48, %v1927_v4  ;;  %v1415_v22 = vsel %vm1350_vm2, %v1412_v28, %v1414_v60  ;;  %v1969_v63 = vmul.f32 %v9099_v40, %v10401_v9 }
 0x241   : > { %v1489_v38 = vadd.f32 %v1415_v22, %v1269_v11  ;;  %v1635_v35 = vsel %vm1570_vm3, %v1632_v54, %v1634_v1  ;;  %v1853_v26 = vrot.slane %v1750_v7, 2  ;;  %v2193_v5 = vmul.f32 %v9102_v41, %v10401_v9 }
 0x242   : > { %v3085_v49 = vadd.f32 %v9128_v0, %v3045_v13  ;;  %v2375_v19 = vadd.f32 %v2298_v62, %v2151_v17  ;;  %v2075_v6 = vrot.slane %v1969_v63, 3  ;;  %v2417_v12 = vmul.f32 %v9112_v45, %v10482_v56 }
 0x243   : > { %v1709_v48 = vadd.f32 %v1635_v35, %v1489_v38  ;;  %v1854_v28 = vsel %vm1570_vm3, %v1851_v33, %v1853_v26  ;;  %v2299_v23 = vrot.slane %v2193_v5, 4  ;;  %v2640_v11 = vmul.f32 %v9115_v50, %v10482_v56 }
 0x244   : > { %v3121_v36 = vmax.f32 %v3085_v49, 0.0  ;;  %v2598_v54 = vadd.f32 %v2521_v43, %v2375_v19  ;;  %v2076_v27 = vsel %vm2011_vm4, %v2073_v52, %v2075_v6  ;;  %v2522_v31 = vrot.slane %v2417_v12, 4 }
 0x245   : > { %v1928_v4 = vadd.f32 %v1854_v28, %v1709_v48  ;;  %v2300_v7 = vsel %vm2235_vm5, %v2297_v37, %v2299_v23  ;;  %v2746_v62 = vrot.slane %v2640_v11, 5  ;;  %v2864_v13 = vmul.f32 %v10369_v21, %v10482_v56 }
 0x246   : > { %7851 = vmatmul.mubr.f32.gmra.mrb[28].mxu1 %v3121_v36  ;;  %v2822_v17 = vadd.f32 %v2745_v18, %v2598_v54  ;;  %v2523_v33 = vsel %vm2235_vm5, %v2520_v8, %v2522_v31  ;;  %v1270_v22 = vmul.f32 %v9085_v25, %v10320_v44  ;;  %v1311_v43 = vmul.f32 %v9072_v15, %v10360_v29 }
 0x247   : > { %v2152_v63 = vadd.f32 %v2076_v27, %v1928_v4  ;;  %v2747_v52 = vsel %vm2682_vm6, %v2744_v24, %v2746_v62  ;;  %v2970_v38 = vrot.slane %v2864_v13, 6  ;;  %v1531_v37 = vmul.f32 %v9075_v16, %v10360_v29 }
 0x248   : > { %v3046_v35 = vadd.f32 %v2969_v47, %v2822_v17  ;;  %v1416_v5 = vrot.slane %v1311_v43, 1  ;;  %v1751_v18 = vmul.f32 %v9096_v39, %v10442_v59  ;;  %v1970_v8 = vmul.f32 %v9099_v40, %v10442_v59 }
 0x249   : > { %v2376_v49 = vadd.f32 %v2300_v7, %v2152_v63  ;;  %v2971_v44 = vsel %vm2906_vm7, %v2968_v2, %v2970_v38  ;;  %v1636_v19 = vrot.slane %v1531_v37, 2  ;;  %v10810_v12 = vmul.f32 %v9102_v41, %v10442_v59 }
 0x24a   : > { %v3086_v24 = vadd.f32 %v9128_v0, %v3046_v35  ;;  %v1417_v48 = vsel %vm1350_vm2, %v1414_v60, %v1416_v5  ;;  %v1855_v47 = vrot.slane %v1751_v18, 2  ;;  %v2077_v28 = vrot.slane %v1970_v8, 3 }
 0x24b   : > { %v2599_v11 = vadd.f32 %v2523_v33, %v2376_v49  ;;  %v1490_v36 = vadd.f32 %v1417_v48, %v1270_v22  ;;  %v1637_v54 = vsel %vm1570_vm3, %v1634_v1, %v1636_v19  ;;  %v2301_v27 = vrot.slane %v10810_v12, 4 }
 0x24c   : > { %v3122_v4 = vmax.f32 %v3086_v24, 0.0  ;;  %v1856_v2 = vsel %vm1570_vm3, %v1853_v26, %v1855_v47  ;;  %v2078_v7 = vsel %vm2011_vm4, %v2075_v6, %v2077_v28  ;;  %v2418_v13 = vmul.f32 %v9112_v45, %v10528_v30 }
 0x24d   : > { %v10820_v17 = vpop.f32.mrb[8].mxu1  ;;  %v2823_v43 = vadd.f32 %v2747_v52, %v2599_v11  ;;  %v1710_v60 = vadd.f32 %v1637_v54, %v1490_v36  ;;  %v2302_v63 = vsel %vm2235_vm5, %v2299_v23, %v2301_v27  ;;  %v2641_v33 = vmul.f32 %v9115_v50, %v10528_v30 }
 0x24e   : > { %v10825_v1 = vpop.f32.mrb[9].mxu1  ;;  %7853 = vmatprep.mubr.f32.mxu1 %v3122_v4  ;;  %v2524_v22 = vrot.slane %v2418_v13, 4  ;;  %v2865_v26 = vmul.f32 %v10369_v21, %v10528_v30  ;;  %v1271_v6 = vmul.f32 %v9085_v25, %v10360_v29  ;;  %v1312_v37 = vmul.f32 %v9072_v15, %v10401_v9 }
 0x24f   : > { %v3047_v52 = vadd.f32 %v2971_v44, %v2823_v43  ;;  %v1929_v35 = vadd.f32 %v1856_v2, %v1710_v60  ;;  %v2748_v18 = vrot.slane %v2641_v33, 5  ;;  %v1532_v23 = vmul.f32 %v9075_v16, %v10401_v9 }
 0x250   : > { %v2525_v8 = vsel %vm2235_vm5, %v2522_v31, %v2524_v22  ;;  %v2972_v49 = vrot.slane %v2865_v26, 6  ;;  %v1418_v12 = vrot.slane %v1312_v37, 1  ;;  %v1752_v24 = vmul.f32 %v9096_v39, %v10482_v56 }
 0x251   : > { %v3087_v48 = vadd.f32 %v9128_v0, %v3047_v52  ;;  %v2153_v11 = vadd.f32 %v2078_v7, %v1929_v35  ;;  %v2749_v29 = vsel %vm2682_vm6, %v2746_v62, %v2748_v18  ;;  %v1638_v36 = vrot.slane %v1532_v23, 2 }
 0x252   : > { %v2973_v44 = vsel %vm2906_vm7, %v2970_v38, %v2972_v49  ;;  %v1419_v54 = vsel %vm1350_vm2, %v1416_v5, %v1418_v12  ;;  %v1857_v4 = vrot.slane %v1752_v24, 2  ;;  %v1971_v2 = vmul.f32 %v9099_v40, %v10482_v56 }
 0x253   : > { %v3123_v31 = vmax.f32 %v3087_v48, 0.0  ;;  %v2377_v13 = vadd.f32 %v2302_v63, %v2153_v11  ;;  %v1491_v43 = vadd.f32 %v1419_v54, %v1271_v6  ;;  %v1639_v60 = vsel %vm1570_vm3, %v1636_v19, %v1638_v36 }
 0x254   : > { %v1858_v33 = vsel %vm1570_vm3, %v1855_v47, %v1857_v4  ;;  %v2079_v26 = vrot.slane %v1971_v2, 3  ;;  %v2195_v62 = vmul.f32 %v9102_v41, %v10482_v56  ;;  %v2419_v38 = vmul.f32 %v9112_v45, %v10578_v58 }
 0x255   : > { %7854 = vmatmul.mubr.f32.gmra.mrb[30].mxu1 %v3123_v31  ;;  %v2600_v5 = vadd.f32 %v2525_v8, %v2377_v13  ;;  %v1711_v7 = vadd.f32 %v1639_v60, %v1491_v43  ;;  %v2642_v37 = vmul.f32 %v9115_v50, %v10578_v58  ;;  %v2866_v63 = vmul.f32 %v10369_v21, %v10578_v58 }
 0x256   : > { %v2080_v19 = vsel %vm2011_vm4, %v2077_v28, %v2079_v26  ;;  %v2303_v6 = vrot.slane %v2195_v62, 4  ;;  %v2526_v47 = vrot.slane %v2419_v38, 4  ;;  %v1272_v52 = vmul.f32 %v9085_v25, %v10401_v9 }
 0x257   : > { %v2824_v56 = vadd.f32 %v2749_v29, %v2600_v5  ;;  %v1930_v35 = vadd.f32 %v1858_v33, %v1711_v7  ;;  %v2750_v23 = vrot.slane %v2642_v37, 5  ;;  %v2974_v45 = vrot.slane %v2866_v63, 6  ;;  %v7193_v63 = vld [vmem:[%s13838_s4 + $0x90] sm:$0xff] }
 0x258   : > { %v2304_v8 = vsel %vm2235_vm5, %v2301_v27, %v2303_v6  ;;  %v2527_v24 = vsel %vm2235_vm5, %v2524_v22, %v2526_v47  ;;  %v1313_v50 = vmul.f32 %v9072_v15, %v10442_v59  ;;  %v1533_v21 = vmul.f32 %v9075_v16, %v10442_v59 }
 0x259   : > { %v3048_v58 = vadd.f32 %v2973_v44, %v2824_v56  ;;  %v2154_v28 = vadd.f32 %v2080_v19, %v1930_v35  ;;  %v2751_v48 = vsel %vm2682_vm6, %v2748_v18, %v2750_v23  ;;  %v2975_v9 = vsel %vm2906_vm7, %v2972_v49, %v2974_v45  ;;  %v7194_v19 = vld [vmem:[%s13838_s4 + $0x98] sm:$0xff] }
 0x25a   : > { %v1420_v11 = vrot.slane %v1313_v50, 1  ;;  %v1640_v29 = vrot.slane %v1533_v21, 2  ;;  %v1753_v54 = vmul.f32 %v9096_v39, %v10528_v30  ;;  %v1972_v27 = vmul.f32 %v9099_v40, %v10528_v30 }
 0x25b   : > { %v3088_v22 = vadd.f32 %v9128_v0, %v3048_v58  ;;  %v2378_v15 = vadd.f32 %v2304_v8, %v2154_v28  ;;  %v2196_v16 = vmul.f32 %v9102_v41, %v10528_v30  ;;  %v13993_v44 = vrot.slane %v10666_v57, 4 }
 0x25c   : > { %v1421_v49 = vsel %vm1350_vm2, %v1418_v12, %v1420_v11  ;;  %v1641_v2 = vsel %vm1570_vm3, %v1638_v36, %v1640_v29  ;;  %v1859_v31 = vrot.slane %v1753_v54, 2  ;;  %v2081_v13 = vrot.slane %v1972_v27, 3  ;;  %v7191_v36 = vld [vmem:[%s13838_s4 + $0x80] sm:$0xff] }
 0x25d   : > { %v2529_v18 = vsel %vm2235_vm5, %v2526_v47, %v13993_v44  ;;  %v3124_v39 = vmax.f32 %v3088_v22, 0.0  ;;  %v2601_v43 = vadd.f32 %v2527_v24, %v2378_v15  ;;  %v1492_v60 = vadd.f32 %v1421_v49, %v1272_v52 }
 0x25e   : > { %v2305_v40 = vrot.slane %v2196_v16, 4  ;;  %v1860_v33 = vsel %vm1570_vm3, %v1857_v4, %v1859_v31  ;;  %v2082_v62 = vsel %vm2011_vm4, %v2079_v26, %v2081_v13  ;;  %v13994_v41 = vrot.slane %v10669_v10, 5  ;;  %v7192_v26 = vld [vmem:[%s13838_s4 + $0x88] sm:$0xff] }
 0x25f   : > { %v13995_v38 = vrot.slane %v10672_v20, 6  ;;  %7856 = vmatprep.mubr.f32.mxu1 %v3124_v39  ;;  %v2825_v5 = vadd.f32 %v2751_v48, %v2601_v43  ;;  %v1712_v7 = vadd.f32 %v1641_v2, %v1492_v60  ;;  %v1273_v4 = vmul.f32 %v9085_v25, %v10442_v59  ;;  %v7196_v20 = vld [vmem:[%s13838_s4 + $0xa8] sm:$0xff] }
 0x260   : > { %v2753_v30 = vsel %vm2682_vm6, %v2750_v23, %v13994_v41  ;;  %v2306_v37 = vsel %vm2235_vm5, %v2303_v6, %v2305_v40  ;;  %v13996_v47 = vrot.slane %v10588_v46, 3  ;;  %v2307_v6 = vrot.slane %v10592_v61, 4 }
 0x261   : > { %v2977_v12 = vsel %vm2906_vm7, %v2974_v45, %v13995_v38  ;;  %v13997_v25 = vrot.slane %v10714_v51, 4  ;;  %v13998_v59 = vmov %v13993_v44  ;;  %v13999_v35 = vrot.slane %v10717_v32, 5  ;;  %v10914_v8 = vpop.f32.mrb[10].mxu1  ;;  %v7198_v44 = vld [vmem:[%s13838_s4 + $0xb8] sm:$0xff] }
 0x262   : > { %v2084_v52 = vsel %vm2011_vm4, %v2081_v13, %v13996_v47  ;;  %v14000_v23 = vmov %v13994_v41  ;;  %v3049_v24 = vadd.f32 %v2975_v9, %v2825_v5  ;;  %v1931_v46 = vadd.f32 %v1860_v33, %v1712_v7  ;;  %v10921_v57 = vpop.f32.mrb[11].mxu1  ;;  %v7195_v9 = vld [vmem:[%s13838_s4 + $0xa0] sm:$0xff]  ;;  %v7200_v33 = vld [vmem:[%s13838_s4 + $0xc8] sm:$0xff] }
 0x263   : > { %v2531_v56 = vsel %vm2235_vm5, %v13998_v59, %v13997_v25  ;;  %v2755_v45 = vsel %vm2682_vm6, %v14000_v23, %v13999_v35  ;;  %v1493_v50 = vadd.f32 %v1420_v11, %v1273_v4  ;;  %v14001_v21 = vrot.slane %v10720_v34, 6  ;;  %v7202_v4 = vld [vmem:[%s13838_s4 + $0xd8] sm:$0xff]  ;;  %v7205_v59 = vld [vmem:[%s13838_s4 + $0xf0] sm:$0xff] }
 0x264   : > { %v14002_v61 = vmov %v13995_v38  ;;  %v2308_v58 = vsel %vm2235_vm5, %v2305_v40, %v2307_v6  ;;  %v8316_v32 = vpack.c.bf16 %v7192_v26, %v7191_v36  ;;  %v8320_v28 = vpack.c.bf16 %v7194_v19, %v7193_v63  ;;  %v7199_v40 = vld [vmem:[%s13838_s4 + $0xc0] sm:$0xff] }
 0x265   : > { %v2979_v51 = vsel %vm2906_vm7, %v14002_v61, %v14001_v21  ;;  %v3089_v10 = vadd.f32 %v9128_v0, %v3049_v24  ;;  %v2155_v48 = vadd.f32 %v2082_v62, %v1931_v46  ;;  %v1713_v54 = vadd.f32 %v1640_v29, %v1493_v50  ;;  %v7197_v29 = vld [vmem:[%s13838_s4 + $0xb0] sm:$0xff]  ;;  %v14004_v38 = vld [vmem:[#allocation6_spill] sm:$0xff] }
 0x266   : > { %8317 = vmatprep.subr.bf16.mxu1 %v8316_v32  ;;  %v8324_v22 = vpack.c.bf16 %v7196_v20, %v7195_v9  ;;  %v8328_v13 = vpack.c.bf16 %v7198_v44, %v7197_v29  ;;  %v14005_v61 = vmov 0.0|0.0   ;;  %v14008_v9 = vld [vmem:[#allocation11_spill] sm:$0xff] }
 0x267   : > { %v3125_v34 = vmax.f32 %v3089_v10, 0.0  ;;  %v2379_v11 = vadd.f32 %v2306_v37, %v2155_v48  ;;  %v1932_v27 = vadd.f32 %v1859_v31, %v1713_v54  ;;  %8319 = vmatpush3.bf16.msra.mxu1 %v8316_v32  ;;  %v10940_v31 = vld [vmem:[%s13837_s3] sm:$0xff]  ;;  %v7201_v37 = vld [vmem:[%s13838_s4 + $0xd0] sm:$0xff] }
 0x268   : > { %8321 = vmatprep.subr.bf16.mxu1 %v8320_v28  ;;  %v10955_v36 = vrot.slane %v10940_v31, %v14004_v38  ;;  %v8336_v47 = vpack.c.bf16 %v7202_v4, %v7201_v37  ;;  %v14007_v32 = vld [vmem:[#allocation10_spill] sm:$0xff] }
 0x269   : > { %7857 = vmatmul.mubr.f32.gmra.mrb[32].mxu1 %v3125_v34  ;;  %v2602_v15 = vadd.f32 %v2529_v18, %v2379_v11  ;;  %v2156_v16 = vadd.f32 %v2084_v52, %v1932_v27  ;;  %v14003_v18 = vld [vmem:[#allocation5_spill] sm:$0xff]  ;;  %v7204_v52 = vld [vmem:[%s13838_s4 + $0xe8] sm:$0xff] }
 0x26a   : > { %v10944_v39 = vrot.slane %v10940_v31, %v14003_v18 }
 0x26b   : > { %v2826_v49 = vadd.f32 %v2753_v30, %v2602_v15  ;;  %v2380_v2 = vadd.f32 %v2308_v58, %v2156_v16  ;;  %8323 = vmatpush3.bf16.msra.mxu1 %v8320_v28  ;;  %v8332_v30 = vpack.c.bf16 %v7200_v33, %v7199_v40 }
 0x26c   : > { %8325 = vmatprep.subr.bf16.mxu1 %v8324_v22  ;;  %v3395_v23 = vmul.f32 %v10944_v39, %v10547_v3  ;;  %v3397_v46 = vmul.f32 %v10944_v39, %v10644_v14  ;;  %v3396_v21 = vmul.f32 %v10537_v55, %v10944_v39  ;;  %v3398_v28 = vmul.f32 %v14007_v32, %v10944_v39 }
 0x26d   : > { %v3050_v43 = vadd.f32 %v2977_v12, %v2826_v49  ;;  %v2603_v60 = vadd.f32 %v2531_v56, %v2380_v2  ;;  %v3393_v12 = vmul.f32 %v10944_v39, %v10455_v53  ;;  %v7203_v53 = vld [vmem:[%s13838_s4 + $0xe0] sm:$0xff]  ;;  %v7206_v56 = vld [vmem:[%s13838_s4 + $0xf8] sm:$0xff]  ;;  %v3401_v48 = vmul.f32 %v10944_v39, %v10825_v1 }
 0x26e   : > { %v8344_v35 = vpack.c.bf16 %v7206_v56, %v7205_v59  ;;  %v3435_v24 = vadd.f32 %v10955_v36, %v3395_v23  ;;  %v3437_v3 = vadd.f32 %v10955_v36, %v3397_v46  ;;  %v3436_v58 = vadd.f32 %v10955_v36, %v3396_v21 }
 0x26f   : > { %v3090_v62 = vadd.f32 %v9128_v0, %v3050_v43  ;;  %v2827_v41 = vadd.f32 %v2755_v45, %v2603_v60  ;;  %8327 = vmatpush3.bf16.msra.mxu1 %v8324_v22  ;;  %v3433_v63 = vadd.f32 %v10955_v36, %v3393_v12  ;;  %v3394_v45 = vmul.f32 %v10440_v42, %v10944_v39 }
 0x270   : > { %8329 = vmatprep.subr.bf16.mxu1 %v8328_v13  ;;  %v3438_v54 = vadd.f32 %v10955_v36, %v3398_v28  ;;  %v3400_v20 = vmul.f32 %v14008_v9, %v10944_v39  ;;  %v3441_v34 = vadd.f32 %v10955_v36, %v3401_v48  ;;  %v3403_v11 = vmul.f32 %v10944_v39, %v10921_v57 }
 0x271   : > { %v3126_v5 = vmax.f32 %v3090_v62, 0.0  ;;  %v3051_v7 = vadd.f32 %v2979_v51, %v2827_v41  ;;  %v3434_v50 = vadd.f32 %v10955_v36, %v3394_v45  ;;  %v14006_v51 = vld [vmem:[#allocation12_spill] sm:$0xff]  ;;  %v3402_v22 = vmul.f32 %v10820_v17, %v10944_v39 }
 0x272   : > { %v3399_v42 = vmul.f32 %v10944_v39, %v14006_v51  ;;  %v3440_v27 = vadd.f32 %v10955_v36, %v3400_v20  ;;  %v3443_v1 = vadd.f32 %v10955_v36, %v3403_v11  ;;  %v3404_v29 = vmul.f32 %v10914_v8, %v10944_v39 }
 0x273   : > { %7859 = vmatprep.mubr.f32.mxu1 %v3126_v5  ;;  %v3091_v26 = vadd.f32 %v9128_v0, %v3051_v7  ;;  %8331 = vmatpush3.bf16.msra.mxu1 %v8328_v13  ;;  %v8340_v0 = vpack.c.bf16 %v7204_v52, %v7203_v53  ;;  %v3442_v16 = vadd.f32 %v10955_v36, %v3402_v22 }
 0x274   : > { %8333 = vmatprep.subr.bf16.mxu1 %v8332_v30  ;;  %v3439_v55 = vadd.f32 %v10955_v36, %v3399_v42  ;;  %v3444_v49 = vadd.f32 %v10955_v36, %v3404_v29 }
 0x275   : > { %v3127_v19 = vmax.f32 %v3091_v26, 0.0 }
 0x276   : > { %v7828_v6 = vpop.f32.mrb[12].mxu1 }
 0x277   : > { %7860 = vmatmul.mubr.f32.gmra.mrb[34].mxu1 %v3127_v19  ;;  %v3270_v25 = vpop.f32.mrb[13].mxu1  ;;  %v3406_v17 = vmul.f32 %v7828_v6, %v10944_v39 }
 0x278   : > { %8335 = vmatpush3.bf16.msra.mxu1 %v8332_v30  ;;  %7894 = vmatprep.mubr.f32.mxu1 %v3433_v63  ;;  %v3405_v15 = vmul.f32 %v10944_v39, %v3270_v25 }
 0x279   : > { %8337 = vmatprep.subr.bf16.mxu1 %v8336_v47  ;;  %v3446_v13 = vadd.f32 %v10955_v36, %v3406_v17 }
 0x27a   : > { %v3445_v57 = vadd.f32 %v10955_v36, %v3405_v15 }
 0x27c   : > { %8339 = vmatpush3.bf16.msra.mxu1 %v8336_v47 }
 0x27d   : > { %8341 = vmatprep.subr.bf16.mxu1 %v8340_v0 }
 0x280   : > { %8343 = vmatpush3.bf16.msra.mxu1 %v8340_v0 }
 0x281   : > { %8345 = vmatprep.subr.bf16.mxu1 %v8344_v35 }
 0x284   : > { %8347 = vmatpush3.bf16.msra.mxu1 %v8344_v35 }
 0x285   : > { %8393 = vmatprep.subr.bf16.mxu1 %v14005_v61 }
 0x287   : > { %7895 = vmatmul.mubr.f32.vlgmr.msra.gmra.mrb[36].mxu1 %v3434_v50 }
 0x288   : > { %7897 = vmatprep.mubr.f32.mxu1 %v3435_v24 }
 0x289   : > { %v7831_v14 = vpop.f32.mrb[14].mxu1 }
 0x28a   : > { %v3280_v10 = vpop.f32.mrb[15].mxu1  ;;  %v3408_v43 = vmul.f32 %v7831_v14, %v10944_v39 }
 0x28b   : > { %7898 = vmatmul.mubr.f32.gmra.mrb[38].mxu1 %v3436_v58  ;;  %v3407_v44 = vmul.f32 %v10944_v39, %v3280_v10 }
 0x28c   : > { %7900 = vmatprep.mubr.f32.mxu1 %v3437_v3  ;;  %v3448_v33 = vadd.f32 %v10955_v36, %v3408_v43 }
 0x28d   : > { %v3447_v2 = vadd.f32 %v10955_v36, %v3407_v44 }
 0x28f   : > { %7901 = vmatmul.mubr.f32.gmra.mrb[40].mxu1 %v3438_v54 }
 0x290   : > { %7903 = vmatprep.mubr.f32.mxu1 %v3439_v55 }
 0x293   : > { %7904 = vmatmul.mubr.f32.gmra.mrb[42].mxu1 %v3440_v27 }
 0x294   : > { %7906 = vmatprep.mubr.f32.mxu1 %v3441_v34 }
 0x297   : > { %7907 = vmatmul.mubr.f32.gmra.mrb[44].mxu1 %v3442_v16 }
 0x298   : > { %7909 = vmatprep.mubr.f32.mxu1 %v3443_v1 }
 0x29b   : > { %7910 = vmatmul.mubr.f32.gmra.mrb[46].mxu1 %v3444_v49 }
 0x29c   : > { %7912 = vmatprep.mubr.f32.mxu1 %v3445_v57 }
 0x29d   : > { %v7834_v60 = vpop.f32.mrb[16].mxu1 }
 0x29e   : > { %v3290_v8 = vpop.f32.mrb[17].mxu1  ;;  %v3410_v62 = vmul.f32 %v7834_v60, %v10944_v39 }
 0x29f   : > { %7913 = vmatmul.mubr.f32.gmra.mrb[48].mxu1 %v3446_v13  ;;  %v3409_v40 = vmul.f32 %v10944_v39, %v3290_v8 }
 0x2a0   : > { %7915 = vmatprep.mubr.f32.mxu1 %v3447_v2  ;;  %v3450_v30 = vadd.f32 %v10955_v36, %v3410_v62  ;;  %v14010_v62 = vld [vmem:[#allocation7_spill] sm:$0xff] }
 0x2a1   : > { %v3449_v41 = vadd.f32 %v10955_v36, %v3409_v40 }
 0x2a3   : > { %7916 = vmatmul.mubr.f32.gmra.mrb[50].mxu1 %v3448_v33  ;;  %v14009_v33 = vmov 0.0  }
 0x2a4   : > { %7918 = vmatprep.mubr.f32.mxu1 %v3449_v41  ;;  %v11065_v41 = vrot.slane %v10940_v31, %v14010_v62 }
 0x2a7   : > { %7919 = vmatmul.mubr.f32.gmra.mrb[52].mxu1 %v3450_v30  ;;  %v14011_v30 = vld [vmem:[#allocation8_spill] sm:$0xff] }
 0x2b1   : > { %v7837_v12 = vpop.f32.mrb[18].mxu1 }
 0x2b2   : > { %v3412_v5 = vmul.f32 %v7837_v12, %v10944_v39  ;;  %v3300_v7 = vpop.f32.mrb[19].mxu1  ;;  %v11069_v12 = vrot.slane %v10940_v31, %v14011_v30 }
 0x2b3   : > { %v3411_v37 = vmul.f32 %v10944_v39, %v3300_v7 }
 0x2b4   : > { %v3452_v26 = vadd.f32 %v10955_v36, %v3412_v5 }
 0x2b5   : > { %v3451_v4 = vadd.f32 %v10955_v36, %v3411_v37 }
 0x2b7   : > { %7921 = vmatprep.mubr.f32.mxu1 %v3451_v4 }
 0x2b8   : > { %7922 = vmatmul.mubr.f32.gmra.mrb[54].mxu1 %v3452_v26  ;;  %v14012_v26 = vld [vmem:[#allocation2_spill] sm:$0xff] }
 0x2c5   : > { %v7840_v63 = vpop.f32.mrb[20].mxu1 }
 0x2c6   : > { %v3414_v19 = vmul.f32 %v7840_v63, %v10944_v39  ;;  %v3310_v47 = vpop.f32.mrb[21].mxu1 }
 0x2c7   : > { %v3413_v53 = vmul.f32 %v10944_v39, %v3310_v47 }
 0x2c8   : > { %v3454_v6 = vadd.f32 %v10955_v36, %v3414_v19 }
 0x2c9   : > { %v3453_v52 = vadd.f32 %v10955_v36, %v3413_v53 }
 0x2cb   : > { %7924 = vmatprep.mubr.f32.mxu1 %v3453_v52  ;;  %v14013_v52 = vld [vmem:[#allocation3_spill] sm:$0xff] }
 0x2cc   : > { %7925 = vmatmul.mubr.f32.gmra.mrb[56].mxu1 %v3454_v6 }
 0x2da   : > { %v7843_v25 = vpop.f32.mrb[22].mxu1 }
 0x2db   : > { %v3416_v0 = vmul.f32 %v7843_v25, %v10944_v39  ;;  %v3320_v59 = vpop.f32.mrb[23].mxu1  ;;  %v14014_v25 = vld [vmem:[#allocation4_spill] sm:$0xff] }
 0x2dc   : > { %v3415_v56 = vmul.f32 %v10944_v39, %v3320_v59 }
 0x2dd   : > { %v3456_v23 = vadd.f32 %v10955_v36, %v3416_v0 }
 0x2de   : > { %v3455_v35 = vadd.f32 %v10955_v36, %v3415_v56 }
 0x2e0   : > { %7927 = vmatprep.mubr.f32.mxu1 %v3455_v35 }
 0x2e1   : > { %7928 = vmatmul.mubr.f32.gmra.mrb[58].mxu1 %v3456_v23 }
 0x2ed   : > { %v7846_v45 = vpop.f32.mrb[24].mxu1 }
 0x2ee   : > { %v3418_v24 = vmul.f32 %v7846_v45, %v10944_v39  ;;  %v3330_v46 = vpop.f32.mrb[25].mxu1 }
 0x2ef   : > { %v3417_v50 = vmul.f32 %v10944_v39, %v3330_v46 }
 0x2f0   : > { %v3458_v3 = vadd.f32 %v10955_v36, %v3418_v24 }
 0x2f1   : > { %v3457_v21 = vadd.f32 %v10955_v36, %v3417_v50 }
 0x2f3   : > { %7930 = vmatprep.mubr.f32.mxu1 %v3457_v21 }
 0x2f4   : > { %7931 = vmatmul.mubr.f32.gmra.mrb[60].mxu1 %v3458_v3 }
 0x301   : > { %v7849_v51 = vpop.f32.mrb[26].mxu1 }
 0x302   : > { %v3420_v42 = vmul.f32 %v7849_v51, %v10944_v39  ;;  %v3340_v58 = vpop.f32.mrb[27].mxu1  ;;  %v14015_v51 = vld [vmem:[#allocation9_spill] sm:$0xff] }
 0x303   : > { %v3419_v32 = vmul.f32 %v10944_v39, %v3340_v58 }
 0x304   : > { %v3460_v14 = vadd.f32 %v10955_v36, %v3420_v42 }
 0x305   : > { %v3459_v28 = vadd.f32 %v10955_v36, %v3419_v32 }
 0x307   : > { %7933 = vmatprep.mubr.f32.mxu1 %v3459_v28 }
 0x308   : > { %7934 = vmatmul.mubr.f32.gmra.mrb[62].mxu1 %v3460_v14  ;;  %v11108_v14 = vrot.slane %v10940_v31, %v14015_v51 }
 0x319   : > { %v7852_v10 = vpop.f32.mrb[28].mxu1 }
 0x31a   : > { %v3422_v55 = vmul.f32 %v7852_v10, %v10944_v39  ;;  %v3350_v48 = vpop.f32.mrb[29].mxu1 }
 0x31b   : > { %v3421_v54 = vmul.f32 %v10944_v39, %v3350_v48 }
 0x31c   : > { %v3462_v20 = vadd.f32 %v10955_v36, %v3422_v55 }
 0x31d   : > { %v3461_v9 = vadd.f32 %v10955_v36, %v3421_v54 }
 0x31f   : > { %7936 = vmatprep.mubr.f32.mxu1 %v3461_v9 }
 0x320   : > { %7937 = vmatmul.mubr.f32.gmra.mrb[64].mxu1 %v3462_v20 }
 0x328   : > { %v7855_v34 = vpop.f32.mrb[30].mxu1 }
 0x329   : > { %v3424_v11 = vmul.f32 %v7855_v34, %v10944_v39  ;;  %v3360_v27 = vpop.f32.mrb[31].mxu1 }
 0x32a   : > { %v3423_v22 = vmul.f32 %v10944_v39, %v3360_v27 }
 0x32b   : > { %v3464_v15 = vadd.f32 %v10955_v36, %v3424_v11 }
 0x32c   : > { %v3463_v1 = vadd.f32 %v10955_v36, %v3423_v22 }
 0x32e   : > { %7939 = vmatprep.mubr.f32.mxu1 %v3463_v1 }
 0x32f   : > { %7940 = vmatmul.mubr.f32.gmra.mrb[66].mxu1 %v3464_v15 }
 0x33c   : > { %v7858_v16 = vpop.f32.mrb[32].mxu1 }
 0x33d   : > { %v3426_v29 = vmul.f32 %v7858_v16, %v10944_v39  ;;  %v3370_v57 = vpop.f32.mrb[33].mxu1 }
 0x33e   : > { %v3425_v44 = vmul.f32 %v10944_v39, %v3370_v57 }
 0x33f   : > { %v3466_v17 = vadd.f32 %v10955_v36, %v3426_v29 }
 0x340   : > { %v3465_v49 = vadd.f32 %v10955_v36, %v3425_v44 }
 0x342   : > { %7942 = vmatprep.mubr.f32.mxu1 %v3465_v49 }
 0x343   : > { %7943 = vmatmul.mubr.f32.gmra.mrb[68].mxu1 %v3466_v17 }
 0x34a   : > { %v7861_v2 = vpop.f32.mrb[34].mxu1 }
 0x34b   : > { %v3428_v13 = vmul.f32 %v7861_v2, %v10944_v39  ;;  %v3380_v43 = vpop.f32.mrb[35].mxu1 }
 0x34c   : > { %v3427_v60 = vmul.f32 %v10944_v39, %v3380_v43 }
 0x34d   : > { %v3468_v40 = vadd.f32 %v10955_v36, %v3428_v13 }
 0x34e   : > { %v3467_v8 = vadd.f32 %v10955_v36, %v3427_v60  ;;  %v7207_v36 = vld [vmem:[%s13836_s2 + $0x10] sm:$0xff] }
 0x34f   : > { %v11078_v63 = vrot.slane %v7207_v36, %v14012_v26  ;;  %v11082_v6 = vrot.slane %v7207_v36, %v14013_v52  ;;  %v11085_v0 = vrot.slane %v7207_v36, %v14014_v25  ;;  %v11089_v35 = vrot.slane %v7207_v36, %v14003_v18 }
 0x350   : > { %7945 = vmatprep.mubr.f32.mxu1 %v3467_v8  ;;  %v11092_v23 = vrot.slane %v7207_v36, %v14004_v38  ;;  %v11096_v50 = vrot.slane %v7207_v36, %v14010_v62  ;;  %v11099_v21 = vrot.slane %v7207_v36, %v14011_v30  ;;  %v11103_v42 = vrot.slane %v7207_v36, %v14015_v51 }
 0x351   : > { %7946 = vmatmul.mubr.f32.gmra.mrb[70].mxu1 %v3468_v40 }
 0x352   : > { %7980 = vmatprep.mubr.msk.f32.mxu1 %vm8614_vm0, %v14009_v33 }
 0x35a   : > { %v7896_v5 = vpop.f32.mrb[36].mxu1 }
 0x35b   : > { %v3736_v39 = vmul.f32 %v7896_v5, %v11065_v41  ;;  %v3552_v7 = vpop.f32.mrb[37].mxu1 }
 0x35c   : > { %v3735_v37 = vmul.f32 %v11065_v41, %v3552_v7 }
 0x35d   : > { %v3776_v4 = vadd.f32 %v11069_v12, %v3736_v39 }
 0x35e   : > { %v3775_v19 = vadd.f32 %v11069_v12, %v3735_v37  ;;  %v7899_v47 = vpop.f32.mrb[38].mxu1 }
 0x35f   : > { %v3812_v53 = vmax.f32 %v3776_v4, 0.0  ;;  %v3738_v59 = vmul.f32 %v7899_v47, %v11065_v41  ;;  %v3562_v56 = vpop.f32.mrb[39].mxu1 }
 0x360   : > { %v3811_v45 = vmax.f32 %v3775_v19, 0.0  ;;  %v3737_v24 = vmul.f32 %v11065_v41, %v3562_v56 }
 0x361   : > { %v3848_v46 = vmin.f32 %v3812_v53, 6.0  ;;  %v3778_v3 = vadd.f32 %v11069_v12, %v3738_v59 }
 0x362   : > { %v3847_v58 = vmin.f32 %v3811_v45, 6.0  ;;  %v3777_v32 = vadd.f32 %v11069_v12, %v3737_v24  ;;  %v7902_v28 = vpop.f32.mrb[40].mxu1 }
 0x363   : > { %v11111_v10 = vmul.f32 %v11078_v63, %v3848_v46  ;;  %v11114_v55 = vmul.f32 %v11082_v6, %v3848_v46  ;;  %v11117_v48 = vmul.f32 %v11085_v0, %v3848_v46  ;;  %v3814_v54 = vmax.f32 %v3778_v3, 0.0  ;;  %v3572_v9 = vpop.f32.mrb[41].mxu1 }
 0x364   : > { %v3890_v20 = vmul.f32 %v11078_v63, %v3847_v58  ;;  %v3925_v34 = vmul.f32 %v11082_v6, %v3847_v58  ;;  %v4118_v11 = vmul.f32 %v11085_v0, %v3847_v58  ;;  %v3813_v27 = vmax.f32 %v3777_v32, 0.0 }
 0x365   : > { %v3990_v31 = vrot.slane %v11114_v55, 1  ;;  %v4183_v22 = vrot.slane %v11117_v48, 2  ;;  %v3850_v1 = vmin.f32 %v3814_v54, 6.0  ;;  %v3740_v15 = vmul.f32 %v7902_v28, %v11065_v41 }
 0x366   : > { %v3989_v16 = vrot.slane %v3925_v34, 1  ;;  %v4182_v29 = vrot.slane %v4118_v11, 2  ;;  %v3849_v57 = vmin.f32 %v3813_v27, 6.0  ;;  %v3739_v44 = vmul.f32 %v11065_v41, %v3572_v9  ;;  %v7905_v49 = vpop.f32.mrb[42].mxu1 }
 0x367   : > { %v11127_v17 = vmul.f32 %v11078_v63, %v3850_v1  ;;  %v11130_v2 = vmul.f32 %v11082_v6, %v3850_v1  ;;  %v11133_v13 = vmul.f32 %v11085_v0, %v3850_v1  ;;  %v11136_v43 = vmul.f32 %v11089_v35, %v3850_v1  ;;  %v3582_v60 = vpop.f32.mrb[43].mxu1 }
 0x368   : > { %v3991_v8 = vsel %vm1350_vm2, %v3989_v16, %v3990_v31  ;;  %v4184_v40 = vsel %vm1570_vm3, %v4182_v29, %v4183_v22  ;;  %v11141_v5 = vmul.f32 %v11092_v23, %v3850_v1  ;;  %v11144_v39 = vmul.f32 %v11096_v50, %v3850_v1 }
 0x369   : > { %v4083_v36 = vadd.f32 %v3991_v8, %v3890_v20  ;;  %v13875_v7 = vrot.slane %v11130_v2, 1  ;;  %v4376_v4 = vrot.slane %v11136_v43, 2  ;;  %v3892_v53 = vmul.f32 %v11078_v63, %v3849_v57 }
 0x36a   : > { %v4569_v19 = vrot.slane %v11141_v5, 3  ;;  %v4762_v47 = vrot.slane %v11144_v39, 4  ;;  %v3927_v59 = vmul.f32 %v11082_v6, %v3849_v57  ;;  %v7908_v56 = vpop.f32.mrb[44].mxu1  ;;  %v11154_v24 = vmul.f32 %v11085_v0, %v3849_v57 }
 0x36b   : > { %v4276_v45 = vadd.f32 %v4184_v40, %v4083_v36  ;;  %v4311_v46 = vmul.f32 %v11089_v35, %v3849_v57  ;;  %v11158_v3 = vmul.f32 %v11092_v23, %v3849_v57  ;;  %v3592_v58 = vpop.f32.mrb[45].mxu1  ;;  %v4697_v28 = vmul.f32 %v11096_v50, %v3849_v57 }
 0x36c   : > { %v3992_v32 = vrot.slane %v3927_v59, 1  ;;  %v3780_v55 = vadd.f32 %v11069_v12, %v3740_v15  ;;  %v3779_v48 = vadd.f32 %v11069_v12, %v3739_v44  ;;  %v13876_v54 = vrot.slane %v11154_v24, 2 }
 0x36d   : > { %v4375_v9 = vrot.slane %v4311_v46, 2  ;;  %v4568_v20 = vrot.slane %v11158_v3, 3  ;;  %v3742_v34 = vmul.f32 %v7905_v49, %v11065_v41  ;;  %v4761_v27 = vrot.slane %v4697_v28, 4 }
 0x36e   : > { %v3995_v11 = vsel %vm1350_vm2, %v3992_v32, %v13875_v7  ;;  %v3816_v1 = vmax.f32 %v3780_v55, 0.0  ;;  %v3815_v16 = vmax.f32 %v3779_v48, 0.0  ;;  %v7911_v29 = vpop.f32.mrb[46].mxu1  ;;  %v3741_v44 = vmul.f32 %v11065_v41, %v3582_v60 }
 0x36f   : > { %v11169_v57 = vadd.f32 %v3995_v11, %v3892_v53  ;;  %v3782_v15 = vadd.f32 %v11069_v12, %v3742_v34  ;;  %v3744_v8 = vmul.f32 %v7908_v56, %v11065_v41  ;;  %v3602_v40 = vpop.f32.mrb[47].mxu1  ;;  %v3743_v59 = vmul.f32 %v11065_v41, %v3592_v58 }
 0x370   : > { %v11174_v36 = vmin.f32 %v3816_v1, 6.0  ;;  %v11176_v49 = vmin.f32 %v3815_v16, 6.0  ;;  %v3746_v46 = vmul.f32 %v7911_v29, %v11065_v41  ;;  %v3781_v28 = vadd.f32 %v11069_v12, %v3741_v44 }
 0x371   : > { %v3818_v3 = vmax.f32 %v3782_v15, 0.0  ;;  %v3784_v53 = vadd.f32 %v11069_v12, %v3744_v8  ;;  %v3745_v55 = vmul.f32 %v11065_v41, %v3602_v40  ;;  %v3783_v60 = vadd.f32 %v11069_v12, %v3743_v59 }
 0x372   : > { %v3786_v56 = vadd.f32 %v11069_v12, %v3746_v46  ;;  %v7914_v48 = vpop.f32.mrb[48].mxu1  ;;  %v3993_v34 = vsel %vm1350_vm2, %v3990_v31, %v3992_v32  ;;  %v4186_v58 = vsel %vm1570_vm3, %v4183_v22, %v13876_v54  ;;  %v3817_v1 = vmax.f32 %v3781_v28, 0.0 }
 0x373   : > { %v11189_v11 = vmin.f32 %v3818_v3, 6.0  ;;  %v3820_v16 = vmax.f32 %v3784_v53, 0.0  ;;  %v3785_v29 = vadd.f32 %v11069_v12, %v3745_v55  ;;  %v3612_v15 = vpop.f32.mrb[49].mxu1  ;;  %v3819_v44 = vmax.f32 %v3783_v60, 0.0 }
 0x374   : > { %v3822_v8 = vmax.f32 %v3786_v56, 0.0  ;;  %v3748_v40 = vmul.f32 %v7914_v48, %v11065_v41  ;;  %v3747_v59 = vmul.f32 %v11065_v41, %v3612_v15  ;;  %v11194_v46 = vmin.f32 %v3817_v1, 6.0 }
 0x375   : > { %v11196_v31 = vmin.f32 %v3820_v16, 6.0  ;;  %v3821_v32 = vmax.f32 %v3785_v29, 0.0  ;;  %v4084_v22 = vadd.f32 %v3993_v34, %v11111_v10  ;;  %v11199_v3 = vmin.f32 %v3819_v44, 6.0 }
 0x376   : > { %v11201_v28 = vmin.f32 %v3822_v8, 6.0  ;;  %v3788_v53 = vadd.f32 %v11069_v12, %v3748_v40  ;;  %v3787_v55 = vadd.f32 %v11069_v12, %v3747_v59  ;;  %v7917_v60 = vpop.f32.mrb[50].mxu1  ;;  %v11209_v1 = vmul.f32 %v11089_v35, %v11176_v49 }
 0x377   : > { %v11205_v56 = vmin.f32 %v3821_v32, 6.0  ;;  %v4277_v48 = vadd.f32 %v4186_v58, %v4084_v22  ;;  %v4377_v10 = vsel %vm1570_vm3, %v4375_v9, %v4376_v4  ;;  %v3622_v34 = vpop.f32.mrb[51].mxu1  ;;  %v11216_v44 = vmul.f32 %v11092_v23, %v11176_v49 }
 0x378   : > { %v3824_v16 = vmax.f32 %v3788_v53, 0.0  ;;  %v3823_v29 = vmax.f32 %v3787_v55, 0.0  ;;  %v4469_v15 = vadd.f32 %v4377_v10, %v4276_v45  ;;  %v13874_v8 = vrot.slane %v11209_v1, 2 }
 0x379   : > { %v4570_v58 = vsel %vm2011_vm4, %v4568_v20, %v4569_v19  ;;  %v11224_v40 = vmul.f32 %v11096_v50, %v11176_v49  ;;  %v4763_v9 = vsel %vm2235_vm5, %v4761_v27, %v4762_v47  ;;  %v13878_v32 = vrot.slane %v11216_v44, 3 }
 0x37a   : > { %v11229_v59 = vmin.f32 %v3824_v16, 6.0  ;;  %v11231_v45 = vmin.f32 %v3823_v29, 6.0  ;;  %v4662_v22 = vadd.f32 %v4570_v58, %v4469_v15  ;;  %v11234_v53 = vpop.f32.mrb[52].mxu1  ;;  %v4379_v20 = vsel %vm1570_vm3, %v4376_v4, %v13874_v8  ;;  %v11251_v29 = vld [vmem:[%s13836_s2 + $0x18] ss:$0 sm:$0xff] }
 0x37b   : > { %v13877_v55 = vrot.slane %v11224_v40, 4  ;;  %v4890_v27 = vmul.f32 %v11099_v21, %v11176_v49  ;;  %v4891_v10 = vmul.f32 %v11099_v21, %v11174_v36  ;;  %v11246_v16 = vpop.f32.mrb[53].mxu1  ;;  %v4470_v15 = vadd.f32 %v4379_v20, %v4277_v48 }
 0x37c   : > { %v4572_v43 = vsel %vm2011_vm4, %v4569_v19, %v13878_v32  ;;  %v4855_v4 = vadd.f32 %v4763_v9, %v4662_v22  ;;  %v11260_v58 = vmul.f32 %v11099_v21, %v11194_v46  ;;  %v5083_v48 = vmul.f32 %v11103_v42, %v11176_v49 }
 0x37d   : > { %v4765_v8 = vsel %vm2235_vm5, %v4762_v47, %v13877_v55  ;;  %v4954_v7 = vrot.slane %v4890_v27, 4  ;;  %v4955_v54 = vrot.slane %v4891_v10, 4  ;;  %v4663_v20 = vadd.f32 %v4572_v43, %v4470_v15 }
 0x37e   : > { %v4957_v5 = vrot.slane %v11260_v58, 4  ;;  %v5084_v19 = vmul.f32 %v11103_v42, %v11174_v36  ;;  %v11274_v9 = vmul.f32 %v11103_v42, %v11194_v46  ;;  %v5147_v39 = vrot.slane %v5083_v48, 5 }
 0x37f   : > { %v4956_v22 = vsel %vm2235_vm5, %v4954_v7, %v4955_v54  ;;  %v5276_v47 = vmul.f32 %v11251_v29, %v11176_v49  ;;  %v5277_v27 = vmul.f32 %v11251_v29, %v11174_v36  ;;  %v4856_v10 = vadd.f32 %v4765_v8, %v4663_v20 }
 0x380   : > { %v4958_v15 = vsel %vm2235_vm5, %v4955_v54, %v4957_v5  ;;  %v5048_v43 = vadd.f32 %v4956_v22, %v4855_v4  ;;  %v5148_v55 = vrot.slane %v5084_v19, 5  ;;  %v13886_v32 = vrot.slane %v11274_v9, 5 }
 0x381   : > { %v11287_v37 = vmul.f32 %v11251_v29, %v11194_v46  ;;  %v5340_v7 = vrot.slane %v5276_v47, 6  ;;  %v5341_v48 = vrot.slane %v5277_v27, 6  ;;  %v5049_v51 = vadd.f32 %v4958_v15, %v4856_v10 }
 0x382   : > { %v5149_v30 = vsel %vm2682_vm6, %v5147_v39, %v5148_v55  ;;  %v3750_v62 = vmul.f32 %v7917_v60, %v11065_v41  ;;  %v3749_v8 = vmul.f32 %v11065_v41, %v3622_v34  ;;  %v5151_v54 = vsel %vm2682_vm6, %v5148_v55, %v13886_v32 }
 0x383   : > { %v5241_v4 = vadd.f32 %v5149_v30, %v5048_v43  ;;  %v5342_v20 = vsel %vm2906_vm7, %v5340_v7, %v5341_v48  ;;  %v13882_v19 = vrot.slane %v11287_v37, 6  ;;  %v5242_v22 = vadd.f32 %v5151_v54, %v5049_v51 }
 0x384   : > { %v3790_v47 = vadd.f32 %v11069_v12, %v3750_v62  ;;  %v3789_v27 = vadd.f32 %v11069_v12, %v3749_v8  ;;  %v11301_v39 = vmul.f32 %v11082_v6, %v11176_v49  ;;  %v11308_v30 = vmul.f32 %v11085_v0, %v11176_v49 }
 0x385   : > { %v5344_v60 = vsel %vm2906_vm7, %v5341_v48, %v13882_v19  ;;  %v5434_v34 = vadd.f32 %v5342_v20, %v5241_v4  ;;  %v14016_v55 = vrot.slane %v11133_v13, 2  ;;  %v14017_v51 = vrot.slane %v11154_v24, 2 }
 0x386   : > { %v5435_v10 = vadd.f32 %v5344_v60, %v5242_v22  ;;  %v3826_v15 = vmax.f32 %v3790_v47, 0.0  ;;  %v3825_v43 = vmax.f32 %v3789_v27, 0.0  ;;  %v13885_v7 = vrot.slane %v11301_v39, 1 }
 0x387   : > { %v4188_v62 = vsel %vm1570_vm3, %v14017_v51, %v14016_v55  ;;  %v5469_v8 = vadd.f32 %v11108_v14, %v5434_v34  ;;  %v13884_v48 = vrot.slane %v11308_v30, 2  ;;  %v4314_v4 = vmul.f32 %v11089_v35, %v11174_v36 }
 0x388   : > { %v4278_v54 = vadd.f32 %v4188_v62, %v11169_v57  ;;  %v5470_v20 = vadd.f32 %v11108_v14, %v5435_v10  ;;  %v11322_v19 = vmin.f32 %v3826_v15, 6.0  ;;  %v11324_v24 = vmin.f32 %v3825_v43, 6.0 }
 0x389   : > { %v14018_v22 = vrot.slane %v11130_v2, 1  ;;  %v14019_v57 = vmov %v14016_v55  ;;  %v11339_v34 = vmul.f32 %v11089_v35, %v11194_v46  ;;  %v4380_v55 = vrot.slane %v4314_v4, 2 }
 0x38a   : > { %v4190_v60 = vsel %vm1570_vm3, %v14019_v57, %v13884_v48  ;;  %v8349_v51 = vpack.c.bf16 %v5470_v20, %v5469_v8  ;;  %v4507_v62 = vmul.f32 %v11092_v23, %v11174_v36  ;;  %v11345_v2 = vmul.f32 %v11092_v23, %v11194_v46 }
 0x38b   : > { %v3997_v47 = vsel %vm1350_vm2, %v14018_v22, %v13885_v7  ;;  %v14020_v13 = vrot.slane %v11209_v1, 2  ;;  %v13883_v43 = vrot.slane %v11339_v34, 2  ;;  %v11355_v8 = vmul.f32 %v11096_v50, %v11194_v46  ;;  %v11358_v57 = vpop.f32.mrb[54].mxu1 }
 0x38c   : > { %v4086_v27 = vadd.f32 %v3997_v47, %v11127_v17  ;;  %v4700_v17 = vmul.f32 %v11096_v50, %v11174_v36  ;;  %8350 = vmatpush1.bf16.msra.mxu0 %v8349_v51  ;;  %v4573_v20 = vrot.slane %v4507_v62, 3  ;;  %v4575_v22 = vrot.slane %v11345_v2, 3  ;;  %v11371_v51 = vpop.f32.mrb[55].mxu1 }
 0x38d   : > { %v4381_v15 = vsel %vm1570_vm3, %v14020_v13, %v4380_v55  ;;  %8351 = vmatprep.subr.bf16.mxu0 %v14005_v61  ;;  %v4383_v1 = vsel %vm1570_vm3, %v4380_v55, %v13883_v43  ;;  %v3752_v58 = vmul.f32 %v11234_v53, %v11065_v41 }
 0x38e   : > { %v4279_v10 = vadd.f32 %v4190_v60, %v4086_v27  ;;  %v4471_v4 = vadd.f32 %v4381_v15, %v4278_v54  ;;  %v4766_v47 = vrot.slane %v4700_v17, 4  ;;  %v13887_v27 = vrot.slane %v11355_v8, 4 }
 0x38f   : > { %v4893_v60 = vmul.f32 %v11099_v21, %v11189_v11  ;;  %v11369_v54 = vmul.f32 %v11099_v21, %v11199_v3  ;;  %v14021_v17 = vrot.slane %v11216_v44, 3  ;;  %v4576_v55 = vsel %vm2011_vm4, %v4573_v20, %v4575_v22 }
 0x390   : > { %v4472_v62 = vadd.f32 %v4383_v1, %v4279_v10  ;;  %v14022_v15 = vrot.slane %v11224_v40, 4  ;;  %v4769_v7 = vsel %vm2235_vm5, %v4766_v47, %v13887_v27  ;;  %v5086_v44 = vmul.f32 %v11103_v42, %v11189_v11 }
 0x391   : > { %v4574_v13 = vsel %vm2011_vm4, %v14021_v17, %v4573_v20  ;;  %v4959_v32 = vrot.slane %v4893_v60, 4  ;;  %v13888_v10 = vrot.slane %v11369_v54, 4  ;;  %v11390_v17 = vmul.f32 %v11103_v42, %v11199_v3 }
 0x392   : > { %v4767_v43 = vsel %vm2235_vm5, %v14022_v15, %v4766_v47  ;;  %v4664_v48 = vadd.f32 %v4574_v13, %v4471_v4  ;;  %v4665_v1 = vadd.f32 %v4576_v55, %v4472_v62  ;;  %v5279_v40 = vmul.f32 %v11251_v29, %v11189_v11 }
 0x393   : > { %v4960_v4 = vsel %vm2235_vm5, %v4957_v5, %v4959_v32  ;;  %v4962_v47 = vsel %vm2235_vm5, %v4959_v32, %v13888_v10  ;;  %v11402_v60 = vmul.f32 %v11251_v29, %v11199_v3  ;;  %v5152_v13 = vrot.slane %v5086_v44, 5 }
 0x394   : > { %v4857_v20 = vadd.f32 %v4767_v43, %v4664_v48  ;;  %v4858_v62 = vadd.f32 %v4769_v7, %v4665_v1  ;;  %v5154_v55 = vrot.slane %v11390_v17, 5  ;;  %v5345_v15 = vrot.slane %v5279_v40, 6 }
 0x395   : > { %v13892_v48 = vrot.slane %v11402_v60, 6  ;;  %v3751_v5 = vmul.f32 %v11065_v41, %v11246_v16  ;;  %v14023_v32 = vrot.slane %v11274_v9, 5  ;;  %v14024_v1 = vrot.slane %v11287_v37, 6 }
 0x396   : > { %v5050_v27 = vadd.f32 %v4960_v4, %v4857_v20  ;;  %v5051_v43 = vadd.f32 %v4962_v47, %v4858_v62  ;;  %v5155_v7 = vsel %vm2682_vm6, %v5152_v13, %v5154_v55  ;;  %v3792_v16 = vadd.f32 %v11069_v12, %v3752_v58 }
 0x397   : > { %v5153_v10 = vsel %vm2682_vm6, %v14023_v32, %v5152_v13  ;;  %v5346_v44 = vsel %vm2906_vm7, %v14024_v1, %v5345_v15  ;;  %v5348_v53 = vsel %vm2906_vm7, %v5345_v15, %v13892_v48  ;;  %v3791_v20 = vadd.f32 %v11069_v12, %v3751_v5 }
 0x398   : > { %v5243_v40 = vadd.f32 %v5153_v10, %v5050_v27  ;;  %v5244_v9 = vadd.f32 %v5155_v7, %v5051_v43  ;;  %v3894_v4 = vmul.f32 %v11078_v63, %v11176_v49  ;;  %v3895_v47 = vmul.f32 %v11078_v63, %v11174_v36 }
 0x399   : > { %v3930_v37 = vmul.f32 %v11082_v6, %v11174_v36  ;;  %v3828_v27 = vmax.f32 %v3792_v16, 0.0  ;;  %v3827_v10 = vmax.f32 %v3791_v20, 0.0  ;;  %v11432_v13 = vmul.f32 %v11082_v6, %v11194_v46 }
 0x39a   : > { %v5436_v62 = vadd.f32 %v5346_v44, %v5243_v40  ;;  %v5437_v15 = vadd.f32 %v5348_v53, %v5244_v9  ;;  %v4123_v5 = vmul.f32 %v11085_v0, %v11174_v36  ;;  %v11438_v49 = vmul.f32 %v11085_v0, %v11194_v46 }
 0x39b   : > { %v3998_v58 = vrot.slane %v3930_v37, 1  ;;  %v11441_v32 = vmin.f32 %v3828_v27, 6.0  ;;  %v11443_v7 = vmin.f32 %v3827_v10, 6.0  ;;  %v13889_v1 = vrot.slane %v11432_v13, 1 }
 0x39c   : > { %v5471_v43 = vadd.f32 %v11108_v14, %v5436_v62  ;;  %v5472_v44 = vadd.f32 %v11108_v14, %v5437_v15  ;;  %v14025_v40 = vrot.slane %v11301_v39, 1  ;;  %v4191_v16 = vrot.slane %v4123_v5, 2 }
 0x39d   : > { %v13891_v36 = vrot.slane %v11438_v49, 2  ;;  %v4001_v20 = vsel %vm1350_vm2, %v3998_v58, %v13889_v1  ;;  %v4316_v37 = vmul.f32 %v11089_v35, %v11189_v11  ;;  %v11458_v62 = vmul.f32 %v11089_v35, %v11199_v3 }
 0x39e   : > { %v3999_v53 = vsel %vm1350_vm2, %v14025_v40, %v3998_v58  ;;  %v8352_v27 = vpack.c.bf16 %v5472_v44, %v5471_v43  ;;  %v4088_v10 = vadd.f32 %v4001_v20, %v3895_v47  ;;  %v14026_v39 = vrot.slane %v11308_v30, 2 }
 0x39f   : > { %v4087_v9 = vadd.f32 %v3999_v53, %v3894_v4  ;;  %v4194_v5 = vsel %vm1570_vm3, %v4191_v16, %v13891_v36  ;;  %v4384_v58 = vrot.slane %v4316_v37, 2  ;;  %v13890_v4 = vrot.slane %v11458_v62, 2 }
 0x3a0   : > { %v4192_v15 = vsel %vm1570_vm3, %v14026_v39, %v4191_v16  ;;  %v4509_v53 = vmul.f32 %v11092_v23, %v11189_v11  ;;  %8353 = vmatpush1.bf16.msra.mxu0 %v8352_v27  ;;  %v4281_v1 = vadd.f32 %v4194_v5, %v4088_v10  ;;  %v11471_v47 = vmul.f32 %v11092_v23, %v11199_v3  ;;  %v11489_v5 = vpop.f32.mrb[56].mxu1 }
 0x3a1   : > { %v4280_v40 = vadd.f32 %v4192_v15, %v4087_v9  ;;  %v4702_v30 = vmul.f32 %v11096_v50, %v11189_v11  ;;  %v11477_v43 = vmul.f32 %v11096_v50, %v11199_v3  ;;  %8354 = vmatprep.subr.bf16.mxu0 %v14005_v61  ;;  %v14027_v44 = vrot.slane %v11339_v34, 2 }
 0x3a2   : > { %v4387_v20 = vsel %vm1570_vm3, %v4384_v58, %v13890_v4  ;;  %v4577_v9 = vrot.slane %v4509_v53, 3  ;;  %v4895_v37 = vmul.f32 %v11099_v21, %v11196_v31  ;;  %v4579_v39 = vrot.slane %v11471_v47, 3  ;;  %v11499_v4 = vpop.f32.mrb[57].mxu1 }
 0x3a3   : > { %v4385_v16 = vsel %vm1570_vm3, %v14027_v44, %v4384_v58  ;;  %v4474_v10 = vadd.f32 %v4387_v20, %v4281_v1  ;;  %v4770_v15 = vrot.slane %v4702_v30, 4  ;;  %v13897_v44 = vrot.slane %v11477_v43, 4 }
 0x3a4   : > { %v4473_v27 = vadd.f32 %v4385_v16, %v4280_v40  ;;  %v4578_v34 = vsel %vm2011_vm4, %v4575_v22, %v4577_v9  ;;  %v11497_v58 = vmul.f32 %v11099_v21, %v11205_v56  ;;  %v4963_v53 = vrot.slane %v4895_v37, 4 }
 0x3a5   : > { %v4580_v1 = vsel %vm2011_vm4, %v4577_v9, %v4579_v39  ;;  %v14028_v30 = vrot.slane %v11355_v8, 4  ;;  %v5088_v22 = vmul.f32 %v11103_v42, %v11196_v31  ;;  %v4773_v20 = vsel %vm2235_vm5, %v4770_v15, %v13897_v44 }
 0x3a6   : > { %v4666_v40 = vadd.f32 %v4578_v34, %v4473_v27  ;;  %v4667_v16 = vadd.f32 %v4580_v1, %v4474_v10  ;;  %v14029_v37 = vrot.slane %v11369_v54, 4  ;;  %v13896_v48 = vrot.slane %v11497_v58, 4 }
 0x3a7   : > { %v4771_v2 = vsel %vm2235_vm5, %v14028_v30, %v4770_v15  ;;  %v11518_v8 = vmul.f32 %v11103_v42, %v11205_v56  ;;  %v5156_v27 = vrot.slane %v5088_v22, 5  ;;  %v5281_v34 = vmul.f32 %v11251_v29, %v11196_v31 }
 0x3a8   : > { %v4964_v36 = vsel %vm2235_vm5, %v14029_v37, %v4963_v53  ;;  %v4859_v9 = vadd.f32 %v4771_v2, %v4666_v40  ;;  %v4860_v10 = vadd.f32 %v4773_v20, %v4667_v16  ;;  %v4966_v15 = vsel %vm2235_vm5, %v4963_v53, %v13896_v48 }
 0x3a9   : > { %v11527_v54 = vmul.f32 %v11251_v29, %v11205_v56  ;;  %v3754_v1 = vmul.f32 %v11358_v57, %v11065_v41  ;;  %v5157_v30 = vsel %vm2682_vm6, %v5154_v55, %v5156_v27  ;;  %v13894_v2 = vrot.slane %v11518_v8, 5 }
 0x3aa   : > { %v5052_v40 = vadd.f32 %v4964_v36, %v4859_v9  ;;  %v5349_v22 = vrot.slane %v5281_v34, 6  ;;  %v5053_v16 = vadd.f32 %v4966_v15, %v4860_v10  ;;  %v3753_v37 = vmul.f32 %v11065_v41, %v11371_v51 }
 0x3ab   : > { %v13893_v20 = vrot.slane %v11527_v54, 6  ;;  %v3794_v53 = vadd.f32 %v11069_v12, %v3754_v1  ;;  %v5159_v57 = vsel %vm2682_vm6, %v5156_v27, %v13894_v2  ;;  %v14030_v17 = vrot.slane %v11402_v60, 6 }
 0x3ac   : > { %v5245_v36 = vadd.f32 %v5157_v30, %v5052_v40  ;;  %v3896_v9 = vmul.f32 %v11078_v63, %v11194_v46  ;;  %v5246_v34 = vadd.f32 %v5159_v57, %v5053_v16  ;;  %v3793_v51 = vadd.f32 %v11069_v12, %v3753_v37 }
 0x3ad   : > { %v5350_v55 = vsel %vm2906_vm7, %v14030_v17, %v5349_v22  ;;  %v5352_v10 = vsel %vm2906_vm7, %v5349_v22, %v13893_v20  ;;  %v3830_v15 = vmax.f32 %v3794_v53, 0.0  ;;  %v3897_v27 = vmul.f32 %v11078_v63, %v11189_v11 }
 0x3ae   : > { %v5438_v1 = vadd.f32 %v5350_v55, %v5245_v36  ;;  %v3932_v60 = vmul.f32 %v11082_v6, %v11189_v11  ;;  %v11557_v40 = vmul.f32 %v11082_v6, %v11199_v3  ;;  %v5439_v46 = vadd.f32 %v5352_v10, %v5246_v34 }
 0x3af   : > { %v11559_v30 = vmin.f32 %v3830_v15, 6.0  ;;  %v3829_v16 = vmax.f32 %v3793_v51, 0.0  ;;  %v4125_v22 = vmul.f32 %v11085_v0, %v11189_v11  ;;  %v11567_v36 = vmul.f32 %v11085_v0, %v11199_v3 }
 0x3b0   : > { %v5473_v53 = vadd.f32 %v11108_v14, %v5438_v1  ;;  %v4002_v37 = vrot.slane %v3932_v60, 1  ;;  %v13895_v57 = vrot.slane %v11557_v40, 1  ;;  %v5474_v17 = vadd.f32 %v11108_v14, %v5439_v46 }
 0x3b1   : > { %v11570_v55 = vmin.f32 %v3829_v16, 6.0  ;;  %v4195_v34 = vrot.slane %v4125_v22, 2  ;;  %v4318_v10 = vmul.f32 %v11089_v35, %v11196_v31  ;;  %v14031_v15 = vrot.slane %v11432_v13, 1 }
 0x3b2   : > { %v4005_v51 = vsel %vm1350_vm2, %v4002_v37, %v13895_v57  ;;  %v4197_v1 = vrot.slane %v11567_v36, 2  ;;  %v11583_v60 = vmul.f32 %v11089_v35, %v11205_v56  ;;  %v8355_v46 = vpack.c.bf16 %v5474_v17, %v5473_v53 }
 0x3b3   : > { %v4003_v11 = vsel %vm1350_vm2, %v14031_v15, %v4002_v37  ;;  %v4090_v22 = vadd.f32 %v4005_v51, %v3897_v27  ;;  %v14032_v20 = vrot.slane %v11438_v49, 2  ;;  %v4388_v15 = vrot.slane %v4318_v10, 2 }
 0x3b4   : > { %v4089_v16 = vadd.f32 %v4003_v11, %v3896_v9  ;;  %v4198_v13 = vsel %vm1570_vm3, %v4195_v34, %v4197_v1  ;;  %v4390_v37 = vrot.slane %v11583_v60, 2  ;;  %v4511_v57 = vmul.f32 %v11092_v23, %v11196_v31  ;;  %8356 = vmatpush1.bf16.msra.mxu0 %v8355_v46 }
 0x3b5   : > { %v4196_v2 = vsel %vm1570_vm3, %v14032_v20, %v4195_v34  ;;  %v4283_v44 = vadd.f32 %v4198_v13, %v4090_v22  ;;  %v11596_v9 = vmul.f32 %v11092_v23, %v11205_v56  ;;  %v4704_v49 = vmul.f32 %v11096_v50, %v11196_v31  ;;  %8357 = vmatprep.subr.bf16.mxu0 %v14005_v61  ;;  %v11630_v13 = vpop.f32.mrb[58].mxu1 }
 0x3b6   : > { %v4282_v48 = vadd.f32 %v4196_v2, %v4089_v16  ;;  %v14033_v20 = vrot.slane %v11458_v62, 2  ;;  %v4391_v53 = vsel %vm1570_vm3, %v4388_v15, %v4390_v37  ;;  %v4581_v17 = vrot.slane %v4511_v57, 3 }
 0x3b7   : > { %v11609_v2 = vmul.f32 %v11096_v50, %v11205_v56  ;;  %v4476_v10 = vadd.f32 %v4391_v53, %v4283_v44  ;;  %v4583_v11 = vrot.slane %v11596_v9, 3  ;;  %v4774_v51 = vrot.slane %v4704_v49, 4  ;;  %v11636_v53 = vpop.f32.mrb[59].mxu1 }
 0x3b8   : > { %v4389_v27 = vsel %vm1570_vm3, %v14033_v20, %v4388_v15  ;;  %v4582_v62 = vsel %vm2011_vm4, %v4579_v39, %v4581_v17  ;;  %v4897_v16 = vmul.f32 %v11099_v21, %v11201_v28  ;;  %v11620_v57 = vmul.f32 %v11099_v21, %v11231_v45 }
 0x3b9   : > { %v4475_v34 = vadd.f32 %v4389_v27, %v4282_v48  ;;  %v13898_v46 = vrot.slane %v11609_v2, 4  ;;  %v4584_v48 = vsel %vm2011_vm4, %v4581_v17, %v4583_v11  ;;  %v14034_v22 = vrot.slane %v11477_v43, 4 }
 0x3ba   : > { %v5090_v39 = vmul.f32 %v11103_v42, %v11201_v28  ;;  %v4669_v15 = vadd.f32 %v4584_v48, %v4476_v10  ;;  %v4967_v20 = vrot.slane %v4897_v16, 4  ;;  %v13899_v27 = vrot.slane %v11620_v57, 4 }
 0x3bb   : > { %v4668_v44 = vadd.f32 %v4582_v62, %v4475_v34  ;;  %v4775_v47 = vsel %vm2235_vm5, %v14034_v22, %v4774_v51  ;;  %v4777_v49 = vsel %vm2235_vm5, %v4774_v51, %v13898_v46  ;;  %v11640_v43 = vmul.f32 %v11103_v42, %v11231_v45 }
 0x3bc   : > { %v5160_v34 = vrot.slane %v5090_v39, 5  ;;  %v5283_v62 = vmul.f32 %v11251_v29, %v11201_v28  ;;  %v4862_v22 = vadd.f32 %v4777_v49, %v4669_v15  ;;  %v14035_v10 = vrot.slane %v11497_v58, 4 }
 0x3bd   : > { %v4861_v17 = vadd.f32 %v4775_v47, %v4668_v44  ;;  %v4970_v51 = vsel %vm2235_vm5, %v4967_v20, %v13899_v27  ;;  %v11652_v16 = vmul.f32 %v11251_v29, %v11231_v45  ;;  %v14036_v47 = vrot.slane %v11518_v8, 5 }
 0x3be   : > { %v4968_v48 = vsel %vm2235_vm5, %v14035_v10, %v4967_v20  ;;  %v5162_v46 = vrot.slane %v11640_v43, 5  ;;  %v5353_v15 = vrot.slane %v5283_v62, 6  ;;  %v5055_v49 = vadd.f32 %v4970_v51, %v4862_v22 }
 0x3bf   : > { %v5054_v44 = vadd.f32 %v4968_v48, %v4861_v17  ;;  %v5161_v39 = vsel %vm2682_vm6, %v14036_v47, %v5160_v34  ;;  %v13900_v58 = vrot.slane %v11652_v16, 6  ;;  %v3756_v10 = vmul.f32 %v11489_v5, %v11065_v41 }
 0x3c0   : > { %v3755_v20 = vmul.f32 %v11065_v41, %v11499_v4  ;;  %v5163_v17 = vsel %vm2682_vm6, %v5160_v34, %v5162_v46  ;;  %v14037_v8 = vrot.slane %v11527_v54, 6  ;;  %v3898_v62 = vmul.f32 %v11078_v63, %v11199_v3 }
 0x3c1   : > { %v5247_v48 = vadd.f32 %v5161_v39, %v5054_v44  ;;  %v5248_v22 = vadd.f32 %v5163_v17, %v5055_v49  ;;  %v5356_v5 = vsel %vm2906_vm7, %v5353_v15, %v13900_v58  ;;  %v3796_v51 = vadd.f32 %v11069_v12, %v3756_v10 }
 0x3c2   : > { %v5354_v47 = vsel %vm2906_vm7, %v14037_v8, %v5353_v15  ;;  %v3795_v4 = vadd.f32 %v11069_v12, %v3755_v20  ;;  %v3899_v34 = vmul.f32 %v11078_v63, %v11196_v31  ;;  %v3934_v54 = vmul.f32 %v11082_v6, %v11196_v31 }
 0x3c3   : > { %v5440_v27 = vadd.f32 %v5354_v47, %v5247_v48  ;;  %v11682_v44 = vmul.f32 %v11082_v6, %v11205_v56  ;;  %v5441_v3 = vadd.f32 %v5356_v5, %v5248_v22  ;;  %v3832_v39 = vmax.f32 %v3796_v51, 0.0 }
 0x3c4   : > { %v3831_v49 = vmax.f32 %v3795_v4, 0.0  ;;  %v4127_v15 = vmul.f32 %v11085_v0, %v11196_v31  ;;  %v4006_v20 = vrot.slane %v3934_v54, 1  ;;  %v11690_v48 = vmul.f32 %v11085_v0, %v11205_v56 }
 0x3c5   : > { %v5475_v10 = vadd.f32 %v11108_v14, %v5440_v27  ;;  %v4008_v17 = vrot.slane %v11682_v44, 1  ;;  %v5476_v8 = vadd.f32 %v11108_v14, %v5441_v3  ;;  %v11693_v47 = vmin.f32 %v3832_v39, 6.0 }
 0x3c6   : > { %v11695_v58 = vmin.f32 %v3831_v49, 6.0  ;;  %v4199_v22 = vrot.slane %v4127_v15, 2  ;;  %v14038_v5 = vrot.slane %v11557_v40, 1  ;;  %v13904_v51 = vrot.slane %v11690_v48, 2 }
 0x3c7   : > { %v4009_v27 = vsel %vm1350_vm2, %v4006_v20, %v4008_v17  ;;  %v4320_v4 = vmul.f32 %v11089_v35, %v11201_v28  ;;  %v8358_v54 = vpack.c.bf16 %v5476_v8, %v5475_v10  ;;  %v11714_v15 = vmul.f32 %v11089_v35, %v11231_v45 }
 0x3c8   : > { %v4007_v31 = vsel %vm1350_vm2, %v14038_v5, %v4006_v20  ;;  %v4092_v39 = vadd.f32 %v4009_v27, %v3899_v34  ;;  %v4200_v49 = vsel %vm1570_vm3, %v4197_v1, %v4199_v22  ;;  %v4202_v40 = vsel %vm1570_vm3, %v4199_v22, %v13904_v51 }
 0x3c9   : > { %v4091_v3 = vadd.f32 %v4007_v31, %v3898_v62  ;;  %v4392_v20 = vrot.slane %v4320_v4, 2  ;;  %v4513_v5 = vmul.f32 %v11092_v23, %v11201_v28  ;;  %8359 = vmatpush1.bf16.msra.mxu0 %v8358_v54  ;;  %v11720_v36 = vmul.f32 %v11092_v23, %v11231_v45 }
 0x3ca   : > { %v4285_v62 = vadd.f32 %v4202_v40, %v4092_v39  ;;  %v4706_v1 = vmul.f32 %v11096_v50, %v11201_v28  ;;  %8360 = vmatprep.subr.bf16.mxu0 %v14005_v61  ;;  %v13901_v8 = vrot.slane %v11714_v15, 2  ;;  %v11731_v31 = vmul.f32 %v11096_v50, %v11231_v45 }
 0x3cb   : > { %v4284_v10 = vadd.f32 %v4200_v49, %v4091_v3  ;;  %v4393_v34 = vsel %vm1570_vm3, %v4390_v37, %v4392_v20  ;;  %v4585_v22 = vrot.slane %v4513_v5, 3  ;;  %v13903_v4 = vrot.slane %v11720_v36, 3 }
 0x3cc   : > { %v4778_v54 = vrot.slane %v4706_v1, 4  ;;  %v4899_v3 = vmul.f32 %v11099_v21, %v11229_v59  ;;  %v4395_v60 = vsel %vm1570_vm3, %v4392_v20, %v13901_v8  ;;  %v13902_v39 = vrot.slane %v11731_v31, 4 }
 0x3cd   : > { %v4477_v27 = vadd.f32 %v4393_v34, %v4284_v10  ;;  %v4586_v37 = vsel %vm2011_vm4, %v4583_v11, %v4585_v22  ;;  %v11745_v49 = vmul.f32 %v11099_v21, %v11324_v24  ;;  %v4478_v40 = vadd.f32 %v4395_v60, %v4285_v62  ;;  %v11753_v34 = vpop.f32.mrb[60].mxu1 }
 0x3ce   : > { %v4588_v5 = vsel %vm2011_vm4, %v4585_v22, %v13903_v4  ;;  %v14039_v1 = vrot.slane %v11609_v2, 4  ;;  %v4781_v9 = vsel %vm2235_vm5, %v4778_v54, %v13902_v39  ;;  %v4971_v11 = vrot.slane %v4899_v3, 4  ;;  %v11761_v60 = vpop.f32.mrb[61].mxu1 }
 0x3cf   : > { %v4670_v10 = vadd.f32 %v4586_v37, %v4477_v27  ;;  %v4973_v8 = vrot.slane %v11745_v49, 4  ;;  %v5092_v62 = vmul.f32 %v11103_v42, %v11229_v59  ;;  %v4671_v22 = vadd.f32 %v4588_v5, %v4478_v40 }
 0x3d0   : > { %v4779_v20 = vsel %vm2235_vm5, %v14039_v1, %v4778_v54  ;;  %v11765_v2 = vmul.f32 %v11103_v42, %v11324_v24  ;;  %v5285_v37 = vmul.f32 %v11251_v29, %v11229_v59  ;;  %v14040_v1 = vrot.slane %v11620_v57, 4 }
 0x3d1   : > { %v4863_v27 = vadd.f32 %v4779_v20, %v4670_v10  ;;  %v4974_v3 = vsel %vm2235_vm5, %v4971_v11, %v4973_v8  ;;  %v5164_v39 = vrot.slane %v5092_v62, 5  ;;  %v11777_v40 = vmul.f32 %v11251_v29, %v11324_v24 }
 0x3d2   : > { %v4972_v54 = vsel %vm2235_vm5, %v14040_v1, %v4971_v11  ;;  %v4864_v5 = vadd.f32 %v4781_v9, %v4671_v22  ;;  %v13906_v20 = vrot.slane %v11765_v2, 5  ;;  %v5357_v4 = vrot.slane %v5285_v37, 6 }
 0x3d3   : > { %v5056_v10 = vadd.f32 %v4972_v54, %v4863_v27  ;;  %v5165_v57 = vsel %vm2682_vm6, %v5162_v46, %v5164_v39  ;;  %v13905_v1 = vrot.slane %v11777_v40, 6  ;;  %v3758_v51 = vmul.f32 %v11630_v13, %v11065_v41 }
 0x3d4   : > { %v3757_v11 = vmul.f32 %v11065_v41, %v11636_v53  ;;  %v5057_v62 = vadd.f32 %v4974_v3, %v4864_v5  ;;  %v5167_v9 = vsel %vm2682_vm6, %v5164_v39, %v13906_v20  ;;  %v14041_v27 = vrot.slane %v11652_v16, 6 }
 0x3d5   : > { %v5249_v22 = vadd.f32 %v5165_v57, %v5056_v10  ;;  %v5360_v46 = vsel %vm2906_vm7, %v5357_v4, %v13905_v1  ;;  %v3798_v37 = vadd.f32 %v11069_v12, %v3758_v51  ;;  %v3900_v53 = vmul.f32 %v11078_v63, %v11205_v56 }
 0x3d6   : > { %v5358_v43 = vsel %vm2906_vm7, %v14041_v27, %v5357_v4  ;;  %v3797_v13 = vadd.f32 %v11069_v12, %v3757_v11  ;;  %v5250_v54 = vadd.f32 %v5167_v9, %v5057_v62  ;;  %v3901_v39 = vmul.f32 %v11078_v63, %v11201_v28 }
 0x3d7   : > { %v5442_v3 = vadd.f32 %v5358_v43, %v5249_v22  ;;  %v3936_v16 = vmul.f32 %v11082_v6, %v11201_v28  ;;  %v3834_v5 = vmax.f32 %v3798_v37, 0.0  ;;  %v11807_v4 = vmul.f32 %v11082_v6, %v11231_v45 }
 0x3d8   : > { %v3833_v10 = vmax.f32 %v3797_v13, 0.0  ;;  %v4129_v51 = vmul.f32 %v11085_v0, %v11201_v28  ;;  %v5443_v57 = vadd.f32 %v5360_v46, %v5250_v54  ;;  %v11814_v62 = vmul.f32 %v11085_v0, %v11231_v45 }
 0x3d9   : > { %v5477_v56 = vadd.f32 %v11108_v14, %v5442_v3  ;;  %v4010_v11 = vrot.slane %v3936_v16, 1  ;;  %v11816_v9 = vmin.f32 %v3834_v5, 6.0  ;;  %v4012_v27 = vrot.slane %v11807_v4, 1 }
 0x3da   : > { %v11818_v22 = vmin.f32 %v3833_v10, 6.0  ;;  %v4203_v43 = vrot.slane %v4129_v51, 2  ;;  %v5478_v37 = vadd.f32 %v11108_v14, %v5443_v57  ;;  %v13909_v46 = vrot.slane %v11814_v62, 2 }
 0x3db   : > { %v4011_v28 = vsel %vm1350_vm2, %v4008_v17, %v4010_v11  ;;  %v4322_v13 = vmul.f32 %v11089_v35, %v11229_v59  ;;  %v4013_v54 = vsel %vm1350_vm2, %v4010_v11, %v4012_v27  ;;  %v14042_v16 = vrot.slane %v11690_v48, 2 }
 0x3dc   : > { %v4093_v3 = vadd.f32 %v4011_v28, %v3900_v53  ;;  %v11836_v10 = vmul.f32 %v11089_v35, %v11324_v24  ;;  %v8361_v44 = vpack.c.bf16 %v5478_v37, %v5477_v56  ;;  %v4094_v17 = vadd.f32 %v4013_v54, %v3901_v39 }
 0x3dd   : > { %v4204_v5 = vsel %vm1570_vm3, %v14042_v16, %v4203_v43  ;;  %v4206_v51 = vsel %vm1570_vm3, %v4203_v43, %v13909_v46  ;;  %v4396_v57 = vrot.slane %v4322_v13, 2  ;;  %v4515_v53 = vmul.f32 %v11092_v23, %v11229_v59 }
 0x3de   : > { %v4286_v1 = vadd.f32 %v4204_v5, %v4093_v3  ;;  %v13908_v20 = vrot.slane %v11836_v10, 2  ;;  %v11846_v48 = vmul.f32 %v11092_v23, %v11324_v24  ;;  %8362 = vmatpush1.bf16.msra.mxu0 %v8361_v44  ;;  %v4287_v11 = vadd.f32 %v4206_v51, %v4094_v17 }
 0x3df   : > { %v14043_v56 = vrot.slane %v11714_v15, 2  ;;  %v4708_v43 = vmul.f32 %v11096_v50, %v11229_v59  ;;  %v11855_v37 = vmul.f32 %v11096_v50, %v11324_v24  ;;  %8363 = vmatprep.subr.bf16.mxu0 %v14005_v61  ;;  %v4589_v54 = vrot.slane %v4515_v53, 3  ;;  %v11877_v53 = vpop.f32.mrb[62].mxu1 }
 0x3e0   : > { %v4399_v28 = vsel %vm1570_vm3, %v4396_v57, %v13908_v20  ;;  %v13907_v3 = vrot.slane %v11846_v48, 3  ;;  %v4901_v44 = vmul.f32 %v11099_v21, %v11322_v19  ;;  %v14044_v17 = vrot.slane %v11720_v36, 3 }
 0x3e1   : > { %v4397_v39 = vsel %vm1570_vm3, %v14043_v56, %v4396_v57  ;;  %v4480_v15 = vadd.f32 %v4399_v28, %v4287_v11  ;;  %v4782_v16 = vrot.slane %v4708_v43, 4  ;;  %v4784_v5 = vrot.slane %v11855_v37, 4 }
 0x3e2   : > { %v4479_v13 = vadd.f32 %v4397_v39, %v4286_v1  ;;  %v4590_v51 = vsel %vm2011_vm4, %v14044_v17, %v4589_v54  ;;  %v4592_v56 = vsel %vm2011_vm4, %v4589_v54, %v13907_v3  ;;  %v11873_v1 = vmul.f32 %v11099_v21, %v11443_v7  ;;  %v11885_v54 = vpop.f32.mrb[63].mxu1 }
 0x3e3   : > { %v5094_v57 = vmul.f32 %v11103_v42, %v11322_v19  ;;  %v4673_v39 = vadd.f32 %v4592_v56, %v4480_v15  ;;  %v14045_v43 = vrot.slane %v11731_v31, 4  ;;  %v4785_v28 = vsel %vm2235_vm5, %v4782_v16, %v4784_v5 }
 0x3e4   : > { %v4672_v11 = vadd.f32 %v4590_v51, %v4479_v13  ;;  %v4975_v17 = vrot.slane %v4901_v44, 4  ;;  %v13910_v3 = vrot.slane %v11873_v1, 4  ;;  %v11890_v20 = vmul.f32 %v11103_v42, %v11443_v7 }
 0x3e5   : > { %v4783_v36 = vsel %vm2235_vm5, %v14045_v43, %v4782_v16  ;;  %v5168_v46 = vrot.slane %v5094_v57, 5  ;;  %v4866_v15 = vadd.f32 %v4785_v28, %v4673_v39  ;;  %v5287_v31 = vmul.f32 %v11251_v29, %v11322_v19 }
 0x3e6   : > { %v4865_v13 = vadd.f32 %v4783_v36, %v4672_v11  ;;  %v11896_v51 = vmul.f32 %v11251_v29, %v11443_v7  ;;  %v4976_v16 = vsel %vm2235_vm5, %v4973_v8, %v4975_v17  ;;  %v4978_v44 = vsel %vm2235_vm5, %v4975_v17, %v13910_v3 }
 0x3e7   : > { %v14046_v56 = vrot.slane %v11765_v2, 5  ;;  %v5170_v11 = vrot.slane %v11890_v20, 5  ;;  %v5059_v43 = vadd.f32 %v4978_v44, %v4866_v15  ;;  %v5361_v36 = vrot.slane %v5287_v31, 6 }
 0x3e8   : > { %v5058_v39 = vadd.f32 %v4976_v16, %v4865_v13  ;;  %v5363_v28 = vrot.slane %v11896_v51, 6  ;;  %v3760_v8 = vmul.f32 %v11753_v34, %v11065_v41  ;;  %v3759_v17 = vmul.f32 %v11065_v41, %v11761_v60 }
 0x3e9   : > { %v5169_v57 = vsel %vm2682_vm6, %v14046_v56, %v5168_v46  ;;  %v5171_v49 = vsel %vm2682_vm6, %v5168_v46, %v5170_v11  ;;  %v3902_v2 = vmul.f32 %v11078_v63, %v11231_v45  ;;  %v14047_v13 = vrot.slane %v11777_v40, 6 }
 0x3ea   : > { %v5251_v56 = vadd.f32 %v5169_v57, %v5058_v39  ;;  %v5252_v3 = vadd.f32 %v5171_v49, %v5059_v43  ;;  %v5364_v31 = vsel %vm2906_vm7, %v5361_v36, %v5363_v28  ;;  %v3800_v46 = vadd.f32 %v11069_v12, %v3760_v8 }
 0x3eb   : > { %v5362_v15 = vsel %vm2906_vm7, %v14047_v13, %v5361_v36  ;;  %v3799_v34 = vadd.f32 %v11069_v12, %v3759_v17  ;;  %v3903_v60 = vmul.f32 %v11078_v63, %v11229_v59  ;;  %v3938_v45 = vmul.f32 %v11082_v6, %v11229_v59 }
 0x3ec   : > { %v5444_v16 = vadd.f32 %v5362_v15, %v5251_v56  ;;  %v5445_v44 = vadd.f32 %v5364_v31, %v5252_v3  ;;  %v11932_v40 = vmul.f32 %v11082_v6, %v11324_v24  ;;  %v4131_v57 = vmul.f32 %v11085_v0, %v11229_v59 }
 0x3ed   : > { %v3836_v39 = vmax.f32 %v3800_v46, 0.0  ;;  %v3835_v43 = vmax.f32 %v3799_v34, 0.0  ;;  %v4014_v36 = vrot.slane %v3938_v45, 1  ;;  %v11938_v49 = vmul.f32 %v11085_v0, %v11324_v24 }
 0x3ee   : > { %v5479_v8 = vadd.f32 %v11108_v14, %v5444_v16  ;;  %v5480_v17 = vadd.f32 %v11108_v14, %v5445_v44  ;;  %v13912_v3 = vrot.slane %v11932_v40, 1  ;;  %v4207_v56 = vrot.slane %v4131_v57, 2 }
 0x3ef   : > { %v11943_v13 = vmin.f32 %v3836_v39, 6.0  ;;  %v11945_v15 = vmin.f32 %v3835_v43, 6.0  ;;  %v4015_v59 = vsel %vm1350_vm2, %v4012_v27, %v4014_v36  ;;  %v13911_v31 = vrot.slane %v11938_v49, 2 }
 0x3f0   : > { %v8364_v46 = vpack.c.bf16 %v5480_v17, %v5479_v8  ;;  %v4017_v34 = vsel %vm1350_vm2, %v4014_v36, %v13912_v3  ;;  %v4095_v45 = vadd.f32 %v4015_v59, %v3902_v2  ;;  %v14048_v16 = vrot.slane %v11814_v62, 2 }
 0x3f1   : > { %v4096_v57 = vadd.f32 %v4017_v34, %v3903_v60  ;;  %v4210_v39 = vsel %vm1570_vm3, %v4207_v56, %v13911_v31  ;;  %v4324_v4 = vmul.f32 %v11089_v35, %v11322_v19  ;;  %v11964_v27 = vmul.f32 %v11089_v35, %v11443_v7 }
 0x3f2   : > { %v4208_v44 = vsel %vm1570_vm3, %v14048_v16, %v4207_v56  ;;  %8365 = vmatpush1.bf16.msra.mxu0 %v8364_v46  ;;  %v4517_v2 = vmul.f32 %v11092_v23, %v11322_v19  ;;  %v11970_v62 = vmul.f32 %v11092_v23, %v11443_v7  ;;  %v4710_v60 = vmul.f32 %v11096_v50, %v11322_v19 }
 0x3f3   : > { %v4288_v43 = vadd.f32 %v4208_v44, %v4095_v45  ;;  %8366 = vmatprep.subr.bf16.mxu0 %v14005_v61  ;;  %v4289_v36 = vadd.f32 %v4210_v39, %v4096_v57  ;;  %v4400_v8 = vrot.slane %v4324_v4, 2  ;;  %v13913_v17 = vrot.slane %v11964_v27, 2 }
 0x3f4   : > { %v11978_v56 = vmul.f32 %v11096_v50, %v11443_v7  ;;  %v4593_v59 = vrot.slane %v4517_v2, 3  ;;  %v4595_v46 = vrot.slane %v11970_v62, 3  ;;  %v4786_v34 = vrot.slane %v4710_v60, 4 }
 0x3f5   : > { %v4903_v45 = vmul.f32 %v11099_v21, %v11441_v32  ;;  %v14049_v16 = vrot.slane %v11836_v10, 2  ;;  %v4403_v57 = vsel %vm1570_vm3, %v4400_v8, %v13913_v17  ;;  %v11992_v4 = vmul.f32 %v11099_v21, %v11570_v55 }
 0x3f6   : > { %v13915_v39 = vrot.slane %v11978_v56, 4  ;;  %v4482_v31 = vadd.f32 %v4403_v57, %v4289_v36  ;;  %v14050_v60 = vrot.slane %v11846_v48, 3  ;;  %v4596_v10 = vsel %vm2011_vm4, %v4593_v59, %v4595_v46 }
 0x3f7   : > { %v4401_v44 = vsel %vm1570_vm3, %v14049_v16, %v4400_v8  ;;  %v4787_v8 = vsel %vm2235_vm5, %v4784_v5, %v4786_v34  ;;  %v4979_v17 = vrot.slane %v4903_v45, 4  ;;  %v5096_v48 = vmul.f32 %v11103_v42, %v11441_v32 }
 0x3f8   : > { %v4481_v2 = vadd.f32 %v4401_v44, %v4288_v43  ;;  %v4594_v3 = vsel %vm2011_vm4, %v14050_v60, %v4593_v59  ;;  %v4789_v16 = vsel %vm2235_vm5, %v4786_v34, %v13915_v39  ;;  %v13914_v43 = vrot.slane %v11992_v4, 4 }
 0x3f9   : > { %v4675_v44 = vadd.f32 %v4596_v10, %v4482_v31  ;;  %v12011_v57 = vmul.f32 %v11103_v42, %v11570_v55  ;;  %v14051_v37 = vrot.slane %v11873_v1, 4  ;;  %v5289_v34 = vmul.f32 %v11251_v29, %v11441_v32 }
 0x3fa   : > { %v4674_v36 = vadd.f32 %v4594_v3, %v4481_v2  ;;  %v4982_v59 = vsel %vm2235_vm5, %v4979_v17, %v13914_v43  ;;  %v12023_v3 = vmul.f32 %v11251_v29, %v11570_v55  ;;  %v5172_v2 = vrot.slane %v5096_v48, 5 }
 0x3fb   : > { %v4980_v5 = vsel %vm2235_vm5, %v14051_v37, %v4979_v17  ;;  %v4868_v45 = vadd.f32 %v4789_v16, %v4675_v44  ;;  %v5174_v60 = vrot.slane %v12011_v57, 5  ;;  %v5365_v10 = vrot.slane %v5289_v34, 6  ;;  %v12045_v44 = vpop.f32.mrb[64].mxu1 }
 0x3fc   : > { %v4867_v31 = vadd.f32 %v4787_v8, %v4674_v36  ;;  %v13917_v1 = vrot.slane %v12023_v3, 6  ;;  %v3762_v37 = vmul.f32 %v11877_v53, %v11065_v41  ;;  %v3761_v17 = vmul.f32 %v11065_v41, %v11885_v54 }
 0x3fd   : > { %v5061_v39 = vadd.f32 %v4982_v59, %v4868_v45  ;;  %v5173_v29 = vsel %vm2682_vm6, %v5170_v11, %v5172_v2  ;;  %v5175_v8 = vsel %vm2682_vm6, %v5172_v2, %v5174_v60  ;;  %v5366_v16 = vsel %vm2906_vm7, %v5363_v28, %v5365_v10 }
 0x3fe   : > { %v5060_v43 = vadd.f32 %v4980_v5, %v4867_v31  ;;  %v5368_v53 = vsel %vm2906_vm7, %v5365_v10, %v13917_v1  ;;  %v3802_v54 = vadd.f32 %v11069_v12, %v3762_v37  ;;  %v3801_v36 = vadd.f32 %v11069_v12, %v3761_v17  ;;  %v12051_v5 = vpop.f32.mrb[65].mxu1 }
 0x3ff   : > { %v5254_v11 = vadd.f32 %v5175_v8, %v5061_v39  ;;  %v3904_v48 = vmul.f32 %v11078_v63, %v11324_v24  ;;  %v3905_v51 = vmul.f32 %v11078_v63, %v11322_v19  ;;  %v3940_v34 = vmul.f32 %v11082_v6, %v11322_v19 }
 0x400   : > { %v5253_v20 = vadd.f32 %v5173_v29, %v5060_v43  ;;  %v3838_v28 = vmax.f32 %v3802_v54, 0.0  ;;  %v3837_v59 = vmax.f32 %v3801_v36, 0.0  ;;  %v12057_v31 = vmul.f32 %v11082_v6, %v11443_v7 }
 0x401   : > { %v5447_v43 = vadd.f32 %v5368_v53, %v5254_v11  ;;  %v4133_v39 = vmul.f32 %v11085_v0, %v11322_v19  ;;  %v12063_v24 = vmul.f32 %v11085_v0, %v11443_v7  ;;  %v4018_v37 = vrot.slane %v3940_v34, 1 }
 0x402   : > { %v5446_v45 = vadd.f32 %v5366_v16, %v5253_v20  ;;  %v12065_v2 = vmin.f32 %v3838_v28, 6.0  ;;  %v12067_v10 = vmin.f32 %v3837_v59, 6.0  ;;  %v13916_v17 = vrot.slane %v12057_v31, 1 }
 0x403   : > { %v5482_v8 = vadd.f32 %v11108_v14, %v5447_v43  ;;  %v4211_v16 = vrot.slane %v4133_v39, 2  ;;  %v4213_v53 = vrot.slane %v12063_v24, 2  ;;  %v14052_v19 = vrot.slane %v11932_v40, 1 }
 0x404   : > { %v5481_v29 = vadd.f32 %v11108_v14, %v5446_v45  ;;  %v4021_v36 = vsel %vm1350_vm2, %v4018_v37, %v13916_v17  ;;  %v4326_v20 = vmul.f32 %v11089_v35, %v11441_v32  ;;  %v12083_v11 = vmul.f32 %v11089_v35, %v11570_v55 }
 0x405   : > { %v4019_v54 = vsel %vm1350_vm2, %v14052_v19, %v4018_v37  ;;  %v4098_v34 = vadd.f32 %v4021_v36, %v3905_v51  ;;  %v14053_v45 = vrot.slane %v11938_v49, 2  ;;  %v4214_v43 = vsel %vm1570_vm3, %v4211_v16, %v4213_v53 }
 0x406   : > { %v8367_v28 = vpack.c.bf16 %v5482_v8, %v5481_v29  ;;  %v4097_v59 = vadd.f32 %v4019_v54, %v3904_v48  ;;  %v4404_v39 = vrot.slane %v4326_v20, 2  ;;  %v4406_v37 = vrot.slane %v12083_v11, 2 }
 0x407   : > { %v4212_v40 = vsel %vm1570_vm3, %v14053_v45, %v4211_v16  ;;  %v4519_v19 = vmul.f32 %v11092_v23, %v11441_v32  ;;  %v4291_v1 = vadd.f32 %v4214_v43, %v4098_v34  ;;  %v12096_v48 = vmul.f32 %v11092_v23, %v11570_v55 }
 0x408   : > { %8368 = vmatpush1.bf16.msra.mxu0 %v8367_v28  ;;  %v4290_v17 = vadd.f32 %v4212_v40, %v4097_v59  ;;  %v4712_v49 = vmul.f32 %v11096_v50, %v11441_v32  ;;  %v14054_v51 = vrot.slane %v11964_v27, 2  ;;  %v4407_v8 = vsel %vm1570_vm3, %v4404_v39, %v4406_v37 }
 0x409   : > { %8369 = vmatprep.subr.bf16.mxu0 %v14005_v61  ;;  %v4597_v16 = vrot.slane %v4519_v19, 3  ;;  %v12109_v54 = vmul.f32 %v11096_v50, %v11570_v55  ;;  %v4484_v20 = vadd.f32 %v4407_v8, %v4291_v1  ;;  %v4599_v28 = vrot.slane %v12096_v48, 3 }
 0x40a   : > { %v4405_v29 = vsel %vm1570_vm3, %v14054_v51, %v4404_v39  ;;  %v4790_v59 = vrot.slane %v4712_v49, 4  ;;  %v4905_v45 = vmul.f32 %v11099_v21, %v11559_v30  ;;  %v12120_v40 = vmul.f32 %v11099_v21, %v11695_v58 }
 0x40b   : > { %v4483_v36 = vadd.f32 %v4405_v29, %v4290_v17  ;;  %v4598_v27 = vsel %vm2011_vm4, %v4595_v46, %v4597_v16  ;;  %v13919_v34 = vrot.slane %v12109_v54, 4  ;;  %v4600_v1 = vsel %vm2011_vm4, %v4597_v16, %v4599_v28 }
 0x40c   : > { %v14055_v43 = vrot.slane %v11978_v56, 4  ;;  %v5098_v46 = vmul.f32 %v11103_v42, %v11559_v30  ;;  %v4677_v39 = vadd.f32 %v4600_v1, %v4484_v20  ;;  %v4983_v49 = vrot.slane %v4905_v45, 4  ;;  %v12141_v56 = vld [vmem:[%s13836_s2 + $0x18] ss:$0 sm:$0xff]  ;;  %v12145_v20 = vpop.f32.mrb[66].mxu1 }
 0x40d   : > { %v4676_v17 = vadd.f32 %v4598_v27, %v4483_v36  ;;  %v4793_v19 = vsel %vm2235_vm5, %v4790_v59, %v13919_v34  ;;  %v13918_v51 = vrot.slane %v12120_v40, 4  ;;  %v12136_v8 = vmul.f32 %v11103_v42, %v11695_v58 }
 0x40e   : > { %v4791_v62 = vsel %vm2235_vm5, %v14055_v43, %v4790_v59  ;;  %v5176_v16 = vrot.slane %v5098_v46, 5  ;;  %v5291_v36 = vmul.f32 %v12141_v56, %v11559_v30  ;;  %v4870_v59 = vadd.f32 %v4793_v19, %v4677_v39  ;;  %v12157_v43 = vpop.f32.mrb[67].mxu1 }
 0x40f   : > { %v4869_v29 = vadd.f32 %v4791_v62, %v4676_v17  ;;  %v14056_v27 = vrot.slane %v11992_v4, 4  ;;  %v4986_v1 = vsel %vm2235_vm5, %v4983_v49, %v13918_v51  ;;  %v12155_v17 = vmul.f32 %v12141_v56, %v11695_v58 }
 0x410   : > { %v5177_v46 = vsel %vm2682_vm6, %v5174_v60, %v5176_v16  ;;  %v5178_v39 = vrot.slane %v12136_v8, 5  ;;  %v5369_v4 = vrot.slane %v5291_v36, 6  ;;  %v5063_v19 = vadd.f32 %v4986_v1, %v4870_v59 }
 0x411   : > { %v4984_v45 = vsel %vm2235_vm5, %v14056_v27, %v4983_v49  ;;  %v13920_v27 = vrot.slane %v12155_v17, 6  ;;  %v3764_v49 = vmul.f32 %v12045_v44, %v11065_v41  ;;  %v3763_v51 = vmul.f32 %v11065_v41, %v12051_v5 }
 0x412   : > { %v5062_v62 = vadd.f32 %v4984_v45, %v4869_v29  ;;  %v5179_v29 = vsel %vm2682_vm6, %v5176_v16, %v5178_v39  ;;  %v14057_v57 = vrot.slane %v12023_v3, 6  ;;  %v3906_v36 = vmul.f32 %v11078_v63, %v11443_v7 }
 0x413   : > { %v5256_v59 = vadd.f32 %v5179_v29, %v5063_v19  ;;  %v5372_v44 = vsel %vm2906_vm7, %v5369_v4, %v13920_v27  ;;  %v3804_v1 = vadd.f32 %v11069_v12, %v3764_v49  ;;  %v3803_v5 = vadd.f32 %v11069_v12, %v3763_v51 }
 0x414   : > { %v5255_v45 = vadd.f32 %v5177_v46, %v5062_v62  ;;  %v5370_v60 = vsel %vm2906_vm7, %v14057_v57, %v5369_v4  ;;  %v3907_v16 = vmul.f32 %v11078_v63, %v11441_v32  ;;  %v3942_v3 = vmul.f32 %v11082_v6, %v11441_v32 }
 0x415   : > { %v12187_v62 = vmul.f32 %v11082_v6, %v11570_v55  ;;  %v5449_v7 = vadd.f32 %v5372_v44, %v5256_v59  ;;  %v3840_v46 = vmax.f32 %v3804_v1, 0.0  ;;  %v3839_v19 = vmax.f32 %v3803_v5, 0.0 }
 0x416   : > { %v5448_v34 = vadd.f32 %v5370_v60, %v5255_v45  ;;  %v4135_v4 = vmul.f32 %v11085_v0, %v11441_v32  ;;  %v4022_v51 = vrot.slane %v3942_v3, 1  ;;  %v12195_v45 = vmul.f32 %v11085_v0, %v11570_v55 }
 0x417   : > { %v4024_v29 = vrot.slane %v12187_v62, 1  ;;  %v5484_v57 = vadd.f32 %v11108_v14, %v5449_v7  ;;  %v12198_v60 = vmin.f32 %v3840_v46, 6.0  ;;  %v12200_v27 = vmin.f32 %v3839_v19, 6.0 }
 0x418   : > { %v5483_v49 = vadd.f32 %v11108_v14, %v5448_v34  ;;  %v4215_v59 = vrot.slane %v4135_v4, 2  ;;  %v14058_v44 = vrot.slane %v12057_v31, 1  ;;  %v13922_v1 = vrot.slane %v12195_v45, 2 }
 0x419   : > { %v4025_v34 = vsel %vm1350_vm2, %v4022_v51, %v4024_v29  ;;  %v4328_v5 = vmul.f32 %v11089_v35, %v11559_v30  ;;  %v12219_v4 = vmul.f32 %v11089_v35, %v11695_v58  ;;  %v12225_v24 = vmul.f32 %v11092_v23, %v11695_v58 }
 0x41a   : > { %v4023_v32 = vsel %vm1350_vm2, %v14058_v44, %v4022_v51  ;;  %v8370_v3 = vpack.c.bf16 %v5484_v57, %v5483_v49  ;;  %v4100_v46 = vadd.f32 %v4025_v34, %v3907_v16  ;;  %v4216_v19 = vsel %vm1570_vm3, %v4213_v53, %v4215_v59 }
 0x41b   : > { %v4099_v7 = vadd.f32 %v4023_v32, %v3906_v36  ;;  %v4218_v31 = vsel %vm1570_vm3, %v4215_v59, %v13922_v1  ;;  %v4408_v51 = vrot.slane %v4328_v5, 2  ;;  %v4521_v44 = vmul.f32 %v11092_v23, %v11559_v30 }
 0x41c   : > { %8371 = vmatpush1.bf16.msra.mxu0 %v8370_v3  ;;  %v4293_v36 = vadd.f32 %v4218_v31, %v4100_v46  ;;  %v4714_v53 = vmul.f32 %v11096_v50, %v11559_v30  ;;  %v13921_v57 = vrot.slane %v12219_v4, 2  ;;  %v12236_v32 = vmul.f32 %v11096_v50, %v11695_v58 }
 0x41d   : > { %v4292_v49 = vadd.f32 %v4216_v19, %v4099_v7  ;;  %8372 = vmatprep.subr.bf16.mxu0 %v14005_v61  ;;  %v4409_v16 = vsel %vm1570_vm3, %v4406_v37, %v4408_v51  ;;  %v4601_v59 = vrot.slane %v4521_v44, 3  ;;  %v13924_v5 = vrot.slane %v12225_v24, 3 }
 0x41e   : > { %v4794_v3 = vrot.slane %v4714_v53, 4  ;;  %v4907_v7 = vmul.f32 %v11099_v21, %v11693_v47  ;;  %v4411_v11 = vsel %vm1570_vm3, %v4408_v51, %v13921_v57  ;;  %v13923_v46 = vrot.slane %v12236_v32, 4 }
 0x41f   : > { %v4485_v34 = vadd.f32 %v4409_v16, %v4292_v49  ;;  %v4602_v37 = vsel %vm2011_vm4, %v4599_v28, %v4601_v59  ;;  %v12250_v19 = vmul.f32 %v11099_v21, %v11818_v22  ;;  %v4486_v31 = vadd.f32 %v4411_v11, %v4293_v36  ;;  %v12264_v36 = vpop.f32.mrb[68].mxu1 }
 0x420   : > { %v4604_v44 = vsel %vm2011_vm4, %v4601_v59, %v13924_v5  ;;  %v14059_v53 = vrot.slane %v12109_v54, 4  ;;  %v4797_v48 = vsel %vm2235_vm5, %v4794_v3, %v13923_v46  ;;  %v4987_v28 = vrot.slane %v4907_v7, 4 }
 0x421   : > { %v4678_v49 = vadd.f32 %v4602_v37, %v4485_v34  ;;  %v13931_v16 = vrot.slane %v12250_v19, 4  ;;  %v5100_v57 = vmul.f32 %v11103_v42, %v11693_v47  ;;  %v4679_v11 = vadd.f32 %v4604_v44, %v4486_v31  ;;  %v12272_v34 = vpop.f32.mrb[69].mxu1 }
 0x422   : > { %v4795_v51 = vsel %vm2235_vm5, %v14059_v53, %v4794_v3  ;;  %v12268_v59 = vmul.f32 %v11103_v42, %v11818_v22  ;;  %v5293_v54 = vmul.f32 %v12141_v56, %v11693_v47  ;;  %v14060_v3 = vrot.slane %v12120_v40, 4 }
 0x423   : > { %v4871_v1 = vadd.f32 %v4795_v51, %v4678_v49  ;;  %v4990_v37 = vsel %vm2235_vm5, %v4987_v28, %v13931_v16  ;;  %v5180_v53 = vrot.slane %v5100_v57, 5  ;;  %v12282_v31 = vmul.f32 %v12141_v56, %v11818_v22 }
 0x424   : > { %v4988_v7 = vsel %vm2235_vm5, %v14060_v3, %v4987_v28  ;;  %v4872_v44 = vadd.f32 %v4797_v48, %v4679_v11  ;;  %v13926_v51 = vrot.slane %v12268_v59, 5  ;;  %v5373_v46 = vrot.slane %v5293_v54, 6 }
 0x425   : > { %v5064_v49 = vadd.f32 %v4988_v7, %v4871_v1  ;;  %v5181_v40 = vsel %vm2682_vm6, %v5178_v39, %v5180_v53  ;;  %v13925_v3 = vrot.slane %v12282_v31, 6  ;;  %v3766_v5 = vmul.f32 %v12145_v20, %v11065_v41 }
 0x426   : > { %v3765_v57 = vmul.f32 %v11065_v41, %v12157_v43  ;;  %v5065_v28 = vadd.f32 %v4990_v37, %v4872_v44  ;;  %v5183_v1 = vsel %vm2682_vm6, %v5180_v53, %v13926_v51  ;;  %v14061_v11 = vrot.slane %v12155_v17, 6 }
 0x427   : > { %v5257_v48 = vadd.f32 %v5181_v40, %v5064_v49  ;;  %v5376_v39 = vsel %vm2906_vm7, %v5373_v46, %v13925_v3  ;;  %v3806_v54 = vadd.f32 %v11069_v12, %v3766_v5  ;;  %v3908_v43 = vmul.f32 %v11078_v63, %v11570_v55 }
 0x428   : > { %v5374_v8 = vsel %vm2906_vm7, %v14061_v11, %v5373_v46  ;;  %v3805_v20 = vadd.f32 %v11069_v12, %v3765_v57  ;;  %v5258_v7 = vadd.f32 %v5183_v1, %v5065_v28  ;;  %v3909_v53 = vmul.f32 %v11078_v63, %v11559_v30 }
 0x429   : > { %v5450_v37 = vadd.f32 %v5374_v8, %v5257_v48  ;;  %v3944_v17 = vmul.f32 %v11082_v6, %v11559_v30  ;;  %v3842_v44 = vmax.f32 %v3806_v54, 0.0  ;;  %v12312_v46 = vmul.f32 %v11082_v6, %v11695_v58 }
 0x42a   : > { %v3841_v49 = vmax.f32 %v3805_v20, 0.0  ;;  %v4137_v5 = vmul.f32 %v11085_v0, %v11559_v30  ;;  %v5451_v40 = vadd.f32 %v5376_v39, %v5258_v7  ;;  %v12319_v28 = vmul.f32 %v11085_v0, %v11695_v58 }
 0x42b   : > { %v5485_v55 = vadd.f32 %v11108_v14, %v5450_v37  ;;  %v4026_v57 = vrot.slane %v3944_v17, 1  ;;  %v12321_v1 = vmin.f32 %v3842_v44, 6.0  ;;  %v13928_v11 = vrot.slane %v12312_v46, 1 }
 0x42c   : > { %v12323_v48 = vmin.f32 %v3841_v49, 6.0  ;;  %v4219_v8 = vrot.slane %v4137_v5, 2  ;;  %v5486_v54 = vadd.f32 %v11108_v14, %v5451_v40  ;;  %v13927_v39 = vrot.slane %v12319_v28, 2 }
 0x42d   : > { %v4027_v30 = vsel %vm1350_vm2, %v4024_v29, %v4026_v57  ;;  %v4330_v20 = vmul.f32 %v11089_v35, %v11693_v47  ;;  %v4029_v7 = vsel %vm1350_vm2, %v4026_v57, %v13928_v11  ;;  %v14062_v17 = vrot.slane %v12195_v45, 2  ;;  %v12353_v57 = vpop.f32.mrb[70].mxu1 }
 0x42e   : > { %v4101_v37 = vadd.f32 %v4027_v30, %v3908_v43  ;;  %v12341_v49 = vmul.f32 %v11089_v35, %v11818_v22  ;;  %v8373_v62 = vpack.c.bf16 %v5486_v54, %v5485_v55  ;;  %v4102_v29 = vadd.f32 %v4029_v7, %v3909_v53 }
 0x42f   : > { %v4220_v44 = vsel %vm1570_vm3, %v14062_v17, %v4219_v8  ;;  %v4222_v5 = vsel %vm1570_vm3, %v4219_v8, %v13927_v39  ;;  %v4412_v40 = vrot.slane %v4330_v20, 2  ;;  %v4523_v43 = vmul.f32 %v11092_v23, %v11693_v47  ;;  %v12364_v20 = vpop.f32.mrb[71].mxu1 }
 0x430   : > { %v4294_v3 = vadd.f32 %v4220_v44, %v4101_v37  ;;  %v13930_v51 = vrot.slane %v12341_v49, 2  ;;  %v12351_v45 = vmul.f32 %v11092_v23, %v11818_v22  ;;  %8374 = vmatpush1.bf16.msra.mxu0 %v8373_v62  ;;  %v4295_v55 = vadd.f32 %v4222_v5, %v4102_v29 }
 0x431   : > { %v14063_v53 = vrot.slane %v12219_v4, 2  ;;  %v4716_v8 = vmul.f32 %v11096_v50, %v11693_v47  ;;  %v12362_v30 = vmul.f32 %v11096_v50, %v11818_v22  ;;  %8375 = vmatprep.subr.bf16.mxu0 %v14005_v61  ;;  %v4605_v17 = vrot.slane %v4523_v43, 3 }
 0x432   : > { %v4415_v7 = vsel %vm1570_vm3, %v4412_v40, %v13930_v51  ;;  %v13929_v4 = vrot.slane %v12351_v45, 3  ;;  %v4909_v5 = vmul.f32 %v11099_v21, %v11816_v9 }
 0x433   : > { %v4413_v54 = vsel %vm1570_vm3, %v14063_v53, %v4412_v40  ;;  %v4488_v44 = vadd.f32 %v4415_v7, %v4295_v55  ;;  %v4798_v62 = vrot.slane %v4716_v8, 4  ;;  %v13937_v29 = vrot.slane %v12362_v30, 4 }
 0x434   : > { %v4487_v37 = vadd.f32 %v4413_v54, %v4294_v3  ;;  %v14064_v53 = vrot.slane %v12225_v24, 3  ;;  %v4608_v11 = vsel %vm2011_vm4, %v4605_v17, %v13929_v4  ;;  %v12382_v3 = vmul.f32 %v11099_v21, %v11945_v15 }
 0x435   : > { %v5102_v40 = vmul.f32 %v11103_v42, %v11816_v9  ;;  %v4681_v55 = vadd.f32 %v4608_v11, %v4488_v44  ;;  %v14065_v54 = vrot.slane %v12236_v32, 4  ;;  %v4801_v24 = vsel %vm2235_vm5, %v4798_v62, %v13937_v29 }
 0x436   : > { %v4606_v39 = vsel %vm2011_vm4, %v14064_v53, %v4605_v17  ;;  %v4991_v7 = vrot.slane %v4909_v5, 4  ;;  %v13936_v17 = vrot.slane %v12382_v3, 4  ;;  %v12395_v53 = vmul.f32 %v11103_v42, %v11945_v15 }
 0x437   : > { %v4680_v43 = vadd.f32 %v4606_v39, %v4487_v37  ;;  %v4799_v8 = vsel %vm2235_vm5, %v14065_v54, %v4798_v62  ;;  %v5184_v4 = vrot.slane %v5102_v40, 5  ;;  %v4874_v16 = vadd.f32 %v4801_v24, %v4681_v55 }
 0x438   : > { %v5295_v11 = vmul.f32 %v12141_v56, %v11816_v9  ;;  %v12401_v32 = vmul.f32 %v12141_v56, %v11945_v15  ;;  %v14066_v39 = vrot.slane %v12250_v19, 4  ;;  %v4994_v44 = vsel %vm2235_vm5, %v4991_v7, %v13936_v17 }
 0x439   : > { %v4873_v51 = vadd.f32 %v4799_v8, %v4680_v43  ;;  %v14067_v62 = vrot.slane %v12268_v59, 5  ;;  %v13935_v40 = vrot.slane %v12395_v53, 5  ;;  %v5067_v55 = vadd.f32 %v4994_v44, %v4874_v16 }
 0x43a   : > { %v4992_v37 = vsel %vm2235_vm5, %v14066_v39, %v4991_v7  ;;  %v5377_v54 = vrot.slane %v5295_v11, 6  ;;  %v13933_v8 = vrot.slane %v12401_v32, 6  ;;  %v3768_v24 = vmul.f32 %v12264_v36, %v11065_v41 }
 0x43b   : > { %v5185_v5 = vsel %vm2682_vm6, %v14067_v62, %v5184_v4  ;;  %v5066_v43 = vadd.f32 %v4992_v37, %v4873_v51  ;;  %v5187_v19 = vsel %vm2682_vm6, %v5184_v4, %v13935_v40  ;;  %v3767_v7 = vmul.f32 %v11065_v41, %v12272_v34 }
 0x43c   : > { %v3910_v59 = vmul.f32 %v11078_v63, %v11695_v58  ;;  %v5260_v62 = vadd.f32 %v5187_v19, %v5067_v55  ;;  %v14068_v16 = vrot.slane %v12282_v31, 6  ;;  %v5380_v11 = vsel %vm2906_vm7, %v5377_v54, %v13933_v8 }
 0x43d   : > { %v5259_v39 = vadd.f32 %v5185_v5, %v5066_v43  ;;  %v3808_v4 = vadd.f32 %v11069_v12, %v3768_v24  ;;  %v3807_v36 = vadd.f32 %v11069_v12, %v3767_v7  ;;  %v3911_v34 = vmul.f32 %v11078_v63, %v11693_v47 }
 0x43e   : > { %v5378_v51 = vsel %vm2906_vm7, %v14068_v16, %v5377_v54  ;;  %v3946_v58 = vmul.f32 %v11082_v6, %v11693_v47  ;;  %v5453_v44 = vadd.f32 %v5380_v11, %v5260_v62  ;;  %v12437_v31 = vmul.f32 %v11082_v6, %v11818_v22 }
 0x43f   : > { %v5452_v37 = vadd.f32 %v5378_v51, %v5259_v39  ;;  %v4139_v5 = vmul.f32 %v11085_v0, %v11693_v47  ;;  %v3844_v43 = vmax.f32 %v3808_v4, 0.0  ;;  %v3843_v55 = vmax.f32 %v3807_v36, 0.0 }
 0x440   : > { %v4030_v54 = vrot.slane %v3946_v58, 1  ;;  %v12443_v19 = vmul.f32 %v11085_v0, %v11818_v22  ;;  %v5488_v7 = vadd.f32 %v11108_v14, %v5453_v44  ;;  %v13932_v39 = vrot.slane %v12437_v31, 1 }
 0x441   : > { %v5487_v24 = vadd.f32 %v11108_v14, %v5452_v37  ;;  %v4223_v62 = vrot.slane %v4139_v5, 2  ;;  %v12448_v16 = vmin.f32 %v3844_v43, 6.0  ;;  %v12450_v51 = vmin.f32 %v3843_v55, 6.0 }
 0x442   : > { %v14069_v47 = vrot.slane %v12312_v46, 1  ;;  %v13934_v4 = vrot.slane %v12443_v19, 2  ;;  %v4033_v58 = vsel %vm1350_vm2, %v4030_v54, %v13932_v39  ;;  %v14070_v44 = vrot.slane %v12319_v28, 2 }
 0x443   : > { %v8376_v36 = vpack.c.bf16 %v5488_v7, %v5487_v24  ;;  %v12464_v43 = vmul.f32 %v11089_v35, %v12448_v16  ;;  %v12468_v46 = vmul.f32 %v11092_v23, %v12448_v16  ;;  %v12472_v55 = vmul.f32 %v11089_v35, %v12450_v51 }
 0x444   : > { %v4031_v11 = vsel %vm1350_vm2, %v14069_v47, %v4030_v54  ;;  %v4224_v5 = vsel %vm1570_vm3, %v14070_v44, %v4223_v62  ;;  %v12476_v54 = vmul.f32 %v11092_v23, %v12450_v51  ;;  %v12480_v28 = vmul.f32 %v11096_v50, %v12450_v51 }
 0x445   : > { %v4103_v37 = vadd.f32 %v4031_v11, %v3910_v59  ;;  %8377 = vmatpush1.bf16.msra.mxu0 %v8376_v36  ;;  %v4104_v59 = vadd.f32 %v4033_v58, %v3911_v34  ;;  %v4226_v24 = vsel %vm1570_vm3, %v4223_v62, %v13934_v4  ;;  %v4332_v8 = vmul.f32 %v11089_v35, %v11816_v9 }
 0x446   : > { %14071 = vst [vmem:[#allocation12_spill] sm:$0xff] %v12480_v28  ;;  %8378 = vmatprep.subr.bf16.mxu0 %v14005_v61  ;;  %v12494_v34 = vmul.f32 %v11089_v35, %v11945_v15  ;;  %v4525_v62 = vmul.f32 %v11092_v23, %v11816_v9  ;;  %v12500_v58 = vmul.f32 %v11092_v23, %v11945_v15  ;;  %v14072_v29 = vrot.slane %v12341_v49, 2 }
 0x447   : > { %v4296_v7 = vadd.f32 %v4224_v5, %v4103_v37  ;;  %v4297_v39 = vadd.f32 %v4226_v24, %v4104_v59  ;;  %v4718_v37 = vmul.f32 %v11096_v50, %v11816_v9  ;;  %v12506_v5 = vmul.f32 %v11096_v50, %v11945_v15 }
 0x448   : > { %v4911_v59 = vmul.f32 %v11099_v21, %v11943_v13  ;;  %v4416_v24 = vrot.slane %v4332_v8, 2  ;;  %v13942_v11 = vrot.slane %v12494_v34, 2  ;;  %v4609_v47 = vrot.slane %v4525_v62, 3 }
 0x449   : > { %v12513_v4 = vmul.f32 %v11099_v21, %v12067_v10  ;;  %v4802_v44 = vrot.slane %v4718_v37, 4  ;;  %v13941_v40 = vrot.slane %v12506_v5, 4  ;;  %v14073_v62 = vrot.slane %v12351_v45, 3 }
 0x44a   : > { %v4995_v17 = vrot.slane %v4911_v59, 4  ;;  %v4417_v38 = vsel %vm1570_vm3, %v14072_v29, %v4416_v24  ;;  %v4419_v8 = vsel %vm1570_vm3, %v4416_v24, %v13942_v11  ;;  %v14074_v37 = vrot.slane %v12500_v58, 3 }
 0x44b   : > { %v4610_v18 = vsel %vm2011_vm4, %v14073_v62, %v4609_v47  ;;  %v13940_v25 = vrot.slane %v12513_v4, 4  ;;  %v4489_v52 = vadd.f32 %v4417_v38, %v4296_v7  ;;  %v4490_v36 = vadd.f32 %v4419_v8, %v4297_v39 }
 0x44c   : > { %v4612_v59 = vsel %vm2011_vm4, %v4609_v47, %v14074_v37  ;;  %v14075_v49 = vrot.slane %v12362_v30, 4  ;;  %v4805_v24 = vsel %vm2235_vm5, %v4802_v44, %v13941_v40  ;;  %v14076_v45 = vrot.slane %v12382_v3, 4 }
 0x44d   : > { %v4998_v38 = vsel %vm2235_vm5, %v4995_v17, %v13940_v25  ;;  %v5104_v39 = vmul.f32 %v11103_v42, %v11943_v13  ;;  %v4682_v7 = vadd.f32 %v4610_v18, %v4489_v52  ;;  %v4683_v47 = vadd.f32 %v4612_v59, %v4490_v36 }
 0x44e   : > { %v4803_v29 = vsel %vm2235_vm5, %v14075_v49, %v4802_v44  ;;  %v4996_v62 = vsel %vm2235_vm5, %v14076_v45, %v4995_v17  ;;  %v12546_v30 = vmul.f32 %v11103_v42, %v12067_v10  ;;  %v5297_v44 = vmul.f32 %v12141_v56, %v11943_v13 }
 0x44f   : > { %v5188_v8 = vrot.slane %v5104_v39, 5  ;;  %v12552_v3 = vmul.f32 %v12141_v56, %v12067_v10  ;;  %v3770_v17 = vmul.f32 %v12353_v57, %v11065_v41  ;;  %v3769_v37 = vmul.f32 %v11065_v41, %v12364_v20 }
 0x450   : > { %v4875_v18 = vadd.f32 %v4803_v29, %v4682_v7  ;;  %v4876_v52 = vadd.f32 %v4805_v24, %v4683_v47  ;;  %v13948_v36 = vrot.slane %v12546_v30, 5  ;;  %v5381_v59 = vrot.slane %v5297_v44, 6 }
 0x451   : > { %v14077_v49 = vrot.slane %v12395_v53, 5  ;;  %v13947_v39 = vrot.slane %v12552_v3, 6  ;;  %v3810_v25 = vadd.f32 %v11069_v12, %v3770_v17  ;;  %v3809_v40 = vadd.f32 %v11069_v12, %v3769_v37 }
 0x452   : > { %v5068_v11 = vadd.f32 %v4996_v62, %v4875_v18  ;;  %v5069_v57 = vadd.f32 %v4998_v38, %v4876_v52  ;;  %v5191_v41 = vsel %vm2682_vm6, %v5188_v8, %v13948_v36  ;;  %v14078_v20 = vrot.slane %v12401_v32, 6 }
 0x453   : > { %v5189_v45 = vsel %vm2682_vm6, %v14077_v49, %v5188_v8  ;;  %v5384_v53 = vsel %vm2906_vm7, %v5381_v59, %v13947_v39  ;;  %v3846_v24 = vmax.f32 %v3810_v25, 0.0  ;;  %v3845_v7 = vmax.f32 %v3809_v40, 0.0 }
 0x454   : > { %v5382_v29 = vsel %vm2906_vm7, %v14078_v20, %v5381_v59  ;;  %v3919_v47 = vmul.f32 %v11078_v63, %v12198_v60  ;;  %v5261_v12 = vadd.f32 %v5189_v45, %v5068_v11  ;;  %v5262_v62 = vadd.f32 %v5191_v41, %v5069_v57 }
 0x455   : > { %v12578_v38 = vmul.f32 %v11082_v6, %v12198_v60  ;;  %v12582_v32 = vmul.f32 %v11082_v6, %v12323_v48  ;;  %v3882_v44 = vmin.f32 %v3846_v24, 6.0  ;;  %v3881_v8 = vmin.f32 %v3845_v7, 6.0 }
 0x456   : > { %v12586_v17 = vmul.f32 %v11085_v0, %v12198_v60  ;;  %v12590_v25 = vmul.f32 %v11085_v0, %v12323_v48  ;;  %v5454_v40 = vadd.f32 %v5382_v29, %v5261_v12  ;;  %v5455_v11 = vadd.f32 %v5384_v53, %v5262_v62 }
 0x457   : > { %14079 = vst [vmem:[#allocation10_spill] sm:$0xff] %v12582_v32  ;;  %v13946_v37 = vrot.slane %v12578_v38, 1  ;;  %v13944_v18 = vrot.slane %v12582_v32, 1  ;;  %v4921_v52 = vmul.f32 %v11099_v21, %v3882_v44  ;;  %v12596_v59 = vmul.f32 %v11103_v42, %v3882_v44 }
 0x458   : > { %14080 = vst [vmem:[#allocation11_spill] sm:$0xff] %v12590_v25  ;;  %v12599_v49 = vmul.f32 %v12141_v56, %v3882_v44  ;;  %v13945_v45 = vrot.slane %v12586_v17, 2  ;;  %v5489_v57 = vadd.f32 %v11108_v14, %v5454_v40  ;;  %v5490_v41 = vadd.f32 %v11108_v14, %v5455_v11 }
 0x459   : > { %14081 = vst [vmem:[#allocation13_spill] sm:$0xff] %v12596_v59  ;;  %v4049_v20 = vsel %vm1350_vm2, %v13946_v37, %v13944_v18  ;;  %v13943_v29 = vrot.slane %v12590_v25, 2  ;;  %v5015_v53 = vrot.slane %v4921_v52, 4  ;;  %v12619_v40 = vmul.f32 %v11089_v35, %v12321_v1 }
 0x45a   : > { %14082 = vst [vmem:[#allocation14_spill] sm:$0xff] %v12599_v49  ;;  %v4112_v12 = vadd.f32 %v4049_v20, %v3919_v47  ;;  %v8379_v62 = vpack.c.bf16 %v5490_v41, %v5489_v57  ;;  %v12623_v11 = vmul.f32 %v11092_v23, %v12321_v1  ;;  %v12627_v7 = vmul.f32 %v11096_v50, %v12321_v1 }
 0x45b   : > { %v4242_v44 = vsel %vm1570_vm3, %v13945_v45, %v13943_v29  ;;  %v12632_v57 = vmul.f32 %v11099_v21, %v12448_v16  ;;  %v13950_v41 = vrot.slane %v12619_v40, 2  ;;  %v4920_v29 = vmul.f32 %v11099_v21, %v3881_v8 }
 0x45c   : > { %v4305_v52 = vadd.f32 %v4242_v44, %v4112_v12  ;;  %8380 = vmatpush1.bf16.msra.mxu0 %v8379_v62  ;;  %v13954_v20 = vrot.slane %v12623_v11, 3  ;;  %v12639_v12 = vmul.f32 %v11103_v42, %v12448_v16  ;;  %v12645_v24 = vmul.f32 %v11103_v42, %v3881_v8 }
 0x45d   : > { %8381 = vmatprep.subr.bf16.mxu0 %v14005_v61  ;;  %v12648_v62 = vmul.f32 %v12141_v56, %v3881_v8  ;;  %v14085_v45 = vrot.slane %v12472_v55, 2  ;;  %v14086_v39 = vrot.slane %v12476_v54, 3  ;;  %v5013_v44 = vrot.slane %v4920_v29, 4 }
 0x45e   : > { %14083 = vst [vmem:[#allocation15_spill] sm:$0xff] %v12645_v24  ;;  %v13953_v18 = vrot.slane %v12639_v12, 5  ;;  %v14087_v26 = vrot.slane %v12480_v28, 4  ;;  %v14088_v8 = vrot.slane %v12627_v7, 4  ;;  %v13952_v49 = vrot.slane %v12645_v24, 5 }
 0x45f   : > { %14084 = vst [vmem:[#allocation16_spill] sm:$0xff] %v12648_v62  ;;  %v4435_v37 = vsel %vm1570_vm3, %v13950_v41, %v14085_v45  ;;  %v4628_v36 = vsel %vm2011_vm4, %v13954_v20, %v14086_v39  ;;  %v14089_v41 = vrot.slane %v12632_v57, 4  ;;  %v12672_v39 = vsel %vm2235_vm5, %v5013_v44, %v5015_v53 }
 0x460   : > { %v4498_v47 = vadd.f32 %v4435_v37, %v4305_v52  ;;  %v4821_v33 = vsel %vm2235_vm5, %v14088_v8, %v14087_v26  ;;  %14090 = vst [vmem:[#allocation17_spill] sm:$0xff] %v12672_v39  ;;  %v3912_v37 = vmul.f32 %v11078_v63, %v11818_v22  ;;  %v3913_v29 = vmul.f32 %v11078_v63, %v11816_v9 }
 0x461   : > { %v5014_v25 = vsel %vm2235_vm5, %v14089_v41, %v5013_v44  ;;  %v12683_v26 = vsel %vm2682_vm6, %v13953_v18, %v13952_v49  ;;  %v3948_v41 = vmul.f32 %v11082_v6, %v11816_v9  ;;  %v12689_v53 = vmul.f32 %v11082_v6, %v11945_v15 }
 0x462   : > { %v4691_v52 = vadd.f32 %v4628_v36, %v4498_v47  ;;  %v4141_v22 = vmul.f32 %v11085_v0, %v11816_v9  ;;  %v12695_v36 = vmul.f32 %v11085_v0, %v11945_v15  ;;  %v4334_v47 = vmul.f32 %v11089_v35, %v11943_v13 }
 0x463   : > { %v12701_v44 = vmul.f32 %v11089_v35, %v12067_v10  ;;  %v4034_v49 = vrot.slane %v3948_v41, 1  ;;  %v13959_v45 = vrot.slane %v12689_v53, 1  ;;  %v4527_v18 = vmul.f32 %v11092_v23, %v11943_v13 }
 0x464   : > { %v4884_v8 = vadd.f32 %v4821_v33, %v4691_v52  ;;  %v4227_v20 = vrot.slane %v4141_v22, 2  ;;  %v13961_v9 = vrot.slane %v12695_v36, 2  ;;  %v4420_v39 = vrot.slane %v4334_v47, 2 }
 0x465   : > { %v14091_v24 = vrot.slane %v12437_v31, 1  ;;  %v4037_v33 = vsel %vm1350_vm2, %v4034_v49, %v13959_v45  ;;  %v12718_v52 = vmul.f32 %v11092_v23, %v12067_v10  ;;  %v14092_v47 = vrot.slane %v12443_v19, 2 }
 0x466   : > { %v12708_v32 = vadd.f32 %v5014_v25, %v4884_v8  ;;  %v4106_v22 = vadd.f32 %v4037_v33, %v3913_v29  ;;  %v4230_v31 = vsel %vm1570_vm3, %v4227_v20, %v13961_v9  ;;  %v14093_v25 = vrot.slane %v12494_v34, 2 }
 0x467   : > { %v4035_v59 = vsel %vm1350_vm2, %v14091_v24, %v4034_v49  ;;  %v4228_v28 = vsel %vm1570_vm3, %v14092_v47, %v4227_v20  ;;  %v14094_v49 = vrot.slane %v12701_v44, 2  ;;  %v4613_v45 = vrot.slane %v4527_v18, 3 }
 0x468   : > { %v4105_v41 = vadd.f32 %v4035_v59, %v3912_v37  ;;  %v4421_v24 = vsel %vm1570_vm3, %v14093_v25, %v4420_v39  ;;  %v13960_v59 = vrot.slane %v12718_v52, 3  ;;  %v4299_v29 = vadd.f32 %v4230_v31, %v4106_v22 }
 0x469   : > { %v4423_v8 = vsel %vm1570_vm3, %v4420_v39, %v14094_v49  ;;  %v4720_v19 = vmul.f32 %v11096_v50, %v11943_v13  ;;  %v12737_v33 = vmul.f32 %v11096_v50, %v12067_v10  ;;  %v14095_v34 = vrot.slane %v12500_v58, 3 }
 0x46a   : > { %v4298_v37 = vadd.f32 %v4228_v28, %v4105_v41  ;;  %v4616_v39 = vsel %vm2011_vm4, %v4613_v45, %v13960_v59  ;;  %v4913_v18 = vmul.f32 %v11099_v21, %v12065_v2  ;;  %v12749_v28 = vmul.f32 %v11099_v21, %v12200_v27 }
 0x46b   : > { %v4614_v20 = vsel %vm2011_vm4, %v14095_v34, %v4613_v45  ;;  %v4492_v22 = vadd.f32 %v4423_v8, %v4299_v29  ;;  %v4806_v47 = vrot.slane %v4720_v19, 4  ;;  %v13964_v31 = vrot.slane %v12737_v33, 4 }
 0x46c   : > { %v4491_v41 = vadd.f32 %v4421_v24, %v4298_v37  ;;  %v4999_v25 = vrot.slane %v4913_v18, 4  ;;  %v13963_v58 = vrot.slane %v12749_v28, 4  ;;  %v5106_v49 = vmul.f32 %v11103_v42, %v12065_v2 }
 0x46d   : > { %v12757_v45 = vmul.f32 %v11103_v42, %v12200_v27  ;;  %v4685_v59 = vadd.f32 %v4616_v39, %v4492_v22  ;;  %v14096_v9 = vrot.slane %v12506_v5, 4  ;;  %v4809_v8 = vsel %vm2235_vm5, %v4806_v47, %v13964_v31 }
 0x46e   : > { %v4684_v34 = vadd.f32 %v4614_v20, %v4491_v41  ;;  %v14097_v37 = vrot.slane %v12513_v4, 4  ;;  %v5002_v19 = vsel %vm2235_vm5, %v4999_v25, %v13963_v58  ;;  %v5192_v18 = vrot.slane %v5106_v49, 5 }
 0x46f   : > { %v4807_v24 = vsel %vm2235_vm5, %v14096_v9, %v4806_v47  ;;  %v13962_v20 = vrot.slane %v12757_v45, 5  ;;  %v4878_v41 = vadd.f32 %v4809_v8, %v4685_v59  ;;  %v5299_v5 = vmul.f32 %v12141_v56, %v12065_v2 }
 0x470   : > { %v5000_v29 = vsel %vm2235_vm5, %v14097_v37, %v4999_v25  ;;  %v4877_v39 = vadd.f32 %v4807_v24, %v4684_v34  ;;  %v12776_v9 = vmul.f32 %v12141_v56, %v12200_v27  ;;  %v14098_v4 = vrot.slane %v12546_v30, 5 }
 0x471   : > { %v5195_v47 = vsel %vm2682_vm6, %v5192_v18, %v13962_v20  ;;  %v3914_v25 = vmul.f32 %v11078_v63, %v11945_v15  ;;  %v3915_v59 = vmul.f32 %v11078_v63, %v11943_v13  ;;  %v5071_v34 = vadd.f32 %v5002_v19, %v4878_v41 }
 0x472   : > { %v5193_v22 = vsel %vm2682_vm6, %v14098_v4, %v5192_v18  ;;  %v5070_v49 = vadd.f32 %v5000_v29, %v4877_v39  ;;  %v5385_v24 = vrot.slane %v5299_v5, 6  ;;  %v5387_v8 = vrot.slane %v12776_v9, 6 }
 0x473   : > { %v3950_v30 = vmul.f32 %v11082_v6, %v11943_v13  ;;  %v12793_v37 = vmul.f32 %v11082_v6, %v12067_v10  ;;  %v4143_v18 = vmul.f32 %v11085_v0, %v11943_v13  ;;  %v12799_v15 = vmul.f32 %v11085_v0, %v12067_v10 }
 0x474   : > { %v5263_v4 = vadd.f32 %v5193_v22, %v5070_v49  ;;  %v5264_v29 = vadd.f32 %v5195_v47, %v5071_v34  ;;  %v14099_v19 = vrot.slane %v12552_v3, 6  ;;  %v5388_v41 = vsel %vm2906_vm7, %v5385_v24, %v5387_v8 }
 0x475   : > { %v4038_v5 = vrot.slane %v3950_v30, 1  ;;  %v13967_v20 = vrot.slane %v12793_v37, 1  ;;  %v4231_v58 = vrot.slane %v4143_v18, 2  ;;  %v4233_v13 = vrot.slane %v12799_v15, 2 }
 0x476   : > { %v5386_v39 = vsel %vm2906_vm7, %v14099_v19, %v5385_v24  ;;  %v5457_v62 = vadd.f32 %v5388_v41, %v5264_v29  ;;  %v4336_v22 = vmul.f32 %v11089_v35, %v12065_v2  ;;  %v12813_v3 = vmul.f32 %v11089_v35, %v12200_v27 }
 0x477   : > { %v5456_v31 = vadd.f32 %v5386_v39, %v5263_v4  ;;  %v14100_v47 = vrot.slane %v12689_v53, 1  ;;  %v4041_v34 = vsel %vm1350_vm2, %v4038_v5, %v13967_v20  ;;  %v14101_v24 = vrot.slane %v12695_v36, 2 }
 0x478   : > { %v4234_v18 = vsel %vm1570_vm3, %v4231_v58, %v4233_v13  ;;  %v5492_v29 = vadd.f32 %v11108_v14, %v5457_v62  ;;  %v4108_v53 = vadd.f32 %v4041_v34, %v3915_v59  ;;  %v4424_v39 = vrot.slane %v4336_v22, 2 }
 0x479   : > { %v4039_v49 = vsel %vm1350_vm2, %v14100_v47, %v4038_v5  ;;  %v4232_v30 = vsel %vm1570_vm3, %v14101_v24, %v4231_v58  ;;  %v5491_v4 = vadd.f32 %v11108_v14, %v5456_v31  ;;  %v4426_v41 = vrot.slane %v12813_v3, 2 }
 0x47a   : > { %v4107_v19 = vadd.f32 %v4039_v49, %v3914_v25  ;;  %v4529_v5 = vmul.f32 %v11092_v23, %v12065_v2  ;;  %v12834_v36 = vmul.f32 %v11092_v23, %v12200_v27  ;;  %v4301_v20 = vadd.f32 %v4234_v18, %v4108_v53 }
 0x47b   : > { %v8382_v47 = vpack.c.bf16 %v5492_v29, %v5491_v4  ;;  %v4722_v31 = vmul.f32 %v11096_v50, %v12065_v2  ;;  %v14102_v62 = vrot.slane %v12701_v44, 2  ;;  %v4427_v25 = vsel %vm1570_vm3, %v4424_v39, %v4426_v41 }
 0x47c   : > { %v4300_v24 = vadd.f32 %v4232_v30, %v4107_v19  ;;  %v4617_v59 = vrot.slane %v4529_v5, 3  ;;  %v4619_v22 = vrot.slane %v12834_v36, 3  ;;  %v4494_v34 = vadd.f32 %v4427_v25, %v4301_v20 }
 0x47d   : > { %v4425_v58 = vsel %vm1570_vm3, %v14102_v62, %v4424_v39  ;;  %8383 = vmatpush1.bf16.msra.mxu0 %v8382_v47  ;;  %v12847_v30 = vmul.f32 %v11096_v50, %v12200_v27  ;;  %v4810_v18 = vrot.slane %v4722_v31, 4  ;;  %v14103_v44 = vrot.slane %v12718_v52, 3 }
 0x47e   : > { %v4493_v49 = vadd.f32 %v4425_v58, %v4300_v24  ;;  %8384 = vmatprep.subr.bf16.mxu0 %v14005_v61  ;;  %v4620_v29 = vsel %vm2011_vm4, %v4617_v59, %v4619_v22  ;;  %v4915_v19 = vmul.f32 %v11099_v21, %v12198_v60  ;;  %v12860_v20 = vmul.f32 %v11099_v21, %v12323_v48 }
 0x47f   : > { %v4618_v4 = vsel %vm2011_vm4, %v14103_v44, %v4617_v59  ;;  %v4687_v39 = vadd.f32 %v4620_v29, %v4494_v34  ;;  %v14104_v5 = vrot.slane %v12737_v33, 4  ;;  %v13968_v52 = vrot.slane %v12847_v30, 4 }
 0x480   : > { %v4686_v53 = vadd.f32 %v4618_v4, %v4493_v49  ;;  %v5003_v24 = vrot.slane %v4915_v19, 4  ;;  %v5005_v31 = vrot.slane %v12860_v20, 4  ;;  %v5108_v62 = vmul.f32 %v11103_v42, %v12198_v60 }
 0x481   : > { %v4811_v47 = vsel %vm2235_vm5, %v14104_v5, %v4810_v18  ;;  %v12871_v58 = vmul.f32 %v11103_v42, %v12323_v48  ;;  %v4813_v25 = vsel %vm2235_vm5, %v4810_v18, %v13968_v52  ;;  %v5301_v33 = vmul.f32 %v12141_v56, %v12198_v60 }
 0x482   : > { %v4879_v59 = vadd.f32 %v4811_v47, %v4686_v53  ;;  %v12880_v49 = vmul.f32 %v12141_v56, %v12323_v48  ;;  %v4880_v34 = vadd.f32 %v4813_v25, %v4687_v39  ;;  %v14105_v44 = vrot.slane %v12749_v28, 4 }
 0x483   : > { %v5006_v29 = vsel %vm2235_vm5, %v5003_v24, %v5005_v31  ;;  %v5196_v19 = vrot.slane %v5108_v62, 5  ;;  %v5198_v18 = vrot.slane %v12871_v58, 5  ;;  %v5389_v53 = vrot.slane %v5301_v33, 6 }
 0x484   : > { %v5004_v4 = vsel %vm2235_vm5, %v14105_v44, %v5003_v24  ;;  %v13969_v47 = vrot.slane %v12880_v49, 6  ;;  %v5073_v52 = vadd.f32 %v5006_v29, %v4880_v34  ;;  %v14106_v56 = vrot.slane %v12757_v45, 5 }
 0x485   : > { %v5072_v5 = vadd.f32 %v5004_v4, %v4879_v59  ;;  %v3916_v28 = vmul.f32 %v11078_v63, %v12067_v10  ;;  %v3917_v25 = vmul.f32 %v11078_v63, %v12065_v2  ;;  %v5199_v24 = vsel %vm2682_vm6, %v5196_v19, %v5198_v18 }
 0x486   : > { %v5197_v39 = vsel %vm2682_vm6, %v14106_v56, %v5196_v19  ;;  %v5390_v59 = vsel %vm2906_vm7, %v5387_v8, %v5389_v53  ;;  %v5392_v45 = vsel %vm2906_vm7, %v5389_v53, %v13969_v47  ;;  %v5266_v33 = vadd.f32 %v5199_v24, %v5073_v52 }
 0x487   : > { %v5265_v62 = vadd.f32 %v5197_v39, %v5072_v5  ;;  %v3952_v10 = vmul.f32 %v11082_v6, %v12065_v2  ;;  %v3953_v34 = vmul.f32 %v11082_v6, %v12200_v27  ;;  %v4145_v44 = vmul.f32 %v11085_v0, %v12065_v2 }
 0x488   : > { %v12914_v9 = vmul.f32 %v11085_v0, %v12200_v27  ;;  %v4338_v8 = vmul.f32 %v11089_v35, %v12198_v60  ;;  %v12920_v52 = vmul.f32 %v11089_v35, %v12323_v48  ;;  %v5459_v29 = vadd.f32 %v5392_v45, %v5266_v33 }
 0x489   : > { %v5458_v4 = vadd.f32 %v5390_v59, %v5265_v62  ;;  %v4042_v19 = vrot.slane %v3952_v10, 1  ;;  %v4044_v5 = vrot.slane %v3953_v34, 1  ;;  %v4235_v53 = vrot.slane %v4145_v44, 2 }
 0x48a   : > { %v4237_v2 = vrot.slane %v12914_v9, 2  ;;  %v4428_v39 = vrot.slane %v4338_v8, 2  ;;  %v4430_v24 = vrot.slane %v12920_v52, 2  ;;  %v5494_v62 = vadd.f32 %v11108_v14, %v5459_v29 }
 0x48b   : > { %v5493_v56 = vadd.f32 %v11108_v14, %v5458_v4  ;;  %v14107_v59 = vrot.slane %v12793_v37, 1  ;;  %v4045_v35 = vsel %vm1350_vm2, %v4042_v19, %v4044_v5  ;;  %v4236_v45 = vsel %vm1570_vm3, %v4233_v13, %v4235_v53 }
 0x48c   : > { %v4110_v10 = vadd.f32 %v4045_v35, %v3917_v25  ;;  %v4238_v34 = vsel %vm1570_vm3, %v4235_v53, %v4237_v2  ;;  %v4429_v44 = vsel %vm1570_vm3, %v4426_v41, %v4428_v39  ;;  %v4431_v9 = vsel %vm1570_vm3, %v4428_v39, %v4430_v24 }
 0x48d   : > { %v4043_v47 = vsel %vm1350_vm2, %v14107_v59, %v4042_v19  ;;  %v8385_v4 = vpack.c.bf16 %v5494_v62, %v5493_v56  ;;  %v4531_v37 = vmul.f32 %v11092_v23, %v12198_v60  ;;  %v4532_v8 = vmul.f32 %v11092_v23, %v12323_v48 }
 0x48e   : > { %v4109_v33 = vadd.f32 %v4043_v47, %v3916_v28  ;;  %v4303_v52 = vadd.f32 %v4238_v34, %v4110_v10  ;;  %v4724_v13 = vmul.f32 %v11096_v50, %v12198_v60  ;;  %v4725_v47 = vmul.f32 %v11096_v50, %v12323_v48 }
 0x48f   : > { %8386 = vmatpush1.bf16.msra.mxu0 %v8385_v4  ;;  %v4621_v3 = vrot.slane %v4531_v37, 3  ;;  %v4623_v41 = vrot.slane %v4532_v8, 3  ;;  %v4917_v28 = vmul.f32 %v11099_v21, %v12321_v1  ;;  %v4918_v25 = vmul.f32 %v11099_v21, %v12450_v51 }
 0x490   : > { %v4302_v15 = vadd.f32 %v4236_v45, %v4109_v33  ;;  %8387 = vmatprep.subr.bf16.mxu0 %v14005_v61  ;;  %v4496_v29 = vadd.f32 %v4431_v9, %v4303_v52  ;;  %v4814_v19 = vrot.slane %v4724_v13, 4  ;;  %v4816_v53 = vrot.slane %v4725_v47, 4 }
 0x491   : > { %v4622_v60 = vsel %vm2011_vm4, %v4619_v22, %v4621_v3  ;;  %v4624_v56 = vsel %vm2011_vm4, %v4621_v3, %v4623_v41  ;;  %v5007_v39 = vrot.slane %v4917_v28, 4  ;;  %v5009_v62 = vrot.slane %v4918_v25, 4 }
 0x492   : > { %v4495_v23 = vadd.f32 %v4429_v44, %v4302_v15  ;;  %v4689_v35 = vadd.f32 %v4624_v56, %v4496_v29  ;;  %v14108_v45 = vrot.slane %v12847_v30, 4  ;;  %v4817_v33 = vsel %vm2235_vm5, %v4814_v19, %v4816_v53  ;;  %v8604_v30 = vld [vmem:[%s13836_s2 + $0x18] ss:$0 sm:$0xff] }
 0x493   : > { %v5008_v10 = vsel %vm2235_vm5, %v5005_v31, %v5007_v39  ;;  %v5010_v36 = vsel %vm2235_vm5, %v5007_v39, %v5009_v62  ;;  %v5110_v22 = vmul.f32 %v11103_v42, %v12321_v1  ;;  %v5111_v34 = vmul.f32 %v11103_v42, %v12450_v51 }
 0x494   : > { %v4688_v59 = vadd.f32 %v4622_v60, %v4495_v23  ;;  %v4815_v21 = vsel %vm2235_vm5, %v14108_v45, %v4814_v19  ;;  %v4882_v4 = vadd.f32 %v4817_v33, %v4689_v35  ;;  %v5303_v9 = vmul.f32 %v8604_v30, %v12321_v1 }
 0x495   : > { %v5304_v20 = vmul.f32 %v8604_v30, %v12450_v51  ;;  %v5200_v37 = vrot.slane %v5110_v22, 5  ;;  %v5202_v31 = vrot.slane %v5111_v34, 5  ;;  %v3918_v8 = vmul.f32 %v11078_v63, %v12200_v27 }
 0x496   : > { %v4881_v44 = vadd.f32 %v4815_v21, %v4688_v59  ;;  %v14109_v15 = vrot.slane %v12578_v38, 1  ;;  %v5075_v13 = vadd.f32 %v5010_v36, %v4882_v4  ;;  %v5393_v47 = vrot.slane %v5303_v9, 6 }
 0x497   : > { %v5395_v3 = vrot.slane %v5304_v20, 6  ;;  %v5201_v28 = vsel %vm2682_vm6, %v5198_v18, %v5200_v37  ;;  %v5203_v25 = vsel %vm2682_vm6, %v5200_v37, %v5202_v31  ;;  %v14110_v23 = vrot.slane %v12586_v17, 2  ;;  %v14123_v20 = vld [vmem:[#allocation13_spill] sm:$0xff] }
 0x498   : > { %v4047_v52 = vsel %vm1350_vm2, %v4044_v5, %v14109_v15  ;;  %v5074_v42 = vadd.f32 %v5008_v10, %v4881_v44  ;;  %v5268_v19 = vadd.f32 %v5203_v25, %v5075_v13  ;;  %v14111_v38 = vrot.slane %v12880_v49, 6 }
 0x499   : > { %v4111_v51 = vadd.f32 %v4047_v52, %v3918_v8  ;;  %v4240_v29 = vsel %vm1570_vm3, %v4237_v2, %v14110_v23  ;;  %v5396_v60 = vsel %vm2906_vm7, %v5393_v47, %v5395_v3  ;;  %v14112_v58 = vrot.slane %v12619_v40, 2  ;;  %v5501_v8 = vld [vmem:[%s13839_s5 + $0x8] sm:$0xff]  ;;  %v14127_v52 = vld [vmem:[#allocation10_spill] sm:$0xff] }
 0x49a   : > { %v5267_v27 = vadd.f32 %v5201_v28, %v5074_v42  ;;  %v5394_v5 = vsel %vm2906_vm7, %v14111_v38, %v5393_v47  ;;  %v14113_v39 = vrot.slane %v12623_v11, 3  ;;  %v14114_v17 = vrot.slane %v12627_v7, 4  ;;  %v14129_v47 = vld [vmem:[#allocation11_spill] sm:$0xff]  ;;  %7210 = vmatprep.mubr.msk.f32.mxu0 %vm5514_vm8, %v5501_v8  ;;  %v5511_v8 = vld [vmem:[%s13839_s5 + $0x58] sm:$0xff] }
 0x49b   : > { %v4304_v56 = vadd.f32 %v4240_v29, %v4111_v51  ;;  %v4433_v18 = vsel %vm1570_vm3, %v4430_v24, %v14112_v58  ;;  %v5461_v45 = vadd.f32 %v5396_v60, %v5268_v19  ;;  %v14115_v49 = vrot.slane %v12632_v57, 4  ;;  %v14131_v29 = vld [vmem:[#allocation14_spill] sm:$0xff]  ;;  %v7220_v60 = vld [vmem:[%s13838_s4 + $0x118] sm:$0xff] }
 0x49c   : > { %v4626_v59 = vsel %vm2011_vm4, %v4623_v41, %v14113_v39  ;;  %v4819_v2 = vsel %vm2235_vm5, %v4816_v53, %v14114_v17  ;;  %v5460_v35 = vadd.f32 %v5394_v5, %v5267_v27  ;;  %v14116_v33 = vrot.slane %v12639_v12, 5  ;;  %v7219_v5 = vld [vmem:[%s13838_s4 + $0x110] sm:$0xff] }
 0x49d   : > { %v5012_v21 = vsel %vm2235_vm5, %v5009_v62, %v14115_v49  ;;  %v4497_v10 = vadd.f32 %v4433_v18, %v4304_v56  ;;  %v5270_v11 = vadd.f32 %v12683_v26, %v12708_v32  ;;  %v5305_v24 = vmul.f32 %v8604_v30, %v12448_v16  ;;  %v14134_v56 = vld [vmem:[#allocation12_spill] sm:$0xff] }
 0x49e   : > { %v5205_v40 = vsel %vm2682_vm6, %v5202_v31, %v14116_v33  ;;  %v3920_v7 = vmul.f32 %v11078_v63, %v12323_v48  ;;  %v5495_v41 = vadd.f32 %v11108_v14, %v5460_v35  ;;  %v5496_v53 = vadd.f32 %v11108_v14, %v5461_v45  ;;  %v7222_v33 = vld [vmem:[%s13838_s4 + $0x128] sm:$0xff] }
 0x49f   : > { %v3956_v57 = vmul.f32 %v11082_v6, %v12321_v1  ;;  %v4149_v12 = vmul.f32 %v11085_v0, %v12321_v1  ;;  %v4690_v62 = vadd.f32 %v4626_v59, %v4497_v10  ;;  %v5397_v36 = vrot.slane %v5305_v24, 6 }
 0x4a0   : > { %v14117_v22 = vrot.slane %v12464_v43, 2  ;;  %v14118_v32 = vrot.slane %v12472_v55, 2  ;;  %v14119_v63 = vrot.slane %v12468_v46, 3  ;;  %v14120_v48 = vrot.slane %v12476_v54, 3  ;;  %v14121_v43 = vld [vmem:[#allocation16_spill] sm:$0xff]  ;;  %v14125_v46 = vld [vmem:[#allocation15_spill] sm:$0xff] }
 0x4a1   : > { %v8388_v44 = vpack.c.bf16 %v5496_v53, %v5495_v41  ;;  %v4050_v4 = vrot.slane %v3956_v57, 1  ;;  %v4243_v6 = vrot.slane %v4149_v12, 2  ;;  %v4728_v0 = vmul.f32 %v11096_v50, %v12448_v16  ;;  %v7217_v50 = vld [vmem:[%s13838_s4 + $0x100] sm:$0xff]  ;;  %v7218_v16 = vld [vmem:[%s13838_s4 + $0x108] sm:$0xff]  ;;  %v7223_v41 = vld [vmem:[%s13838_s4 + $0x130] sm:$0xff] }
 0x4a2   : > { %v4437_v26 = vsel %vm1570_vm3, %v14118_v32, %v14117_v22  ;;  %v4630_v34 = vsel %vm2011_vm4, %v14120_v48, %v14119_v63  ;;  %v4883_v1 = vadd.f32 %v4819_v2, %v4690_v62  ;;  %v5398_v30 = vsel %vm2906_vm7, %v5395_v3, %v5397_v36  ;;  %v7224_v53 = vld [vmem:[%s13838_s4 + $0x138] sm:$0xff]  ;;  %v7225_v32 = vld [vmem:[%s13838_s4 + $0x140] sm:$0xff] }
 0x4a3   : > { %v14122_v9 = vrot.slane %v14121_v43, 6  ;;  %v14124_v37 = vrot.slane %v14123_v20, 5  ;;  %v14126_v31 = vrot.slane %v14125_v46, 5  ;;  %8389 = vmatpush1.bf16.msra.mxu0 %v8388_v44  ;;  %v14128_v42 = vrot.slane %v14127_v52, 1  ;;  %v14136_v57 = vld [vmem:[#allocation17_spill] sm:$0xff]  ;;  %v5500_v44 = vld [vmem:[%s13839_s5] sm:$0xff] }
 0x4a4   : > { %v14130_v3 = vrot.slane %v14129_v47, 2  ;;  %v4822_v25 = vrot.slane %v4728_v0, 4  ;;  %8390 = vmatprep.subr.bf16.mxu0 %v14005_v61  ;;  %v5076_v51 = vadd.f32 %v5012_v21, %v4883_v1  ;;  %v14132_v27 = vrot.slane %v14131_v29, 6  ;;  %v7221_v21 = vld [vmem:[%s13838_s4 + $0x120] sm:$0xff]  ;;  %v5503_v0 = vld [vmem:[%s13839_s5 + $0x18] sm:$0xff]  ;;  %v5502_v1 = vld [vmem:[%s13839_s5 + $0x10] sm:$0xff] }
 0x4a5   : > { %v5400_v55 = vsel %vm2906_vm7, %v5397_v36, %v14122_v9  ;;  %v5209_v54 = vsel %vm2682_vm6, %v14126_v31, %v14124_v37  ;;  %v4051_v13 = vsel %vm1350_vm2, %v14128_v42, %v4050_v4  ;;  %v14133_v19 = vmov %v14122_v9  ;;  %v7227_v4 = vld [vmem:[%s13838_s4 + $0x150] sm:$0xff]  ;;  %v7230_v43 = vld [vmem:[%s13838_s4 + $0x168] sm:$0xff]  ;;  %v5504_v20 = vld [vmem:[%s13839_s5 + $0x20] sm:$0xff] }
 0x4a6   : > { %v5463_v15 = vadd.f32 %v5400_v55, %v5270_v11  ;;  %v4244_v28 = vsel %vm1570_vm3, %v14130_v3, %v4243_v6  ;;  %v4113_v23 = vadd.f32 %v4051_v13, %v3920_v7  ;;  %v5402_v38 = vsel %vm2906_vm7, %v14133_v19, %v14132_v27  ;;  %v7228_v6 = vld [vmem:[%s13838_s4 + $0x158] sm:$0xff]  ;;  %v5505_v9 = vld [vmem:[%s13839_s5 + $0x28] sm:$0xff]  ;;  %v5506_v46 = vld [vmem:[%s13839_s5 + $0x30] sm:$0xff] }
 0x4a7   : > { %v14135_v58 = vrot.slane %v14134_v56, 4  ;;  %v8394_v39 = vpack.c.bf16 %v7218_v16, %v7217_v50  ;;  %v5269_v59 = vadd.f32 %v5205_v40, %v5076_v51  ;;  %v8397_v2 = vpack.c.bf16 %v7220_v60, %v7219_v5  ;;  %v5507_v37 = vld [vmem:[%s13839_s5 + $0x38] sm:$0xff]  ;;  %v5509_v31 = vld [vmem:[%s13839_s5 + $0x48] sm:$0xff]  ;;  %v5510_v50 = vld [vmem:[%s13839_s5 + $0x50] sm:$0xff] }
 0x4a8   : > { %v4306_v17 = vadd.f32 %v4244_v28, %v4113_v23  ;;  %v5498_v45 = vadd.f32 %v11108_v14, %v5463_v15  ;;  %v8400_v11 = vpack.c.bf16 %v7222_v33, %v7221_v21  ;;  %v14137_v62 = vmov 0.0   ;;  %v5513_v16 = vld [vmem:[%s13839_s5 + $0x68] sm:$0x1]  ;;  %v5512_v15 = vld [vmem:[%s13839_s5 + $0x60] sm:$0x1]  ;;  %v7231_v52 = vld [vmem:[%s13838_s4 + $0x170] sm:$0xff] }
 0x4a9   : > { %v4823_v18 = vsel %vm2235_vm5, %v14135_v58, %v4822_v25  ;;  %8395 = vmatpush3.bf16.msra.mxu1 %v8394_v39  ;;  %v5462_v35 = vadd.f32 %v5398_v30, %v5269_v59  ;;  %v8403_v36 = vpack.c.bf16 %v7224_v53, %v7223_v41  ;;  %v7229_v30 = vld [vmem:[%s13838_s4 + $0x160] sm:$0xff]  ;;  %v7232_v42 = vld [vmem:[%s13838_s4 + $0x178] sm:$0xff]  ;;  %v7234_v3 = vld [vmem:[%s13838_s4 + $0x188] sm:$0xff] }
 0x4aa   : > { %v4499_v49 = vadd.f32 %v4437_v26, %v4306_v17  ;;  %8396 = vmatprep.subr.bf16.mxu1 %v14005_v61  ;;  %v7226_v26 = vld [vmem:[%s13838_s4 + $0x148] sm:$0xff]  ;;  %v8412_v55 = vpack.c.bf16 %v7230_v43, %v7229_v30  ;;  %v8415_v13 = vpack.c.bf16 %v7232_v42, %v7231_v52  ;;  %v7233_v47 = vld [vmem:[%s13838_s4 + $0x180] sm:$0xff]  ;;  %v7235_v28 = vld [vmem:[%s13838_s4 + $0x190] sm:$0xff] }
 0x4ab   : > { %v5497_v10 = vadd.f32 %v11108_v14, %v5462_v35  ;;  %v8406_v48 = vpack.c.bf16 %v7226_v26, %v7225_v32  ;;  %v8418_v25 = vpack.c.bf16 %v7234_v3, %v7233_v47  ;;  %v7236_v51 = vld [vmem:[%s13838_s4 + $0x198] sm:$0xff]  ;;  %v7237_v29 = vld [vmem:[%s13838_s4 + $0x1a0] sm:$0xff]  ;;  %v7238_v27 = vld [vmem:[%s13838_s4 + $0x1a8] sm:$0xff] }
 0x4ac   : > { %v4692_v40 = vadd.f32 %v4630_v34, %v4499_v49  ;;  %v8421_v23 = vpack.c.bf16 %v7236_v51, %v7235_v28  ;;  %v8424_v19 = vpack.c.bf16 %v7238_v27, %v7237_v29  ;;  %v7240_v5 = vld [vmem:[%s13838_s4 + $0x1b8] sm:$0xff]  ;;  %v7241_v56 = vld [vmem:[%s13838_s4 + $0x1c0] sm:$0xff]  ;;  %v7242_v58 = vld [vmem:[%s13838_s4 + $0x1c8] sm:$0xff] }
 0x4ad   : > { %8398 = vmatpush3.bf16.msra.mxu1 %v8397_v2  ;;  %v8391_v24 = vpack.c.bf16 %v5498_v45, %v5497_v10  ;;  %v7243_v39 = vld [vmem:[%s13838_s4 + $0x1d0] sm:$0xff]  ;;  %v7244_v59 = vld [vmem:[%s13838_s4 + $0x1d8] sm:$0xff]  ;;  %v7245_v2 = vld [vmem:[%s13838_s4 + $0x1e0] sm:$0xff] }
 0x4ae   : > { %v4885_v7 = vadd.f32 %v4823_v18, %v4692_v40  ;;  %8399 = vmatprep.subr.bf16.mxu1 %v14005_v61  ;;  %v8430_v18 = vpack.c.bf16 %v7242_v58, %v7241_v56  ;;  %v8433_v17 = vpack.c.bf16 %v7244_v59, %v7243_v39  ;;  %v7246_v35 = vld [vmem:[%s13838_s4 + $0x1e8] sm:$0xff]  ;;  %v7251_v43 = vld [vmem:[%s13838_s4 + $0x210] sm:$0xff]  ;;  %v14138_v28 = vld [vmem:[#allocation2_spill] sm:$0xff] }
 0x4af   : > { %8392 = vmatpush1.bf16.msra.mxu0 %v8391_v24  ;;  %v8436_v45 = vpack.c.bf16 %v7246_v35, %v7245_v2  ;;  %v7250_v30 = vld [vmem:[%s13838_s4 + $0x208] sm:$0xff]  ;;  %v7259_v42 = vld [vmem:[%s13838_s4 + $0x250] sm:$0xff] }
 0x4b0   : > { %v5078_v12 = vadd.f32 %v14136_v57, %v4885_v7  ;;  %5596 = vmatprep.subr.mxu0 %v14137_v62  ;;  %v13277_v3 = vld [vmem:[%s13837_s3 + $0x8] sm:$0xff] }
 0x4b1   : > { %8401 = vmatpush3.bf16.msra.mxu1 %v8400_v11  ;;  %v14139_v51 = vld [vmem:[#allocation3_spill] sm:$0xff] }
 0x4b2   : > { %v5271_v22 = vadd.f32 %v5209_v54, %v5078_v12  ;;  %8402 = vmatprep.subr.bf16.mxu1 %v14005_v61  ;;  %v5508_v54 = vld [vmem:[%s13839_s5 + $0x40] sm:$0xff] }
 0x4b4   : > { %v5464_v63 = vadd.f32 %v5402_v38, %v5271_v22  ;;  %v7239_v38 = vld [vmem:[%s13838_s4 + $0x1b0] sm:$0xff] }
 0x4b5   : > { %8404 = vmatpush3.bf16.msra.mxu1 %v8403_v36  ;;  %v8427_v60 = vpack.c.bf16 %v7240_v5, %v7239_v38 }
 0x4b6   : > { %v5499_v34 = vadd.f32 %v11108_v14, %v5464_v63  ;;  %8405 = vmatprep.subr.bf16.mxu1 %v14005_v61  ;;  %v8409_v14 = vpack.c.bf16 %v7228_v6, %v7227_v4  ;;  %v7247_v6 = vld [vmem:[%s13838_s4 + $0x1f0] sm:$0xff] }
 0x4b8   : > { %5597 = vmatpush1.msra.mxu0 %v5499_v34 }
 0x4b9   : > { %5601 = vmatmul.mubr.f32.vlgmr.msra.gmra.mrb[82].mxu0 %v5500_v44  ;;  %8407 = vmatpush3.bf16.msra.mxu1 %v8406_v48 }
 0x4ba   : > { %7211 = vmatprep.mubr.msk.f32.mxu0 %vm5514_vm8, %v5503_v0  ;;  %8408 = vmatprep.subr.bf16.mxu1 %v14005_v61  ;;  %v7248_v0 = vld [vmem:[%s13838_s4 + $0x1f8] sm:$0xff] }
 0x4bb   : > { %8417 = vmatprep.subr.bf16.mxu0 %v14005_v61 }
 0x4bc   : > { %8419 = vmatpush3.bf16.msra.mxu0 %v8418_v25  ;;  %v5763_v25 = vrot.slane %v13277_v3, %v14138_v28 }
 0x4bd   : > { %5606 = vmatmul.mubr.f32.gmra.mrb[84].mxu0 %v5502_v1  ;;  %8410 = vmatpush3.bf16.msra.mxu1 %v8409_v14  ;;  %v8439_v14 = vpack.c.bf16 %v7248_v0, %v7247_v6  ;;  %v7249_v1 = vld [vmem:[%s13838_s4 + $0x200] sm:$0xff]  ;;  %v14141_v6 = vld [vmem:[#allocation5_spill] sm:$0xff] }
 0x4be   : > { %7212 = vmatprep.mubr.msk.f32.mxu0 %vm5514_vm8, %v5505_v9  ;;  %8411 = vmatprep.subr.bf16.mxu1 %v14005_v61  ;;  %v8442_v9 = vpack.c.bf16 %v7250_v30, %v7249_v1  ;;  %v5913_v0 = vrot.slane %v13277_v3, %v14141_v6 }
 0x4bf   : > { %8420 = vmatprep.subr.bf16.mxu0 %v14005_v61 }
 0x4c0   : > { %8422 = vmatpush3.bf16.msra.mxu0 %v8421_v23  ;;  %v5774_v23 = vrot.slane %v13277_v3, %v14139_v51 }
 0x4c1   : > { %5611 = vmatmul.mubr.f32.gmra.mrb[86].mxu0 %v5504_v20  ;;  %8413 = vmatpush3.bf16.msra.mxu1 %v8412_v55  ;;  %v7252_v55 = vld [vmem:[%s13838_s4 + $0x218] sm:$0xff] }
 0x4c2   : > { %7213 = vmatprep.mubr.msk.f32.mxu0 %vm5514_vm8, %v5507_v37  ;;  %8414 = vmatprep.subr.bf16.mxu1 %v14005_v61  ;;  %v8445_v20 = vpack.c.bf16 %v7252_v55, %v7251_v43  ;;  %v7253_v37 = vld [vmem:[%s13838_s4 + $0x220] sm:$0xff] }
 0x4c3   : > { %8423 = vmatprep.subr.bf16.mxu0 %v14005_v61 }
 0x4c4   : > { %8425 = vmatpush3.bf16.msra.mxu0 %v8424_v19 }
 0x4c5   : > { %5616 = vmatmul.mubr.f32.gmra.mrb[88].mxu0 %v5506_v46  ;;  %8416 = vmatpush3.bf16.msra.mxu1 %v8415_v13  ;;  %v7254_v46 = vld [vmem:[%s13838_s4 + $0x228] sm:$0xff]  ;;  %v7260_v13 = vld [vmem:[%s13838_s4 + $0x258] sm:$0xff] }
 0x4c6   : > { %7214 = vmatprep.mubr.msk.f32.mxu0 %vm5514_vm8, %v5509_v31  ;;  %8441 = vmatprep.subr.bf16.mxu1 %v14005_v61  ;;  %v8448_v31 = vpack.c.bf16 %v7254_v46, %v7253_v37  ;;  %v8457_v47 = vpack.c.bf16 %v7260_v13, %v7259_v42 }
 0x4c7   : > { %8426 = vmatprep.subr.bf16.mxu0 %v14005_v61 }
 0x4c8   : > { %8428 = vmatpush3.bf16.msra.mxu0 %v8427_v60 }
 0x4c9   : > { %5621 = vmatmul.mubr.f32.gmra.mrb[90].mxu0 %v5508_v54  ;;  %8429 = vmatprep.subr.bf16.mxu0 %v14005_v61  ;;  %v7255_v54 = vld [vmem:[%s13838_s4 + $0x230] sm:$0xff] }
 0x4ca   : > { %7215 = vmatprep.mubr.msk.f32.mxu0 %vm5514_vm8, %v5511_v8  ;;  %v7256_v8 = vld [vmem:[%s13838_s4 + $0x238] sm:$0xff] }
 0x4cc   : > { %8431 = vmatpush3.bf16.msra.mxu0 %v8430_v18 }
 0x4cd   : > { %5626 = vmatmul.mubr.f32.gmra.mrb[92].mxu0 %v5510_v50  ;;  %8432 = vmatprep.subr.bf16.mxu0 %v14005_v61  ;;  %v8451_v50 = vpack.c.bf16 %v7256_v8, %v7255_v54 }
 0x4ce   : > { %7216 = vmatprep.mubr.msk.f32.mxu0 %vm5514_vm8, %v5513_v16  ;;  %v7257_v16 = vld [vmem:[%s13838_s4 + $0x240] sm:$0xff] }
 0x4d0   : > { %8434 = vmatpush3.bf16.msra.mxu0 %v8433_v17 }
 0x4d1   : > { %5631 = vmatmul.mubr.f32.gmra.mrb[94].mxu0 %v5512_v15  ;;  %8435 = vmatprep.subr.bf16.mxu0 %v14005_v61  ;;  %v7258_v15 = vld [vmem:[%s13838_s4 + $0x248] sm:$0xff] }
 0x4d2   : > { %8033 = vmatprep.mubr.msk.f32.mxu0 %vm8614_vm0, %v14137_v62  ;;  %v8454_v52 = vpack.c.bf16 %v7258_v15, %v7257_v16 }
 0x4d4   : > { %8437 = vmatpush3.bf16.msra.mxu0 %v8436_v45 }
 0x4d5   : > { %8438 = vmatprep.subr.bf16.mxu0 %v14005_v61 }
 0x4d8   : > { %8440 = vmatpush3.bf16.msra.mxu0 %v8439_v14 }
 0x58c   : > { %v5602_v49 = vpop.f32.mrb[82].mxu0 }
 0x58d   : > { %v5636_v21 = vmax.f32 %v5602_v49, 0.0  ;;  %v5604_v33 = vpop.f32.mrb[83].mxu0 }
 0x58f   : > { %7981 = vmatmul.mubr.f32.vlgmr.msra.gmra.mrb[72].mxu1 %v5636_v21 }
 0x590   : > { %v5607_v10 = vpop.f32.mrb[84].mxu0  ;;  %7983 = vmatprep.mubr.msk.f32.mxu1 %vm8614_vm0, %v14137_v62  ;;  %8443 = vmatpush3.bf16.msra.mxu1 %v8442_v9 }
 0x591   : > { %v5637_v40 = vmax.f32 %v5607_v10, 0.0  ;;  %v5609_v11 = vpop.f32.mrb[85].mxu0  ;;  %8444 = vmatprep.subr.bf16.mxu1 %v14005_v61 }
 0x593   : > { %7984 = vmatmul.mubr.f32.gmra.mrb[74].mxu1 %v5637_v40 }
 0x594   : > { %v5612_v24 = vpop.f32.mrb[86].mxu0  ;;  %7986 = vmatprep.mubr.msk.f32.mxu1 %vm8614_vm0, %v14137_v62  ;;  %8446 = vmatpush3.bf16.msra.mxu1 %v8445_v20 }
 0x595   : > { %v5638_v7 = vmax.f32 %v5612_v24, 0.0  ;;  %v5614_v41 = vpop.f32.mrb[87].mxu0  ;;  %8447 = vmatprep.subr.bf16.mxu1 %v14005_v61 }
 0x597   : > { %7987 = vmatmul.mubr.f32.gmra.mrb[76].mxu1 %v5638_v7 }
 0x598   : > { %v5617_v53 = vpop.f32.mrb[88].mxu0  ;;  %7989 = vmatprep.mubr.msk.f32.mxu1 %vm8614_vm0, %v14137_v62  ;;  %8449 = vmatpush3.bf16.msra.mxu1 %v8448_v31 }
 0x599   : > { %v5639_v57 = vmax.f32 %v5617_v53, 0.0  ;;  %v5619_v12 = vpop.f32.mrb[89].mxu0  ;;  %8450 = vmatprep.subr.bf16.mxu1 %v14005_v61 }
 0x59b   : > { %7990 = vmatmul.mubr.f32.gmra.mrb[78].mxu1 %v5639_v57 }
 0x59c   : > { %v5622_v36 = vpop.f32.mrb[90].mxu0  ;;  %7992 = vmatprep.mubr.msk.f32.mxu1 %vm8614_vm0, %v14137_v62  ;;  %8452 = vmatpush3.bf16.msra.mxu1 %v8451_v50 }
 0x59d   : > { %v5640_v22 = vmax.f32 %v5622_v36, 0.0  ;;  %v5624_v32 = vpop.f32.mrb[91].mxu0  ;;  %8453 = vmatprep.subr.bf16.mxu1 %v14005_v61 }
 0x59e   : > { %v7262_v32 = vld [vmem:[%s13838_s4 + $0x268] sm:$0xff] }
 0x59f   : > { %7993 = vmatmul.mubr.f32.gmra.mrb[80].mxu1 %v5640_v22  ;;  %v7261_v22 = vld [vmem:[%s13838_s4 + $0x260] sm:$0xff] }
 0x5a0   : > { %v5627_v26 = vpop.f32.mrb[92].mxu0  ;;  %7995 = vmatprep.mubr.msk.f32.mxu1 %vm8614_vm0, %v14137_v62  ;;  %8455 = vmatpush3.bf16.msra.mxu1 %v8454_v52 }
 0x5a1   : > { %v5641_v63 = vmax.f32 %v5627_v26, 0.0  ;;  %v5629_v48 = vpop.f32.mrb[93].mxu0  ;;  %8456 = vmatprep.subr.bf16.mxu1 %v14005_v61  ;;  %v8460_v26 = vpack.c.bf16 %v7262_v32, %v7261_v22  ;;  %v7273_v22 = vld [vmem:[%s13838_s4 + $0x2a8] sm:$0xff] }
 0x5a2   : > { %v7264_v48 = vld [vmem:[%s13838_s4 + $0x278] sm:$0xff] }
 0x5a3   : > { %7996 = vmatmul.mubr.f32.gmra.mrb[82].mxu1 %v5641_v63  ;;  %v7263_v63 = vld [vmem:[%s13838_s4 + $0x270] sm:$0xff] }
 0x5a4   : > { %v5632_v34 = vpop.f32.mrb[94].mxu0  ;;  %7998 = vmatprep.mubr.msk.f32.mxu1 %vm8614_vm0, %v14137_v62  ;;  %8458 = vmatpush3.bf16.msra.mxu1 %v8457_v47 }
 0x5a5   : > { %v5642_v44 = vmax.f32 %v5632_v34, 0.0  ;;  %v5634_v4 = vpop.f32.mrb[95].mxu0  ;;  %8459 = vmatprep.subr.bf16.mxu1 %v14005_v61  ;;  %v8463_v34 = vpack.c.bf16 %v7264_v48, %v7263_v63  ;;  %v7275_v63 = vld [vmem:[%s13838_s4 + $0x2b8] sm:$0xff] }
 0x5a7   : > { %7999 = vmatmul.mubr.f32.gmra.mrb[84].mxu1 %v5642_v44  ;;  %v14140_v44 = vld [vmem:[#allocation4_spill] sm:$0xff] }
 0x5a8   : > { %8086 = vmatprep.mubr.msk.f32.mxu1 %vm8614_vm0, %v14137_v62  ;;  %8461 = vmatpush3.bf16.msra.mxu1 %v8460_v26  ;;  %v5902_v4 = vrot.slane %v13277_v3, %v14140_v44  ;;  %v7274_v26 = vld [vmem:[%s13838_s4 + $0x2b0] sm:$0xff] }
 0x5a9   : > { %8462 = vmatprep.subr.bf16.mxu1 %v14005_v61  ;;  %v8475_v48 = vpack.c.bf16 %v7275_v63, %v7274_v26 }
 0x5ac   : > { %8464 = vmatpush3.bf16.msra.mxu1 %v8463_v34  ;;  %v7276_v34 = vld [vmem:[%s13838_s4 + $0x2c0] sm:$0xff] }
 0x5ad   : > { %8465 = vmatprep.subr.bf16.mxu1 %v14005_v61 }
 0x662   : > { %v5726_v29 = vpop.f32.mrb[72].mxu1 }
 0x663   : > { %v5764_v27 = vmul.f32 %v5763_v25, %v5726_v29  ;;  %v7982_v19 = vpop.f32.mrb[73].mxu1 }
 0x665   : > { %v5775_v38 = vadd.f32 %v5774_v23, %v5764_v27 }
 0x666   : > { %v5731_v5 = vpop.f32.mrb[74].mxu1 }
 0x667   : > { %v5765_v60 = vmul.f32 %v5763_v25, %v5731_v5  ;;  %8034 = vmatmul.mubr.f32.vlgmr.msra.gmra.mrb[96].mxu0 %v5775_v38  ;;  %v7985_v56 = vpop.f32.mrb[75].mxu1 }
 0x668   : > { %8036 = vmatprep.mubr.msk.f32.mxu0 %vm8614_vm0, %v14137_v62 }
 0x669   : > { %v5776_v58 = vadd.f32 %v5774_v23, %v5765_v60 }
 0x66a   : > { %v5736_v18 = vpop.f32.mrb[76].mxu1 }
 0x66b   : > { %v5766_v39 = vmul.f32 %v5763_v25, %v5736_v18  ;;  %8037 = vmatmul.mubr.f32.gmra.mrb[98].mxu0 %v5776_v58  ;;  %v7988_v59 = vpop.f32.mrb[77].mxu1 }
 0x66c   : > { %8039 = vmatprep.mubr.msk.f32.mxu0 %vm8614_vm0, %v14137_v62 }
 0x66d   : > { %v5777_v17 = vadd.f32 %v5774_v23, %v5766_v39 }
 0x66e   : > { %v5741_v2 = vpop.f32.mrb[78].mxu1 }
 0x66f   : > { %v5767_v35 = vmul.f32 %v5763_v25, %v5741_v2  ;;  %8040 = vmatmul.mubr.f32.gmra.mrb[100].mxu0 %v5777_v17  ;;  %v7991_v45 = vpop.f32.mrb[79].mxu1 }
 0x670   : > { %8042 = vmatprep.mubr.msk.f32.mxu0 %vm8614_vm0, %v14137_v62 }
 0x671   : > { %v5778_v49 = vadd.f32 %v5774_v23, %v5767_v35 }
 0x672   : > { %v5746_v21 = vpop.f32.mrb[80].mxu1 }
 0x673   : > { %v5768_v33 = vmul.f32 %v5763_v25, %v5746_v21  ;;  %8043 = vmatmul.mubr.f32.gmra.mrb[102].mxu0 %v5778_v49  ;;  %v7994_v10 = vpop.f32.mrb[81].mxu1 }
 0x674   : > { %8045 = vmatprep.mubr.msk.f32.mxu0 %vm8614_vm0, %v14137_v62 }
 0x675   : > { %v5779_v40 = vadd.f32 %v5774_v23, %v5768_v33 }
 0x676   : > { %v5751_v11 = vpop.f32.mrb[82].mxu1 }
 0x677   : > { %8046 = vmatmul.mubr.f32.gmra.mrb[104].mxu0 %v5779_v40  ;;  %v5769_v24 = vmul.f32 %v5763_v25, %v5751_v11  ;;  %v7997_v7 = vpop.f32.mrb[83].mxu1 }
 0x678   : > { %8048 = vmatprep.mubr.msk.f32.mxu0 %vm8614_vm0, %v14137_v62  ;;  %v7269_v7 = vld [vmem:[%s13838_s4 + $0x288] sm:$0xff] }
 0x679   : > { %v5780_v41 = vadd.f32 %v5774_v23, %v5769_v24  ;;  %v7268_v24 = vld [vmem:[%s13838_s4 + $0x280] sm:$0xff] }
 0x67a   : > { %v5756_v53 = vpop.f32.mrb[84].mxu1 }
 0x67b   : > { %8049 = vmatmul.mubr.f32.gmra.mrb[106].mxu0 %v5780_v41  ;;  %v5770_v57 = vmul.f32 %v5763_v25, %v5756_v53  ;;  %v8000_v12 = vpop.f32.mrb[85].mxu1  ;;  %v8466_v41 = vpack.c.bf16 %v7269_v7, %v7268_v24  ;;  %v7270_v53 = vld [vmem:[%s13838_s4 + $0x290] sm:$0xff] }
 0x67c   : > { %8051 = vmatprep.mubr.msk.f32.mxu0 %vm8614_vm0, %v14137_v62 }
 0x67d   : > { %v5781_v36 = vadd.f32 %v5774_v23, %v5770_v57  ;;  %v7271_v57 = vld [vmem:[%s13838_s4 + $0x298] sm:$0xff] }
 0x67e   : > { %v8469_v12 = vpack.c.bf16 %v7271_v57, %v7270_v53 }
 0x67f   : > { %8052 = vmatmul.mubr.f32.gmra.mrb[108].mxu0 %v5781_v36  ;;  %v7272_v36 = vld [vmem:[%s13838_s4 + $0x2a0] sm:$0xff] }
 0x680   : > { %v8472_v32 = vpack.c.bf16 %v7273_v22, %v7272_v36 }
 0x73a   : > { %v5865_v14 = vpop.f32.mrb[96].mxu0 }
 0x73b   : > { %v5903_v1 = vmul.f32 %v5902_v4, %v5865_v14  ;;  %v8035_v30 = vpop.f32.mrb[97].mxu0  ;;  %v7278_v14 = vld [vmem:[%s13838_s4 + $0x2d0] sm:$0xff] }
 0x73d   : > { %v5914_v43 = vadd.f32 %v5913_v0, %v5903_v1  ;;  %v7279_v1 = vld [vmem:[%s13838_s4 + $0x2d8] sm:$0xff] }
 0x73e   : > { %v5870_v9 = vpop.f32.mrb[98].mxu0  ;;  %v8481_v30 = vpack.c.bf16 %v7279_v1, %v7278_v14 }
 0x73f   : > { %v5921_v55 = vmax.f32 %v5914_v43, 0.0  ;;  %v5904_v20 = vmul.f32 %v5902_v4, %v5870_v9  ;;  %v8038_v37 = vpop.f32.mrb[99].mxu0  ;;  %v7280_v43 = vld [vmem:[%s13838_s4 + $0x2e0] sm:$0xff]  ;;  %v7281_v9 = vld [vmem:[%s13838_s4 + $0x2e8] sm:$0xff] }
 0x740   : > { %v7283_v37 = vld [vmem:[%s13838_s4 + $0x2f8] sm:$0xff] }
 0x741   : > { %v5928_v46 = vmin.f32 %v5921_v55, 6.0  ;;  %v5915_v31 = vadd.f32 %v5913_v0, %v5904_v20  ;;  %v8484_v55 = vpack.c.bf16 %v7281_v9, %v7280_v43  ;;  %v7282_v20 = vld [vmem:[%s13838_s4 + $0x2f0] sm:$0xff] }
 0x742   : > { %v5875_v54 = vpop.f32.mrb[100].mxu0 }
 0x743   : > { %v5922_v8 = vmax.f32 %v5915_v31, 0.0  ;;  %v5905_v50 = vmul.f32 %v5902_v4, %v5875_v54  ;;  %8087 = vmatmul.mubr.f32.vlgmr.msra.gmra.mrb[86].mxu1 %v5928_v46  ;;  %v8041_v16 = vpop.f32.mrb[101].mxu0  ;;  %v8487_v46 = vpack.c.bf16 %v7283_v37, %v7282_v20  ;;  %v14142_v31 = vld [vmem:[#allocation6_spill] sm:$0xff] }
 0x744   : > { %8089 = vmatprep.mubr.msk.f32.mxu1 %vm8614_vm0, %v14137_v62  ;;  %8467 = vmatpush3.bf16.msra.mxu1 %v8466_v41  ;;  %v13384_v54 = vrot.slane %v13277_v3, %v14142_v31 }
 0x745   : > { %v5929_v15 = vmin.f32 %v5922_v8, 6.0  ;;  %v5916_v52 = vadd.f32 %v5913_v0, %v5905_v50  ;;  %8468 = vmatprep.subr.bf16.mxu1 %v14005_v61  ;;  %v14143_v8 = vld [vmem:[#allocation7_spill] sm:$0xff] }
 0x746   : > { %v5880_v42 = vpop.f32.mrb[102].mxu0  ;;  %v13388_v50 = vrot.slane %v13277_v3, %v14143_v8 }
 0x747   : > { %v5923_v13 = vmax.f32 %v5916_v52, 0.0  ;;  %v5906_v47 = vmul.f32 %v5902_v4, %v5880_v42  ;;  %8090 = vmatmul.mubr.f32.gmra.mrb[88].mxu1 %v5929_v15  ;;  %v8044_v25 = vpop.f32.mrb[103].mxu0  ;;  %v7265_v42 = vld [vmem:[%s13836_s2 + $0x20] sm:$0xff] }
 0x748   : > { %8092 = vmatprep.mubr.msk.f32.mxu1 %vm8614_vm0, %v14137_v62  ;;  %8470 = vmatpush3.bf16.msra.mxu1 %v8469_v12 }
 0x749   : > { %v5930_v23 = vmin.f32 %v5923_v13, 6.0  ;;  %v5917_v29 = vadd.f32 %v5913_v0, %v5906_v47  ;;  %8471 = vmatprep.subr.bf16.mxu1 %v14005_v61 }
 0x74a   : > { %v5885_v27 = vpop.f32.mrb[104].mxu0 }
 0x74b   : > { %v5924_v19 = vmax.f32 %v5917_v29, 0.0  ;;  %v5907_v38 = vmul.f32 %v5902_v4, %v5885_v27  ;;  %8093 = vmatmul.mubr.f32.gmra.mrb[90].mxu1 %v5930_v23  ;;  %v8047_v5 = vpop.f32.mrb[105].mxu0  ;;  %v13396_v23 = vrot.slane %v7265_v42, %v14139_v51  ;;  %v13399_v29 = vrot.slane %v7265_v42, %v14140_v44 }
 0x74c   : > { %8095 = vmatprep.mubr.msk.f32.mxu1 %vm8614_vm0, %v14137_v62  ;;  %8473 = vmatpush3.bf16.msra.mxu1 %v8472_v32  ;;  %v13403_v5 = vrot.slane %v7265_v42, %v14141_v6 }
 0x74d   : > { %v5931_v60 = vmin.f32 %v5924_v19, 6.0  ;;  %v5918_v56 = vadd.f32 %v5913_v0, %v5907_v38  ;;  %8474 = vmatprep.subr.bf16.mxu1 %v14005_v61 }
 0x74e   : > { %v5890_v58 = vpop.f32.mrb[106].mxu0 }
 0x74f   : > { %v5925_v18 = vmax.f32 %v5918_v56, 0.0  ;;  %8096 = vmatmul.mubr.f32.gmra.mrb[92].mxu1 %v5931_v60  ;;  %v5908_v39 = vmul.f32 %v5902_v4, %v5890_v58  ;;  %v8050_v59 = vpop.f32.mrb[107].mxu0 }
 0x750   : > { %8098 = vmatprep.mubr.msk.f32.mxu1 %vm8614_vm0, %v14137_v62  ;;  %8476 = vmatpush3.bf16.msra.mxu1 %v8475_v48 }
 0x751   : > { %v5932_v17 = vmin.f32 %v5925_v18, 6.0  ;;  %v5919_v2 = vadd.f32 %v5913_v0, %v5908_v39  ;;  %8477 = vmatprep.subr.bf16.mxu1 %v14005_v61 }
 0x752   : > { %v5895_v35 = vpop.f32.mrb[108].mxu0 }
 0x753   : > { %v5926_v45 = vmax.f32 %v5919_v2, 0.0  ;;  %8099 = vmatmul.mubr.f32.gmra.mrb[94].mxu1 %v5932_v17  ;;  %v5909_v49 = vmul.f32 %v5902_v4, %v5895_v35  ;;  %v8053_v21 = vpop.f32.mrb[109].mxu0  ;;  %v7277_v4 = vld [vmem:[%s13838_s4 + $0x2c8] sm:$0xff]  ;;  %v13411_v35 = vrot.slane %v7265_v42, %v14143_v8 }
 0x754   : > { %8101 = vmatprep.mubr.msk.f32.mxu1 %vm8614_vm0, %v14137_v62  ;;  %v13417_v21 = vrot.slane %v7265_v42, %v14138_v28 }
 0x755   : > { %v5933_v33 = vmin.f32 %v5926_v45, 6.0  ;;  %v5920_v10 = vadd.f32 %v5913_v0, %v5909_v49  ;;  %v8478_v0 = vpack.c.bf16 %v7277_v4, %v7276_v34  ;;  %v14144_v45 = vld [vmem:[#allocation8_spill] sm:$0xff] }
 0x756   : > { %v13414_v49 = vrot.slane %v7265_v42, %v14144_v45 }
 0x757   : > { %8102 = vmatmul.mubr.f32.gmra.mrb[96].mxu1 %v5933_v33  ;;  %v5927_v40 = vmax.f32 %v5920_v10, 0.0 }
 0x758   : > { %8104 = vmatprep.mubr.msk.f32.mxu1 %vm8614_vm0, %v14137_v62  ;;  %8479 = vmatpush3.bf16.msra.mxu1 %v8478_v0 }
 0x759   : > { %v5934_v11 = vmin.f32 %v5927_v40, 6.0  ;;  %8480 = vmatprep.subr.bf16.mxu1 %v14005_v61 }
 0x75b   : > { %8105 = vmatmul.mubr.f32.gmra.mrb[98].mxu1 %v5934_v11  ;;  %v14145_v11 = vld [vmem:[#allocation9_spill] sm:$0xff] }
 0x75c   : > { %8139 = vmatprep.mubr.msk.f32.mxu1 %vm8614_vm0, %v14137_v62  ;;  %8482 = vmatpush3.bf16.msra.mxu1 %v8481_v30  ;;  %v13423_v24 = vrot.slane %v7265_v42, %v14145_v11 }
 0x75d   : > { %8483 = vmatprep.subr.bf16.mxu1 %v14005_v61 }
 0x760   : > { %8485 = vmatpush3.bf16.msra.mxu1 %v8484_v55 }
 0x761   : > { %8486 = vmatprep.subr.bf16.mxu1 %v14005_v61 }
 0x764   : > { %8488 = vmatpush3.bf16.msra.mxu1 %v8487_v46 }
 0x816   : > { %v6018_v16 = vpop.f32.mrb[86].mxu1 }
 0x817   : > { %v6056_v15 = vmul.f32 %v13384_v54, %v6018_v16  ;;  %v8088_v52 = vpop.f32.mrb[87].mxu1 }
 0x818   : > { %v13447_v52 = vrot.slane %v7265_v42, %v14142_v31 }
 0x819   : > { %v6067_v13 = vadd.f32 %v13388_v50, %v6056_v15 }
 0x81a   : > { %v6023_v47 = vpop.f32.mrb[88].mxu1 }
 0x81b   : > { %v6074_v25 = vmax.f32 %v6067_v13, 0.0  ;;  %v6057_v27 = vmul.f32 %v13384_v54, %v6023_v47  ;;  %v8091_v19 = vpop.f32.mrb[89].mxu1 }
 0x81d   : > { %v6081_v38 = vmin.f32 %v6074_v25, 6.0  ;;  %v6068_v60 = vadd.f32 %v13388_v50, %v6057_v27 }
 0x81e   : > { %v6028_v56 = vpop.f32.mrb[90].mxu1 }
 0x81f   : > { %v6104_v58 = vmul.f32 %v13396_v23, %v6081_v38  ;;  %v6137_v18 = vmul.f32 %v13399_v29, %v6081_v38  ;;  %v8094_v39 = vpop.f32.mrb[91].mxu1  ;;  %v6075_v59 = vmax.f32 %v6068_v60, 0.0  ;;  %v6058_v17 = vmul.f32 %v13384_v54, %v6028_v56 }
 0x820   : > { %v6170_v2 = vmul.f32 %v13403_v5, %v6081_v38  ;;  %v6095_v43 = vmul.f32 %v13417_v21, %v6081_v38 }
 0x821   : > { %v13419_v33 = vmin.f32 %v6075_v59, 6.0  ;;  %v6069_v10 = vadd.f32 %v13388_v50, %v6058_v17  ;;  %v6114_v7 = vrot.slane %v6104_v58, 1  ;;  %v6147_v41 = vrot.slane %v6137_v18, 2 }
 0x822   : > { %v6033_v40 = vpop.f32.mrb[92].mxu1  ;;  %v6181_v26 = vrot.slane %v6170_v2, 7 }
 0x823   : > { %v6059_v53 = vmul.f32 %v13384_v54, %v6033_v40  ;;  %v8097_v57 = vpop.f32.mrb[93].mxu1  ;;  %v6076_v12 = vmax.f32 %v6069_v10, 0.0  ;;  %v6105_v36 = vmul.f32 %v13396_v23, %v13419_v33  ;;  %v6138_v22 = vmul.f32 %v13399_v29, %v13419_v33 }
 0x824   : > { %v6171_v32 = vmul.f32 %v13403_v5, %v13419_v33  ;;  %v6218_v48 = vmul.f32 %v13411_v35, %v13419_v33  ;;  %v6251_v34 = vmul.f32 %v13414_v49, %v13419_v33  ;;  %v6284_v60 = vmul.f32 %v13423_v24, %v13419_v33 }
 0x825   : > { %v6070_v63 = vadd.f32 %v13388_v50, %v6059_v53  ;;  %v13437_v4 = vmin.f32 %v6076_v12, 6.0  ;;  %v6115_v14 = vrot.slane %v6105_v36, 1  ;;  %v6148_v1 = vrot.slane %v6138_v22, 2 }
 0x826   : > { %v6038_v0 = vpop.f32.mrb[94].mxu1  ;;  %v6182_v30 = vrot.slane %v6171_v32, 7  ;;  %v6228_v47 = vrot.slane %v6218_v48, 1  ;;  %v6261_v38 = vrot.slane %v6251_v34, 6  ;;  %v6294_v10 = vrot.slane %v6284_v60, 7 }
 0x827   : > { %v6077_v9 = vmax.f32 %v6070_v63, 0.0  ;;  %v6060_v55 = vmul.f32 %v13384_v54, %v6038_v0  ;;  %v8100_v20 = vpop.f32.mrb[95].mxu1  ;;  %v6116_v37 = vsel %vm1350_vm2, %v6114_v7, %v6115_v14  ;;  %v6149_v46 = vsel %vm1570_vm3, %v6147_v41, %v6148_v1 }
 0x828   : > { %v6183_v16 = vsel %vm6180_vm9, %v6181_v26, %v6182_v30  ;;  %v6219_v15 = vmul.f32 %v13411_v35, %v13437_v4  ;;  %v6128_v13 = vadd.f32 %v6116_v37, %v6095_v43  ;;  %v6252_v25 = vmul.f32 %v13414_v49, %v13437_v4  ;;  %v13474_v43 = vld [vmem:[%s13836_s2 + $0x28] ss:$0 sm:$0xff] }
 0x829   : > { %v6285_v56 = vmul.f32 %v13423_v24, %v13437_v4  ;;  %v6071_v58 = vadd.f32 %v13388_v50, %v6060_v55  ;;  %v13457_v17 = vmin.f32 %v6077_v9, 6.0  ;;  %v6204_v53 = vmul.f32 %v13447_v52, %v13419_v33 }
 0x82a   : > { %v6043_v27 = vpop.f32.mrb[96].mxu1  ;;  %v6229_v19 = vrot.slane %v6219_v15, 1  ;;  %v6161_v39 = vadd.f32 %v6149_v46, %v6128_v13  ;;  %v6262_v59 = vrot.slane %v6252_v25, 6  ;;  %v6106_v22 = vmul.f32 %v13396_v23, %v13437_v4 }
 0x82b   : > { %v6061_v18 = vmul.f32 %v13384_v54, %v6043_v27  ;;  %v8103_v42 = vpop.f32.mrb[97].mxu1  ;;  %v6295_v40 = vrot.slane %v6285_v56, 7  ;;  %v6139_v32 = vmul.f32 %v13399_v29, %v13437_v4  ;;  %v6172_v26 = vmul.f32 %v13403_v5, %v13437_v4 }
 0x82c   : > { %v6230_v2 = vsel %vm1350_vm2, %v6228_v47, %v6229_v19  ;;  %v6195_v41 = vadd.f32 %v6183_v16, %v6161_v39  ;;  %v6263_v57 = vsel %vm2906_vm7, %v6261_v38, %v6262_v59  ;;  %v6078_v63 = vmax.f32 %v6071_v58, 0.0 }
 0x82d   : > { %v6072_v7 = vadd.f32 %v13388_v50, %v6061_v18  ;;  %v6296_v12 = vsel %vm6180_vm9, %v6294_v10, %v6295_v40  ;;  %v6117_v9 = vrot.slane %v6106_v22, 1  ;;  %v6150_v55 = vrot.slane %v6139_v32, 2 }
 0x82e   : > { %v6048_v36 = vpop.f32.mrb[98].mxu1  ;;  %v6209_v34 = vadd.f32 %v6204_v53, %v6195_v41  ;;  %v6184_v20 = vrot.slane %v6172_v26, 7  ;;  %v6220_v37 = vmul.f32 %v13411_v35, %v13457_v17  ;;  %v6096_v15 = vmul.f32 %v13417_v21, %v13419_v33 }
 0x82f   : > { %v6079_v48 = vmax.f32 %v6072_v7, 0.0  ;;  %v8106_v0 = vpop.f32.mrb[99].mxu1  ;;  %v6253_v13 = vmul.f32 %v13414_v49, %v13457_v17  ;;  %v6118_v47 = vsel %vm1350_vm2, %v6115_v14, %v6117_v9  ;;  %v6151_v25 = vsel %vm1570_vm3, %v6148_v1, %v6150_v55 }
 0x830   : > { %v6242_v16 = vadd.f32 %v6230_v2, %v6209_v34  ;;  %v6185_v27 = vsel %vm6180_vm9, %v6182_v30, %v6184_v20  ;;  %v6231_v38 = vrot.slane %v6220_v37, 1  ;;  %v6317_v56 = vmul.f32 %v13474_v43, %v13437_v4 }
 0x831   : > { %v13478_v46 = vmin.f32 %v6079_v48, 6.0  ;;  %v13491_v58 = vrot.slane %v13277_v3, %v14144_v45  ;;  %v6129_v18 = vadd.f32 %v6118_v47, %v6096_v15  ;;  %v6264_v42 = vrot.slane %v6253_v13, 6 }
 0x832   : > { %v6275_v60 = vadd.f32 %v6263_v57, %v6242_v16  ;;  %v6232_v14 = vsel %vm1350_vm2, %v6229_v19, %v6231_v38  ;;  %v13498_v1 = vmin.f32 %v6078_v63, 6.0  ;;  %v13501_v39 = vmul.f32 %v13384_v54, %v6048_v36 }
 0x833   : > { %v13495_v33 = vmul.f32 %v13411_v35, %v13478_v46  ;;  %v6286_v2 = vmul.f32 %v13423_v24, %v13457_v17  ;;  %v13507_v10 = vmul.f32 %v13414_v49, %v13478_v46  ;;  %v6162_v7 = vadd.f32 %v6151_v25, %v6129_v18 }
 0x834   : > { %v6308_v30 = vadd.f32 %v6296_v12, %v6275_v60  ;;  %v6205_v41 = vmul.f32 %v13447_v52, %v13437_v4  ;;  %v6265_v19 = vsel %vm2906_vm7, %v6262_v59, %v6264_v42  ;;  %v6107_v12 = vmul.f32 %v13396_v23, %v13457_v17 }
 0x835   : > { %v6297_v57 = vrot.slane %v6286_v2, 7  ;;  %v6140_v54 = vmul.f32 %v13399_v29, %v13457_v17  ;;  %v6235_v36 = vrot.slane %v13495_v33, 1  ;;  %v6196_v22 = vadd.f32 %v6185_v27, %v6162_v7  ;;  %v7289_v33 = vld [vmem:[%s13838_s4 + $0x300] sm:$0xff] }
 0x836   : > { %v6322_v53 = vadd.f32 %v6317_v56, %v6308_v30  ;;  %v6097_v32 = vmul.f32 %v13417_v21, %v13437_v4  ;;  %v6173_v26 = vmul.f32 %v13403_v5, %v13457_v17  ;;  %v6119_v48 = vrot.slane %v6107_v12, 1 }
 0x837   : > { %v6298_v59 = vsel %vm6180_vm9, %v6295_v40, %v6297_v57  ;;  %v6152_v34 = vrot.slane %v6140_v54, 2  ;;  %v6210_v0 = vadd.f32 %v6205_v41, %v6196_v22  ;;  %v6221_v16 = vmul.f32 %v13411_v35, %v13498_v1 }
 0x838   : > { %v6331_v63 = vadd.f32 %v13491_v58, %v6322_v53  ;;  %v6186_v37 = vrot.slane %v6173_v26, 7  ;;  %v6254_v15 = vmul.f32 %v13414_v49, %v13498_v1  ;;  %v6120_v4 = vsel %vm1350_vm2, %v6117_v9, %v6119_v48 }
 0x839   : > { %v6153_v47 = vsel %vm1570_vm3, %v6150_v55, %v6152_v34  ;;  %v6287_v25 = vmul.f32 %v13423_v24, %v13498_v1  ;;  %v6243_v27 = vadd.f32 %v6232_v14, %v6210_v0  ;;  %v6130_v40 = vadd.f32 %v6120_v4, %v6097_v32 }
 0x83a   : > { %v6336_v13 = vmax.f32 %v6331_v63, 0.0  ;;  %v6187_v60 = vsel %vm6180_vm9, %v6184_v20, %v6186_v37  ;;  %v6233_v56 = vrot.slane %v6221_v16, 1  ;;  %v6318_v35 = vmul.f32 %v13474_v43, %v13457_v17 }
 0x83b   : > { %v6206_v49 = vmul.f32 %v13447_v52, %v13457_v17  ;;  %v6266_v18 = vrot.slane %v6254_v15, 6  ;;  %v6299_v30 = vrot.slane %v6287_v25, 7  ;;  %v6276_v9 = vadd.f32 %v6265_v19, %v6243_v27 }
 0x83c   : > { %8140 = vmatmul.mubr.f32.vlgmr.msra.gmra.mrb[100].mxu1 %v6336_v13  ;;  %v6163_v55 = vadd.f32 %v6153_v47, %v6130_v40  ;;  %v6234_v14 = vsel %vm1350_vm2, %v6231_v38, %v6233_v56  ;;  %v6108_v20 = vmul.f32 %v13396_v23, %v13498_v1  ;;  %v6141_v41 = vmul.f32 %v13399_v29, %v13498_v1 }
 0x83d   : > { %8142 = vmatprep.mubr.msk.f32.mxu1 %vm8614_vm0, %v14137_v62  ;;  %v6267_v2 = vsel %vm2906_vm7, %v6264_v42, %v6266_v18  ;;  %v6300_v7 = vsel %vm6180_vm9, %v6297_v57, %v6299_v30  ;;  %v6174_v53 = vmul.f32 %v13403_v5, %v13498_v1  ;;  %v6309_v12 = vadd.f32 %v6298_v59, %v6276_v9 }
 0x83e   : > { %v6197_v54 = vadd.f32 %v6187_v60, %v6163_v55  ;;  %v6098_v19 = vmul.f32 %v13417_v21, %v13457_v17  ;;  %v6121_v22 = vrot.slane %v6108_v20, 1  ;;  %v6154_v38 = vrot.slane %v6141_v41, 2 }
 0x83f   : > { %v6188_v32 = vrot.slane %v6174_v53, 7  ;;  %v6236_v23 = vsel %vm1350_vm2, %v6233_v56, %v6235_v36  ;;  %v6268_v42 = vrot.slane %v13507_v10, 6  ;;  %v6323_v57 = vadd.f32 %v6318_v35, %v6309_v12 }
 0x840   : > { %v6211_v26 = vadd.f32 %v6206_v49, %v6197_v54  ;;  %v6122_v29 = vsel %vm1350_vm2, %v6119_v48, %v6121_v22  ;;  %v6288_v5 = vmul.f32 %v13423_v24, %v13478_v46  ;;  %v6155_v59 = vsel %vm1570_vm3, %v6152_v34, %v6154_v38 }
 0x841   : > { %v6131_v63 = vadd.f32 %v6122_v29, %v6098_v19  ;;  %v6189_v17 = vsel %vm6180_vm9, %v6186_v37, %v6188_v32  ;;  %v6269_v0 = vsel %vm2906_vm7, %v6266_v18, %v6268_v42  ;;  %v6332_v16 = vadd.f32 %v13491_v58, %v6323_v57  ;;  %v7293_v57 = vld [vmem:[%s13838_s4 + $0x320] sm:$0xff] }
 0x842   : > { %v6244_v15 = vadd.f32 %v6234_v14, %v6211_v26  ;;  %v6301_v13 = vrot.slane %v6288_v5, 7  ;;  %v6073_v10 = vadd.f32 %v13388_v50, %v13501_v39  ;;  %v6099_v48 = vmul.f32 %v13417_v21, %v13498_v1  ;;  %v7294_v26 = vld [vmem:[%s13838_s4 + $0x328] sm:$0xff]  ;;  %v7295_v5 = vld [vmem:[%s13838_s4 + $0x330] sm:$0xff] }
 0x843   : > { %v6164_v4 = vadd.f32 %v6155_v59, %v6131_v63  ;;  %v6337_v47 = vmax.f32 %v6332_v16, 0.0  ;;  %v6207_v37 = vmul.f32 %v13447_v52, %v13498_v1  ;;  %v6319_v60 = vmul.f32 %v13474_v43, %v13498_v1  ;;  %v7296_v63 = vld [vmem:[%s13838_s4 + $0x338] sm:$0xff] }
 0x844   : > { %v6277_v24 = vadd.f32 %v6267_v2, %v6244_v15  ;;  %v6302_v25 = vsel %vm6180_vm9, %v6299_v30, %v6301_v13  ;;  %v6132_v27 = vadd.f32 %v6121_v22, %v6099_v48  ;;  %v6208_v50 = vmul.f32 %v13447_v52, %v13478_v46  ;;  %v7299_v15 = vld [vmem:[%s13838_s4 + $0x350] sm:$0xff]  ;;  %v7302_v48 = vld [vmem:[%s13838_s4 + $0x368] sm:$0xff] }
 0x845   : > { %v6198_v34 = vadd.f32 %v6189_v17, %v6164_v4  ;;  %8143 = vmatmul.mubr.f32.gmra.mrb[102].mxu1 %v6337_v47  ;;  %v6080_v39 = vmax.f32 %v6073_v10, 0.0  ;;  %v6320_v1 = vmul.f32 %v13474_v43, %v13478_v46  ;;  %v8505_v29 = vpack.c.bf16 %v7294_v26, %v7293_v57  ;;  %v7297_v17 = vld [vmem:[%s13838_s4 + $0x340] sm:$0xff]  ;;  %v7309_v57 = vld [vmem:[%s13838_s4 + $0x388] sm:$0xff] }
 0x846   : > { %v6310_v40 = vadd.f32 %v6300_v7, %v6277_v24  ;;  %8145 = vmatprep.mubr.msk.f32.mxu1 %vm8614_vm0, %v14137_v62  ;;  %v6165_v56 = vadd.f32 %v6154_v38, %v6132_v27  ;;  %v8509_v59 = vpack.c.bf16 %v7296_v63, %v7295_v5  ;;  %v7301_v4 = vld [vmem:[%s13838_s4 + $0x360] sm:$0xff]  ;;  %v7303_v24 = vld [vmem:[%s13838_s4 + $0x370] sm:$0xff]  ;;  %v7311_v5 = vld [vmem:[%s13838_s4 + $0x398] sm:$0xff] }
 0x847   : > { %v6212_v21 = vadd.f32 %v6207_v37, %v6198_v34  ;;  %v6087_v9 = vmin.f32 %v6080_v39, 6.0  ;;  %v8521_v47 = vpack.c.bf16 %v7302_v48, %v7301_v4  ;;  %v7312_v63 = vld [vmem:[%s13838_s4 + $0x3a0] sm:$0xff]  ;;  %v7318_v48 = vld [vmem:[%s13838_s4 + $0x3d0] sm:$0xff] }
 0x848   : > { %v6324_v35 = vadd.f32 %v6319_v60, %v6310_v40  ;;  %v6199_v18 = vadd.f32 %v6188_v32, %v6165_v56  ;;  %v6451_v40 = vrot.slane %v13277_v3, %v14145_v11  ;;  %v13643_v60 = vld [vmem:[%s13837_s3 + $0x10] sm:$0x7f] }
 0x849   : > { %v6245_v49 = vadd.f32 %v6236_v23, %v6212_v21  ;;  %v6321_v7 = vmul.f32 %v13474_v43, %v6087_v9  ;;  %v6466_v43 = vld [vmem:[%s13840_s6] sm:$0xff]  ;;  %v7292_v23 = vld [vmem:[%s13838_s4 + $0x318] sm:$0xff]  ;;  %v6460_v39 = vrot.slane %v13643_v60, %v14138_v28 }
 0x84a   : > { %v6333_v30 = vadd.f32 %v13491_v58, %v6324_v35  ;;  %v6213_v14 = vadd.f32 %v6208_v50, %v6199_v18 }
 0x84b   : > { %v6278_v55 = vadd.f32 %v6269_v0, %v6245_v49  ;;  %v7298_v0 = vld [vmem:[%s13838_s4 + $0x348] sm:$0xff] }
 0x84c   : > { %v6338_v20 = vmax.f32 %v6333_v30, 0.0  ;;  %v6246_v52 = vadd.f32 %v6235_v36, %v6213_v14  ;;  %v7291_v36 = vld [vmem:[%s13838_s4 + $0x310] sm:$0xff]  ;;  %v8513_v16 = vpack.c.bf16 %v7298_v0, %v7297_v17 }
 0x84d   : > { %v6311_v2 = vadd.f32 %v6302_v25, %v6278_v55  ;;  %v7304_v25 = vld [vmem:[%s13838_s4 + $0x378] sm:$0xff]  ;;  %v7314_v17 = vld [vmem:[%s13838_s4 + $0x3b0] sm:$0xff] }
 0x84e   : > { %8146 = vmatmul.mubr.f32.gmra.mrb[104].mxu1 %v6338_v20  ;;  %v6279_v53 = vadd.f32 %v6268_v42, %v6246_v52  ;;  %v8501_v42 = vpack.c.bf16 %v7292_v23, %v7291_v36  ;;  %v8525_v34 = vpack.c.bf16 %v7304_v25, %v7303_v24  ;;  %v7320_v25 = vld [vmem:[%s13838_s4 + $0x3e0] sm:$0xff] }
 0x84f   : > { %8148 = vmatprep.mubr.msk.f32.mxu1 %vm8614_vm0, %v14137_v62  ;;  %v6325_v41 = vadd.f32 %v6320_v1, %v6311_v2 }
 0x850   : > { %v6312_v54 = vadd.f32 %v6301_v13, %v6279_v53  ;;  %v7300_v13 = vld [vmem:[%s13838_s4 + $0x358] sm:$0xff] }
 0x851   : > { %v6334_v12 = vadd.f32 %v13491_v58, %v6325_v41  ;;  %v8517_v10 = vpack.c.bf16 %v7300_v13, %v7299_v15  ;;  %v7316_v13 = vld [vmem:[%s13838_s4 + $0x3c0] sm:$0xff] }
 0x852   : > { %v6326_v22 = vadd.f32 %v6321_v7, %v6312_v54 }
 0x853   : > { %v6339_v19 = vmax.f32 %v6334_v12, 0.0 }
 0x854   : > { %v6335_v38 = vadd.f32 %v13491_v58, %v6326_v22  ;;  %v7290_v58 = vld [vmem:[%s13838_s4 + $0x308] sm:$0xff]  ;;  %v6468_v22 = vld [vmem:[%s13840_s6 + $0x10] sm:$0xff] }
 0x855   : > { %8149 = vmatmul.mubr.f32.gmra.mrb[106].mxu1 %v6339_v19  ;;  %v8497_v32 = vpack.c.bf16 %v7290_v58, %v7289_v33  ;;  %v6467_v19 = vld [vmem:[%s13840_s6 + $0x8] sm:$0xff] }
 0x856   : > { %8151 = vmatprep.mubr.msk.f32.mxu1 %vm8614_vm0, %v14137_v62  ;;  %v6340_v46 = vmax.f32 %v6335_v38, 0.0  ;;  %v6469_v38 = vld [vmem:[%s13840_s6 + $0x18] sm:$0x1] }
 0x857   : > { %8498 = vmatprep.subr.bf16.mxu0 %v8497_v32 }
 0x858   : > { %8500 = vmatpush3.bf16.msra.mxu0 %v8497_v32 }
 0x859   : > { %8152 = vmatmul.mubr.f32.gmra.mrb[108].mxu1 %v6340_v46  ;;  %8502 = vmatprep.subr.bf16.mxu0 %v8501_v42 }
 0x85a   : > { %8164 = vmatprep.mubr.msk.f32.mxu1 %vm6470_vm10, %v6466_v43 }
 0x85c   : > { %8504 = vmatpush3.bf16.msra.mxu0 %v8501_v42  ;;  %v7308_v42 = vld [vmem:[%s13838_s4 + $0x380] sm:$0xff] }
 0x85d   : > { %8506 = vmatprep.subr.bf16.mxu0 %v8505_v29  ;;  %v8529_v26 = vpack.c.bf16 %v7309_v57, %v7308_v42 }
 0x860   : > { %8508 = vmatpush3.bf16.msra.mxu0 %v8505_v29  ;;  %v7310_v29 = vld [vmem:[%s13838_s4 + $0x390] sm:$0xff] }
 0x861   : > { %8510 = vmatprep.subr.bf16.mxu0 %v8509_v59 }
 0x864   : > { %8512 = vmatpush3.bf16.msra.mxu0 %v8509_v59  ;;  %v7313_v59 = vld [vmem:[%s13838_s4 + $0x3a8] sm:$0xff] }
 0x865   : > { %8514 = vmatprep.subr.bf16.mxu0 %v8513_v16  ;;  %v8537_v0 = vpack.c.bf16 %v7313_v59, %v7312_v63  ;;  %v13755_v63 = vld [vmem:[%s13836_s2 + $0x38] ss:$0 sm:$0xff] }
 0x868   : > { %8516 = vmatpush3.bf16.msra.mxu0 %v8513_v16  ;;  %v7315_v16 = vld [vmem:[%s13838_s4 + $0x3b8] sm:$0xff] }
 0x869   : > { %8518 = vmatprep.subr.bf16.mxu0 %v8517_v10  ;;  %v8541_v15 = vpack.c.bf16 %v7315_v16, %v7314_v17 }
 0x86c   : > { %8520 = vmatpush3.bf16.msra.mxu0 %v8517_v10  ;;  %v7317_v10 = vld [vmem:[%s13838_s4 + $0x3c8] sm:$0xff] }
 0x86d   : > { %8522 = vmatprep.subr.bf16.mxu0 %v8521_v47  ;;  %v8545_v4 = vpack.c.bf16 %v7317_v10, %v7316_v13 }
 0x870   : > { %8524 = vmatpush3.bf16.msra.mxu0 %v8521_v47  ;;  %v7319_v47 = vld [vmem:[%s13838_s4 + $0x3d8] sm:$0xff] }
 0x871   : > { %8526 = vmatprep.subr.bf16.mxu0 %v8525_v34  ;;  %v8549_v24 = vpack.c.bf16 %v7319_v47, %v7318_v48 }
 0x874   : > { %8528 = vmatpush3.bf16.msra.mxu0 %v8525_v34  ;;  %v7321_v34 = vld [vmem:[%s13838_s4 + $0x3e8] sm:$0xff] }
 0x875   : > { %8561 = vmatprep.subr.bf16.mxu0 %v14005_v61 }
 0x90f   : > { %v6424_v37 = vpop.f32.mrb[100].mxu1 }
 0x910   : > { %v8141_v27 = vpop.f32.mrb[101].mxu1  ;;  %v6452_v50 = vmul.f32 %v6451_v40, %v6424_v37  ;;  %v8553_v37 = vpack.c.bf16 %v7321_v34, %v7320_v25 }
 0x911   : > { %v7322_v27 = vld [vmem:[%s13838_s4 + $0x3f0] sm:$0xff] }
 0x912   : > { %v6461_v49 = vadd.f32 %v6460_v39, %v6452_v50 }
 0x918   : > { %v6429_v21 = vpop.f32.mrb[102].mxu1 }
 0x919   : > { %v6453_v56 = vmul.f32 %v6451_v40, %v6429_v21  ;;  %v8144_v35 = vpop.f32.mrb[103].mxu1  ;;  %v7325_v21 = vld [vmem:[%s13838_s4 + $0x408] sm:$0xff] }
 0x91b   : > { %v6462_v18 = vadd.f32 %v6460_v39, %v6453_v56  ;;  %v7326_v56 = vld [vmem:[%s13838_s4 + $0x410] sm:$0xff] }
 0x91d   : > { %v8489_v30 = vpack.c.bf16 %v6462_v18, %v6461_v49  ;;  %v7327_v49 = vld [vmem:[%s13838_s4 + $0x418] sm:$0xff] }
 0x91e   : > { %v8565_v18 = vpack.c.bf16 %v7327_v49, %v7326_v56 }
 0x91f   : > { %8490 = vmatprep.subr.bf16.mxu1 %v8489_v30 }
 0x920   : > { %8492 = vmatpush3.bf16.msra.mxu1 %v8489_v30  ;;  %v7328_v30 = vld [vmem:[%s13838_s4 + $0x420] sm:$0xff] }
 0x921   : > { %v6434_v9 = vpop.f32.mrb[104].mxu1 }
 0x922   : > { %v8147_v55 = vpop.f32.mrb[105].mxu1  ;;  %v6454_v3 = vmul.f32 %v6451_v40, %v6434_v9  ;;  %v7329_v9 = vld [vmem:[%s13838_s4 + $0x428] sm:$0xff] }
 0x923   : > { %v8568_v55 = vpack.c.bf16 %v7329_v9, %v7328_v30 }
 0x924   : > { %v6463_v1 = vadd.f32 %v6460_v39, %v6454_v3  ;;  %v7330_v3 = vld [vmem:[%s13838_s4 + $0x430] sm:$0xff] }
 0x928   : > { %v6439_v14 = vpop.f32.mrb[106].mxu1 }
 0x929   : > { %v6455_v20 = vmul.f32 %v6451_v40, %v6439_v14  ;;  %v8150_v2 = vpop.f32.mrb[107].mxu1  ;;  %v7331_v14 = vld [vmem:[%s13838_s4 + $0x438] sm:$0xff] }
 0x92a   : > { %v6676_v2 = vrot.slane %v13643_v60, %v14139_v51 }
 0x92b   : > { %v6464_v52 = vadd.f32 %v6460_v39, %v6455_v20  ;;  %v8571_v20 = vpack.c.bf16 %v7331_v14, %v7330_v3 }
 0x92c   : > { %v6444_v7 = vpop.f32.mrb[108].mxu1 }
 0x92d   : > { %v6456_v41 = vmul.f32 %v6451_v40, %v6444_v7  ;;  %v8493_v53 = vpack.c.bf16 %v6464_v52, %v6463_v1  ;;  %v8153_v12 = vpop.f32.mrb[109].mxu1  ;;  %v7323_v40 = vld [vmem:[%s13838_s4 + $0x3f8] sm:$0xff]  ;;  %v6684_v1 = vrot.slane %v13643_v60, %v14140_v44 }
 0x92e   : > { %v8557_v50 = vpack.c.bf16 %v7323_v40, %v7322_v27 }
 0x92f   : > { %v6465_v54 = vadd.f32 %v6460_v39, %v6456_v41  ;;  %8494 = vmatprep.subr.bf16.mxu1 %v8493_v53  ;;  %v7324_v39 = vld [vmem:[%s13838_s4 + $0x400] sm:$0xff] }
 0x930   : > { %8496 = vmatpush3.bf16.msra.mxu1 %v8493_v53  ;;  %v8562_v35 = vpack.c.bf16 %v7325_v21, %v7324_v39 }
 0x931   : > { %8162 = vmatprep.subr.msk.mxu1 %vm6180_vm9, %v6465_v54 }
 0x934   : > { %8163 = vmatpush3.msk.msra.mxu1 %vm6180_vm9, %v6465_v54 }
 0x935   : > { %8165 = vmatmul.mubr.msk.f32.vlgmr.msra.gmra.mrb[110].mxu1 %vm6470_vm10, %v6467_v19  ;;  %8530 = vmatprep.subr.bf16.mxu1 %v8529_v26  ;;  %v7305_v19 = vld [vmem:[%s13836_s2 + $0x30] sm:$0xff] }
 0x936   : > { %8167 = vmatprep.mubr.msk.f32.mxu1 %vm6470_vm10, %v6468_v22  ;;  %8532 = vmatpush3.bf16.msra.mxu1 %v8529_v26  ;;  %v6737_v57 = vrot.slane %v7305_v19, %v14139_v51  ;;  %v6767_v17 = vrot.slane %v7305_v19, %v14141_v6  ;;  %v6805_v51 = vrot.slane %v7305_v19, %v14143_v8 }
 0x939   : > { %8168 = vmatmul.mubr.msk.f32.gmra.mrb[112].mxu1 %vm6470_vm10, %v6469_v38 }
 0xa08   : > { %v8166_v46 = vpop.f32.mrb[110].mxu1 }
 0xa09   : > { %v6982_v43 = vrot.slane %v8166_v46, 6  ;;  %v6552_v33 = vpop.f32.mrb[111].mxu1 }
 0xa0a   : > { %v6981_v58 = vrot.slane %v6552_v33, 6  ;;  %8202 = vmatprep.mubr.f32.mxu0 %v6552_v33  ;;  %v6709_v33 = vpop.permute.xlu0 %6708 }
 0xa0b   : > { %8203 = vmatmul.mubr.f32.vlgmr.msra.gmra.mrb[110].mxu0 %v8166_v46 }
 0xa0c   : > { %v8169_v36 = vpop.f32.mrb[112].mxu1  ;;  %v13662_v32 = vsel %vm2906_vm7, %v6981_v58, %v6982_v43  ;;  %8563 = vmatpush3.bf16.msra.mxu0 %v8562_v35 }
 0xa0d   : > { %v6562_v23 = vpop.f32.mrb[113].mxu1  ;;  %8564 = vmatprep.subr.bf16.mxu0 %v14005_v61 }
 0xa0e   : > { %8205 = vmatprep.mubr.f32.mxu0 %v6562_v23  ;;  %v6704_v23 = vpop.permute.xlu1 %6703  ;;  %v6719_v34 = vpop.permute.xlu0 %6718 }
 0xa0f   : > { %8206 = vmatmul.mubr.f32.gmra.mrb[112].mxu0 %v8169_v36 }
 0xa10   : > { %8275 = vmatprep.mubr.msk.f32.mxu0 %vm8614_vm0, %v14137_v62  ;;  %v8533_v62 = vpack.c.bf16 %v7311_v5, %v7310_v29  ;;  %8566 = vmatpush3.bf16.msra.mxu0 %v8565_v18  ;;  %v6731_v29 = vrot.slane %v7305_v19, %v14138_v28 }
 0xa11   : > { %8567 = vmatprep.subr.bf16.mxu0 %v14005_v61 }
 0xa12   : > { %8534 = vmatprep.subr.bf16.mxu1 %v8533_v62  ;;  %v6714_v39 = vpop.permute.xlu1 %6713 }
 0xa13   : > { %8536 = vmatpush3.bf16.msra.mxu1 %v8533_v62  ;;  %v6752_v62 = vrot.slane %v7305_v19, %v14140_v44  ;;  %v6839_v44 = vrot.slane %v7305_v19, %v14145_v11 }
 0xa14   : > { %8538 = vmatprep.subr.bf16.mxu1 %v8537_v0  ;;  %8569 = vmatpush3.bf16.msra.mxu0 %v8568_v55 }
 0xa15   : > { %8570 = vmatprep.subr.bf16.mxu0 %v14005_v61 }
 0xa17   : > { %8540 = vmatpush3.bf16.msra.mxu1 %v8537_v0 }
 0xa18   : > { %8542 = vmatprep.subr.bf16.mxu1 %v8541_v15  ;;  %8572 = vmatpush3.bf16.msra.mxu0 %v8571_v20 }
 0xa19   : > { %8573 = vmatprep.subr.bf16.mxu0 %v14005_v61 }
 0xa1b   : > { %8544 = vmatpush3.bf16.msra.mxu1 %v8541_v15  ;;  %v6786_v15 = vrot.slane %v7305_v19, %v14142_v31 }
 0xa1c   : > { %8546 = vmatprep.subr.bf16.mxu1 %v8545_v4 }
 0xa1f   : > { %8548 = vmatpush3.bf16.msra.mxu1 %v8545_v4  ;;  %v6824_v4 = vrot.slane %v7305_v19, %v14144_v45 }
 0xa20   : > { %8550 = vmatprep.subr.bf16.mxu1 %v8549_v24 }
 0xa23   : > { %8552 = vmatpush3.bf16.msra.mxu1 %v8549_v24 }
 0xa24   : > { %8554 = vmatprep.subr.bf16.mxu1 %v8553_v37 }
 0xa27   : > { %8556 = vmatpush3.bf16.msra.mxu1 %v8553_v37 }
 0xa28   : > { %8558 = vmatprep.subr.bf16.mxu1 %v8557_v50 }
 0xa2b   : > { %8560 = vmatpush3.bf16.msra.mxu1 %v8557_v50 }
 0xade   : > { %v8204_v52 = vpop.f32.mrb[110].mxu0 }
 0xadf   : > { %v6678_v7 = vmul.f32 %v8204_v52, %v6676_v2  ;;  %v6654_v41 = vpop.f32.mrb[111].mxu0 }
 0xae0   : > { %v6677_v53 = vmul.f32 %v6676_v2, %v6654_v41 }
 0xae1   : > { %v6686_v12 = vadd.f32 %v6684_v1, %v6678_v7 }
 0xae2   : > { %v6685_v54 = vadd.f32 %v6684_v1, %v6677_v53  ;;  %v8207_v22 = vpop.f32.mrb[112].mxu0 }
 0xae3   : > { %v6690_v38 = vmax.f32 %v6686_v12, 0.0  ;;  %v6680_v46 = vmul.f32 %v8207_v22, %v6676_v2  ;;  %v6664_v43 = vpop.f32.mrb[113].mxu0 }
 0xae4   : > { %v6689_v58 = vmax.f32 %v6685_v54, 0.0  ;;  %v6679_v36 = vmul.f32 %v6676_v2, %v6664_v43 }
 0xae5   : > { %v6694_v42 = vmin.f32 %v6690_v38, 6.0  ;;  %v6688_v26 = vadd.f32 %v6684_v1, %v6680_v46 }
 0xae6   : > { %v6693_v5 = vmin.f32 %v6689_v58, 6.0  ;;  %v6687_v59 = vadd.f32 %v6684_v1, %v6679_v36 }
 0xae7   : > { %v13758_v0 = vmul.f32 %v6709_v33, %v6694_v42  ;;  %v6692_v16 = vmax.f32 %v6688_v26, 0.0 }
 0xae8   : > { %v6721_v13 = vmul.f32 %v6704_v23, %v6693_v5  ;;  %v6691_v10 = vmax.f32 %v6687_v59, 0.0 }
 0xae9   : > { %v6696_v48 = vmin.f32 %v6692_v16, 6.0  ;;  %v13766_v47 = vmul.f32 %v13755_v63, %v13758_v0  ;;  %v6733_v24 = vmul.f32 %v6731_v29, %v13758_v0  ;;  %v6739_v25 = vmul.f32 %v6737_v57, %v13758_v0 }
 0xaea   : > { %v6738_v37 = vmul.f32 %v6737_v57, %v6721_v13  ;;  %v6753_v27 = vmul.f32 %v6752_v62, %v6721_v13  ;;  %v6695_v40 = vmin.f32 %v6691_v10, 6.0  ;;  %v6732_v50 = vmul.f32 %v6731_v29, %v6721_v13 }
 0xaeb   : > { %v6724_v21 = vmul.f32 %v6719_v34, %v6696_v48  ;;  %v6743_v56 = vrot.slane %v6739_v25, 1  ;;  %v6754_v45 = vmul.f32 %v6752_v62, %v13758_v0  ;;  %v6768_v11 = vmul.f32 %v6767_v17, %v6721_v13 }
 0xaec   : > { %v6742_v35 = vrot.slane %v6738_v37, 1  ;;  %v6723_v49 = vmul.f32 %v6714_v39, %v6695_v40  ;;  %v6757_v18 = vrot.slane %v6753_v27, 2  ;;  %v6769_v30 = vmul.f32 %v6767_v17, %v13758_v0 }
 0xaed   : > { %v6857_v9 = vmul.f32 %v13755_v63, %v6724_v21  ;;  %v6748_v55 = vadd.f32 %v6743_v56, %v6733_v24  ;;  %v6758_v3 = vrot.slane %v6754_v45, 2  ;;  %v6774_v14 = vrot.slane %v6768_v11, 5 }
 0xaee   : > { %v6770_v20 = vmul.f32 %v6767_v17, %v6723_v49  ;;  %v6789_v2 = vmul.f32 %v6786_v15, %v6723_v49  ;;  %v6744_v1 = vsel %vm1350_vm2, %v6742_v35, %v6743_v56  ;;  %v6775_v52 = vrot.slane %v6769_v30, 5 }
 0xaef   : > { %v6864_v7 = vrot.slane %v6857_v9, 4  ;;  %v6747_v41 = vadd.f32 %v6744_v1, %v6732_v50  ;;  %v6759_v53 = vsel %vm1570_vm3, %v6757_v18, %v6758_v3  ;;  %v6763_v12 = vadd.f32 %v6758_v3, %v6748_v55 }
 0xaf0   : > { %v6777_v54 = vrot.slane %v6770_v20, 5  ;;  %v6776_v19 = vsel %vm2682_vm6, %v6774_v14, %v6775_v52  ;;  %v6787_v22 = vmul.f32 %v6786_v15, %v6721_v13  ;;  %v6788_v38 = vmul.f32 %v6786_v15, %v13758_v0 }
 0xaf1   : > { %v6762_v46 = vadd.f32 %v6759_v53, %v6747_v41  ;;  %v6796_v43 = vrot.slane %v6789_v2, 6  ;;  %v6806_v33 = vmul.f32 %v6805_v51, %v6721_v13  ;;  %v6807_v58 = vmul.f32 %v6805_v51, %v13758_v0  ;;  %v7335_v41 = vld [vmem:[%s13838_s4 + $0x458] sm:$0xff]  ;;  %v7336_v53 = vld [vmem:[%s13838_s4 + $0x460] sm:$0xff] }
 0xaf2   : > { %v6778_v36 = vsel %vm2682_vm6, %v6775_v52, %v6777_v54  ;;  %v6793_v23 = vrot.slane %v6787_v22, 6  ;;  %v6794_v42 = vrot.slane %v6788_v38, 6  ;;  %v6808_v57 = vmul.f32 %v6805_v51, %v6723_v49  ;;  %v7333_v52 = vld [vmem:[%s13838_s4 + $0x448] sm:$0xff]  ;;  %v7338_v22 = vld [vmem:[%s13838_s4 + $0x470] sm:$0xff]  ;;  %v7339_v38 = vld [vmem:[%s13838_s4 + $0x478] sm:$0xff] }
 0xaf3   : > { %v6781_v26 = vadd.f32 %v6776_v19, %v6762_v46  ;;  %v6782_v29 = vadd.f32 %v6778_v36, %v6763_v12  ;;  %v6812_v5 = vrot.slane %v6806_v33, 7  ;;  %v6813_v62 = vrot.slane %v6807_v58, 7  ;;  %v7337_v54 = vld [vmem:[%s13838_s4 + $0x468] sm:$0xff] }
 0xaf4   : > { %v6795_v59 = vsel %vm2906_vm7, %v6793_v23, %v6794_v42  ;;  %v6797_v17 = vsel %vm2906_vm7, %v6794_v42, %v6796_v43  ;;  %v6815_v16 = vrot.slane %v6808_v57, 7  ;;  %v6825_v15 = vmul.f32 %v6824_v4, %v13758_v0 }
 0xaf5   : > { %v6800_v10 = vadd.f32 %v6795_v59, %v6781_v26  ;;  %v6801_v13 = vadd.f32 %v6797_v17, %v6782_v29  ;;  %v6814_v48 = vsel %vm6180_vm9, %v6812_v5, %v6813_v62  ;;  %v6826_v24 = vmul.f32 %v6824_v4, %v6723_v49 }
 0xaf6   : > { %v6816_v25 = vsel %vm6180_vm9, %v6813_v62, %v6815_v16  ;;  %v6829_v34 = vrot.slane %v6825_v15, 2  ;;  %v6840_v51 = vmul.f32 %v6839_v44, %v13758_v0  ;;  %v6841_v37 = vmul.f32 %v6839_v44, %v6723_v49 }
 0xaf7   : > { %v6819_v27 = vadd.f32 %v6814_v48, %v6800_v10  ;;  %v6820_v40 = vadd.f32 %v6816_v25, %v6801_v13  ;;  %v6830_v50 = vrot.slane %v6826_v24, 2  ;;  %v6856_v39 = vmul.f32 %v13755_v63, %v6723_v49 }
 0xaf8   : > { %v6844_v21 = vrot.slane %v6840_v51, 3  ;;  %v6845_v56 = vrot.slane %v6841_v37, 3  ;;  %v6861_v35 = vrot.slane %v13766_v47, 4  ;;  %v6873_v55 = vrot.slane %v13643_v60, %v14141_v6  ;;  %v7332_v47 = vld [vmem:[%s13838_s4 + $0x440] sm:$0xff]  ;;  %v7334_v6 = vld [vmem:[%s13838_s4 + $0x450] sm:$0xff] }
 0xaf9   : > { %v6831_v45 = vsel %vm1570_vm3, %v6829_v34, %v6830_v50  ;;  %v6835_v11 = vadd.f32 %v6830_v50, %v6820_v40  ;;  %v6862_v18 = vrot.slane %v6856_v39, 4  ;;  %v8577_v12 = vpack.c.bf16 %v7335_v41, %v7334_v6 }
 0xafa   : > { %v6834_v4 = vadd.f32 %v6831_v45, %v6819_v27  ;;  %v6846_v30 = vsel %vm2011_vm4, %v6844_v21, %v6845_v56  ;;  %v8580_v19 = vpack.c.bf16 %v7337_v54, %v7336_v53  ;;  %v8583_v46 = vpack.c.bf16 %v7339_v38, %v7338_v22 }
 0xafb   : > { %v6850_v9 = vadd.f32 %v6845_v56, %v6835_v11  ;;  %v6863_v0 = vsel %vm2235_vm5, %v6861_v35, %v6862_v18  ;;  %v6865_v44 = vsel %vm2235_vm5, %v6862_v18, %v6864_v7  ;;  %v8574_v7 = vpack.c.bf16 %v7333_v52, %v7332_v47 }
 0xafc   : > { %v6849_v63 = vadd.f32 %v6846_v30, %v6834_v4  ;;  %v6972_v43 = vrot.slane %v13643_v60, %v14142_v31  ;;  %v6977_v58 = vrot.slane %v13643_v60, %v14143_v8 }
 0xafd   : > { %v6869_v49 = vadd.f32 %v6865_v44, %v6850_v9  ;;  %8575 = vmatpush3.bf16.msra.mxu0 %v8574_v7 }
 0xafe   : > { %v6868_v3 = vadd.f32 %v6863_v0, %v6849_v63  ;;  %8576 = vmatprep.subr.bf16.mxu0 %v14005_v61 }
 0xaff   : > { %v6875_v14 = vadd.f32 %v6873_v55, %v6869_v49 }
 0xb00   : > { %v6874_v20 = vadd.f32 %v6873_v55, %v6868_v3 }
 0xb01   : > { %v6877_v2 = vmax.f32 %v6875_v14, 0.0  ;;  %8578 = vmatpush3.bf16.msra.mxu0 %v8577_v12 }
 0xb02   : > { %v6876_v1 = vmax.f32 %v6874_v20, 0.0  ;;  %8579 = vmatprep.subr.bf16.mxu0 %v14005_v61 }
 0xb04   : > { %8240 = vmatprep.mubr.f32.mxu1 %v6876_v1 }
 0xb05   : > { %8241 = vmatmul.mubr.f32.vlgmr.msra.gmra.mrb[114].mxu1 %v6877_v2  ;;  %8581 = vmatpush3.bf16.msra.mxu0 %v8580_v19 }
 0xb06   : > { %8582 = vmatprep.subr.bf16.mxu0 %v14005_v61  ;;  %v7012_v61 = vrot.slane %v13643_v60, 6 }
 0xb09   : > { %8584 = vmatpush3.bf16.msra.mxu0 %v8583_v46 }
 0xbd8   : > { %v8242_v33 = vpop.f32.mrb[114].mxu1 }
 0xbd9   : > { %v6961_v36 = vpop.f32.mrb[115].mxu1 }
 0xbda   : > { %v6973_v23 = vmul.f32 %v6972_v43, %v6961_v36 }
 0xbdc   : > { %v6978_v42 = vadd.f32 %v6977_v58, %v6973_v23 }
 0xbde   : > { %v6985_v57 = vadd.f32 %v13662_v32, %v6978_v42 }
 0xbe0   : > { %v6987_v26 = vrot.slane %v6985_v57, 1 }
 0xbe2   : > { %v6989_v29 = vmax.f32 %v6985_v57, %v6987_v26 }
 0xbe4   : > { %v6991_v5 = vrot.slane %v6989_v29, 5 }
 0xbe6   : > { %v6993_v62 = vmax.f32 %v6989_v29, %v6991_v5 }
 0xbe8   : > { %8276 = vmatmul.mubr.f32.vlgmr.msra.gmra.mrb[114].mxu0 %v6993_v62 }
 0xcbb   : > { %v7080_v59 = vpop.f32.mrb[114].mxu0 }
 0xcbc   : > { %v7081_v17 = vadd.f32 %v7080_v59, %v7012_v61  ;;  %v8277_v31 = vpop.f32.mrb[115].mxu0 }
 0xcbe   : > { %v7087_v8 = vrot.slane %v7081_v17, %v14138_v28 }
 0xcc0   : > { %7088 = vst [vmem:[%s330_s21] sm:$0xff] %v7087_v8 }
 0xcc1 PF: > { %s19_s30 = sadd.s32 1, %s8611_s30  }
 0xcc2   : > { %p16_p4 = scmp.ge.s32.totalorder %s19_s30, 4  }
 0xcc4   :  { %18 = sbr.rel (!%p16_p4) target bundleno = 1 (0x1), region = 97 }

</bundles_post_ra>
